<compile_context>
chip_gen: v7x
topology: tpu7x:2x2x1
jax: 0.10.0
libtpu: 0.0.40
codegen_flags: <defaults>
</compile_context>

<pallas_src>
import functools

import jax
import jax.numpy as jnp
from jax import lax
from jax.experimental import pallas as pl
from jax.experimental.pallas import tpu as pltpu

LANE = 128
_VMEM_LIMIT = 48 << 20  # <= v7x 64 MiB physical VMEM; ample for every tile here


def _round_up(a, m):
    return (a + m - 1) // m * m


def _cdiv(a, b):
    return -(-a // b)


# ----------------------------------------------------------------------------
# Pallas kernels
# ----------------------------------------------------------------------------
def _matmul_bias_relu_kernel(x_ref, w_ref, b_ref, o_ref):
    """One M-tile of y = relu(x @ w + b). bf16 operands, f32 accumulate."""
    x = x_ref[...].astype(jnp.bfloat16)
    acc = jnp.dot(x, w_ref[...], preferred_element_type=jnp.float32)
    acc = acc + b_ref[...]
    o_ref[...] = jnp.maximum(acc, 0.0).astype(o_ref.dtype)


def _tail_kernel(x_ref, w1_ref, b1_ref, w2_ref, b2_ref, heads_ref, av_ref, *,
                 batch, action_dim, inv_action_dim):
    """Fused value/advantage streams + heads + duelling combine.

    x:  (Mp, 3200) zero-padded flattened features (rows >= batch are zero).
    w1: (3200, 1024) = [value_stream_w | advantage_stream_w] (bf16).
    w2: (1024, 128)  block weight: col 0 = value head, cols 1..1+A = adv head.
    heads_ref: lane-dense slab; col 0 = value, cols 1..1+A = advantage.
    av_ref:    lane-dense slab; cols 1..1+A = action_value.
    """
    x = x_ref[...].astype(jnp.bfloat16)
    h = jnp.dot(x, w1_ref[...], preferred_element_type=jnp.float32)
    h = jnp.maximum(h + b1_ref[...], 0.0)
    acc = jnp.dot(h.astype(jnp.bfloat16), w2_ref[...],
                  preferred_element_type=jnp.float32) + b2_ref[...]

    # PyTorch: advantage.sum() over the WHOLE (batch, action_dim) tensor.
    # Mask out padded rows (>= batch) and padded / non-advantage lanes.
    row = lax.broadcasted_iota(jnp.int32, acc.shape, 0)
    col = lax.broadcasted_iota(jnp.int32, acc.shape, 1)
    adv_mask = (row < batch) & (col >= 1) & (col < 1 + action_dim)
    adv_sum = jnp.sum(jnp.where(adv_mask, acc, 0.0))

    value_col = acc[:, 0:1]                       # (Mp, 1), broadcasts over lanes
    heads_ref[...] = acc.astype(heads_ref.dtype)
    av_ref[...] = (value_col + (acc - inv_action_dim * adv_sum)).astype(av_ref.dtype)


# ----------------------------------------------------------------------------
# pallas_call wrappers
# ----------------------------------------------------------------------------
def _choose_m_tiling(M, max_tm=512):
    """(tm, Mp): tm multiple of 16 (bf16 sublane pack) dividing Mp; >=2 tiles
    when there is enough work so both v7x TensorCores get a share."""
    if M <= 32:
        tm = _round_up(max(M, 1), 16)
        return tm, tm
    ntiles = max(2, _cdiv(M, max_tm))
    tm = _round_up(_cdiv(M, ntiles), 16)
    return tm, ntiles * tm


def matmul_bias_relu(x, w, b, out_dtype=jnp.bfloat16):
    """relu(x @ w + b). x:(M,K) bf16, w:(K,N) bf16, b:(N,) f32, N % 128 == 0."""
    M, K = x.shape
    K2, N = w.shape
    assert K == K2 and N % LANE == 0, (K, K2, N)
    tm, Mp = _choose_m_tiling(M)
    if Mp != M:
        x = jnp.pad(x, ((0, Mp - M), (0, 0)))

    out = pl.pallas_call(
        _matmul_bias_relu_kernel,
        out_shape=jax.ShapeDtypeStruct((Mp, N), out_dtype),
        grid_spec=pltpu.PrefetchScalarGridSpec(
            num_scalar_prefetch=0,
            grid=(Mp // tm,),
            in_specs=[
                pl.BlockSpec((tm, K), lambda i: (i, 0)),   # activation tile
                pl.BlockSpec((K, N), lambda i: (0, 0)),    # full weight (bf16)
                pl.BlockSpec((1, N), lambda i: (0, 0)),    # bias row
            ],
            out_specs=pl.BlockSpec((tm, N), lambda i: (i, 0)),
        ),
        compiler_params=pltpu.CompilerParams(
            dimension_semantics=("parallel",),
            vmem_limit_bytes=_VMEM_LIMIT,
        ),
    )(x, w, b.reshape(1, N))
    # Padded rows are relu(bias) != 0 — never consume them.
    return out[:M]


def duelling_tail(feat, w1, b1, w2, b2, *, batch, action_dim):
    """Fused hidden streams + heads + duelling combine (single pallas_call)."""
    M, K = feat.shape
    Mp = _round_up(M, 16)
    if Mp != M:
        feat = jnp.pad(feat, ((0, Mp - M), (0, 0)))
    N1 = w1.shape[1]
    N2 = w2.shape[1]

    # Single M tile: advantage.sum() is global over the whole batch, so the
    # combine needs the full batch resident in one grid step.
    heads, av = pl.pallas_call(
        functools.partial(_tail_kernel, batch=batch, action_dim=action_dim,
                          inv_action_dim=1.0 / float(action_dim)),
        out_shape=(jax.ShapeDtypeStruct((Mp, N2), jnp.float32),
                   jax.ShapeDtypeStruct((Mp, N2), jnp.float32)),
        grid_spec=pltpu.PrefetchScalarGridSpec(
            num_scalar_prefetch=0,
            grid=(1,),
            in_specs=[
                pl.BlockSpec((Mp, K), lambda i: (0, 0)),    # features (bf16)
                pl.BlockSpec((K, N1), lambda i: (0, 0)),    # fused hidden weight
                pl.BlockSpec((1, N1), lambda i: (0, 0)),    # fused hidden bias
                pl.BlockSpec((N1, N2), lambda i: (0, 0)),   # fused head weight
                pl.BlockSpec((1, N2), lambda i: (0, 0)),    # fused head bias
            ],
            out_specs=[pl.BlockSpec((Mp, N2), lambda i: (0, 0)),
                       pl.BlockSpec((Mp, N2), lambda i: (0, 0))],
        ),
        compiler_params=pltpu.CompilerParams(
            dimension_semantics=("arbitrary",),
            vmem_limit_bytes=_VMEM_LIMIT,
        ),
    )(feat, w1, b1.reshape(1, N1), w2, b2.reshape(1, N2))

    value = heads[:batch, 0:1]
    advantage = heads[:batch, 1:1 + action_dim]
    action_value = av[:batch, 1:1 + action_dim]
    return value, advantage, action_value


# ----------------------------------------------------------------------------
# Conv via im2col (slicing glue in JAX, matmul hot path in Pallas)
# ----------------------------------------------------------------------------
def _im2col(x_nhwc, kh, kw, stride):
    # TODO(synk): for larger batch sizes, fuse im2col into the Pallas kernel
    # (in-kernel (kh,kw) loop over pl.ds strided slices) to avoid materializing
    # the kh*kw-amplified patch matrix in HBM.
    B, H, W, C = x_nhwc.shape
    OH = (H - kh) // stride + 1
    OW = (W - kw) // stride + 1
    patches = []
    for i in range(kh):
        for j in range(kw):
            patches.append(
                x_nhwc[:, i:i + stride * OH:stride, j:j + stride * OW:stride, :])
    # (B, OH, OW, kh*kw, C): column order (i, j, c) matches the weight layout
    # built in init_params ((kh, kw, in, out) flattened over the first three).
    p = jnp.stack(patches, axis=3)
    return p.reshape(B * OH * OW, kh * kw * C), OH, OW


def conv2d_relu(x_nhwc, w_flat, b, kh, kw, stride):
    """x_nhwc:(B,H,W,Cin) bf16; w_flat:(kh*kw*Cin, Cout_pad) bf16 -> (B,OH,OW,Cout_pad) bf16."""
    B = x_nhwc.shape[0]
    cols, OH, OW = _im2col(x_nhwc, kh, kw, stride)
    y = matmul_bias_relu(cols, w_flat, b)
    return y.reshape(B, OH, OW, w_flat.shape[1])


# ----------------------------------------------------------------------------
# Parameters (stored pre-fused / pre-padded, weights in bf16)
# ----------------------------------------------------------------------------
def init_params(key, in_channels, action_dim):
    ks = jax.random.split(key, 14)

    def w(k, shape, fan_in):
        return jax.random.normal(k, shape, jnp.float32) / jnp.sqrt(float(fan_in))

    C, CP = 64, 128                    # real / lane-padded conv channel count
    feat, featp = 64 * 7 * 7, 3200     # real / 128-aligned flattened feature dim
    hid = 512
    bf16 = jnp.bfloat16

    # conv1: (kh*kw*Cin, 64) padded to 128 output lanes (zero cols / zero bias).
    c1 = w(ks[0], (8 * 8 * in_channels, C), 8 * 8 * in_channels)
    conv1_w = jnp.pad(c1, ((0, 0), (0, CP - C)))
    conv1_b = jnp.pad(w(ks[1], (C,), 8 * 8 * in_channels), (0, CP - C))

    # conv2/conv3: pad ONLY the output lanes; the contraction dim stays at the
    # real 64 input channels (padded output channels are sliced off before the
    # next im2col), halving K vs. carrying zero-padded input channels.
    c2 = w(ks[2], (4, 4, C, C), 4 * 4 * C)
    conv2_w = jnp.pad(c2, ((0, 0), (0, 0), (0, 0), (0, CP - C))
                      ).reshape(4 * 4 * C, CP)
    conv2_b = jnp.pad(w(ks[3], (C,), 4 * 4 * C), (0, CP - C))

    c3 = w(ks[4], (3, 3, C, C), 3 * 3 * C)
    conv3_w = jnp.pad(c3, ((0, 0), (0, 0), (0, 0), (0, CP - C))
                      ).reshape(3 * 3 * C, CP)
    conv3_b = jnp.pad(w(ks[5], (C,), 3 * 3 * C), (0, CP - C))

    # Fused hidden layer: [value_stream | advantage_stream], K padded 3136->3200.
    vs_w = w(ks[6], (feat, hid), feat)
    as_w = w(ks[8], (feat, hid), feat)
    hidden_w = jnp.pad(jnp.concatenate([vs_w, as_w], axis=1),
                       ((0, featp - feat), (0, 0)))
    hidden_b = jnp.concatenate([w(ks[7], (hid,), feat), w(ks[9], (hid,), feat)])

    # Fused heads: block weight (1024, 128). Col 0 = value head (reads value
    # stream rows), cols 1..1+A = advantage head (reads advantage stream rows).
    v_w = w(ks[10], (hid, 1), hid)
    a_w = w(ks[12], (hid, action_dim), hid)
    head_w = jnp.zeros((2 * hid, LANE), jnp.float32)
    head_w = head_w.at[:hid, 0:1].set(v_w)
    head_w = head_w.at[hid:, 1:1 + action_dim].set(a_w)
    head_b = jnp.zeros((LANE,), jnp.float32)
    head_b = head_b.at[0].set(w(ks[11], (1,), hid)[0])
    head_b = head_b.at[1:1 + action_dim].set(w(ks[13], (action_dim,), hid))

    return {
        "conv1_w": conv1_w.astype(bf16), "conv1_b": conv1_b,
        "conv2_w": conv2_w.astype(bf16), "conv2_b": conv2_b,
        "conv3_w": conv3_w.astype(bf16), "conv3_b": conv3_b,
        "hidden_w": hidden_w.astype(bf16), "hidden_b": hidden_b,
        "head_w": head_w.astype(bf16), "head_b": head_b,
    }


# ----------------------------------------------------------------------------
# Model forward
# ----------------------------------------------------------------------------
def duelling_dqn_forward(x_nchw, params, action_dim):
    B = x_nchw.shape[0]
    # NCHW (PyTorch) -> NHWC for the kernels; bf16 activations, f32 accumulate.
    x = jnp.transpose(x_nchw, (0, 2, 3, 1)).astype(jnp.bfloat16)

    x = conv2d_relu(x, params["conv1_w"], params["conv1_b"], 8, 8, 4)            # (B,20,20,128)
    x = conv2d_relu(x[..., :64], params["conv2_w"], params["conv2_b"], 4, 4, 2)  # (B, 9, 9,128)
    x = conv2d_relu(x[..., :64], params["conv3_w"], params["conv3_b"], 3, 3, 1)  # (B, 7, 7,128)

    # PyTorch view(-1, 64*7*7) flattens the REAL 64 channels in (C, H, W) order;
    # then zero-pad the feature dim 3136 -> 3200 to stay 128-lane aligned.
    feat = jnp.transpose(x[..., :64], (0, 3, 1, 2)).reshape(B, 64 * 7 * 7)
    feat = jnp.pad(feat, ((0, 0), (0, 3200 - 64 * 7 * 7)))

    value, advantage, action_value = duelling_tail(
        feat, params["hidden_w"], params["hidden_b"],
        params["head_w"], params["head_b"],
        batch=B, action_dim=action_dim)
    return value, advantage, action_value


if __name__ == "__main__":
    B, C, H, W = 2, 4, 84, 84       # 84x84 is forced by the 64*7*7 flatten
    ACTION_DIM = 6

    key = jax.random.PRNGKey(0)
    k_x, k_p = jax.random.split(key)
    x = jax.random.normal(k_x, (B, C, H, W), jnp.float32)
    params = init_params(k_p, C, ACTION_DIM)

    fwd = jax.jit(functools.partial(duelling_dqn_forward, action_dim=ACTION_DIM))
    value, advantage, action_value = fwd(x, params)
    jax.block_until_ready((value, advantage, action_value))

    assert value.shape == (B, 1)
    assert advantage.shape == (B, ACTION_DIM)
    assert action_value.shape == (B, ACTION_DIM)
    print("KERNEL_OK")
</pallas_src>

<mosaic_0001>
module attributes {stable_mosaic.version = 11 : i64} {
  func.func @_matmul_bias_relu_kernel(%arg0: i32, %arg1: memref<400x256xbf16, #tpu.memory_space<vmem>>, %arg2: memref<256x128xbf16, #tpu.memory_space<vmem>>, %arg3: memref<1x128xf32, #tpu.memory_space<vmem>>, %arg4: memref<400x128xbf16, #tpu.memory_space<vmem>>) attributes {dimension_semantics = [#tpu.dimension_semantics<parallel>], iteration_bounds = array<i64: 2>, scalar_prefetch = 0 : i64, scratch_operands = 0 : i64, tpu.core_type = #tpu.core_type<tc>, window_params = [{transform_indices = @transform_0, window_bounds = array<i64: 400, 256>}, {pipeline_mode = #tpu.pipeline_mode<synchronous>, transform_indices = @transform_1, window_bounds = array<i64: 256, 128>}, {pipeline_mode = #tpu.pipeline_mode<synchronous>, transform_indices = @transform_2, window_bounds = array<i64: 1, 128>}, {transform_indices = @transform_3, window_bounds = array<i64: 400, 128>}]} {
    %c0 = arith.constant 0 : index
    %c0_0 = arith.constant 0 : index
    %0 = vector.load %arg1[%c0, %c0_0] : memref<400x256xbf16, #tpu.memory_space<vmem>>, vector<400x256xbf16>
    %c0_1 = arith.constant 0 : index
    %c0_2 = arith.constant 0 : index
    %1 = vector.load %arg2[%c0_1, %c0_2] : memref<256x128xbf16, #tpu.memory_space<vmem>>, vector<256x128xbf16>
    %cst = arith.constant dense<0.000000e+00> : vector<400x128xf32>
    %2 = tpu.matmul %0, %1, %cst {dimension_numbers = #tpu.dot_dimension_numbers<[1], [0], [0], [1], [0, 0, 1, 1], [], []>} : vector<400x256xbf16>, vector<256x128xbf16>, vector<400x128xf32> -> vector<400x128xf32>
    %c0_3 = arith.constant 0 : index
    %c0_4 = arith.constant 0 : index
    %3 = vector.load %arg3[%c0_3, %c0_4] : memref<1x128xf32, #tpu.memory_space<vmem>>, vector<1x128xf32>
    %4 = vector.broadcast %3 : vector<1x128xf32> to vector<400x128xf32>
    %5 = arith.addf %2, %4 : vector<400x128xf32>
    %cst_5 = arith.constant 0.000000e+00 : f32
    %6 = vector.broadcast %cst_5 : f32 to vector<400x128xf32>
    %7 = arith.maximumf %5, %6 : vector<400x128xf32>
    %8 = arith.truncf %7 : vector<400x128xf32> to vector<400x128xbf16>
    %c0_6 = arith.constant 0 : index
    %c0_7 = arith.constant 0 : index
    %9 = vector.load %arg4[%c0_6, %c0_7] : memref<400x128xbf16, #tpu.memory_space<vmem>>, vector<400x128xbf16>
    tpu.vector_store %arg4[%c0_6, %c0_7], %8 {strides = array<i32>} : memref<400x128xbf16, #tpu.memory_space<vmem>>, vector<400x128xbf16>,
    return
  }
  func.func @transform_0(%arg0: i32) -> (i32, i32) {
    %c0_i32 = arith.constant 0 : i32
    %c0_i32_0 = arith.constant 0 : i32
    return %arg0, %c0_i32 : i32, i32
  }
  func.func @transform_1(%arg0: i32) -> (i32, i32) {
    %c0_i32 = arith.constant 0 : i32
    %c0_i32_0 = arith.constant 0 : i32
    %c0_i32_1 = arith.constant 0 : i32
    return %c0_i32, %c0_i32_0 : i32, i32
  }
  func.func @transform_2(%arg0: i32) -> (i32, i32) {
    %c0_i32 = arith.constant 0 : i32
    %c0_i32_0 = arith.constant 0 : i32
    %c0_i32_1 = arith.constant 0 : i32
    return %c0_i32, %c0_i32_0 : i32, i32
  }
  func.func @transform_3(%arg0: i32) -> (i32, i32) {
    %c0_i32 = arith.constant 0 : i32
    %c0_i32_0 = arith.constant 0 : i32
    return %arg0, %c0_i32 : i32, i32
  }
}

module attributes {stable_mosaic.version = 11 : i64} {
  func.func @_matmul_bias_relu_kernel(%arg0: i32, %arg1: memref<96x1024xbf16, #tpu.memory_space<vmem>>, %arg2: memref<1024x128xbf16, #tpu.memory_space<vmem>>, %arg3: memref<1x128xf32, #tpu.memory_space<vmem>>, %arg4: memref<96x128xbf16, #tpu.memory_space<vmem>>) attributes {dimension_semantics = [#tpu.dimension_semantics<parallel>], iteration_bounds = array<i64: 2>, scalar_prefetch = 0 : i64, scratch_operands = 0 : i64, tpu.core_type = #tpu.core_type<tc>, window_params = [{transform_indices = @transform_0, window_bounds = array<i64: 96, 1024>}, {pipeline_mode = #tpu.pipeline_mode<synchronous>, transform_indices = @transform_1, window_bounds = array<i64: 1024, 128>}, {pipeline_mode = #tpu.pipeline_mode<synchronous>, transform_indices = @transform_2, window_bounds = array<i64: 1, 128>}, {transform_indices = @transform_3, window_bounds = array<i64: 96, 128>}]} {
    %c0 = arith.constant 0 : index
    %c0_0 = arith.constant 0 : index
    %0 = vector.load %arg1[%c0, %c0_0] : memref<96x1024xbf16, #tpu.memory_space<vmem>>, vector<96x1024xbf16>
    %c0_1 = arith.constant 0 : index
    %c0_2 = arith.constant 0 : index
    %1 = vector.load %arg2[%c0_1, %c0_2] : memref<1024x128xbf16, #tpu.memory_space<vmem>>, vector<1024x128xbf16>
    %cst = arith.constant dense<0.000000e+00> : vector<96x128xf32>
    %2 = tpu.matmul %0, %1, %cst {dimension_numbers = #tpu.dot_dimension_numbers<[1], [0], [0], [1], [0, 0, 1, 1], [], []>} : vector<96x1024xbf16>, vector<1024x128xbf16>, vector<96x128xf32> -> vector<96x128xf32>
    %c0_3 = arith.constant 0 : index
    %c0_4 = arith.constant 0 : index
    %3 = vector.load %arg3[%c0_3, %c0_4] : memref<1x128xf32, #tpu.memory_space<vmem>>, vector<1x128xf32>
    %4 = vector.broadcast %3 : vector<1x128xf32> to vector<96x128xf32>
    %5 = arith.addf %2, %4 : vector<96x128xf32>
    %cst_5 = arith.constant 0.000000e+00 : f32
    %6 = vector.broadcast %cst_5 : f32 to vector<96x128xf32>
    %7 = arith.maximumf %5, %6 : vector<96x128xf32>
    %8 = arith.truncf %7 : vector<96x128xf32> to vector<96x128xbf16>
    %c0_6 = arith.constant 0 : index
    %c0_7 = arith.constant 0 : index
    %9 = vector.load %arg4[%c0_6, %c0_7] : memref<96x128xbf16, #tpu.memory_space<vmem>>, vector<96x128xbf16>
    tpu.vector_store %arg4[%c0_6, %c0_7], %8 {strides = array<i32>} : memref<96x128xbf16, #tpu.memory_space<vmem>>, vector<96x128xbf16>,
    return
  }
  func.func @transform_0(%arg0: i32) -> (i32, i32) {
    %c0_i32 = arith.constant 0 : i32
    %c0_i32_0 = arith.constant 0 : i32
    return %arg0, %c0_i32 : i32, i32
  }
  func.func @transform_1(%arg0: i32) -> (i32, i32) {
    %c0_i32 = arith.constant 0 : i32
    %c0_i32_0 = arith.constant 0 : i32
    %c0_i32_1 = arith.constant 0 : i32
    return %c0_i32, %c0_i32_0 : i32, i32
  }
  func.func @transform_2(%arg0: i32) -> (i32, i32) {
    %c0_i32 = arith.constant 0 : i32
    %c0_i32_0 = arith.constant 0 : i32
    %c0_i32_1 = arith.constant 0 : i32
    return %c0_i32, %c0_i32_0 : i32, i32
  }
  func.func @transform_3(%arg0: i32) -> (i32, i32) {
    %c0_i32 = arith.constant 0 : i32
    %c0_i32_0 = arith.constant 0 : i32
    return %arg0, %c0_i32 : i32, i32
  }
}

module attributes {stable_mosaic.version = 11 : i64} {
  func.func @_matmul_bias_relu_kernel(%arg0: i32, %arg1: memref<64x576xbf16, #tpu.memory_space<vmem>>, %arg2: memref<576x128xbf16, #tpu.memory_space<vmem>>, %arg3: memref<1x128xf32, #tpu.memory_space<vmem>>, %arg4: memref<64x128xbf16, #tpu.memory_space<vmem>>) attributes {dimension_semantics = [#tpu.dimension_semantics<parallel>], iteration_bounds = array<i64: 2>, scalar_prefetch = 0 : i64, scratch_operands = 0 : i64, tpu.core_type = #tpu.core_type<tc>, window_params = [{transform_indices = @transform_0, window_bounds = array<i64: 64, 576>}, {pipeline_mode = #tpu.pipeline_mode<synchronous>, transform_indices = @transform_1, window_bounds = array<i64: 576, 128>}, {pipeline_mode = #tpu.pipeline_mode<synchronous>, transform_indices = @transform_2, window_bounds = array<i64: 1, 128>}, {transform_indices = @transform_3, window_bounds = array<i64: 64, 128>}]} {
    %c0 = arith.constant 0 : index
    %c0_0 = arith.constant 0 : index
    %0 = vector.load %arg1[%c0, %c0_0] : memref<64x576xbf16, #tpu.memory_space<vmem>>, vector<64x576xbf16>
    %c0_1 = arith.constant 0 : index
    %c0_2 = arith.constant 0 : index
    %1 = vector.load %arg2[%c0_1, %c0_2] : memref<576x128xbf16, #tpu.memory_space<vmem>>, vector<576x128xbf16>
    %cst = arith.constant dense<0.000000e+00> : vector<64x128xf32>
    %2 = tpu.matmul %0, %1, %cst {dimension_numbers = #tpu.dot_dimension_numbers<[1], [0], [0], [1], [0, 0, 1, 1], [], []>} : vector<64x576xbf16>, vector<576x128xbf16>, vector<64x128xf32> -> vector<64x128xf32>
    %c0_3 = arith.constant 0 : index
    %c0_4 = arith.constant 0 : index
    %3 = vector.load %arg3[%c0_3, %c0_4] : memref<1x128xf32, #tpu.memory_space<vmem>>, vector<1x128xf32>
    %4 = vector.broadcast %3 : vector<1x128xf32> to vector<64x128xf32>
    %5 = arith.addf %2, %4 : vector<64x128xf32>
    %cst_5 = arith.constant 0.000000e+00 : f32
    %6 = vector.broadcast %cst_5 : f32 to vector<64x128xf32>
    %7 = arith.maximumf %5, %6 : vector<64x128xf32>
    %8 = arith.truncf %7 : vector<64x128xf32> to vector<64x128xbf16>
    %c0_6 = arith.constant 0 : index
    %c0_7 = arith.constant 0 : index
    %9 = vector.load %arg4[%c0_6, %c0_7] : memref<64x128xbf16, #tpu.memory_space<vmem>>, vector<64x128xbf16>
    tpu.vector_store %arg4[%c0_6, %c0_7], %8 {strides = array<i32>} : memref<64x128xbf16, #tpu.memory_space<vmem>>, vector<64x128xbf16>,
    return
  }
  func.func @transform_0(%arg0: i32) -> (i32, i32) {
    %c0_i32 = arith.constant 0 : i32
    %c0_i32_0 = arith.constant 0 : i32
    return %arg0, %c0_i32 : i32, i32
  }
  func.func @transform_1(%arg0: i32) -> (i32, i32) {
    %c0_i32 = arith.constant 0 : i32
    %c0_i32_0 = arith.constant 0 : i32
    %c0_i32_1 = arith.constant 0 : i32
    return %c0_i32, %c0_i32_0 : i32, i32
  }
  func.func @transform_2(%arg0: i32) -> (i32, i32) {
    %c0_i32 = arith.constant 0 : i32
    %c0_i32_0 = arith.constant 0 : i32
    %c0_i32_1 = arith.constant 0 : i32
    return %c0_i32, %c0_i32_0 : i32, i32
  }
  func.func @transform_3(%arg0: i32) -> (i32, i32) {
    %c0_i32 = arith.constant 0 : i32
    %c0_i32_0 = arith.constant 0 : i32
    return %arg0, %c0_i32 : i32, i32
  }
}

module attributes {stable_mosaic.version = 11 : i64} {
  func.func @_tail_kernel(%arg0: i32, %arg1: memref<16x3200xbf16, #tpu.memory_space<vmem>>, %arg2: memref<3200x1024xbf16, #tpu.memory_space<vmem>>, %arg3: memref<1x1024xf32, #tpu.memory_space<vmem>>, %arg4: memref<1024x128xbf16, #tpu.memory_space<vmem>>, %arg5: memref<1x128xf32, #tpu.memory_space<vmem>>, %arg6: memref<16x128xf32, #tpu.memory_space<vmem>>, %arg7: memref<16x128xf32, #tpu.memory_space<vmem>>) attributes {dimension_semantics = [#tpu.dimension_semantics<arbitrary>], iteration_bounds = array<i64: 1>, scalar_prefetch = 0 : i64, scratch_operands = 0 : i64, tpu.core_type = #tpu.core_type<tc>, window_params = [{pipeline_mode = #tpu.pipeline_mode<synchronous>, transform_indices = @transform_0, window_bounds = array<i64: 16, 3200>}, {pipeline_mode = #tpu.pipeline_mode<synchronous>, transform_indices = @transform_1, window_bounds = array<i64: 3200, 1024>}, {pipeline_mode = #tpu.pipeline_mode<synchronous>, transform_indices = @transform_2, window_bounds = array<i64: 1, 1024>}, {pipeline_mode = #tpu.pipeline_mode<synchronous>, transform_indices = @transform_3, window_bounds = array<i64: 1024, 128>}, {pipeline_mode = #tpu.pipeline_mode<synchronous>, transform_indices = @transform_4, window_bounds = array<i64: 1, 128>}, {pipeline_mode = #tpu.pipeline_mode<synchronous>, transform_indices = @transform_5, window_bounds = array<i64: 16, 128>}, {pipeline_mode = #tpu.pipeline_mode<synchronous>, transform_indices = @transform_6, window_bounds = array<i64: 16, 128>}]} {
    %c0 = arith.constant 0 : index
    %c0_0 = arith.constant 0 : index
    %0 = vector.load %arg1[%c0, %c0_0] : memref<16x3200xbf16, #tpu.memory_space<vmem>>, vector<16x3200xbf16>
    %c0_1 = arith.constant 0 : index
    %c0_2 = arith.constant 0 : index
    %1 = vector.load %arg2[%c0_1, %c0_2] : memref<3200x1024xbf16, #tpu.memory_space<vmem>>, vector<3200x1024xbf16>
    %cst = arith.constant dense<0.000000e+00> : vector<16x1024xf32>
    %2 = tpu.matmul %0, %1, %cst {dimension_numbers = #tpu.dot_dimension_numbers<[1], [0], [0], [1], [0, 0, 1, 1], [], []>} : vector<16x3200xbf16>, vector<3200x1024xbf16>, vector<16x1024xf32> -> vector<16x1024xf32>
    %c0_3 = arith.constant 0 : index
    %c0_4 = arith.constant 0 : index
    %3 = vector.load %arg3[%c0_3, %c0_4] : memref<1x1024xf32, #tpu.memory_space<vmem>>, vector<1x1024xf32>
    %4 = vector.broadcast %3 : vector<1x1024xf32> to vector<16x1024xf32>
    %5 = arith.addf %2, %4 : vector<16x1024xf32>
    %cst_5 = arith.constant 0.000000e+00 : f32
    %6 = vector.broadcast %cst_5 : f32 to vector<16x1024xf32>
    %7 = arith.maximumf %5, %6 : vector<16x1024xf32>
    %8 = arith.truncf %7 : vector<16x1024xf32> to vector<16x1024xbf16>
    %c0_6 = arith.constant 0 : index
    %c0_7 = arith.constant 0 : index
    %9 = vector.load %arg4[%c0_6, %c0_7] : memref<1024x128xbf16, #tpu.memory_space<vmem>>, vector<1024x128xbf16>
    %cst_8 = arith.constant dense<0.000000e+00> : vector<16x128xf32>
    %10 = tpu.matmul %8, %9, %cst_8 {dimension_numbers = #tpu.dot_dimension_numbers<[1], [0], [0], [1], [0, 0, 1, 1], [], []>} : vector<16x1024xbf16>, vector<1024x128xbf16>, vector<16x128xf32> -> vector<16x128xf32>
    %c0_9 = arith.constant 0 : index
    %c0_10 = arith.constant 0 : index
    %11 = vector.load %arg5[%c0_9, %c0_10] : memref<1x128xf32, #tpu.memory_space<vmem>>, vector<1x128xf32>
    %12 = vector.broadcast %11 : vector<1x128xf32> to vector<16x128xf32>
    %13 = arith.addf %10, %12 : vector<16x128xf32>
    %14 = tpu.iota {dimensions = array<i32: 0>} : vector<16x128xi32>
    %15 = tpu.iota {dimensions = array<i32: 1>} : vector<16x128xi32>
    %c2_i32 = arith.constant 2 : i32
    %16 = vector.broadcast %c2_i32 : i32 to vector<16x128xi32>
    %17 = arith.cmpi slt, %14, %16 : vector<16x128xi32>
    %c1_i32 = arith.constant 1 : i32
    %18 = vector.broadcast %c1_i32 : i32 to vector<16x128xi32>
    %19 = arith.cmpi sge, %15, %18 : vector<16x128xi32>
    %20 = arith.andi %17, %19 : vector<16x128xi1>
    %c7_i32 = arith.constant 7 : i32
    %21 = vector.broadcast %c7_i32 : i32 to vector<16x128xi32>
    %22 = arith.cmpi slt, %15, %21 : vector<16x128xi32>
    %23 = arith.andi %20, %22 : vector<16x128xi1>
    %cst_11 = arith.constant 0.000000e+00 : f32
    %24 = vector.broadcast %cst_11 : f32 to vector<16x128xf32>
    %25 = arith.select %23, %13, %24 : vector<16x128xi1>, vector<16x128xf32>
    %26 = vector.shape_cast %25 : vector<16x128xf32> to vector<1x16x128xf32>
    %cst_12 = arith.constant dense<0.000000e+00> : vector<1xf32>
    %27 = vector.multi_reduction <add>, %26, %cst_12 [1, 2] : vector<1x16x128xf32> to vector<1xf32>
    %28 = vector.shape_cast %27 : vector<1xf32> to vector<1x1x1xf32>
    %29 = vector.extract %28[0, 0, 0] : f32 from vector<1x1x1xf32>
    %30 = vector.extract_strided_slice %13 {offsets = [0, 0], sizes = [16, 1], strides = [1, 1]} : vector<16x128xf32> to vector<16x1xf32>
    %c0_13 = arith.constant 0 : index
    %c0_14 = arith.constant 0 : index
    %31 = vector.load %arg6[%c0_13, %c0_14] : memref<16x128xf32, #tpu.memory_space<vmem>>, vector<16x128xf32>
    tpu.vector_store %arg6[%c0_13, %c0_14], %13 {strides = array<i32>} : memref<16x128xf32, #tpu.memory_space<vmem>>, vector<16x128xf32>,
    %cst_15 = arith.constant 0.166666672 : f32
    %32 = arith.mulf %cst_15, %29 : f32
    %33 = vector.broadcast %32 : f32 to vector<16x128xf32>
    %34 = arith.subf %13, %33 : vector<16x128xf32>
    %35 = vector.broadcast %30 : vector<16x1xf32> to vector<16x128xf32>
    %36 = arith.addf %35, %34 : vector<16x128xf32>
    %c0_16 = arith.constant 0 : index
    %c0_17 = arith.constant 0 : index
    %37 = vector.load %arg7[%c0_16, %c0_17] : memref<16x128xf32, #tpu.memory_space<vmem>>, vector<16x128xf32>
    tpu.vector_store %arg7[%c0_16, %c0_17], %36 {strides = array<i32>} : memref<16x128xf32, #tpu.memory_space<vmem>>, vector<16x128xf32>,
    return
  }
  func.func @transform_0(%arg0: i32) -> (i32, i32) {
    %c0_i32 = arith.constant 0 : i32
    %c0_i32_0 = arith.constant 0 : i32
    %c0_i32_1 = arith.constant 0 : i32
    return %c0_i32, %c0_i32_0 : i32, i32
  }
  func.func @transform_1(%arg0: i32) -> (i32, i32) {
    %c0_i32 = arith.constant 0 : i32
    %c0_i32_0 = arith.constant 0 : i32
    %c0_i32_1 = arith.constant 0 : i32
    return %c0_i32, %c0_i32_0 : i32, i32
  }
  func.func @transform_2(%arg0: i32) -> (i32, i32) {
    %c0_i32 = arith.constant 0 : i32
    %c0_i32_0 = arith.constant 0 : i32
    %c0_i32_1 = arith.constant 0 : i32
    return %c0_i32, %c0_i32_0 : i32, i32
  }
  func.func @transform_3(%arg0: i32) -> (i32, i32) {
    %c0_i32 = arith.constant 0 : i32
    %c0_i32_0 = arith.constant 0 : i32
    %c0_i32_1 = arith.constant 0 : i32
    return %c0_i32, %c0_i32_0 : i32, i32
  }
  func.func @transform_4(%arg0: i32) -> (i32, i32) {
    %c0_i32 = arith.constant 0 : i32
    %c0_i32_0 = arith.constant 0 : i32
    %c0_i32_1 = arith.constant 0 : i32
    return %c0_i32, %c0_i32_0 : i32, i32
  }
  func.func @transform_5(%arg0: i32) -> (i32, i32) {
    %c0_i32 = arith.constant 0 : i32
    %c0_i32_0 = arith.constant 0 : i32
    %c0_i32_1 = arith.constant 0 : i32
    return %c0_i32, %c0_i32_0 : i32, i32
  }
  func.func @transform_6(%arg0: i32) -> (i32, i32) {
    %c0_i32 = arith.constant 0 : i32
    %c0_i32_0 = arith.constant 0 : i32
    %c0_i32_1 = arith.constant 0 : i32
    return %c0_i32, %c0_i32_0 : i32, i32
  }
}

</mosaic_0001>

<bundles_post_ra>
// kernel: duelling_dqn_forward.4
= control target key start
LH: loop header
LB: loop body
LE: loop exit
PB: predicated region body
PF: predicated region fallthrough
CT: control target
= control target key end

     0   :  { %s1690_s12 = smov 0   ;;  %s1925_s0 = inlined_call_operand.vmem [shape: bf16[800,256], index: 0, kind: input, shape index: {}]   ;;  %s1926_s1 = inlined_call_operand.vmem [shape: bf16[256,128], index: 1, kind: input, shape index: {}]   ;;  %s1927_s2 = inlined_call_operand.vmem [shape: f32[1,128], index: 2, kind: input, shape index: {}]   ;;  %s1928_s3 = inlined_call_operand.vmem [shape: bf16[800,128], index: 3, kind: output, shape index: {}]  }
   0x1 LB: > { %s1202_s13 = sadd.s32 4294967295, %s1667_s12   ;;  %p1206_p0 = scmp.ge.s32.totalorder %s1667_s12, 1  ;;  %s1667_s12 = sphi %s1690_s12, %s13_s12  }
   0x2   : > { %p139_p1 = scmp.lt.s32.totalorder %s1667_s12, 3 }
   0x4   : > { %p140_p2 = pnand %p1206_p0, %p139_p1 }
   0x5   : > { %v1570_v0 = vld [vmem:[%s1926_s1] sm:$0xff] (!%p140_p2)   ;;  %v1669_v1 = vmov (!%p140_p2), 0   ;;  %s164_s16 = smul.u32 (!%p140_p2), 50, %s1202_s13  ;;  %v1571_v2 = vld [vmem:[%s1926_s1 + $0x8] sm:$0xff] (!%p140_p2)   ;;  %v1572_v3 = vld [vmem:[%s1926_s1 + $0x10] sm:$0xff] (!%p140_p2)  }
   0x6   : > { %143 = sbr.rel (%p140_p2) target bundleno = 387 (0x183), region = 32  ;;  %613 = vmatprep.subr.bf16.mxu0 (!%p140_p2), %v1669_v1  ;;  %1529 = vmatprep.subr.bf16.mxu1 (!%p140_p2), %v1669_v1  ;;  %v1573_v4 = vld [vmem:[%s1926_s1 + $0x18] sm:$0xff] (!%p140_p2)   ;;  %v1574_v5 = vld [vmem:[%s1926_s1 + $0x20] sm:$0xff] (!%p140_p2)   ;;  %v1575_v7 = vld [vmem:[%s1926_s1 + $0x28] sm:$0xff] (!%p140_p2)  }
   0x7   : > { %614 = vmatpush1.bf16.msra.mxu0 (!%p140_p2), %v1570_v0  ;;  %1545 = vmatpush1.bf16.msra.mxu1 (!%p140_p2), %v1570_v0  ;;  %p165_p3 = scmp.lt.s32.totalorder (!%p140_p2), %s164_s16, 99  ;;  %v1576_v9 = vld [vmem:[%s1926_s1 + $0x30] sm:$0xff] (!%p140_p2)   ;;  %v1577_v10 = vld [vmem:[%s1926_s1 + $0x38] sm:$0xff] (!%p140_p2)   ;;  %v1578_v11 = vld [vmem:[%s1926_s1 + $0x40] sm:$0xff] (!%p140_p2)  }
   0x8   : > { %615 = vmatprep.subr.bf16.mxu0 (!%p140_p2), %v1669_v1  ;;  %1530 = vmatprep.subr.bf16.mxu1 (!%p140_p2), %v1669_v1  ;;  %v1579_v12 = vld [vmem:[%s1926_s1 + $0x48] sm:$0xff] (!%p140_p2)   ;;  %v1580_v13 = vld [vmem:[%s1926_s1 + $0x50] sm:$0xff] (!%p140_p2)   ;;  %v1581_v14 = vld [vmem:[%s1926_s1 + $0x58] sm:$0xff] (!%p140_p2)  }
   0x9   : > { %v1582_v15 = vld [vmem:[%s1926_s1 + $0x60] sm:$0xff] (!%p140_p2)   ;;  %v1583_v16 = vld [vmem:[%s1926_s1 + $0x68] sm:$0xff] (!%p140_p2)   ;;  %v1584_v17 = vld [vmem:[%s1926_s1 + $0x70] sm:$0xff] (!%p140_p2)  }
   0xa   : > { %v1585_v18 = vld [vmem:[%s1926_s1 + $0x78] sm:$0xff] (!%p140_p2)  }
   0xb   : > { %616 = vmatpush1.bf16.msra.mxu0 (!%p140_p2), %v1571_v2  ;;  %1546 = vmatpush1.bf16.msra.mxu1 (!%p140_p2), %v1571_v2 }
   0xc   : > { %617 = vmatprep.subr.bf16.mxu0 (!%p140_p2), %v1669_v1  ;;  %1531 = vmatprep.subr.bf16.mxu1 (!%p140_p2), %v1669_v1 }
   0xd   : > { %s1930_s16 = smov (!%p165_p3, %s164_s16), 99 }
   0xe   : > { %s1329_s23 = sshll.u32 %s1930_s16, 3  ;;  %s1209_s29 = sshll.u32 %s1930_s16, 2 }
   0xf   : > { %618 = vmatpush1.bf16.msra.mxu0 %v1572_v3  ;;  %1547 = vmatpush1.bf16.msra.mxu1 %v1572_v3  ;;  %s1727_s28 = scalar_lea.vmem %s1925_s0, %s1329_s23  ;;  %v1839_v3 = vld [vmem:[%s1927_s2] ss:$0 sm:$0xff]  ;;  %s1849_s4 = scalar_lea.vmem %s1928_s3, %s1209_s29 }
  0x10   : > { %619 = vmatprep.subr.bf16.mxu0 %v1669_v1  ;;  %1532 = vmatprep.subr.bf16.mxu1 %v1669_v1  ;;  %v1588_v6 = vld [vmem:[%s1727_s28 + $0x4] ss:$8 sps:$4 sm:$0xff]   ;;  %v1591_v8 = vld [vmem:[%s1727_s28 + $0xd4] ss:$8 sps:$4 sm:$0xff]   ;;  %v1586_v19 = vld [vmem:[%s1727_s28] ss:$8 sps:$4 sm:$0xff]  }
  0x11   : > { %645 = vmatprep.mubr.bf16.mxu0 %v1588_v6  ;;  %749 = vmatprep.mubr.bf16.mxu1 %v1591_v8  ;;  %v1589_v20 = vld [vmem:[%s1727_s28 + $0xd0] ss:$8 sps:$4 sm:$0xff]   ;;  %v1592_v21 = vld [vmem:[%s1727_s28 + $0x14] ss:$8 sps:$4 sm:$0xff]   ;;  %v1595_v22 = vld [vmem:[%s1727_s28 + $0xe4] ss:$8 sps:$4 sm:$0xff]  }
  0x12   : > { %v1594_v23 = vld [vmem:[%s1727_s28 + $0x10] ss:$8 sps:$4 sm:$0xff]   ;;  %v1597_v24 = vld [vmem:[%s1727_s28 + $0xe0] ss:$8 sps:$4 sm:$0xff]   ;;  %v1598_v25 = vld [vmem:[%s1727_s28 + $0x24] ss:$8 sps:$4 sm:$0xff]  }
  0x13   : > { %620 = vmatpush1.bf16.msra.mxu0 %v1573_v4  ;;  %1548 = vmatpush1.bf16.msra.mxu1 %v1573_v4  ;;  %v1601_v26 = vld [vmem:[%s1727_s28 + $0xf4] ss:$8 sps:$4 sm:$0xff]   ;;  %v1600_v27 = vld [vmem:[%s1727_s28 + $0x20] ss:$8 sps:$4 sm:$0xff]   ;;  %v1603_v28 = vld [vmem:[%s1727_s28 + $0xf0] ss:$8 sps:$4 sm:$0xff]  }
  0x14   : > { %621 = vmatprep.subr.bf16.mxu0 %v1669_v1  ;;  %1533 = vmatprep.subr.bf16.mxu1 %v1669_v1  ;;  %v1604_v29 = vld [vmem:[%s1727_s28 + $0x34] ss:$8 sps:$4 sm:$0xff]   ;;  %v1607_v30 = vld [vmem:[%s1727_s28 + $0x104] ss:$8 sps:$4 sm:$0xff]   ;;  %v1606_v31 = vld [vmem:[%s1727_s28 + $0x30] ss:$8 sps:$4 sm:$0xff]  }
  0x15   : > { %v1609_v32 = vld [vmem:[%s1727_s28 + $0x100] ss:$8 sps:$4 sm:$0xff]   ;;  %v1610_v33 = vld [vmem:[%s1727_s28 + $0x44] ss:$8 sps:$4 sm:$0xff]   ;;  %v1613_v34 = vld [vmem:[%s1727_s28 + $0x114] ss:$8 sps:$4 sm:$0xff]  }
  0x16   : > { %v1612_v35 = vld [vmem:[%s1727_s28 + $0x40] ss:$8 sps:$4 sm:$0xff]   ;;  %v1615_v36 = vld [vmem:[%s1727_s28 + $0x110] ss:$8 sps:$4 sm:$0xff]   ;;  %v1616_v37 = vld [vmem:[%s1727_s28 + $0x54] ss:$8 sps:$4 sm:$0xff]  }
  0x17   : > { %622 = vmatpush1.bf16.msra.mxu0 %v1574_v5  ;;  %1549 = vmatpush1.bf16.msra.mxu1 %v1574_v5  ;;  %v1619_v38 = vld [vmem:[%s1727_s28 + $0x124] ss:$8 sps:$4 sm:$0xff]   ;;  %v1618_v39 = vld [vmem:[%s1727_s28 + $0x50] ss:$8 sps:$4 sm:$0xff]   ;;  %v1621_v40 = vld [vmem:[%s1727_s28 + $0x120] ss:$8 sps:$4 sm:$0xff]  }
  0x18   : > { %623 = vmatprep.subr.bf16.mxu0 %v1669_v1  ;;  %1534 = vmatprep.subr.bf16.mxu1 %v1669_v1  ;;  %v1622_v41 = vld [vmem:[%s1727_s28 + $0x64] ss:$8 sps:$4 sm:$0xff]   ;;  %v1625_v42 = vld [vmem:[%s1727_s28 + $0x134] ss:$8 sps:$4 sm:$0xff]   ;;  %v1624_v43 = vld [vmem:[%s1727_s28 + $0x60] ss:$8 sps:$4 sm:$0xff]  }
  0x19   : > { %v1627_v44 = vld [vmem:[%s1727_s28 + $0x130] ss:$8 sps:$4 sm:$0xff]   ;;  %v1628_v45 = vld [vmem:[%s1727_s28 + $0x74] ss:$8 sps:$4 sm:$0xff]   ;;  %v1631_v46 = vld [vmem:[%s1727_s28 + $0x144] ss:$8 sps:$4 sm:$0xff]  }
  0x1a   : > { %v1630_v47 = vld [vmem:[%s1727_s28 + $0x70] ss:$8 sps:$4 sm:$0xff]   ;;  %v1633_v48 = vld [vmem:[%s1727_s28 + $0x140] ss:$8 sps:$4 sm:$0xff]   ;;  %v1634_v49 = vld [vmem:[%s1727_s28 + $0x84] ss:$8 sps:$4 sm:$0xff]  }
  0x1b   : > { %624 = vmatpush1.bf16.msra.mxu0 %v1575_v7  ;;  %1550 = vmatpush1.bf16.msra.mxu1 %v1575_v7  ;;  %v1637_v50 = vld [vmem:[%s1727_s28 + $0x154] ss:$8 sps:$4 sm:$0xff]   ;;  %v1636_v51 = vld [vmem:[%s1727_s28 + $0x80] ss:$8 sps:$4 sm:$0xff]   ;;  %v1639_v52 = vld [vmem:[%s1727_s28 + $0x150] ss:$8 sps:$4 sm:$0xff]  }
  0x1c   : > { %625 = vmatprep.subr.bf16.mxu0 %v1669_v1  ;;  %1535 = vmatprep.subr.bf16.mxu1 %v1669_v1  ;;  %v1640_v53 = vld [vmem:[%s1727_s28 + $0x94] ss:$8 sps:$4 sm:$0xff]   ;;  %v1643_v54 = vld [vmem:[%s1727_s28 + $0x164] ss:$8 sps:$4 sm:$0xff]   ;;  %v1642_v55 = vld [vmem:[%s1727_s28 + $0x90] ss:$8 sps:$4 sm:$0xff]  }
  0x1d   : > { %v1645_v56 = vld [vmem:[%s1727_s28 + $0x160] ss:$8 sps:$4 sm:$0xff]   ;;  %v1646_v57 = vld [vmem:[%s1727_s28 + $0xa4] ss:$8 sps:$4 sm:$0xff]   ;;  %v1649_v58 = vld [vmem:[%s1727_s28 + $0x174] ss:$8 sps:$4 sm:$0xff]  }
  0x1e   : > { %v1648_v59 = vld [vmem:[%s1727_s28 + $0xa0] ss:$8 sps:$4 sm:$0xff]   ;;  %v1651_v60 = vld [vmem:[%s1727_s28 + $0x170] ss:$8 sps:$4 sm:$0xff]   ;;  %v1652_v61 = vld [vmem:[%s1727_s28 + $0xb4] ss:$8 sps:$4 sm:$0xff]  }
  0x1f   : > { %626 = vmatpush1.bf16.msra.mxu0 %v1576_v9  ;;  %1551 = vmatpush1.bf16.msra.mxu1 %v1576_v9  ;;  %v1655_v62 = vld [vmem:[%s1727_s28 + $0x184] ss:$8 sps:$4 sm:$0xff]   ;;  %v1654_v63 = vld [vmem:[%s1727_s28 + $0xb0] ss:$8 sps:$4 sm:$0xff]   ;;  %v1657_v0 = vld [vmem:[%s1727_s28 + $0x180] ss:$8 sps:$4 sm:$0xff]  }
  0x20   : > { %627 = vmatprep.subr.bf16.mxu0 %v1669_v1  ;;  %1536 = vmatprep.subr.bf16.mxu1 %v1669_v1  ;;  %v1660_v2 = vld [vmem:[%s1727_s28 + $0xc0] ss:$8 sps:$4 sm:$0xff]  }
  0x23   : > { %628 = vmatpush1.bf16.msra.mxu0 %v1577_v10  ;;  %1552 = vmatpush1.bf16.msra.mxu1 %v1577_v10 }
  0x24   : > { %629 = vmatprep.subr.bf16.mxu0 %v1669_v1  ;;  %1537 = vmatprep.subr.bf16.mxu1 %v1669_v1 }
  0x27   : > { %630 = vmatpush1.bf16.msra.mxu0 %v1578_v11  ;;  %1553 = vmatpush1.bf16.msra.mxu1 %v1578_v11 }
  0x28   : > { %631 = vmatprep.subr.bf16.mxu0 %v1669_v1  ;;  %1538 = vmatprep.subr.bf16.mxu1 %v1669_v1 }
  0x2b   : > { %632 = vmatpush1.bf16.msra.mxu0 %v1579_v12  ;;  %1554 = vmatpush1.bf16.msra.mxu1 %v1579_v12 }
  0x2c   : > { %633 = vmatprep.subr.bf16.mxu0 %v1669_v1  ;;  %1539 = vmatprep.subr.bf16.mxu1 %v1669_v1 }
  0x2f   : > { %634 = vmatpush1.bf16.msra.mxu0 %v1580_v13  ;;  %1555 = vmatpush1.bf16.msra.mxu1 %v1580_v13 }
  0x30   : > { %635 = vmatprep.subr.bf16.mxu0 %v1669_v1  ;;  %1540 = vmatprep.subr.bf16.mxu1 %v1669_v1 }
  0x33   : > { %636 = vmatpush1.bf16.msra.mxu0 %v1581_v14  ;;  %1556 = vmatpush1.bf16.msra.mxu1 %v1581_v14 }
  0x34   : > { %637 = vmatprep.subr.bf16.mxu0 %v1669_v1  ;;  %1541 = vmatprep.subr.bf16.mxu1 %v1669_v1 }
  0x37   : > { %638 = vmatpush1.bf16.msra.mxu0 %v1582_v15  ;;  %1557 = vmatpush1.bf16.msra.mxu1 %v1582_v15 }
  0x38   : > { %639 = vmatprep.subr.bf16.mxu0 %v1669_v1  ;;  %1542 = vmatprep.subr.bf16.mxu1 %v1669_v1 }
  0x3b   : > { %640 = vmatpush1.bf16.msra.mxu0 %v1583_v16  ;;  %1558 = vmatpush1.bf16.msra.mxu1 %v1583_v16 }
  0x3c   : > { %641 = vmatprep.subr.bf16.mxu0 %v1669_v1  ;;  %1543 = vmatprep.subr.bf16.mxu1 %v1669_v1 }
  0x3f   : > { %642 = vmatpush1.bf16.msra.mxu0 %v1584_v17  ;;  %1559 = vmatpush1.bf16.msra.mxu1 %v1584_v17 }
  0x40   : > { %643 = vmatprep.subr.bf16.mxu0 %v1669_v1  ;;  %1544 = vmatprep.subr.bf16.mxu1 %v1669_v1  ;;  %v1658_v1 = vld [vmem:[%s1727_s28 + $0xc4] ss:$8 sps:$4 sm:$0xff]  }
  0x43   : > { %644 = vmatpush1.bf16.msra.mxu0 %v1585_v18  ;;  %1560 = vmatpush1.bf16.msra.mxu1 %v1585_v18 }
  0x46   : > { %646 = vmatmul.mubr.bf16.vlgmr.msra.gmra.mrb[0].mxu0 %v1586_v19  ;;  %750 = vmatmul.mubr.bf16.vlgmr.msra.gmra.mrb[0].mxu1 %v1589_v20 }
  0x47   : > { %653 = vmatprep.mubr.bf16.mxu0 %v1592_v21  ;;  %757 = vmatprep.mubr.bf16.mxu1 %v1595_v22 }
  0x4e   : > { %654 = vmatmul.mubr.bf16.gmra.mrb[4].mxu0 %v1594_v23  ;;  %758 = vmatmul.mubr.bf16.gmra.mrb[4].mxu1 %v1597_v24 }
  0x4f   : > { %661 = vmatprep.mubr.bf16.mxu0 %v1598_v25  ;;  %765 = vmatprep.mubr.bf16.mxu1 %v1601_v26 }
  0x56   : > { %662 = vmatmul.mubr.bf16.gmra.mrb[8].mxu0 %v1600_v27  ;;  %766 = vmatmul.mubr.bf16.gmra.mrb[8].mxu1 %v1603_v28 }
  0x57   : > { %669 = vmatprep.mubr.bf16.mxu0 %v1604_v29  ;;  %773 = vmatprep.mubr.bf16.mxu1 %v1607_v30 }
  0x5e   : > { %670 = vmatmul.mubr.bf16.gmra.mrb[12].mxu0 %v1606_v31  ;;  %774 = vmatmul.mubr.bf16.gmra.mrb[12].mxu1 %v1609_v32 }
  0x5f   : > { %677 = vmatprep.mubr.bf16.mxu0 %v1610_v33  ;;  %781 = vmatprep.mubr.bf16.mxu1 %v1613_v34 }
  0x66   : > { %678 = vmatmul.mubr.bf16.gmra.mrb[16].mxu0 %v1612_v35  ;;  %782 = vmatmul.mubr.bf16.gmra.mrb[16].mxu1 %v1615_v36 }
  0x67   : > { %685 = vmatprep.mubr.bf16.mxu0 %v1616_v37  ;;  %789 = vmatprep.mubr.bf16.mxu1 %v1619_v38 }
  0x6e   : > { %686 = vmatmul.mubr.bf16.gmra.mrb[20].mxu0 %v1618_v39  ;;  %790 = vmatmul.mubr.bf16.gmra.mrb[20].mxu1 %v1621_v40 }
  0x6f   : > { %693 = vmatprep.mubr.bf16.mxu0 %v1622_v41  ;;  %797 = vmatprep.mubr.bf16.mxu1 %v1625_v42 }
  0x76   : > { %694 = vmatmul.mubr.bf16.gmra.mrb[24].mxu0 %v1624_v43  ;;  %798 = vmatmul.mubr.bf16.gmra.mrb[24].mxu1 %v1627_v44 }
  0x77   : > { %701 = vmatprep.mubr.bf16.mxu0 %v1628_v45  ;;  %805 = vmatprep.mubr.bf16.mxu1 %v1631_v46 }
  0x7e   : > { %702 = vmatmul.mubr.bf16.gmra.mrb[28].mxu0 %v1630_v47  ;;  %806 = vmatmul.mubr.bf16.gmra.mrb[28].mxu1 %v1633_v48 }
  0x7f   : > { %709 = vmatprep.mubr.bf16.mxu0 %v1634_v49  ;;  %813 = vmatprep.mubr.bf16.mxu1 %v1637_v50 }
  0x86   : > { %710 = vmatmul.mubr.bf16.gmra.mrb[32].mxu0 %v1636_v51  ;;  %814 = vmatmul.mubr.bf16.gmra.mrb[32].mxu1 %v1639_v52 }
  0x87   : > { %717 = vmatprep.mubr.bf16.mxu0 %v1640_v53  ;;  %821 = vmatprep.mubr.bf16.mxu1 %v1643_v54 }
  0x8e   : > { %718 = vmatmul.mubr.bf16.gmra.mrb[36].mxu0 %v1642_v55  ;;  %822 = vmatmul.mubr.bf16.gmra.mrb[36].mxu1 %v1645_v56 }
  0x8f   : > { %725 = vmatprep.mubr.bf16.mxu0 %v1646_v57  ;;  %829 = vmatprep.mubr.bf16.mxu1 %v1649_v58 }
  0x96   : > { %726 = vmatmul.mubr.bf16.gmra.mrb[40].mxu0 %v1648_v59  ;;  %830 = vmatmul.mubr.bf16.gmra.mrb[40].mxu1 %v1651_v60 }
  0x97   : > { %733 = vmatprep.mubr.bf16.mxu0 %v1652_v61  ;;  %837 = vmatprep.mubr.bf16.mxu1 %v1655_v62 }
  0x9e   : > { %734 = vmatmul.mubr.bf16.gmra.mrb[44].mxu0 %v1654_v63  ;;  %838 = vmatmul.mubr.bf16.gmra.mrb[44].mxu1 %v1657_v0 }
  0x9f   : > { %741 = vmatprep.mubr.bf16.mxu0 %v1658_v1 }
  0xa6   : > { %742 = vmatmul.mubr.bf16.gmra.mrb[48].mxu0 %v1660_v2 }
 0x119   : > { %v647_v4 = vpop.f32.mrb[0].mxu0  ;;  %v751_v5 = vpop.f32.mrb[0].mxu1 }
 0x11a   : > { %v648_v6 = vadd.f32 %v1839_v3, %v647_v4  ;;  %v649_v7 = vpop.f32.mrb[1].mxu0  ;;  %v752_v8 = vadd.f32 %v1839_v3, %v751_v5  ;;  %v753_v9 = vpop.f32.mrb[1].mxu1 }
 0x11b   : > { %v650_v10 = vpop.f32.mrb[2].mxu0  ;;  %v754_v11 = vpop.f32.mrb[2].mxu1 }
 0x11c   : > { %v651_v12 = vadd.f32 %v1839_v3, %v650_v10  ;;  %v652_v13 = vpop.f32.mrb[3].mxu0  ;;  %v872_v14 = vmax.f32 %v752_v8, 0.0  ;;  %v755_v15 = vadd.f32 %v1839_v3, %v754_v11  ;;  %v756_v16 = vpop.f32.mrb[3].mxu1  ;;  %v846_v17 = vmax.f32 %v648_v6, 0.0 }
 0x11e   : > { %v847_v18 = vmax.f32 %v651_v12, 0.0  ;;  %v873_v19 = vmax.f32 %v755_v15, 0.0 }
 0x120   : > { %v1383_v20 = vpack.c.bf16 %v847_v18, %v846_v17  ;;  %v1448_v21 = vpack.c.bf16 %v873_v19, %v872_v14 }
 0x121   : > { %v655_v22 = vpop.f32.mrb[4].mxu0  ;;  %v759_v23 = vpop.f32.mrb[4].mxu1 }
 0x122   : > { %1384 = vst [vmem:[%s1849_s4] sm:$0xff] %v1383_v20   ;;  %1517 = vst [vmem:[%s1849_s4 + $0x68] sm:$0xff] %v1448_v21   ;;  %v656_v24 = vadd.f32 %v1839_v3, %v655_v22  ;;  %v657_v25 = vpop.f32.mrb[5].mxu0  ;;  %v760_v26 = vadd.f32 %v1839_v3, %v759_v23  ;;  %v761_v27 = vpop.f32.mrb[5].mxu1 }
 0x123   : > { %v658_v28 = vpop.f32.mrb[6].mxu0  ;;  %v762_v29 = vpop.f32.mrb[6].mxu1 }
 0x124   : > { %v659_v30 = vadd.f32 %v1839_v3, %v658_v28  ;;  %v660_v31 = vpop.f32.mrb[7].mxu0  ;;  %v874_v32 = vmax.f32 %v760_v26, 0.0  ;;  %v763_v33 = vadd.f32 %v1839_v3, %v762_v29  ;;  %v764_v34 = vpop.f32.mrb[7].mxu1  ;;  %v848_v35 = vmax.f32 %v656_v24, 0.0 }
 0x126   : > { %v849_v36 = vmax.f32 %v659_v30, 0.0  ;;  %v875_v37 = vmax.f32 %v763_v33, 0.0 }
 0x128   : > { %v1388_v38 = vpack.c.bf16 %v849_v36, %v848_v35  ;;  %v1453_v39 = vpack.c.bf16 %v875_v37, %v874_v32 }
 0x129   : > { %v663_v40 = vpop.f32.mrb[8].mxu0  ;;  %v767_v41 = vpop.f32.mrb[8].mxu1 }
 0x12a   : > { %1505 = vst [vmem:[%s1849_s4 + $0x8] sm:$0xff] %v1388_v38   ;;  %1518 = vst [vmem:[%s1849_s4 + $0x70] sm:$0xff] %v1453_v39   ;;  %v664_v42 = vadd.f32 %v1839_v3, %v663_v40  ;;  %v665_v43 = vpop.f32.mrb[9].mxu0  ;;  %v768_v44 = vadd.f32 %v1839_v3, %v767_v41  ;;  %v769_v45 = vpop.f32.mrb[9].mxu1 }
 0x12b   : > { %v666_v46 = vpop.f32.mrb[10].mxu0  ;;  %v770_v47 = vpop.f32.mrb[10].mxu1 }
 0x12c   : > { %v667_v48 = vadd.f32 %v1839_v3, %v666_v46  ;;  %v668_v49 = vpop.f32.mrb[11].mxu0  ;;  %v876_v50 = vmax.f32 %v768_v44, 0.0  ;;  %v771_v51 = vadd.f32 %v1839_v3, %v770_v47  ;;  %v772_v52 = vpop.f32.mrb[11].mxu1  ;;  %v850_v53 = vmax.f32 %v664_v42, 0.0 }
 0x12e   : > { %v851_v54 = vmax.f32 %v667_v48, 0.0  ;;  %v877_v55 = vmax.f32 %v771_v51, 0.0 }
 0x130   : > { %v1393_v56 = vpack.c.bf16 %v851_v54, %v850_v53  ;;  %v1458_v57 = vpack.c.bf16 %v877_v55, %v876_v50 }
 0x131   : > { %v671_v58 = vpop.f32.mrb[12].mxu0  ;;  %v775_v59 = vpop.f32.mrb[12].mxu1 }
 0x132   : > { %1506 = vst [vmem:[%s1849_s4 + $0x10] sm:$0xff] %v1393_v56   ;;  %1519 = vst [vmem:[%s1849_s4 + $0x78] sm:$0xff] %v1458_v57   ;;  %v672_v60 = vadd.f32 %v1839_v3, %v671_v58  ;;  %v673_v61 = vpop.f32.mrb[13].mxu0  ;;  %v776_v62 = vadd.f32 %v1839_v3, %v775_v59  ;;  %v777_v63 = vpop.f32.mrb[13].mxu1 }
 0x133   : > { %v674_v0 = vpop.f32.mrb[14].mxu0  ;;  %v778_v1 = vpop.f32.mrb[14].mxu1 }
 0x134   : > { %v675_v2 = vadd.f32 %v1839_v3, %v674_v0  ;;  %v676_v4 = vpop.f32.mrb[15].mxu0  ;;  %v878_v5 = vmax.f32 %v776_v62, 0.0  ;;  %v779_v6 = vadd.f32 %v1839_v3, %v778_v1  ;;  %v780_v7 = vpop.f32.mrb[15].mxu1  ;;  %v852_v8 = vmax.f32 %v672_v60, 0.0 }
 0x136   : > { %v853_v9 = vmax.f32 %v675_v2, 0.0  ;;  %v879_v10 = vmax.f32 %v779_v6, 0.0 }
 0x138   : > { %v1398_v11 = vpack.c.bf16 %v853_v9, %v852_v8  ;;  %v1463_v12 = vpack.c.bf16 %v879_v10, %v878_v5 }
 0x139   : > { %v679_v13 = vpop.f32.mrb[16].mxu0  ;;  %v783_v14 = vpop.f32.mrb[16].mxu1 }
 0x13a   : > { %1507 = vst [vmem:[%s1849_s4 + $0x18] sm:$0xff] %v1398_v11   ;;  %1520 = vst [vmem:[%s1849_s4 + $0x80] sm:$0xff] %v1463_v12   ;;  %v680_v15 = vadd.f32 %v1839_v3, %v679_v13  ;;  %v681_v16 = vpop.f32.mrb[17].mxu0  ;;  %v784_v17 = vadd.f32 %v1839_v3, %v783_v14  ;;  %v785_v18 = vpop.f32.mrb[17].mxu1 }
 0x13b   : > { %v682_v19 = vpop.f32.mrb[18].mxu0  ;;  %v786_v20 = vpop.f32.mrb[18].mxu1 }
 0x13c   : > { %v683_v21 = vadd.f32 %v1839_v3, %v682_v19  ;;  %v684_v22 = vpop.f32.mrb[19].mxu0  ;;  %v880_v23 = vmax.f32 %v784_v17, 0.0  ;;  %v787_v24 = vadd.f32 %v1839_v3, %v786_v20  ;;  %v788_v25 = vpop.f32.mrb[19].mxu1  ;;  %v854_v26 = vmax.f32 %v680_v15, 0.0 }
 0x13e   : > { %v855_v27 = vmax.f32 %v683_v21, 0.0  ;;  %v881_v28 = vmax.f32 %v787_v24, 0.0 }
 0x140   : > { %v1403_v29 = vpack.c.bf16 %v855_v27, %v854_v26  ;;  %v1468_v30 = vpack.c.bf16 %v881_v28, %v880_v23 }
 0x141   : > { %v687_v31 = vpop.f32.mrb[20].mxu0  ;;  %v791_v32 = vpop.f32.mrb[20].mxu1 }
 0x142   : > { %1508 = vst [vmem:[%s1849_s4 + $0x20] sm:$0xff] %v1403_v29   ;;  %1521 = vst [vmem:[%s1849_s4 + $0x88] sm:$0xff] %v1468_v30   ;;  %v688_v33 = vadd.f32 %v1839_v3, %v687_v31  ;;  %v689_v34 = vpop.f32.mrb[21].mxu0  ;;  %v792_v35 = vadd.f32 %v1839_v3, %v791_v32  ;;  %v793_v36 = vpop.f32.mrb[21].mxu1 }
 0x143   : > { %v690_v37 = vpop.f32.mrb[22].mxu0  ;;  %v794_v38 = vpop.f32.mrb[22].mxu1 }
 0x144   : > { %v691_v39 = vadd.f32 %v1839_v3, %v690_v37  ;;  %v692_v40 = vpop.f32.mrb[23].mxu0  ;;  %v882_v41 = vmax.f32 %v792_v35, 0.0  ;;  %v795_v42 = vadd.f32 %v1839_v3, %v794_v38  ;;  %v796_v43 = vpop.f32.mrb[23].mxu1  ;;  %v856_v44 = vmax.f32 %v688_v33, 0.0 }
 0x146   : > { %v857_v45 = vmax.f32 %v691_v39, 0.0  ;;  %v883_v46 = vmax.f32 %v795_v42, 0.0 }
 0x148   : > { %v1408_v47 = vpack.c.bf16 %v857_v45, %v856_v44  ;;  %v1473_v48 = vpack.c.bf16 %v883_v46, %v882_v41 }
 0x149   : > { %v695_v49 = vpop.f32.mrb[24].mxu0  ;;  %v799_v50 = vpop.f32.mrb[24].mxu1 }
 0x14a   : > { %1509 = vst [vmem:[%s1849_s4 + $0x28] sm:$0xff] %v1408_v47   ;;  %1522 = vst [vmem:[%s1849_s4 + $0x90] sm:$0xff] %v1473_v48   ;;  %v696_v51 = vadd.f32 %v1839_v3, %v695_v49  ;;  %v697_v52 = vpop.f32.mrb[25].mxu0  ;;  %v800_v53 = vadd.f32 %v1839_v3, %v799_v50  ;;  %v801_v54 = vpop.f32.mrb[25].mxu1 }
 0x14b   : > { %v698_v55 = vpop.f32.mrb[26].mxu0  ;;  %v802_v56 = vpop.f32.mrb[26].mxu1 }
 0x14c   : > { %v699_v57 = vadd.f32 %v1839_v3, %v698_v55  ;;  %v700_v58 = vpop.f32.mrb[27].mxu0  ;;  %v884_v59 = vmax.f32 %v800_v53, 0.0  ;;  %v803_v60 = vadd.f32 %v1839_v3, %v802_v56  ;;  %v804_v61 = vpop.f32.mrb[27].mxu1  ;;  %v858_v62 = vmax.f32 %v696_v51, 0.0 }
 0x14e   : > { %v859_v63 = vmax.f32 %v699_v57, 0.0  ;;  %v885_v0 = vmax.f32 %v803_v60, 0.0 }
 0x150   : > { %v1413_v1 = vpack.c.bf16 %v859_v63, %v858_v62  ;;  %v1478_v2 = vpack.c.bf16 %v885_v0, %v884_v59 }
 0x151   : > { %v703_v4 = vpop.f32.mrb[28].mxu0  ;;  %v807_v5 = vpop.f32.mrb[28].mxu1 }
 0x152   : > { %1510 = vst [vmem:[%s1849_s4 + $0x30] sm:$0xff] %v1413_v1   ;;  %1523 = vst [vmem:[%s1849_s4 + $0x98] sm:$0xff] %v1478_v2   ;;  %v704_v6 = vadd.f32 %v1839_v3, %v703_v4  ;;  %v705_v7 = vpop.f32.mrb[29].mxu0  ;;  %v808_v8 = vadd.f32 %v1839_v3, %v807_v5  ;;  %v809_v9 = vpop.f32.mrb[29].mxu1 }
 0x153   : > { %v706_v10 = vpop.f32.mrb[30].mxu0  ;;  %v810_v11 = vpop.f32.mrb[30].mxu1 }
 0x154   : > { %v707_v12 = vadd.f32 %v1839_v3, %v706_v10  ;;  %v708_v13 = vpop.f32.mrb[31].mxu0  ;;  %v886_v14 = vmax.f32 %v808_v8, 0.0  ;;  %v811_v15 = vadd.f32 %v1839_v3, %v810_v11  ;;  %v812_v16 = vpop.f32.mrb[31].mxu1  ;;  %v860_v17 = vmax.f32 %v704_v6, 0.0 }
 0x156   : > { %v861_v18 = vmax.f32 %v707_v12, 0.0  ;;  %v887_v19 = vmax.f32 %v811_v15, 0.0 }
 0x158   : > { %v1418_v20 = vpack.c.bf16 %v861_v18, %v860_v17  ;;  %v1483_v21 = vpack.c.bf16 %v887_v19, %v886_v14 }
 0x159   : > { %v711_v22 = vpop.f32.mrb[32].mxu0  ;;  %v815_v23 = vpop.f32.mrb[32].mxu1 }
 0x15a   : > { %1511 = vst [vmem:[%s1849_s4 + $0x38] sm:$0xff] %v1418_v20   ;;  %1524 = vst [vmem:[%s1849_s4 + $0xa0] sm:$0xff] %v1483_v21   ;;  %v712_v24 = vadd.f32 %v1839_v3, %v711_v22  ;;  %v713_v25 = vpop.f32.mrb[33].mxu0  ;;  %v816_v26 = vadd.f32 %v1839_v3, %v815_v23  ;;  %v817_v27 = vpop.f32.mrb[33].mxu1 }
 0x15b   : > { %v714_v28 = vpop.f32.mrb[34].mxu0  ;;  %v818_v29 = vpop.f32.mrb[34].mxu1 }
 0x15c   : > { %v715_v30 = vadd.f32 %v1839_v3, %v714_v28  ;;  %v716_v31 = vpop.f32.mrb[35].mxu0  ;;  %v888_v32 = vmax.f32 %v816_v26, 0.0  ;;  %v819_v33 = vadd.f32 %v1839_v3, %v818_v29  ;;  %v820_v34 = vpop.f32.mrb[35].mxu1  ;;  %v862_v35 = vmax.f32 %v712_v24, 0.0 }
 0x15e   : > { %v863_v36 = vmax.f32 %v715_v30, 0.0  ;;  %v889_v37 = vmax.f32 %v819_v33, 0.0 }
 0x160   : > { %v1423_v38 = vpack.c.bf16 %v863_v36, %v862_v35  ;;  %v1488_v39 = vpack.c.bf16 %v889_v37, %v888_v32 }
 0x161   : > { %v719_v40 = vpop.f32.mrb[36].mxu0  ;;  %v823_v41 = vpop.f32.mrb[36].mxu1 }
 0x162   : > { %1512 = vst [vmem:[%s1849_s4 + $0x40] sm:$0xff] %v1423_v38   ;;  %1525 = vst [vmem:[%s1849_s4 + $0xa8] sm:$0xff] %v1488_v39   ;;  %v720_v42 = vadd.f32 %v1839_v3, %v719_v40  ;;  %v721_v43 = vpop.f32.mrb[37].mxu0  ;;  %v824_v44 = vadd.f32 %v1839_v3, %v823_v41  ;;  %v825_v45 = vpop.f32.mrb[37].mxu1 }
 0x163   : > { %v722_v46 = vpop.f32.mrb[38].mxu0  ;;  %v826_v47 = vpop.f32.mrb[38].mxu1 }
 0x164   : > { %v723_v48 = vadd.f32 %v1839_v3, %v722_v46  ;;  %v724_v49 = vpop.f32.mrb[39].mxu0  ;;  %v890_v50 = vmax.f32 %v824_v44, 0.0  ;;  %v827_v51 = vadd.f32 %v1839_v3, %v826_v47  ;;  %v828_v52 = vpop.f32.mrb[39].mxu1  ;;  %v864_v53 = vmax.f32 %v720_v42, 0.0 }
 0x166   : > { %v865_v54 = vmax.f32 %v723_v48, 0.0  ;;  %v891_v55 = vmax.f32 %v827_v51, 0.0 }
 0x168   : > { %v1428_v56 = vpack.c.bf16 %v865_v54, %v864_v53  ;;  %v1493_v57 = vpack.c.bf16 %v891_v55, %v890_v50 }
 0x169   : > { %v727_v58 = vpop.f32.mrb[40].mxu0  ;;  %v831_v59 = vpop.f32.mrb[40].mxu1 }
 0x16a   : > { %1513 = vst [vmem:[%s1849_s4 + $0x48] sm:$0xff] %v1428_v56   ;;  %1526 = vst [vmem:[%s1849_s4 + $0xb0] sm:$0xff] %v1493_v57   ;;  %v728_v60 = vadd.f32 %v1839_v3, %v727_v58  ;;  %v729_v61 = vpop.f32.mrb[41].mxu0  ;;  %v832_v62 = vadd.f32 %v1839_v3, %v831_v59  ;;  %v833_v63 = vpop.f32.mrb[41].mxu1 }
 0x16b   : > { %v730_v0 = vpop.f32.mrb[42].mxu0  ;;  %v834_v1 = vpop.f32.mrb[42].mxu1 }
 0x16c   : > { %v731_v2 = vadd.f32 %v1839_v3, %v730_v0  ;;  %v732_v4 = vpop.f32.mrb[43].mxu0  ;;  %v892_v5 = vmax.f32 %v832_v62, 0.0  ;;  %v835_v6 = vadd.f32 %v1839_v3, %v834_v1  ;;  %v836_v7 = vpop.f32.mrb[43].mxu1  ;;  %v866_v8 = vmax.f32 %v728_v60, 0.0 }
 0x16e   : > { %v867_v9 = vmax.f32 %v731_v2, 0.0  ;;  %v893_v10 = vmax.f32 %v835_v6, 0.0 }
 0x170   : > { %v1433_v11 = vpack.c.bf16 %v867_v9, %v866_v8  ;;  %v1498_v12 = vpack.c.bf16 %v893_v10, %v892_v5 }
 0x171   : > { %v735_v13 = vpop.f32.mrb[44].mxu0  ;;  %v839_v14 = vpop.f32.mrb[44].mxu1 }
 0x172   : > { %1514 = vst [vmem:[%s1849_s4 + $0x50] sm:$0xff] %v1433_v11   ;;  %1527 = vst [vmem:[%s1849_s4 + $0xb8] sm:$0xff] %v1498_v12   ;;  %v736_v15 = vadd.f32 %v1839_v3, %v735_v13  ;;  %v737_v16 = vpop.f32.mrb[45].mxu0  ;;  %v840_v17 = vadd.f32 %v1839_v3, %v839_v14  ;;  %v841_v18 = vpop.f32.mrb[45].mxu1 }
 0x173   : > { %v738_v19 = vpop.f32.mrb[46].mxu0  ;;  %v842_v20 = vpop.f32.mrb[46].mxu1 }
 0x174   : > { %v739_v21 = vadd.f32 %v1839_v3, %v738_v19  ;;  %v740_v22 = vpop.f32.mrb[47].mxu0  ;;  %v894_v23 = vmax.f32 %v840_v17, 0.0  ;;  %v843_v24 = vadd.f32 %v1839_v3, %v842_v20  ;;  %v844_v25 = vpop.f32.mrb[47].mxu1  ;;  %v868_v26 = vmax.f32 %v736_v15, 0.0 }
 0x176   : > { %v869_v27 = vmax.f32 %v739_v21, 0.0  ;;  %v895_v28 = vmax.f32 %v843_v24, 0.0 }
 0x178   : > { %v1438_v29 = vpack.c.bf16 %v869_v27, %v868_v26  ;;  %v1503_v30 = vpack.c.bf16 %v895_v28, %v894_v23 }
 0x179   : > { %v743_v31 = vpop.f32.mrb[48].mxu0 }
 0x17a   : > { %1515 = vst [vmem:[%s1849_s4 + $0x58] sm:$0xff] %v1438_v29   ;;  %1528 = vst [vmem:[%s1849_s4 + $0xc0] sm:$0xff] %v1503_v30   ;;  %v744_v32 = vadd.f32 %v1839_v3, %v743_v31  ;;  %v745_v33 = vpop.f32.mrb[49].mxu0 }
 0x17b   : > { %v746_v34 = vpop.f32.mrb[50].mxu0 }
 0x17c   : > { %v747_v35 = vadd.f32 %v1839_v3, %v746_v34  ;;  %v748_v36 = vpop.f32.mrb[51].mxu0  ;;  %v870_v37 = vmax.f32 %v744_v32, 0.0 }
 0x17e   : > { %v871_v38 = vmax.f32 %v747_v35, 0.0 }
 0x180   : > { %v1443_v39 = vpack.c.bf16 %v871_v38, %v870_v37 }
 0x182   : > { %1516 = vst [vmem:[%s1849_s4 + $0x60] sm:$0xff] %v1443_v39  }
 0x183 PF: > { %s13_s12 = sadd.s32 1, %s1667_s12  }
 0x184   : > { %p10_p4 = scmp.ge.s32.totalorder %s13_s12, 4  }
 0x186   :  { %12 = sbr.rel (!%p10_p4) target bundleno = 1 (0x1), region = 62 }

// kernel: duelling_dqn_forward.5
= control target key start
LH: loop header
LB: loop body
LE: loop exit
PB: predicated region body
PF: predicated region fallthrough
CT: control target
= control target key end

     0   :  { %s1928_s12 = smov 0   ;;  %s2254_s0 = inlined_call_operand.vmem [shape: bf16[192,1024], index: 0, kind: input, shape index: {}]   ;;  %s2255_s1 = inlined_call_operand.vmem [shape: bf16[1024,128], index: 1, kind: input, shape index: {}]   ;;  %s2256_s2 = inlined_call_operand.vmem [shape: f32[1,128], index: 2, kind: input, shape index: {}]   ;;  %s2257_s3 = inlined_call_operand.vmem [shape: bf16[192,128], index: 3, kind: output, shape index: {}]  }
   0x1 LB: > { %s1437_s13 = sadd.s32 4294967295, %s1906_s12   ;;  %p1441_p0 = scmp.ge.s32.totalorder %s1906_s12, 1  ;;  %s1906_s12 = sphi %s1928_s12, %s13_s12  }
   0x2   : > { %p139_p1 = scmp.lt.s32.totalorder %s1906_s12, 3 }
   0x4   : > { %p140_p2 = pnand %p1441_p0, %p139_p1 }
   0x5   : > { %v1836_v0 = vld [vmem:[%s2255_s1 + $0x40] sm:$0xff] (!%p140_p2)   ;;  %v1840_v4 = vld [vmem:[%s2255_s1 + $0x48] sm:$0xff] (!%p140_p2)   ;;  %v1844_v8 = vld [vmem:[%s2255_s1 + $0x50] sm:$0xff] (!%p140_p2)   ;;  %s164_s19 = smul.u32 (!%p140_p2), 12, %s1437_s13 }
   0x6   : > { %143 = sbr.rel (%p140_p2) target bundleno = 353 (0x161), region = 32  ;;  %v1837_v1 = vld [vmem:[%s2255_s1 + $0xc0] sm:$0xff] (!%p140_p2)   ;;  %1620 = vmatprep.subr.bf16.mxu0 (!%p140_p2), %v1836_v0  ;;  %v1841_v5 = vld [vmem:[%s2255_s1 + $0xc8] sm:$0xff] (!%p140_p2)   ;;  %v1845_v9 = vld [vmem:[%s2255_s1 + $0xd0] sm:$0xff] (!%p140_p2)  }
   0x7   : > { %v1838_v2 = vld [vmem:[%s2255_s1] sm:$0xff] (!%p140_p2)   ;;  %1672 = vmatprep.subr.bf16.mxu1 (!%p140_p2), %v1837_v1  ;;  %v1842_v6 = vld [vmem:[%s2255_s1 + $0x8] sm:$0xff] (!%p140_p2)   ;;  %v1846_v10 = vld [vmem:[%s2255_s1 + $0x10] sm:$0xff] (!%p140_p2)   ;;  %p165_p3 = scmp.lt.s32.totalorder (!%p140_p2), %s164_s19, 23 }
   0x8   : > { %v1839_v3 = vld [vmem:[%s2255_s1 + $0x80] sm:$0xff] (!%p140_p2)   ;;  %1621 = vmatpush3.bf16.msra.mxu0 (!%p140_p2), %v1838_v2  ;;  %v1843_v7 = vld [vmem:[%s2255_s1 + $0x88] sm:$0xff] (!%p140_p2)   ;;  %v1847_v11 = vld [vmem:[%s2255_s1 + $0x90] sm:$0xff] (!%p140_p2)  }
   0x9   : > { %1673 = vmatpush3.bf16.msra.mxu1 (!%p140_p2), %v1839_v3  ;;  %1622 = vmatprep.subr.bf16.mxu0 (!%p140_p2), %v1840_v4  ;;  %v1848_v12 = vld [vmem:[%s2255_s1 + $0x58] sm:$0xff] (!%p140_p2)   ;;  %v1852_v16 = vld [vmem:[%s2255_s1 + $0x60] sm:$0xff] (!%p140_p2)   ;;  %v1856_v20 = vld [vmem:[%s2255_s1 + $0x68] sm:$0xff] (!%p140_p2)  }
   0xa   : > { %1674 = vmatprep.subr.bf16.mxu1 (!%p140_p2), %v1841_v5  ;;  %v1849_v13 = vld [vmem:[%s2255_s1 + $0xd8] sm:$0xff] (!%p140_p2)   ;;  %v1853_v17 = vld [vmem:[%s2255_s1 + $0xe0] sm:$0xff] (!%p140_p2)   ;;  %v1857_v21 = vld [vmem:[%s2255_s1 + $0xe8] sm:$0xff] (!%p140_p2)  }
   0xb   : > { %v1850_v14 = vld [vmem:[%s2255_s1 + $0x18] sm:$0xff] (!%p140_p2)   ;;  %v1854_v18 = vld [vmem:[%s2255_s1 + $0x20] sm:$0xff] (!%p140_p2)   ;;  %v1858_v22 = vld [vmem:[%s2255_s1 + $0x28] sm:$0xff] (!%p140_p2)  }
   0xc   : > { %1623 = vmatpush3.bf16.msra.mxu0 (!%p140_p2), %v1842_v6  ;;  %v1851_v15 = vld [vmem:[%s2255_s1 + $0x98] sm:$0xff] (!%p140_p2)   ;;  %v1855_v19 = vld [vmem:[%s2255_s1 + $0xa0] sm:$0xff] (!%p140_p2)   ;;  %v1859_v23 = vld [vmem:[%s2255_s1 + $0xa8] sm:$0xff] (!%p140_p2)  }
   0xd   : > { %1675 = vmatpush3.bf16.msra.mxu1 %v1843_v7  ;;  %1624 = vmatprep.subr.bf16.mxu0 %v1844_v8  ;;  %s2259_s19 = smov (!%p165_p3, %s164_s19), 23  ;;  %v1860_v24 = vld [vmem:[%s2255_s1 + $0x70] sm:$0xff]   ;;  %v1864_v28 = vld [vmem:[%s2255_s1 + $0x78] sm:$0xff]   ;;  %v1868_v40 = vld [vmem:[%s2255_s1 + $0x140] sm:$0xff]  }
   0xe   : > { %1676 = vmatprep.subr.bf16.mxu1 %v1845_v9  ;;  %v1861_v25 = vld [vmem:[%s2255_s1 + $0xf0] sm:$0xff]   ;;  %s1572_s18 = sshll.u32 %s2259_s19, 5  ;;  %v1865_v29 = vld [vmem:[%s2255_s1 + $0xf8] sm:$0xff]   ;;  %v1869_v41 = vld [vmem:[%s2255_s1 + $0x100] sm:$0xff]  }
   0xf   : > { %v1862_v26 = vld [vmem:[%s2255_s1 + $0x30] sm:$0xff]   ;;  %s2034_s13 = scalar_lea.vmem %s2254_s0, %s1572_s18  ;;  %v1866_v30 = vld [vmem:[%s2255_s1 + $0x38] sm:$0xff]   ;;  %v1870_v42 = vld [vmem:[%s2255_s1 + $0x1c0] sm:$0xff]  }
  0x10   : > { %1625 = vmatpush3.bf16.msra.mxu0 %v1846_v10  ;;  %v1863_v27 = vld [vmem:[%s2255_s1 + $0xb0] sm:$0xff]   ;;  %v1867_v31 = vld [vmem:[%s2255_s1 + $0xb8] sm:$0xff]   ;;  %v178_v32 = vld [vmem:[%s2034_s13] sm:$0xff] }
  0x11   : > { %1677 = vmatpush3.bf16.msra.mxu1 %v1847_v11  ;;  %1626 = vmatprep.subr.bf16.mxu0 %v1848_v12  ;;  %v182_v33 = vld [vmem:[%s2034_s13 + $0x20] sm:$0xff]  ;;  %v179_v34 = vld [vmem:[%s2034_s13 + $0x8] sm:$0xff]  ;;  %v1876_v56 = vld [vmem:[%s2255_s1 + $0x150] sm:$0xff]  }
  0x12   : > { %1678 = vmatprep.subr.bf16.mxu1 %v1849_v13  ;;  %v1446_v35 = vcombine.low %v178_v32, %v182_v33  ;;  %v1447_v36 = vcombine.high %v178_v32, %v182_v33  ;;  %v183_v37 = vld [vmem:[%s2034_s13 + $0x28] sm:$0xff]  ;;  %v1871_v43 = vld [vmem:[%s2255_s1 + $0x180] sm:$0xff]   ;;  %v1877_v57 = vld [vmem:[%s2255_s1 + $0x110] sm:$0xff]  }
  0x13   : > { %v1448_v38 = vcombine.low %v179_v34, %v183_v37  ;;  %v1449_v39 = vcombine.high %v179_v34, %v183_v37  ;;  %v1872_v44 = vld [vmem:[%s2255_s1 + $0x148] sm:$0xff]   ;;  %v186_v45 = vld [vmem:[%s2034_s13 + $0x40] sm:$0xff]  ;;  %v1878_v58 = vld [vmem:[%s2255_s1 + $0x1d0] sm:$0xff]  }
  0x14   : > { %1627 = vmatpush3.bf16.msra.mxu0 %v1850_v14  ;;  %1017 = vmatprep.mubr.bf16.mxu0 %v1447_v36  ;;  %v190_v46 = vld [vmem:[%s2034_s13 + $0x60] sm:$0xff]  ;;  %v187_v48 = vld [vmem:[%s2034_s13 + $0x48] sm:$0xff]  ;;  %v1879_v1 = vld [vmem:[%s2255_s1 + $0x190] sm:$0xff]  }
  0x15   : > { %1679 = vmatpush3.bf16.msra.mxu1 %v1851_v15  ;;  %1628 = vmatprep.subr.bf16.mxu0 %v1852_v16  ;;  %v1455_v47 = vcombine.high %v186_v45, %v190_v46  ;;  %v191_v49 = vld [vmem:[%s2034_s13 + $0x68] sm:$0xff]  ;;  %v1454_v52 = vcombine.low %v186_v45, %v190_v46  ;;  %v194_v59 = vld [vmem:[%s2034_s13 + $0x80] sm:$0xff]  ;;  %v1880_v3 = vld [vmem:[%s2255_s1 + $0x158] sm:$0xff]  }
  0x16   : > { %1680 = vmatprep.subr.bf16.mxu1 %v1853_v17  ;;  %1098 = vmatprep.mubr.bf16.mxu1 %v1449_v39  ;;  %v1457_v50 = vcombine.high %v187_v48, %v191_v49  ;;  %v1873_v51 = vld [vmem:[%s2255_s1 + $0x108] sm:$0xff]   ;;  %v1456_v53 = vcombine.low %v187_v48, %v191_v49  ;;  %v198_v60 = vld [vmem:[%s2034_s13 + $0xa0] sm:$0xff]  ;;  %v1881_v5 = vld [vmem:[%s2255_s1 + $0x118] sm:$0xff]  }
  0x17   : > { %v1874_v54 = vld [vmem:[%s2255_s1 + $0x1c8] sm:$0xff]   ;;  %v1463_v63 = vcombine.high %v194_v59, %v198_v60  ;;  %v1462_v2 = vcombine.low %v194_v59, %v198_v60  ;;  %v1882_v6 = vld [vmem:[%s2255_s1 + $0x1d8] sm:$0xff]   ;;  %v202_v8 = vld [vmem:[%s2034_s13 + $0xc0] sm:$0xff] }
  0x18   : > { %1629 = vmatpush3.bf16.msra.mxu0 %v1854_v18  ;;  %v1875_v55 = vld [vmem:[%s2255_s1 + $0x188] sm:$0xff]   ;;  %v1883_v7 = vld [vmem:[%s2255_s1 + $0x198] sm:$0xff]   ;;  %v206_v9 = vld [vmem:[%s2034_s13 + $0xe0] sm:$0xff] }
  0x19   : > { %1681 = vmatpush3.bf16.msra.mxu1 %v1855_v19  ;;  %1630 = vmatprep.subr.bf16.mxu0 %v1856_v20  ;;  %v195_v61 = vld [vmem:[%s2034_s13 + $0x88] sm:$0xff]  ;;  %v1471_v11 = vcombine.high %v202_v8, %v206_v9  ;;  %v1884_v14 = vld [vmem:[%s2255_s1 + $0x160] sm:$0xff]   ;;  %v1470_v16 = vcombine.low %v202_v8, %v206_v9  ;;  %v1893_v32 = vld [vmem:[%s2255_s1 + $0x130] sm:$0xff]  }
  0x1a   : > { %1682 = vmatprep.subr.bf16.mxu1 %v1857_v21  ;;  %v199_v62 = vld [vmem:[%s2034_s13 + $0xa8] sm:$0xff]  ;;  %v1885_v15 = vld [vmem:[%s2255_s1 + $0x120] sm:$0xff]   ;;  %v1894_v34 = vld [vmem:[%s2255_s1 + $0x1f0] sm:$0xff]  }
  0x1b   : > { %v1465_v0 = vcombine.high %v195_v61, %v199_v62  ;;  %v1464_v4 = vcombine.low %v195_v61, %v199_v62  ;;  %v203_v10 = vld [vmem:[%s2034_s13 + $0xc8] sm:$0xff]  ;;  %v1886_v17 = vld [vmem:[%s2255_s1 + $0x1e0] sm:$0xff]   ;;  %v1899_v45 = vld [vmem:[%s2255_s1 + $0x1b8] sm:$0xff]  }
  0x1c   : > { %1631 = vmatpush3.bf16.msra.mxu0 %v1858_v22  ;;  %v207_v12 = vld [vmem:[%s2034_s13 + $0xe8] sm:$0xff]  ;;  %v1887_v19 = vld [vmem:[%s2255_s1 + $0x1a0] sm:$0xff]   ;;  %v184_v48 = vld [vmem:[%s2034_s13 + $0x30] sm:$0xff] }
  0x1d   : > { %1683 = vmatpush3.bf16.msra.mxu1 %v1859_v23  ;;  %1632 = vmatprep.subr.bf16.mxu0 %v1860_v24  ;;  %v1473_v13 = vcombine.high %v203_v10, %v207_v12  ;;  %v1472_v18 = vcombine.low %v203_v10, %v207_v12  ;;  %v1888_v20 = vld [vmem:[%s2255_s1 + $0x168] sm:$0xff]   ;;  %v210_v21 = vld [vmem:[%s2034_s13 + $0x100] sm:$0xff]  ;;  %v181_v49 = vld [vmem:[%s2034_s13 + $0x18] sm:$0xff] }
  0x1e   : > { %1684 = vmatprep.subr.bf16.mxu1 %v1861_v25  ;;  %v214_v22 = vld [vmem:[%s2034_s13 + $0x120] sm:$0xff]  ;;  %v211_v24 = vld [vmem:[%s2034_s13 + $0x108] sm:$0xff]  ;;  %v196_v62 = vld [vmem:[%s2034_s13 + $0x90] sm:$0xff] }
  0x1f   : > { %v1479_v23 = vcombine.high %v210_v21, %v214_v22  ;;  %v215_v25 = vld [vmem:[%s2034_s13 + $0x128] sm:$0xff]  ;;  %v222_v36 = vld [vmem:[%s2034_s13 + $0x160] sm:$0xff]  ;;  %v205_v8 = vld [vmem:[%s2034_s13 + $0xd8] sm:$0xff] }
  0x20   : > { %1633 = vmatpush3.bf16.msra.mxu0 %v1862_v26  ;;  %v1481_v26 = vcombine.high %v211_v24, %v215_v25  ;;  %v1480_v33 = vcombine.low %v211_v24, %v215_v25  ;;  %v219_v37 = vld [vmem:[%s2034_s13 + $0x148] sm:$0xff]  ;;  %v209_v9 = vld [vmem:[%s2034_s13 + $0xf8] sm:$0xff] }
  0x21   : > { %1685 = vmatpush3.bf16.msra.mxu1 %v1863_v27  ;;  %1634 = vmatprep.subr.bf16.mxu0 %v1864_v28  ;;  %v1889_v27 = vld [vmem:[%s2255_s1 + $0x128] sm:$0xff]   ;;  %v221_v24 = vld [vmem:[%s2034_s13 + $0x158] sm:$0xff] }
  0x22   : > { %1686 = vmatprep.subr.bf16.mxu1 %v1865_v29  ;;  %v1890_v28 = vld [vmem:[%s2255_s1 + $0x1e8] sm:$0xff]   ;;  %v225_v25 = vld [vmem:[%s2034_s13 + $0x178] sm:$0xff] }
  0x23   : > { %v1891_v29 = vld [vmem:[%s2255_s1 + $0x1a8] sm:$0xff]  }
  0x24   : > { %1635 = vmatpush3.bf16.msra.mxu0 %v1866_v30  ;;  %v1892_v30 = vld [vmem:[%s2255_s1 + $0x170] sm:$0xff]  }
  0x25   : > { %1687 = vmatpush3.bf16.msra.mxu1 %v1867_v31  ;;  %1724 = vmatprep.subr.bf16.mxu0 %v1868_v40  ;;  %v1478_v31 = vcombine.low %v210_v21, %v214_v22  ;;  %v220_v22 = vld [vmem:[%s2034_s13 + $0x150] sm:$0xff] }
  0x26   : > { %1776 = vmatprep.subr.bf16.mxu1 %v1870_v42  ;;  %v1896_v42 = vld [vmem:[%s2255_s1 + $0x178] sm:$0xff]  }
  0x27   : > { %1018 = vmatmul.mubr.bf16.vlgmr.msra.gmra.mrb[0].mxu0 %v1446_v35  ;;  %v218_v35 = vld [vmem:[%s2034_s13 + $0x140] sm:$0xff] }
  0x28   : > { %1099 = vmatmul.mubr.bf16.vlgmr.msra.gmra.mrb[0].mxu1 %v1448_v38  ;;  %1725 = vmatpush3.bf16.msra.mxu0 %v1869_v41  ;;  %v223_v38 = vld [vmem:[%s2034_s13 + $0x168] sm:$0xff]  ;;  %v1487_v39 = vcombine.high %v218_v35, %v222_v36  ;;  %v1895_v41 = vld [vmem:[%s2255_s1 + $0x1b0] sm:$0xff]   ;;  %v1486_v46 = vcombine.low %v218_v35, %v222_v36 }
  0x29   : > { %1777 = vmatpush3.bf16.msra.mxu1 %v1871_v43  ;;  %1726 = vmatprep.subr.bf16.mxu0 %v1872_v44  ;;  %v1489_v40 = vcombine.high %v219_v37, %v223_v38  ;;  %v1897_v43 = vld [vmem:[%s2255_s1 + $0x138] sm:$0xff]  }
  0x2a   : > { %1025 = vmatprep.mubr.bf16.mxu0 %v1455_v47  ;;  %1106 = vmatprep.mubr.bf16.mxu1 %v1457_v50  ;;  %v1898_v44 = vld [vmem:[%s2255_s1 + $0x1f8] sm:$0xff]   ;;  %v180_v47 = vld [vmem:[%s2034_s13 + $0x10] sm:$0xff]  ;;  %v1488_v50 = vcombine.low %v219_v37, %v223_v38 }
  0x2b   : > { %1778 = vmatprep.subr.bf16.mxu1 %v1874_v54  ;;  %v188_v54 = vld [vmem:[%s2034_s13 + $0x50] sm:$0xff] }
  0x2c   : > { %1727 = vmatpush3.bf16.msra.mxu0 %v1873_v51  ;;  %v1451_v51 = vcombine.high %v180_v47, %v184_v48 }
  0x2d   : > { %1779 = vmatpush3.bf16.msra.mxu1 %v1875_v55  ;;  %1728 = vmatprep.subr.bf16.mxu0 %v1876_v56  ;;  %v192_v55 = vld [vmem:[%s2034_s13 + $0x70] sm:$0xff]  ;;  %v189_v56 = vld [vmem:[%s2034_s13 + $0x58] sm:$0xff] }
  0x2e   : > { %1780 = vmatprep.subr.bf16.mxu1 %v1878_v58  ;;  %v1450_v58 = vcombine.low %v180_v47, %v184_v48  ;;  %v1459_v60 = vcombine.high %v188_v54, %v192_v55 }
  0x2f   : > { %1026 = vmatmul.mubr.bf16.gmra.mrb[4].mxu0 %v1454_v52  ;;  %v185_v52 = vld [vmem:[%s2034_s13 + $0x38] sm:$0xff] }
  0x30   : > { %1107 = vmatmul.mubr.bf16.gmra.mrb[4].mxu1 %v1456_v53  ;;  %1729 = vmatpush3.bf16.msra.mxu0 %v1877_v57  ;;  %v1453_v53 = vcombine.high %v181_v49, %v185_v52  ;;  %v193_v57 = vld [vmem:[%s2034_s13 + $0x78] sm:$0xff]  ;;  %v1452_v59 = vcombine.low %v181_v49, %v185_v52 }
  0x31   : > { %1033 = vmatprep.mubr.bf16.mxu0 %v1463_v63  ;;  %1114 = vmatprep.mubr.bf16.mxu1 %v1465_v0  ;;  %v1461_v61 = vcombine.high %v189_v56, %v193_v57  ;;  %v200_v63 = vld [vmem:[%s2034_s13 + $0xb0] sm:$0xff]  ;;  %v197_v0 = vld [vmem:[%s2034_s13 + $0x98] sm:$0xff] }
  0x32   : > { %1781 = vmatpush3.bf16.msra.mxu1 %v1879_v1  ;;  %1730 = vmatprep.subr.bf16.mxu0 %v1880_v3  ;;  %v201_v1 = vld [vmem:[%s2034_s13 + $0xb8] sm:$0xff]  ;;  %v1460_v3 = vcombine.low %v189_v56, %v193_v57  ;;  %v1466_v10 = vcombine.low %v196_v62, %v200_v63 }
  0x33   : > { %1782 = vmatprep.subr.bf16.mxu1 %v1882_v6  ;;  %v204_v6 = vld [vmem:[%s2034_s13 + $0xd0] sm:$0xff] }
  0x34   : > { %1731 = vmatpush3.bf16.msra.mxu0 %v1881_v5  ;;  %v1469_v5 = vcombine.high %v197_v0, %v201_v1 }
  0x35   : > { %1732 = vmatprep.subr.bf16.mxu0 %v1884_v14  ;;  %v212_v14 = vld [vmem:[%s2034_s13 + $0x110] sm:$0xff] }
  0x36   : > { %1783 = vmatpush3.bf16.msra.mxu1 %v1883_v7  ;;  %v208_v7 = vld [vmem:[%s2034_s13 + $0xf0] sm:$0xff] }
  0x37   : > { %1034 = vmatmul.mubr.bf16.gmra.mrb[8].mxu0 %v1462_v2  ;;  %1784 = vmatprep.subr.bf16.mxu1 %v1886_v17  ;;  %v1458_v2 = vcombine.low %v188_v54, %v192_v55  ;;  %v1475_v12 = vcombine.high %v204_v6, %v208_v7  ;;  %v217_v17 = vld [vmem:[%s2034_s13 + $0x138] sm:$0xff] }
  0x38   : > { %1115 = vmatmul.mubr.bf16.gmra.mrb[8].mxu1 %v1464_v4  ;;  %1041 = vmatprep.mubr.bf16.mxu0 %v1471_v11  ;;  %v1467_v4 = vcombine.high %v196_v62, %v200_v63  ;;  %v1468_v11 = vcombine.low %v197_v0, %v201_v1 }
  0x39   : > { %1122 = vmatprep.mubr.bf16.mxu1 %v1473_v13  ;;  %1733 = vmatpush3.bf16.msra.mxu0 %v1885_v15  ;;  %v1477_v13 = vcombine.high %v205_v8, %v209_v9  ;;  %v216_v15 = vld [vmem:[%s2034_s13 + $0x130] sm:$0xff] }
  0x3a   : > { %1785 = vmatpush3.bf16.msra.mxu1 %v1887_v19  ;;  %1734 = vmatprep.subr.bf16.mxu0 %v1888_v20  ;;  %v1476_v19 = vcombine.low %v205_v8, %v209_v9  ;;  %v1483_v20 = vcombine.high %v212_v14, %v216_v15 }
  0x3b   : > { %1786 = vmatprep.subr.bf16.mxu1 %v1890_v28 }
  0x3d   : > { %1735 = vmatpush3.bf16.msra.mxu0 %v1889_v27 }
  0x3e   : > { %1787 = vmatpush3.bf16.msra.mxu1 %v1891_v29  ;;  %1736 = vmatprep.subr.bf16.mxu0 %v1892_v30  ;;  %v1493_v29 = vcombine.high %v221_v24, %v225_v25 }
  0x3f   : > { %1042 = vmatmul.mubr.bf16.gmra.mrb[12].mxu0 %v1470_v16  ;;  %1788 = vmatprep.subr.bf16.mxu1 %v1894_v34  ;;  %v213_v16 = vld [vmem:[%s2034_s13 + $0x118] sm:$0xff]  ;;  %v2189_v34 = vld [vmem:[%s2256_s2] ss:$0 sm:$0xff] }
  0x40   : > { %1123 = vmatmul.mubr.bf16.gmra.mrb[12].mxu1 %v1472_v18  ;;  %1049 = vmatprep.mubr.bf16.mxu0 %v1479_v23  ;;  %v1474_v18 = vcombine.low %v204_v6, %v208_v7  ;;  %v1485_v21 = vcombine.high %v213_v16, %v217_v17  ;;  %v224_v23 = vld [vmem:[%s2034_s13 + $0x170] sm:$0xff]  ;;  %v1484_v27 = vcombine.low %v213_v16, %v217_v17  ;;  %s1444_s13 = sshll.u32 %s2259_s19, 2 }
  0x41   : > { %1130 = vmatprep.mubr.bf16.mxu1 %v1481_v26  ;;  %1737 = vmatpush3.bf16.msra.mxu0 %v1893_v32  ;;  %v1482_v26 = vcombine.low %v212_v14, %v216_v15  ;;  %v1491_v28 = vcombine.high %v220_v22, %v224_v23  ;;  %v1490_v30 = vcombine.low %v220_v22, %v224_v23  ;;  %s2233_s28 = scalar_lea.vmem %s2257_s3, %s1444_s13 }
  0x42   : > { %1789 = vmatpush3.bf16.msra.mxu1 %v1895_v41  ;;  %1738 = vmatprep.subr.bf16.mxu0 %v1896_v42 }
  0x43   : > { %1790 = vmatprep.subr.bf16.mxu1 %v1898_v44 }
  0x45   : > { %1739 = vmatpush3.bf16.msra.mxu0 %v1897_v43 }
  0x46   : > { %1791 = vmatpush3.bf16.msra.mxu1 %v1899_v45 }
  0x47   : > { %1050 = vmatmul.mubr.bf16.gmra.mrb[16].mxu0 %v1478_v31  ;;  %v1492_v31 = vcombine.low %v221_v24, %v225_v25 }
  0x48   : > { %1131 = vmatmul.mubr.bf16.gmra.mrb[16].mxu1 %v1480_v33  ;;  %1057 = vmatprep.mubr.bf16.mxu0 %v1487_v39 }
  0x49   : > { %1138 = vmatprep.mubr.bf16.mxu1 %v1489_v40 }
  0x4f   : > { %1058 = vmatmul.mubr.bf16.gmra.mrb[20].mxu0 %v1486_v46 }
  0x50   : > { %1139 = vmatmul.mubr.bf16.gmra.mrb[20].mxu1 %v1488_v50  ;;  %1179 = vmatprep.mubr.bf16.mxu0 %v1451_v51 }
  0x51   : > { %1260 = vmatprep.mubr.bf16.mxu1 %v1453_v53 }
  0x57   : > { %1180 = vmatmul.mubr.bf16.vlgmr.msra.gmra.mrb[24].mxu0 %v1450_v58 }
  0x58   : > { %1261 = vmatmul.mubr.bf16.vlgmr.msra.gmra.mrb[24].mxu1 %v1452_v59  ;;  %1187 = vmatprep.mubr.bf16.mxu0 %v1459_v60 }
  0x59   : > { %1268 = vmatprep.mubr.bf16.mxu1 %v1461_v61 }
  0x5f   : > { %1188 = vmatmul.mubr.bf16.gmra.mrb[28].mxu0 %v1458_v2 }
  0x60   : > { %1269 = vmatmul.mubr.bf16.gmra.mrb[28].mxu1 %v1460_v3  ;;  %1195 = vmatprep.mubr.bf16.mxu0 %v1467_v4 }
  0x61   : > { %1276 = vmatprep.mubr.bf16.mxu1 %v1469_v5 }
  0x67   : > { %1196 = vmatmul.mubr.bf16.gmra.mrb[32].mxu0 %v1466_v10 }
  0x68   : > { %1277 = vmatmul.mubr.bf16.gmra.mrb[32].mxu1 %v1468_v11  ;;  %1203 = vmatprep.mubr.bf16.mxu0 %v1475_v12 }
  0x69   : > { %1284 = vmatprep.mubr.bf16.mxu1 %v1477_v13 }
  0x6f   : > { %1204 = vmatmul.mubr.bf16.gmra.mrb[36].mxu0 %v1474_v18 }
  0x70   : > { %1285 = vmatmul.mubr.bf16.gmra.mrb[36].mxu1 %v1476_v19  ;;  %1211 = vmatprep.mubr.bf16.mxu0 %v1483_v20 }
  0x71   : > { %1292 = vmatprep.mubr.bf16.mxu1 %v1485_v21 }
  0x77   : > { %1212 = vmatmul.mubr.bf16.gmra.mrb[40].mxu0 %v1482_v26 }
  0x78   : > { %1293 = vmatmul.mubr.bf16.gmra.mrb[40].mxu1 %v1484_v27  ;;  %1219 = vmatprep.mubr.bf16.mxu0 %v1491_v28 }
  0x79   : > { %1300 = vmatprep.mubr.bf16.mxu1 %v1493_v29 }
  0x7f   : > { %1220 = vmatmul.mubr.bf16.gmra.mrb[44].mxu0 %v1490_v30 }
  0x80   : > { %1301 = vmatmul.mubr.bf16.gmra.mrb[44].mxu1 %v1492_v31 }
  0xfa   : > { %v1636_v32 = vpop.f32.mrb[0].mxu0 }
  0xfb   : > { %v1688_v33 = vpop.f32.mrb[0].mxu1  ;;  %v1637_v35 = vpop.f32.mrb[1].mxu0 }
  0xfc   : > { %v1638_v36 = vadd.f32 %v1637_v35, %v1636_v32  ;;  %v1689_v37 = vpop.f32.mrb[1].mxu1  ;;  %v1639_v38 = vpop.f32.mrb[2].mxu0 }
  0xfd   : > { %v1690_v39 = vadd.f32 %v1689_v37, %v1688_v33  ;;  %v1691_v40 = vpop.f32.mrb[2].mxu1  ;;  %v1640_v41 = vpop.f32.mrb[3].mxu0 }
  0xfe   : > { %v1020_v42 = vadd.f32 %v1638_v36, %v2189_v34  ;;  %v1641_v43 = vadd.f32 %v1640_v41, %v1639_v38  ;;  %v1692_v44 = vpop.f32.mrb[3].mxu1 }
  0xff   : > { %v1693_v45 = vadd.f32 %v1692_v44, %v1691_v40 }
 0x100   : > { %v2192_v46 = vadd.f32 %v1690_v39, %v1020_v42  ;;  %v1023_v47 = vadd.f32 %v1641_v43, %v2189_v34 }
 0x102   : > { %v2195_v48 = vadd.f32 %v1693_v45, %v1023_v47  ;;  %v1642_v49 = vpop.f32.mrb[4].mxu0 }
 0x103   : > { %v1694_v50 = vpop.f32.mrb[4].mxu1  ;;  %v1643_v51 = vpop.f32.mrb[5].mxu0 }
 0x104   : > { %v1644_v52 = vadd.f32 %v1643_v51, %v1642_v49  ;;  %v1695_v53 = vpop.f32.mrb[5].mxu1  ;;  %v1645_v54 = vpop.f32.mrb[6].mxu0 }
 0x105   : > { %v1696_v55 = vadd.f32 %v1695_v53, %v1694_v50  ;;  %v1697_v56 = vpop.f32.mrb[6].mxu1  ;;  %v1646_v57 = vpop.f32.mrb[7].mxu0 }
 0x106   : > { %v1028_v58 = vadd.f32 %v1644_v52, %v2189_v34  ;;  %v1647_v59 = vadd.f32 %v1646_v57, %v1645_v54  ;;  %v1698_v60 = vpop.f32.mrb[7].mxu1 }
 0x107   : > { %v1699_v61 = vadd.f32 %v1698_v60, %v1697_v56 }
 0x108   : > { %v2198_v62 = vadd.f32 %v1696_v55, %v1028_v58  ;;  %v1031_v63 = vadd.f32 %v1647_v59, %v2189_v34 }
 0x10a   : > { %v2201_v0 = vadd.f32 %v1699_v61, %v1031_v63  ;;  %v1648_v1 = vpop.f32.mrb[8].mxu0 }
 0x10b   : > { %v1700_v2 = vpop.f32.mrb[8].mxu1  ;;  %v1649_v3 = vpop.f32.mrb[9].mxu0 }
 0x10c   : > { %v1650_v4 = vadd.f32 %v1649_v3, %v1648_v1  ;;  %v1701_v5 = vpop.f32.mrb[9].mxu1  ;;  %v1651_v6 = vpop.f32.mrb[10].mxu0 }
 0x10d   : > { %v1702_v7 = vadd.f32 %v1701_v5, %v1700_v2  ;;  %v1703_v8 = vpop.f32.mrb[10].mxu1  ;;  %v1652_v9 = vpop.f32.mrb[11].mxu0 }
 0x10e   : > { %v1036_v10 = vadd.f32 %v1650_v4, %v2189_v34  ;;  %v1653_v11 = vadd.f32 %v1652_v9, %v1651_v6  ;;  %v1704_v12 = vpop.f32.mrb[11].mxu1 }
 0x10f   : > { %v1705_v13 = vadd.f32 %v1704_v12, %v1703_v8 }
 0x110   : > { %v2204_v14 = vadd.f32 %v1702_v7, %v1036_v10  ;;  %v1039_v15 = vadd.f32 %v1653_v11, %v2189_v34 }
 0x112   : > { %v2207_v16 = vadd.f32 %v1705_v13, %v1039_v15  ;;  %v1654_v17 = vpop.f32.mrb[12].mxu0 }
 0x113   : > { %v1706_v18 = vpop.f32.mrb[12].mxu1  ;;  %v1655_v19 = vpop.f32.mrb[13].mxu0 }
 0x114   : > { %v1656_v20 = vadd.f32 %v1655_v19, %v1654_v17  ;;  %v1707_v21 = vpop.f32.mrb[13].mxu1  ;;  %v1657_v22 = vpop.f32.mrb[14].mxu0 }
 0x115   : > { %v1708_v23 = vadd.f32 %v1707_v21, %v1706_v18  ;;  %v1709_v24 = vpop.f32.mrb[14].mxu1  ;;  %v1658_v25 = vpop.f32.mrb[15].mxu0 }
 0x116   : > { %v1044_v26 = vadd.f32 %v1656_v20, %v2189_v34  ;;  %v1659_v27 = vadd.f32 %v1658_v25, %v1657_v22  ;;  %v1710_v28 = vpop.f32.mrb[15].mxu1 }
 0x117   : > { %v1711_v29 = vadd.f32 %v1710_v28, %v1709_v24 }
 0x118   : > { %v2210_v30 = vadd.f32 %v1708_v23, %v1044_v26  ;;  %v1047_v31 = vadd.f32 %v1659_v27, %v2189_v34 }
 0x11a   : > { %v2213_v32 = vadd.f32 %v1711_v29, %v1047_v31  ;;  %v1660_v33 = vpop.f32.mrb[16].mxu0 }
 0x11b   : > { %v1712_v35 = vpop.f32.mrb[16].mxu1  ;;  %v1661_v36 = vpop.f32.mrb[17].mxu0 }
 0x11c   : > { %v1662_v37 = vadd.f32 %v1661_v36, %v1660_v33  ;;  %v1713_v38 = vpop.f32.mrb[17].mxu1  ;;  %v1663_v39 = vpop.f32.mrb[18].mxu0 }
 0x11d   : > { %v1714_v40 = vadd.f32 %v1713_v38, %v1712_v35  ;;  %v1715_v41 = vpop.f32.mrb[18].mxu1  ;;  %v1664_v42 = vpop.f32.mrb[19].mxu0 }
 0x11e   : > { %v1052_v43 = vadd.f32 %v1662_v37, %v2189_v34  ;;  %v1665_v44 = vadd.f32 %v1664_v42, %v1663_v39  ;;  %v1716_v45 = vpop.f32.mrb[19].mxu1 }
 0x11f   : > { %v1717_v47 = vadd.f32 %v1716_v45, %v1715_v41 }
 0x120   : > { %v2216_v49 = vadd.f32 %v1714_v40, %v1052_v43  ;;  %v1055_v50 = vadd.f32 %v1665_v44, %v2189_v34 }
 0x122   : > { %v2219_v51 = vadd.f32 %v1717_v47, %v1055_v50  ;;  %v1666_v52 = vpop.f32.mrb[20].mxu0 }
 0x123   : > { %v1718_v53 = vpop.f32.mrb[20].mxu1  ;;  %v1667_v54 = vpop.f32.mrb[21].mxu0 }
 0x124   : > { %v1668_v55 = vadd.f32 %v1667_v54, %v1666_v52  ;;  %v1719_v56 = vpop.f32.mrb[21].mxu1  ;;  %v1669_v57 = vpop.f32.mrb[22].mxu0 }
 0x125   : > { %v1720_v58 = vadd.f32 %v1719_v56, %v1718_v53  ;;  %v1721_v59 = vpop.f32.mrb[22].mxu1  ;;  %v1670_v60 = vpop.f32.mrb[23].mxu0 }
 0x126   : > { %v1060_v61 = vadd.f32 %v1668_v55, %v2189_v34  ;;  %v1671_v63 = vadd.f32 %v1670_v60, %v1669_v57  ;;  %v1722_v1 = vpop.f32.mrb[23].mxu1 }
 0x127   : > { %v1723_v2 = vadd.f32 %v1722_v1, %v1721_v59 }
 0x128   : > { %v2222_v3 = vadd.f32 %v1720_v58, %v1060_v61  ;;  %v1063_v4 = vadd.f32 %v1671_v63, %v2189_v34 }
 0x12a   : > { %v2225_v5 = vadd.f32 %v1723_v2, %v1063_v4  ;;  %v1740_v6 = vpop.f32.mrb[24].mxu0 }
 0x12b   : > { %v1792_v7 = vpop.f32.mrb[24].mxu1  ;;  %v1741_v8 = vpop.f32.mrb[25].mxu0 }
 0x12c   : > { %v1742_v9 = vadd.f32 %v1741_v8, %v1740_v6  ;;  %v1793_v10 = vpop.f32.mrb[25].mxu1  ;;  %v1743_v11 = vpop.f32.mrb[26].mxu0 }
 0x12d   : > { %v1794_v12 = vadd.f32 %v1793_v10, %v1792_v7  ;;  %v1795_v13 = vpop.f32.mrb[26].mxu1  ;;  %v1744_v15 = vpop.f32.mrb[27].mxu0 }
 0x12e   : > { %v1182_v17 = vadd.f32 %v1742_v9, %v2192_v46  ;;  %v1745_v18 = vadd.f32 %v1744_v15, %v1743_v11  ;;  %v1796_v19 = vpop.f32.mrb[27].mxu1 }
 0x12f   : > { %v1797_v20 = vadd.f32 %v1796_v19, %v1795_v13 }
 0x130   : > { %v1263_v21 = vadd.f32 %v1794_v12, %v1182_v17  ;;  %v1185_v34 = vadd.f32 %v1745_v18, %v2195_v48 }
 0x132   : > { %v1266_v22 = vadd.f32 %v1797_v20, %v1185_v34  ;;  %v1746_v23 = vpop.f32.mrb[28].mxu0  ;;  %v1309_v26 = vmax.f32 %v1263_v21, 0.0 }
 0x133   : > { %v1798_v24 = vpop.f32.mrb[28].mxu1  ;;  %v1747_v25 = vpop.f32.mrb[29].mxu0 }
 0x134   : > { %v1310_v27 = vmax.f32 %v1266_v22, 0.0  ;;  %v1748_v28 = vadd.f32 %v1747_v25, %v1746_v23  ;;  %v1799_v29 = vpop.f32.mrb[29].mxu1  ;;  %v1749_v31 = vpop.f32.mrb[30].mxu0 }
 0x135   : > { %v1800_v46 = vadd.f32 %v1799_v29, %v1798_v24  ;;  %v1801_v33 = vpop.f32.mrb[30].mxu1  ;;  %v1750_v35 = vpop.f32.mrb[31].mxu0 }
 0x136   : > { %v1588_v48 = vpack.c.bf16 %v1310_v27, %v1309_v26  ;;  %v1190_v36 = vadd.f32 %v1748_v28, %v2198_v62  ;;  %v1751_v37 = vadd.f32 %v1750_v35, %v1749_v31  ;;  %v1802_v38 = vpop.f32.mrb[31].mxu1 }
 0x137   : > { %v1803_v39 = vadd.f32 %v1802_v38, %v1801_v33 }
 0x138   : > { %1589 = vst [vmem:[%s2233_s28] sm:$0xff] %v1588_v48   ;;  %v1271_v40 = vadd.f32 %v1800_v46, %v1190_v36  ;;  %v1193_v41 = vadd.f32 %v1751_v37, %v2201_v0 }
 0x13a   : > { %v1274_v42 = vadd.f32 %v1803_v39, %v1193_v41  ;;  %v1752_v43 = vpop.f32.mrb[32].mxu0  ;;  %v1311_v47 = vmax.f32 %v1271_v40, 0.0 }
 0x13b   : > { %v1804_v44 = vpop.f32.mrb[32].mxu1  ;;  %v1753_v45 = vpop.f32.mrb[33].mxu0 }
 0x13c   : > { %v1312_v50 = vmax.f32 %v1274_v42, 0.0  ;;  %v1754_v52 = vadd.f32 %v1753_v45, %v1752_v43  ;;  %v1805_v53 = vpop.f32.mrb[33].mxu1  ;;  %v1755_v54 = vpop.f32.mrb[34].mxu0 }
 0x13d   : > { %v1806_v55 = vadd.f32 %v1805_v53, %v1804_v44  ;;  %v1807_v56 = vpop.f32.mrb[34].mxu1  ;;  %v1756_v62 = vpop.f32.mrb[35].mxu0 }
 0x13e   : > { %v1593_v57 = vpack.c.bf16 %v1312_v50, %v1311_v47  ;;  %v1198_v58 = vadd.f32 %v1754_v52, %v2204_v14  ;;  %v1757_v59 = vadd.f32 %v1756_v62, %v1755_v54  ;;  %v1808_v60 = vpop.f32.mrb[35].mxu1 }
 0x13f   : > { %v1809_v61 = vadd.f32 %v1808_v60, %v1807_v56 }
 0x140   : > { %1615 = vst [vmem:[%s2233_s28 + $0x8] sm:$0xff] %v1593_v57   ;;  %v1279_v0 = vadd.f32 %v1806_v55, %v1198_v58  ;;  %v1201_v63 = vadd.f32 %v1757_v59, %v2207_v16 }
 0x142   : > { %v1282_v1 = vadd.f32 %v1809_v61, %v1201_v63  ;;  %v1758_v2 = vpop.f32.mrb[36].mxu0  ;;  %v1313_v7 = vmax.f32 %v1279_v0, 0.0 }
 0x143   : > { %v1810_v4 = vpop.f32.mrb[36].mxu1  ;;  %v1759_v6 = vpop.f32.mrb[37].mxu0 }
 0x144   : > { %v1314_v8 = vmax.f32 %v1282_v1, 0.0  ;;  %v1760_v9 = vadd.f32 %v1759_v6, %v1758_v2  ;;  %v1811_v10 = vpop.f32.mrb[37].mxu1  ;;  %v1761_v11 = vpop.f32.mrb[38].mxu0 }
 0x145   : > { %v1812_v12 = vadd.f32 %v1811_v10, %v1810_v4  ;;  %v1813_v13 = vpop.f32.mrb[38].mxu1  ;;  %v1762_v14 = vpop.f32.mrb[39].mxu0 }
 0x146   : > { %v1598_v15 = vpack.c.bf16 %v1314_v8, %v1313_v7  ;;  %v1206_v17 = vadd.f32 %v1760_v9, %v2210_v30  ;;  %v1763_v18 = vadd.f32 %v1762_v14, %v1761_v11  ;;  %v1814_v19 = vpop.f32.mrb[39].mxu1 }
 0x147   : > { %v1815_v20 = vadd.f32 %v1814_v19, %v1813_v13 }
 0x148   : > { %1616 = vst [vmem:[%s2233_s28 + $0x10] sm:$0xff] %v1598_v15   ;;  %v1287_v16 = vadd.f32 %v1812_v12, %v1206_v17  ;;  %v1209_v21 = vadd.f32 %v1763_v18, %v2213_v32 }
 0x14a   : > { %v1290_v34 = vadd.f32 %v1815_v20, %v1209_v21  ;;  %v1764_v22 = vpop.f32.mrb[40].mxu0  ;;  %v1315_v25 = vmax.f32 %v1287_v16, 0.0 }
 0x14b   : > { %v1816_v23 = vpop.f32.mrb[40].mxu1  ;;  %v1765_v24 = vpop.f32.mrb[41].mxu0 }
 0x14c   : > { %v1316_v26 = vmax.f32 %v1290_v34, 0.0  ;;  %v1766_v27 = vadd.f32 %v1765_v24, %v1764_v22  ;;  %v1817_v28 = vpop.f32.mrb[41].mxu1  ;;  %v1767_v29 = vpop.f32.mrb[42].mxu0 }
 0x14d   : > { %v1818_v31 = vadd.f32 %v1817_v28, %v1816_v23  ;;  %v1819_v46 = vpop.f32.mrb[42].mxu1  ;;  %v1768_v30 = vpop.f32.mrb[43].mxu0 }
 0x14e   : > { %v1603_v33 = vpack.c.bf16 %v1316_v26, %v1315_v25  ;;  %v1214_v35 = vadd.f32 %v1766_v27, %v2216_v49  ;;  %v1769_v48 = vadd.f32 %v1768_v30, %v1767_v29  ;;  %v1820_v36 = vpop.f32.mrb[43].mxu1 }
 0x14f   : > { %v1821_v37 = vadd.f32 %v1820_v36, %v1819_v46 }
 0x150   : > { %1617 = vst [vmem:[%s2233_s28 + $0x18] sm:$0xff] %v1603_v33   ;;  %v1295_v32 = vadd.f32 %v1818_v31, %v1214_v35  ;;  %v1217_v38 = vadd.f32 %v1769_v48, %v2219_v51 }
 0x152   : > { %v1298_v39 = vadd.f32 %v1821_v37, %v1217_v38  ;;  %v1770_v40 = vpop.f32.mrb[44].mxu0  ;;  %v1317_v43 = vmax.f32 %v1295_v32, 0.0 }
 0x153   : > { %v1822_v41 = vpop.f32.mrb[44].mxu1  ;;  %v1771_v42 = vpop.f32.mrb[45].mxu0 }
 0x154   : > { %v1318_v44 = vmax.f32 %v1298_v39, 0.0  ;;  %v1772_v45 = vadd.f32 %v1771_v42, %v1770_v40  ;;  %v1823_v47 = vpop.f32.mrb[45].mxu1  ;;  %v1773_v50 = vpop.f32.mrb[46].mxu0 }
 0x155   : > { %v1824_v52 = vadd.f32 %v1823_v47, %v1822_v41  ;;  %v1825_v49 = vpop.f32.mrb[46].mxu1  ;;  %v1774_v53 = vpop.f32.mrb[47].mxu0 }
 0x156   : > { %v1608_v54 = vpack.c.bf16 %v1318_v44, %v1317_v43  ;;  %v1222_v55 = vadd.f32 %v1772_v45, %v2222_v3  ;;  %v1775_v56 = vadd.f32 %v1774_v53, %v1773_v50  ;;  %v1826_v62 = vpop.f32.mrb[47].mxu1 }
 0x157   : > { %v1827_v51 = vadd.f32 %v1826_v62, %v1825_v49 }
 0x158   : > { %1618 = vst [vmem:[%s2233_s28 + $0x20] sm:$0xff] %v1608_v54   ;;  %v1303_v57 = vadd.f32 %v1824_v52, %v1222_v55  ;;  %v1225_v58 = vadd.f32 %v1775_v56, %v2225_v5 }
 0x15a   : > { %v1306_v59 = vadd.f32 %v1827_v51, %v1225_v58  ;;  %v1319_v60 = vmax.f32 %v1303_v57, 0.0 }
 0x15c   : > { %v1320_v61 = vmax.f32 %v1306_v59, 0.0 }
 0x15e   : > { %v1613_v0 = vpack.c.bf16 %v1320_v61, %v1319_v60 }
 0x160   : > { %1619 = vst [vmem:[%s2233_s28 + $0x28] sm:$0xff] %v1613_v0  }
 0x161 PF: > { %s13_s12 = sadd.s32 1, %s1906_s12  }
 0x162   : > { %p10_p4 = scmp.ge.s32.totalorder %s13_s12, 4  }
 0x164   :  { %12 = sbr.rel (!%p10_p4) target bundleno = 1 (0x1), region = 62 }

// kernel: duelling_dqn_forward.6
= control target key start
LH: loop header
LB: loop body
LE: loop exit
PB: predicated region body
PF: predicated region fallthrough
CT: control target
= control target key end

     0   :  { %s1233_s12 = smov 0   ;;  %s1389_s0 = inlined_call_operand.vmem [shape: bf16[128,576], index: 0, kind: input, shape index: {}]   ;;  %s1390_s1 = inlined_call_operand.vmem [shape: bf16[576,128], index: 1, kind: input, shape index: {}]   ;;  %s1391_s2 = inlined_call_operand.vmem [shape: f32[1,128], index: 2, kind: input, shape index: {}]   ;;  %s1392_s3 = inlined_call_operand.vmem [shape: bf16[128,128], index: 3, kind: output, shape index: {}]  }
   0x1 LB: > { %s909_s13 = sadd.s32 4294967295, %s1211_s12   ;;  %p913_p0 = scmp.ge.s32.totalorder %s1211_s12, 1  ;;  %s1211_s12 = sphi %s1233_s12, %s13_s12  }
   0x2   : > { %p139_p1 = scmp.lt.s32.totalorder %s1211_s12, 3 }
   0x4   : > { %p140_p2 = pnand %p913_p0, %p139_p1 }
   0x5   : > { %v1141_v0 = vld [vmem:[%s1390_s1 + $0x40] sm:$0xff] (!%p140_p2)   ;;  %v1145_v4 = vld [vmem:[%s1390_s1 + $0x48] sm:$0xff] (!%p140_p2)   ;;  %v1149_v8 = vld [vmem:[%s1390_s1 + $0x50] sm:$0xff] (!%p140_p2)   ;;  %s914_s19 = sshll.u32 (!%p140_p2), %s909_s13, 3  ;;  %vm597_vm0 = vcmask (!%p140_p2), 523264  }
   0x6   : > { %143 = sbr.rel (%p140_p2) target bundleno = 294 (0x126), region = 32  ;;  %v1142_v1 = vld [vmem:[%s1390_s1 + $0xc0] sm:$0xff] (!%p140_p2)   ;;  %1020 = vmatprep.subr.bf16.mxu0 (!%p140_p2), %v1141_v0  ;;  %v1146_v5 = vld [vmem:[%s1390_s1 + $0xc8] sm:$0xff] (!%p140_p2)   ;;  %v1150_v9 = vld [vmem:[%s1390_s1 + $0xd0] sm:$0xff] (!%p140_p2)   ;;  %p165_p3 = scmp.lt.s32.totalorder (!%p140_p2), %s914_s19, 15 }
   0x7   : > { %v1143_v2 = vld [vmem:[%s1390_s1] sm:$0xff] (!%p140_p2)   ;;  %1060 = vmatprep.subr.bf16.mxu1 (!%p140_p2), %v1142_v1  ;;  %v1147_v6 = vld [vmem:[%s1390_s1 + $0x8] sm:$0xff] (!%p140_p2)   ;;  %v1151_v10 = vld [vmem:[%s1390_s1 + $0x10] sm:$0xff] (!%p140_p2)  }
   0x8   : > { %v1144_v3 = vld [vmem:[%s1390_s1 + $0x80] sm:$0xff] (!%p140_p2)   ;;  %1021 = vmatpush3.bf16.msra.mxu0 (!%p140_p2), %v1143_v2  ;;  %v1148_v7 = vld [vmem:[%s1390_s1 + $0x88] sm:$0xff] (!%p140_p2)   ;;  %v1152_v11 = vld [vmem:[%s1390_s1 + $0x90] sm:$0xff] (!%p140_p2)  }
   0x9   : > { %1061 = vmatpush3.bf16.msra.mxu1 (!%p140_p2), %v1144_v3  ;;  %1022 = vmatprep.subr.bf16.mxu0 (!%p140_p2), %v1145_v4  ;;  %v1153_v12 = vld [vmem:[%s1390_s1 + $0x58] sm:$0xff] (!%p140_p2)   ;;  %v1157_v16 = vld [vmem:[%s1390_s1 + $0x60] sm:$0xff] (!%p140_p2)   ;;  %v1161_v20 = vld [vmem:[%s1390_s1 + $0x68] sm:$0xff] (!%p140_p2)  }
   0xa   : > { %1062 = vmatprep.subr.bf16.mxu1 (!%p140_p2), %v1146_v5  ;;  %v1154_v13 = vld [vmem:[%s1390_s1 + $0xd8] sm:$0xff] (!%p140_p2)   ;;  %v1158_v17 = vld [vmem:[%s1390_s1 + $0xe0] sm:$0xff] (!%p140_p2)   ;;  %v1162_v21 = vld [vmem:[%s1390_s1 + $0xe8] sm:$0xff] (!%p140_p2)  }
   0xb   : > { %v1155_v14 = vld [vmem:[%s1390_s1 + $0x18] sm:$0xff] (!%p140_p2)   ;;  %v1159_v18 = vld [vmem:[%s1390_s1 + $0x20] sm:$0xff] (!%p140_p2)   ;;  %v1163_v22 = vld [vmem:[%s1390_s1 + $0x28] sm:$0xff] (!%p140_p2)  }
   0xc   : > { %1023 = vmatpush3.bf16.msra.mxu0 (!%p140_p2), %v1147_v6  ;;  %v1156_v15 = vld [vmem:[%s1390_s1 + $0x98] sm:$0xff] (!%p140_p2)   ;;  %v1160_v19 = vld [vmem:[%s1390_s1 + $0xa0] sm:$0xff] (!%p140_p2)   ;;  %v1164_v23 = vld [vmem:[%s1390_s1 + $0xa8] sm:$0xff] (!%p140_p2)  }
   0xd   : > { %1063 = vmatpush3.bf16.msra.mxu1 %v1148_v7  ;;  %1024 = vmatprep.subr.bf16.mxu0 %v1149_v8  ;;  %s1394_s19 = smov (!%p165_p3, %s914_s19), 15  ;;  %v1165_v24 = vld [vmem:[%s1390_s1 + $0x70] sm:$0xff]   ;;  %v1169_v28 = vld [vmem:[%s1390_s1 + $0x78] sm:$0xff]   ;;  %v1179_v36 = vld [vmem:[%s1390_s1 + $0x100] sm:$0xff]  }
   0xe   : > { %1064 = vmatprep.subr.bf16.mxu1 %v1150_v9  ;;  %v1166_v25 = vld [vmem:[%s1390_s1 + $0xf0] sm:$0xff]   ;;  %s1132_s16 = smul.u32 20, %s1394_s19  ;;  %v1170_v29 = vld [vmem:[%s1390_s1 + $0xf8] sm:$0xff]   ;;  %v1186_v39 = vld [vmem:[%s1390_s1 + $0x108] sm:$0xff]   ;;  %s917_s17 = sshll.u32 %s1394_s19, 2 }
   0xf   : > { %v1167_v26 = vld [vmem:[%s1390_s1 + $0x30] sm:$0xff]   ;;  %v1171_v30 = vld [vmem:[%s1390_s1 + $0x38] sm:$0xff]   ;;  %v918_v58 = vld [vmem:[%s1391_s2] ss:$0 sm:$0xff]  ;;  %s175_s21 = scalar_lea.vmem %s1392_s3, %s917_s17 }
  0x10   : > { %1025 = vmatpush3.bf16.msra.mxu0 %v1151_v10  ;;  %v1168_v27 = vld [vmem:[%s1390_s1 + $0xb0] sm:$0xff]   ;;  %s1339_s13 = scalar_lea.vmem %s1389_s0, %s1132_s16  ;;  %v1172_v31 = vld [vmem:[%s1390_s1 + $0xb8] sm:$0xff]  }
  0x11   : > { %1065 = vmatpush3.bf16.msra.mxu1 %v1152_v11  ;;  %1026 = vmatprep.subr.bf16.mxu0 %v1153_v12  ;;  %v1173_v32 = vld [vmem:[%s1339_s13] ss:$20 sps:$4 sm:$0xff]   ;;  %v1175_v33 = vld [vmem:[%s1339_s13 + $0x4] ss:$20 sps:$4 sm:$0xff]   ;;  %v1176_v34 = vld [vmem:[%s1339_s13 + $0x8] ss:$20 sps:$4 sm:$0xff]  }
  0x12   : > { %1066 = vmatprep.subr.bf16.mxu1 %v1154_v13  ;;  %v1178_v35 = vld [vmem:[%s1339_s13 + $0xc] ss:$20 sps:$4 sm:$0xff]   ;;  %642 = vmatprep.mubr.bf16.mxu0 %v1175_v33  ;;  %v1182_v38 = vld [vmem:[%s1339_s13 + $0x34] ss:$20 sps:$4 sm:$0xff]   ;;  %v1185_v41 = vld [vmem:[%s1339_s13 + $0x30] ss:$20 sps:$4 sm:$0xff]  }
  0x13   : > { %707 = vmatprep.mubr.bf16.mxu1 %v1178_v35  ;;  %v1180_v37 = vld [vmem:[%s1339_s13 + $0x2c] ss:$20 sps:$4 sm:$0xff]   ;;  %v1184_v40 = vld [vmem:[%s1339_s13 + $0x28] ss:$20 sps:$4 sm:$0xff]   ;;  %v1193_v44 = vld [vmem:[%s1390_s1 + $0x110] sm:$0xff]  }
  0x14   : > { %1027 = vmatpush3.bf16.msra.mxu0 %v1155_v14  ;;  %v1187_v42 = vld [vmem:[%s1339_s13 + $0x54] ss:$20 sps:$4 sm:$0xff]   ;;  %v1189_v43 = vld [vmem:[%s1339_s13 + $0x5c] ss:$20 sps:$4 sm:$0xff]   ;;  %v1192_v47 = vld [vmem:[%s1339_s13 + $0x58] ss:$20 sps:$4 sm:$0xff]  }
  0x15   : > { %1067 = vmatpush3.bf16.msra.mxu1 %v1156_v15  ;;  %1028 = vmatprep.subr.bf16.mxu0 %v1157_v16  ;;  %v1200_v45 = vld [vmem:[%s1390_s1 + $0x118] sm:$0xff]   ;;  %v1191_v46 = vld [vmem:[%s1339_s13 + $0x50] ss:$20 sps:$4 sm:$0xff]   ;;  %v1199_v51 = vld [vmem:[%s1339_s13 + $0x80] ss:$20 sps:$4 sm:$0xff]  }
  0x16   : > { %1068 = vmatprep.subr.bf16.mxu1 %v1158_v17  ;;  %v1194_v48 = vld [vmem:[%s1339_s13 + $0x7c] ss:$20 sps:$4 sm:$0xff]   ;;  %v1196_v49 = vld [vmem:[%s1339_s13 + $0x84] ss:$20 sps:$4 sm:$0xff]   ;;  %v1202_v53 = vld [vmem:[%s1339_s13 + $0x60] ss:$20 sps:$4 sm:$0xff]  }
  0x17   : > { %v1198_v50 = vld [vmem:[%s1339_s13 + $0x78] ss:$20 sps:$4 sm:$0xff]   ;;  %v1201_v52 = vld [vmem:[%s1339_s13 + $0x10] ss:$20 sps:$4 sm:$0xff]   ;;  %v1204_v55 = vld [vmem:[%s1339_s13 + $0x88] ss:$20 sps:$4 sm:$0xff]  }
  0x18   : > { %1029 = vmatpush3.bf16.msra.mxu0 %v1159_v18  ;;  %v1203_v54 = vld [vmem:[%s1339_s13 + $0x38] ss:$20 sps:$4 sm:$0xff]  }
  0x19   : > { %1069 = vmatpush3.bf16.msra.mxu1 %v1160_v19  ;;  %1030 = vmatprep.subr.bf16.mxu0 %v1161_v20 }
  0x1a   : > { %1070 = vmatprep.subr.bf16.mxu1 %v1162_v21 }
  0x1c   : > { %1031 = vmatpush3.bf16.msra.mxu0 %v1163_v22 }
  0x1d   : > { %1071 = vmatpush3.bf16.msra.mxu1 %v1164_v23  ;;  %1032 = vmatprep.subr.bf16.mxu0 %v1165_v24 }
  0x1e   : > { %1072 = vmatprep.subr.bf16.mxu1 %v1166_v25 }
  0x20   : > { %1033 = vmatpush3.bf16.msra.mxu0 %v1167_v26 }
  0x21   : > { %1073 = vmatpush3.bf16.msra.mxu1 %v1168_v27  ;;  %1034 = vmatprep.subr.bf16.mxu0 %v1169_v28 }
  0x22   : > { %1074 = vmatprep.subr.bf16.mxu1 %v1170_v29 }
  0x24   : > { %1035 = vmatpush3.bf16.msra.mxu0 %v1171_v30 }
  0x25   : > { %1075 = vmatpush3.bf16.msra.mxu1 %v1172_v31  ;;  %1108 = vmatprep.subr.bf16.mxu0 %v1179_v36 }
  0x26   : > { %1124 = vmatprep.subr.bf16.mxu1 %v1179_v36 }
  0x27   : > { %643 = vmatmul.mubr.bf16.vlgmr.msra.gmra.mrb[0].mxu0 %v1173_v32 }
  0x28   : > { %708 = vmatmul.mubr.bf16.vlgmr.msra.gmra.mrb[0].mxu1 %v1176_v34  ;;  %1109 = vmatpush3.bf16.msra.mxu0 %v1179_v36 }
  0x29   : > { %1128 = vmatpush3.bf16.msra.mxu1 %v1179_v36  ;;  %650 = vmatprep.mubr.bf16.mxu0 %v1180_v37 }
  0x2a   : > { %715 = vmatprep.mubr.bf16.mxu1 %v1182_v38  ;;  %1110 = vmatprep.subr.bf16.mxu0 %v1186_v39 }
  0x2b   : > { %1125 = vmatprep.subr.bf16.mxu1 %v1186_v39 }
  0x2c   : > { %1111 = vmatpush3.bf16.msra.mxu0 %v1186_v39 }
  0x2d   : > { %1129 = vmatpush3.bf16.msra.mxu1 %v1186_v39  ;;  %1112 = vmatprep.subr.bf16.mxu0 %v1193_v44 }
  0x2e   : > { %1126 = vmatprep.subr.bf16.mxu1 %v1193_v44 }
  0x2f   : > { %651 = vmatmul.mubr.bf16.gmra.mrb[4].mxu0 %v1184_v40 }
  0x30   : > { %716 = vmatmul.mubr.bf16.gmra.mrb[4].mxu1 %v1185_v41  ;;  %658 = vmatprep.mubr.bf16.mxu0 %v1187_v42 }
  0x31   : > { %723 = vmatprep.mubr.bf16.mxu1 %v1189_v43  ;;  %1113 = vmatpush3.bf16.msra.mxu0 %v1193_v44 }
  0x32   : > { %1130 = vmatpush3.bf16.msra.mxu1 %v1193_v44  ;;  %1114 = vmatprep.subr.bf16.mxu0 %v1200_v45 }
  0x33   : > { %1127 = vmatprep.subr.bf16.mxu1 %v1200_v45 }
  0x35   : > { %1115 = vmatpush3.bf16.msra.mxu0 %v1200_v45 }
  0x36   : > { %1131 = vmatpush3.bf16.msra.mxu1 %v1200_v45 }
  0x37   : > { %659 = vmatmul.mubr.bf16.gmra.mrb[8].mxu0 %v1191_v46 }
  0x38   : > { %724 = vmatmul.mubr.bf16.gmra.mrb[8].mxu1 %v1192_v47  ;;  %666 = vmatprep.mubr.bf16.mxu0 %v1194_v48 }
  0x39   : > { %731 = vmatprep.mubr.bf16.mxu1 %v1196_v49 }
  0x3f   : > { %667 = vmatmul.mubr.bf16.gmra.mrb[12].mxu0 %v1198_v50 }
  0x40   : > { %732 = vmatmul.mubr.bf16.gmra.mrb[12].mxu1 %v1199_v51  ;;  %1116 = vmatprep.mubr.msk.bf16.mxu0 %vm597_vm0, %v1201_v52 }
  0x41   : > { %1120 = vmatprep.mubr.msk.bf16.mxu1 %vm597_vm0, %v1202_v53 }
  0x47   : > { %1117 = vmatmul.mubr.msk.bf16.vlgmr.msra.gmra.mrb[16].mxu0 %vm597_vm0, %v1203_v54 }
  0x48   : > { %1121 = vmatmul.mubr.msk.bf16.vlgmr.msra.gmra.mrb[16].mxu1 %vm597_vm0, %v1204_v55 }
  0xfa   : > { %v1036_v56 = vpop.f32.mrb[0].mxu0 }
  0xfb   : > { %v1076_v57 = vpop.f32.mrb[0].mxu1  ;;  %v1037_v59 = vpop.f32.mrb[1].mxu0 }
  0xfc   : > { %v1038_v60 = vadd.f32 %v1037_v59, %v1036_v56  ;;  %v1077_v61 = vpop.f32.mrb[1].mxu1  ;;  %v1039_v62 = vpop.f32.mrb[2].mxu0 }
  0xfd   : > { %v1078_v63 = vadd.f32 %v1077_v61, %v1076_v57  ;;  %v1079_v0 = vpop.f32.mrb[2].mxu1  ;;  %v1040_v1 = vpop.f32.mrb[3].mxu0 }
  0xfe   : > { %v645_v2 = vadd.f32 %v1038_v60, %v918_v58  ;;  %v1041_v3 = vadd.f32 %v1040_v1, %v1039_v62  ;;  %v1080_v4 = vpop.f32.mrb[3].mxu1 }
  0xff   : > { %v1081_v5 = vadd.f32 %v1080_v4, %v1079_v0 }
 0x100   : > { %v648_v6 = vadd.f32 %v1041_v3, %v918_v58  ;;  %v710_v7 = vadd.f32 %v1078_v63, %v645_v2 }
 0x102   : > { %v1042_v8 = vpop.f32.mrb[4].mxu0  ;;  %v713_v9 = vadd.f32 %v1081_v5, %v648_v6 }
 0x103   : > { %v1082_v10 = vpop.f32.mrb[4].mxu1  ;;  %v1043_v11 = vpop.f32.mrb[5].mxu0 }
 0x104   : > { %v1044_v12 = vadd.f32 %v1043_v11, %v1042_v8  ;;  %v1083_v13 = vpop.f32.mrb[5].mxu1  ;;  %v1045_v14 = vpop.f32.mrb[6].mxu0 }
 0x105   : > { %v1084_v15 = vadd.f32 %v1083_v13, %v1082_v10  ;;  %v1085_v16 = vpop.f32.mrb[6].mxu1  ;;  %v1046_v17 = vpop.f32.mrb[7].mxu0 }
 0x106   : > { %v653_v18 = vadd.f32 %v1044_v12, %v918_v58  ;;  %v1047_v19 = vadd.f32 %v1046_v17, %v1045_v14  ;;  %v1086_v20 = vpop.f32.mrb[7].mxu1 }
 0x107   : > { %v1087_v21 = vadd.f32 %v1086_v20, %v1085_v16 }
 0x108   : > { %v656_v22 = vadd.f32 %v1047_v19, %v918_v58  ;;  %v718_v23 = vadd.f32 %v1084_v15, %v653_v18 }
 0x10a   : > { %v1048_v24 = vpop.f32.mrb[8].mxu0  ;;  %v721_v25 = vadd.f32 %v1087_v21, %v656_v22 }
 0x10b   : > { %v1088_v26 = vpop.f32.mrb[8].mxu1  ;;  %v1049_v27 = vpop.f32.mrb[9].mxu0 }
 0x10c   : > { %v1050_v28 = vadd.f32 %v1049_v27, %v1048_v24  ;;  %v1089_v29 = vpop.f32.mrb[9].mxu1  ;;  %v1051_v30 = vpop.f32.mrb[10].mxu0 }
 0x10d   : > { %v1090_v31 = vadd.f32 %v1089_v29, %v1088_v26  ;;  %v1091_v32 = vpop.f32.mrb[10].mxu1  ;;  %v1052_v33 = vpop.f32.mrb[11].mxu0 }
 0x10e   : > { %v661_v34 = vadd.f32 %v1050_v28, %v918_v58  ;;  %v1053_v35 = vadd.f32 %v1052_v33, %v1051_v30  ;;  %v1092_v36 = vpop.f32.mrb[11].mxu1 }
 0x10f   : > { %v1093_v37 = vadd.f32 %v1092_v36, %v1091_v32 }
 0x110   : > { %v664_v38 = vadd.f32 %v1053_v35, %v918_v58  ;;  %v726_v39 = vadd.f32 %v1090_v31, %v661_v34 }
 0x112   : > { %v1054_v40 = vpop.f32.mrb[12].mxu0  ;;  %v729_v41 = vadd.f32 %v1093_v37, %v664_v38 }
 0x113   : > { %v1094_v42 = vpop.f32.mrb[12].mxu1  ;;  %v1055_v43 = vpop.f32.mrb[13].mxu0 }
 0x114   : > { %v1056_v44 = vadd.f32 %v1055_v43, %v1054_v40  ;;  %v1095_v45 = vpop.f32.mrb[13].mxu1  ;;  %v1057_v46 = vpop.f32.mrb[14].mxu0 }
 0x115   : > { %v1096_v47 = vadd.f32 %v1095_v45, %v1094_v42  ;;  %v1097_v48 = vpop.f32.mrb[14].mxu1  ;;  %v1058_v49 = vpop.f32.mrb[15].mxu0 }
 0x116   : > { %v669_v50 = vadd.f32 %v1056_v44, %v918_v58  ;;  %v1059_v51 = vadd.f32 %v1058_v49, %v1057_v46  ;;  %v1098_v52 = vpop.f32.mrb[15].mxu1 }
 0x117   : > { %v1099_v53 = vadd.f32 %v1098_v52, %v1097_v48 }
 0x118   : > { %v672_v54 = vadd.f32 %v1059_v51, %v918_v58  ;;  %v734_v55 = vadd.f32 %v1096_v47, %v669_v50 }
 0x11a   : > { %v1118_v56 = vpop.f32.mrb[16].mxu0  ;;  %v737_v57 = vadd.f32 %v1099_v53, %v672_v54 }
 0x11b   : > { %v783_v59 = vadd.f32 %v1118_v56, %v718_v23  ;;  %v1122_v60 = vpop.f32.mrb[16].mxu1  ;;  %v774_v61 = vpop.f32.mrb[17].mxu0 }
 0x11c   : > { %v799_v62 = vadd.f32 %v1122_v60, %v734_v55  ;;  %v775_v63 = vadd.f32 %v774_v61, %v710_v7  ;;  %v790_v0 = vpop.f32.mrb[17].mxu1  ;;  %v1119_v1 = vpop.f32.mrb[18].mxu0 }
 0x11d   : > { %v791_v2 = vadd.f32 %v790_v0, %v726_v39  ;;  %v786_v3 = vadd.f32 %v1119_v1, %v721_v25  ;;  %v1123_v4 = vpop.f32.mrb[18].mxu1  ;;  %v777_v5 = vpop.f32.mrb[19].mxu0  ;;  %v807_v11 = vmax.f32 %v783_v59, 0.0 }
 0x11e   : > { %v802_v6 = vadd.f32 %v1123_v4, %v737_v57  ;;  %v778_v8 = vadd.f32 %v777_v5, %v713_v9  ;;  %v793_v10 = vpop.f32.mrb[19].mxu1  ;;  %v811_v13 = vmax.f32 %v799_v62, 0.0  ;;  %v805_v14 = vmax.f32 %v775_v63, 0.0 }
 0x11f   : > { %v808_v58 = vmax.f32 %v786_v3, 0.0  ;;  %v794_v12 = vadd.f32 %v793_v10, %v729_v41  ;;  %v809_v16 = vmax.f32 %v791_v2, 0.0 }
 0x120   : > { %v812_v7 = vmax.f32 %v802_v6, 0.0  ;;  %v806_v15 = vmax.f32 %v778_v8, 0.0 }
 0x121   : > { %v1005_v17 = vpack.c.bf16 %v808_v58, %v807_v11  ;;  %v810_v18 = vmax.f32 %v794_v12, 0.0 }
 0x122   : > { %v1015_v19 = vpack.c.bf16 %v812_v7, %v811_v13  ;;  %v1000_v20 = vpack.c.bf16 %v806_v15, %v805_v14 }
 0x123   : > { %1017 = vst [vmem:[%s175_s21 + $0x8] sm:$0xff] %v1005_v17   ;;  %v1010_v21 = vpack.c.bf16 %v810_v18, %v809_v16 }
 0x124   : > { %1019 = vst [vmem:[%s175_s21 + $0x18] sm:$0xff] %v1015_v19   ;;  %1001 = vst [vmem:[%s175_s21] sm:$0xff] %v1000_v20  }
 0x125   : > { %1018 = vst [vmem:[%s175_s21 + $0x10] sm:$0xff] %v1010_v21  }
 0x126 PF: > { %s13_s12 = sadd.s32 1, %s1211_s12  }
 0x127   : > { %p10_p4 = scmp.ge.s32.totalorder %s13_s12, 4  }
 0x129   :  { %12 = sbr.rel (!%p10_p4) target bundleno = 1 (0x1), region = 62 }

// kernel: duelling_dqn_forward.7
= control target key start
LH: loop header
LB: loop body
LE: loop exit
PB: predicated region body
PF: predicated region fallthrough
CT: control target
= control target key end

     0   :  { %s20161_s1 = inlined_call_operand.vmem [shape: bf16[3200,1024], index: 1, kind: input, shape index: {}]   ;;  %s20162_s0 = inlined_call_operand.vmem [shape: bf16[16,3200], index: 0, kind: input, shape index: {}]   ;;  %s20163_s2 = inlined_call_operand.vmem [shape: f32[1,1024], index: 2, kind: input, shape index: {}]   ;;  %s20164_s3 = inlined_call_operand.vmem [shape: bf16[1024,128], index: 3, kind: input, shape index: {}]   ;;  %s20165_s4 = inlined_call_operand.vmem [shape: f32[1,128], index: 4, kind: input, shape index: {}]   ;;  %s20166_s5 = inlined_call_operand.vmem [shape: f32[16,128], index: 5, kind: output, shape index: {0}]   ;;  %s20167_s6 = inlined_call_operand.vmem [shape: f32[16,128], index: 6, kind: output, shape index: {1}]  }
   0x1   :  { %v49_v0 = vld [vmem:[%s20161_s1] sm:$0xff]  ;;  %v50_v2 = vld [vmem:[%s20161_s1 + $0x8] sm:$0xff] }
   0x2   :  { %v53_v1 = vld [vmem:[%s20161_s1 + $0x20] sm:$0xff]  ;;  %v54_v4 = vld [vmem:[%s20161_s1 + $0x28] sm:$0xff] }
   0x3   :  { %v12839_v3 = vcombine.high %v49_v0, %v53_v1  ;;  %v12838_v5 = vcombine.low %v49_v0, %v53_v1  ;;  %v57_v6 = vld [vmem:[%s20161_s1 + $0x40] sm:$0xff]  ;;  %v12841_v8 = vcombine.high %v50_v2, %v54_v4  ;;  %v12840_v9 = vcombine.low %v50_v2, %v54_v4  ;;  %v58_v11 = vld [vmem:[%s20161_s1 + $0x48] sm:$0xff] }
   0x4   :  { %v61_v7 = vld [vmem:[%s20161_s1 + $0x60] sm:$0xff]  ;;  %v62_v12 = vld [vmem:[%s20161_s1 + $0x68] sm:$0xff] }
   0x5   :  { %v12847_v10 = vcombine.high %v57_v6, %v61_v7  ;;  %v65_v13 = vld [vmem:[%s20161_s1 + $0x80] sm:$0xff]  ;;  %9817 = vmatprep.subr.bf16.mxu0 %v12839_v3  ;;  %v12849_v14 = vcombine.high %v58_v11, %v62_v12  ;;  %v66_v16 = vld [vmem:[%s20161_s1 + $0x88] sm:$0xff]  ;;  %10376 = vmatprep.subr.bf16.mxu1 %v12841_v8  ;;  %v12846_v18 = vcombine.low %v57_v6, %v61_v7 }
   0x6   :  { %v69_v15 = vld [vmem:[%s20161_s1 + $0xa0] sm:$0xff]  ;;  %v70_v17 = vld [vmem:[%s20161_s1 + $0xa8] sm:$0xff]  ;;  %9818 = vmatpush1.bf16.msra.mxu0 %v12838_v5  ;;  %10377 = vmatpush1.bf16.msra.mxu1 %v12840_v9  ;;  %v12848_v19 = vcombine.low %v58_v11, %v62_v12 }
   0x7   :  { %9819 = vmatprep.subr.bf16.mxu0 %v12847_v10  ;;  %v12855_v20 = vcombine.high %v65_v13, %v69_v15  ;;  %10378 = vmatprep.subr.bf16.mxu1 %v12849_v14  ;;  %v12857_v21 = vcombine.high %v66_v16, %v70_v17  ;;  %v73_v22 = vld [vmem:[%s20161_s1 + $0xc0] sm:$0xff]  ;;  %v74_v24 = vld [vmem:[%s20161_s1 + $0xc8] sm:$0xff]  ;;  %v12854_v26 = vcombine.low %v65_v13, %v69_v15 }
   0x8   :  { %v77_v23 = vld [vmem:[%s20161_s1 + $0xe0] sm:$0xff]  ;;  %v78_v25 = vld [vmem:[%s20161_s1 + $0xe8] sm:$0xff]  ;;  %v12856_v27 = vcombine.low %v66_v16, %v70_v17 }
   0x9   :  { %v12863_v28 = vcombine.high %v73_v22, %v77_v23  ;;  %v12865_v29 = vcombine.high %v74_v24, %v78_v25  ;;  %v81_v30 = vld [vmem:[%s20161_s1 + $0x100] sm:$0xff]  ;;  %v82_v32 = vld [vmem:[%s20161_s1 + $0x108] sm:$0xff]  ;;  %v12862_v34 = vcombine.low %v73_v22, %v77_v23  ;;  %v12864_v35 = vcombine.low %v74_v24, %v78_v25 }
   0xa   :  { %9820 = vmatpush1.bf16.msra.mxu0 %v12846_v18  ;;  %10379 = vmatpush1.bf16.msra.mxu1 %v12848_v19  ;;  %v85_v31 = vld [vmem:[%s20161_s1 + $0x120] sm:$0xff]  ;;  %v86_v33 = vld [vmem:[%s20161_s1 + $0x128] sm:$0xff] }
   0xb   :  { %9821 = vmatprep.subr.bf16.mxu0 %v12855_v20  ;;  %10380 = vmatprep.subr.bf16.mxu1 %v12857_v21  ;;  %v12871_v36 = vcombine.high %v81_v30, %v85_v31  ;;  %v12873_v37 = vcombine.high %v82_v32, %v86_v33  ;;  %v89_v38 = vld [vmem:[%s20161_s1 + $0x140] sm:$0xff]  ;;  %v90_v40 = vld [vmem:[%s20161_s1 + $0x148] sm:$0xff]  ;;  %v12870_v42 = vcombine.low %v81_v30, %v85_v31 }
   0xc   :  { %v93_v39 = vld [vmem:[%s20161_s1 + $0x160] sm:$0xff]  ;;  %v94_v41 = vld [vmem:[%s20161_s1 + $0x168] sm:$0xff]  ;;  %v12872_v43 = vcombine.low %v82_v32, %v86_v33 }
   0xd   :  { %v12879_v44 = vcombine.high %v89_v38, %v93_v39  ;;  %v12881_v45 = vcombine.high %v90_v40, %v94_v41  ;;  %v97_v46 = vld [vmem:[%s20161_s1 + $0x180] sm:$0xff]  ;;  %v98_v48 = vld [vmem:[%s20161_s1 + $0x188] sm:$0xff]  ;;  %v12878_v50 = vcombine.low %v89_v38, %v93_v39  ;;  %v12880_v51 = vcombine.low %v90_v40, %v94_v41 }
   0xe   :  { %9822 = vmatpush1.bf16.msra.mxu0 %v12854_v26  ;;  %10381 = vmatpush1.bf16.msra.mxu1 %v12856_v27  ;;  %v101_v47 = vld [vmem:[%s20161_s1 + $0x1a0] sm:$0xff]  ;;  %v102_v49 = vld [vmem:[%s20161_s1 + $0x1a8] sm:$0xff] }
   0xf   :  { %9823 = vmatprep.subr.bf16.mxu0 %v12863_v28  ;;  %10382 = vmatprep.subr.bf16.mxu1 %v12865_v29  ;;  %v12887_v52 = vcombine.high %v97_v46, %v101_v47  ;;  %v12889_v53 = vcombine.high %v98_v48, %v102_v49  ;;  %v105_v54 = vld [vmem:[%s20161_s1 + $0x1c0] sm:$0xff]  ;;  %v106_v57 = vld [vmem:[%s20161_s1 + $0x1c8] sm:$0xff]  ;;  %v12886_v59 = vcombine.low %v97_v46, %v101_v47 }
  0x10   :  { %v109_v55 = vld [vmem:[%s20161_s1 + $0x1e0] sm:$0xff]  ;;  %v110_v58 = vld [vmem:[%s20161_s1 + $0x1e8] sm:$0xff]  ;;  %v12888_v60 = vcombine.low %v98_v48, %v102_v49 }
  0x11   :  { %v14804_v56 = vld [vmem:[%s20162_s0 + $0x4] ss:$100 sps:$4 sm:$0xff]   ;;  %v12895_v61 = vcombine.high %v105_v54, %v109_v55  ;;  %v12897_v62 = vcombine.high %v106_v57, %v110_v58  ;;  %v12894_v3 = vcombine.low %v105_v54, %v109_v55  ;;  %v12896_v4 = vcombine.low %v106_v57, %v110_v58 }
  0x12   :  { %9824 = vmatpush1.bf16.msra.mxu0 %v12862_v34  ;;  %10383 = vmatpush1.bf16.msra.mxu1 %v12864_v35  ;;  %v113_v63 = vld [vmem:[%s20161_s1 + $0x200] sm:$0xff]  ;;  %v114_v1 = vld [vmem:[%s20161_s1 + $0x208] sm:$0xff] }
  0x13   :  { %9825 = vmatprep.subr.bf16.mxu0 %v12871_v36  ;;  %10384 = vmatprep.subr.bf16.mxu1 %v12873_v37  ;;  %v117_v0 = vld [vmem:[%s20161_s1 + $0x220] sm:$0xff]  ;;  %v118_v2 = vld [vmem:[%s20161_s1 + $0x228] sm:$0xff] }
  0x14   :  { %9849 = vmatprep.mubr.bf16.mxu0 %v14804_v56  ;;  %10408 = vmatprep.mubr.bf16.mxu1 %v14804_v56  ;;  %v12903_v5 = vcombine.high %v113_v63, %v117_v0  ;;  %v12905_v6 = vcombine.high %v114_v1, %v118_v2  ;;  %v121_v7 = vld [vmem:[%s20161_s1 + $0x240] sm:$0xff]  ;;  %v122_v9 = vld [vmem:[%s20161_s1 + $0x248] sm:$0xff]  ;;  %v12902_v11 = vcombine.low %v113_v63, %v117_v0 }
  0x15   :  { %v125_v8 = vld [vmem:[%s20161_s1 + $0x260] sm:$0xff]  ;;  %v126_v10 = vld [vmem:[%s20161_s1 + $0x268] sm:$0xff]  ;;  %v12904_v12 = vcombine.low %v114_v1, %v118_v2 }
  0x16   :  { %9826 = vmatpush1.bf16.msra.mxu0 %v12870_v42  ;;  %10385 = vmatpush1.bf16.msra.mxu1 %v12872_v43  ;;  %v12911_v13 = vcombine.high %v121_v7, %v125_v8  ;;  %v12913_v14 = vcombine.high %v122_v9, %v126_v10  ;;  %v129_v15 = vld [vmem:[%s20161_s1 + $0x280] sm:$0xff]  ;;  %v130_v17 = vld [vmem:[%s20161_s1 + $0x288] sm:$0xff]  ;;  %v12910_v19 = vcombine.low %v121_v7, %v125_v8 }
  0x17   :  { %9827 = vmatprep.subr.bf16.mxu0 %v12879_v44  ;;  %10386 = vmatprep.subr.bf16.mxu1 %v12881_v45  ;;  %v133_v16 = vld [vmem:[%s20161_s1 + $0x2a0] sm:$0xff]  ;;  %v134_v18 = vld [vmem:[%s20161_s1 + $0x2a8] sm:$0xff]  ;;  %v12912_v20 = vcombine.low %v122_v9, %v126_v10 }
  0x18   :  { %v12919_v21 = vcombine.high %v129_v15, %v133_v16  ;;  %v12921_v22 = vcombine.high %v130_v17, %v134_v18  ;;  %v137_v23 = vld [vmem:[%s20161_s1 + $0x2c0] sm:$0xff]  ;;  %v138_v25 = vld [vmem:[%s20161_s1 + $0x2c8] sm:$0xff]  ;;  %v12918_v27 = vcombine.low %v129_v15, %v133_v16  ;;  %v12920_v28 = vcombine.low %v130_v17, %v134_v18 }
  0x19   :  { %v141_v24 = vld [vmem:[%s20161_s1 + $0x2e0] sm:$0xff]  ;;  %v142_v26 = vld [vmem:[%s20161_s1 + $0x2e8] sm:$0xff] }
  0x1a   :  { %9828 = vmatpush1.bf16.msra.mxu0 %v12878_v50  ;;  %10387 = vmatpush1.bf16.msra.mxu1 %v12880_v51  ;;  %v12927_v29 = vcombine.high %v137_v23, %v141_v24  ;;  %v12929_v30 = vcombine.high %v138_v25, %v142_v26  ;;  %v145_v31 = vld [vmem:[%s20161_s1 + $0x300] sm:$0xff]  ;;  %v146_v33 = vld [vmem:[%s20161_s1 + $0x308] sm:$0xff]  ;;  %v12926_v35 = vcombine.low %v137_v23, %v141_v24 }
  0x1b   :  { %9829 = vmatprep.subr.bf16.mxu0 %v12887_v52  ;;  %10388 = vmatprep.subr.bf16.mxu1 %v12889_v53  ;;  %v149_v32 = vld [vmem:[%s20161_s1 + $0x320] sm:$0xff]  ;;  %v150_v34 = vld [vmem:[%s20161_s1 + $0x328] sm:$0xff]  ;;  %v12928_v36 = vcombine.low %v138_v25, %v142_v26 }
  0x1c   :  { %v12935_v37 = vcombine.high %v145_v31, %v149_v32  ;;  %v12937_v38 = vcombine.high %v146_v33, %v150_v34  ;;  %v153_v39 = vld [vmem:[%s20161_s1 + $0x340] sm:$0xff]  ;;  %v154_v41 = vld [vmem:[%s20161_s1 + $0x348] sm:$0xff]  ;;  %v12934_v43 = vcombine.low %v145_v31, %v149_v32  ;;  %v12936_v44 = vcombine.low %v146_v33, %v150_v34 }
  0x1d   :  { %v157_v40 = vld [vmem:[%s20161_s1 + $0x360] sm:$0xff]  ;;  %v158_v42 = vld [vmem:[%s20161_s1 + $0x368] sm:$0xff] }
  0x1e   :  { %9830 = vmatpush1.bf16.msra.mxu0 %v12886_v59  ;;  %10389 = vmatpush1.bf16.msra.mxu1 %v12888_v60  ;;  %v12943_v45 = vcombine.high %v153_v39, %v157_v40  ;;  %v12945_v46 = vcombine.high %v154_v41, %v158_v42  ;;  %v161_v47 = vld [vmem:[%s20161_s1 + $0x380] sm:$0xff]  ;;  %v162_v49 = vld [vmem:[%s20161_s1 + $0x388] sm:$0xff]  ;;  %v12942_v51 = vcombine.low %v153_v39, %v157_v40 }
  0x1f   :  { %9831 = vmatprep.subr.bf16.mxu0 %v12895_v61  ;;  %10390 = vmatprep.subr.bf16.mxu1 %v12897_v62  ;;  %v165_v48 = vld [vmem:[%s20161_s1 + $0x3a0] sm:$0xff]  ;;  %v166_v50 = vld [vmem:[%s20161_s1 + $0x3a8] sm:$0xff]  ;;  %v12944_v52 = vcombine.low %v154_v41, %v158_v42 }
  0x20   :  { %v12951_v53 = vcombine.high %v161_v47, %v165_v48  ;;  %v12953_v54 = vcombine.high %v162_v49, %v166_v50  ;;  %v169_v55 = vld [vmem:[%s20161_s1 + $0x3c0] sm:$0xff]  ;;  %v170_v57 = vld [vmem:[%s20161_s1 + $0x3c8] sm:$0xff]  ;;  %v12950_v59 = vcombine.low %v161_v47, %v165_v48  ;;  %v12952_v60 = vcombine.low %v162_v49, %v166_v50 }
  0x21   :  { %v173_v56 = vld [vmem:[%s20161_s1 + $0x3e0] sm:$0xff]  ;;  %v174_v58 = vld [vmem:[%s20161_s1 + $0x3e8] sm:$0xff] }
  0x22   :  { %9832 = vmatpush1.bf16.msra.mxu0 %v12894_v3  ;;  %10391 = vmatpush1.bf16.msra.mxu1 %v12896_v4  ;;  %v12959_v61 = vcombine.high %v169_v55, %v173_v56  ;;  %v12961_v62 = vcombine.high %v170_v57, %v174_v58  ;;  %v177_v63 = vld [vmem:[%s20161_s1 + $0x400] sm:$0xff]  ;;  %v178_v1 = vld [vmem:[%s20161_s1 + $0x408] sm:$0xff]  ;;  %v12958_v3 = vcombine.low %v169_v55, %v173_v56 }
  0x23   :  { %9833 = vmatprep.subr.bf16.mxu0 %v12903_v5  ;;  %10392 = vmatprep.subr.bf16.mxu1 %v12905_v6  ;;  %v181_v0 = vld [vmem:[%s20161_s1 + $0x420] sm:$0xff]  ;;  %v182_v2 = vld [vmem:[%s20161_s1 + $0x428] sm:$0xff]  ;;  %v12960_v4 = vcombine.low %v170_v57, %v174_v58 }
  0x24   :  { %v12967_v5 = vcombine.high %v177_v63, %v181_v0  ;;  %v12969_v6 = vcombine.high %v178_v1, %v182_v2  ;;  %v185_v7 = vld [vmem:[%s20161_s1 + $0x440] sm:$0xff]  ;;  %v186_v10 = vld [vmem:[%s20161_s1 + $0x448] sm:$0xff] }
  0x25   :  { %v189_v8 = vld [vmem:[%s20161_s1 + $0x460] sm:$0xff]  ;;  %v14807_v18 = vld [vmem:[%s20162_s0 + $0xc] ss:$100 sps:$4 sm:$0xff]  }
  0x26   :  { %9834 = vmatpush1.bf16.msra.mxu0 %v12902_v11  ;;  %10393 = vmatpush1.bf16.msra.mxu1 %v12904_v12  ;;  %v14806_v9 = vld [vmem:[%s20162_s0] ss:$100 sps:$4 sm:$0xff]   ;;  %v190_v11 = vld [vmem:[%s20161_s1 + $0x468] sm:$0xff]  ;;  %v12966_v12 = vcombine.low %v177_v63, %v181_v0 }
  0x27   :  { %9835 = vmatprep.subr.bf16.mxu0 %v12911_v13  ;;  %10394 = vmatprep.subr.bf16.mxu1 %v12913_v14  ;;  %v12968_v13 = vcombine.low %v178_v1, %v182_v2  ;;  %v12975_v14 = vcombine.high %v185_v7, %v189_v8  ;;  %v193_v15 = vld [vmem:[%s20161_s1 + $0x480] sm:$0xff]  ;;  %v12977_v16 = vcombine.high %v186_v10, %v190_v11  ;;  %v210_v34 = vld [vmem:[%s20161_s1 + $0x508] sm:$0xff] }
  0x28   :  { %v197_v17 = vld [vmem:[%s20161_s1 + $0x4a0] sm:$0xff]  ;;  %v218_v42 = vld [vmem:[%s20161_s1 + $0x548] sm:$0xff] }
  0x29   :  { %v12983_v23 = vcombine.high %v193_v15, %v197_v17  ;;  %v201_v24 = vld [vmem:[%s20161_s1 + $0x4c0] sm:$0xff] }
  0x2a   :  { %9836 = vmatpush1.bf16.msra.mxu0 %v12910_v19  ;;  %10395 = vmatpush1.bf16.msra.mxu1 %v12912_v20  ;;  %v194_v19 = vld [vmem:[%s20161_s1 + $0x488] sm:$0xff]  ;;  %v205_v25 = vld [vmem:[%s20161_s1 + $0x4e0] sm:$0xff] }
  0x2b   :  { %9837 = vmatprep.subr.bf16.mxu0 %v12919_v21  ;;  %10396 = vmatprep.subr.bf16.mxu1 %v12921_v22  ;;  %v198_v20 = vld [vmem:[%s20161_s1 + $0x4a8] sm:$0xff]  ;;  %v12974_v21 = vcombine.low %v185_v7, %v189_v8  ;;  %v12976_v22 = vcombine.low %v186_v10, %v190_v11  ;;  %v12991_v31 = vcombine.high %v201_v24, %v205_v25  ;;  %v209_v32 = vld [vmem:[%s20161_s1 + $0x500] sm:$0xff] }
  0x2c   :  { %v12985_v26 = vcombine.high %v194_v19, %v198_v20  ;;  %v213_v33 = vld [vmem:[%s20161_s1 + $0x520] sm:$0xff]  ;;  %v250_v11 = vld [vmem:[%s20161_s1 + $0x648] sm:$0xff] }
  0x2d   :  { %v12999_v39 = vcombine.high %v209_v32, %v213_v33  ;;  %v217_v40 = vld [vmem:[%s20161_s1 + $0x540] sm:$0xff] }
  0x2e   :  { %9838 = vmatpush1.bf16.msra.mxu0 %v12918_v27  ;;  %10397 = vmatpush1.bf16.msra.mxu1 %v12920_v28  ;;  %v202_v27 = vld [vmem:[%s20161_s1 + $0x4c8] sm:$0xff]  ;;  %v221_v41 = vld [vmem:[%s20161_s1 + $0x560] sm:$0xff] }
  0x2f   :  { %9839 = vmatprep.subr.bf16.mxu0 %v12927_v29  ;;  %10398 = vmatprep.subr.bf16.mxu1 %v12929_v30  ;;  %v206_v28 = vld [vmem:[%s20161_s1 + $0x4e8] sm:$0xff]  ;;  %v12982_v29 = vcombine.low %v193_v15, %v197_v17  ;;  %v12984_v30 = vcombine.low %v194_v19, %v198_v20  ;;  %v13007_v47 = vcombine.high %v217_v40, %v221_v41  ;;  %v225_v49 = vld [vmem:[%s20161_s1 + $0x580] sm:$0xff] }
  0x30   :  { %v229_v50 = vld [vmem:[%s20161_s1 + $0x5a0] sm:$0xff]  ;;  %v258_v19 = vld [vmem:[%s20161_s1 + $0x688] sm:$0xff] }
  0x31   :  { %v13015_v55 = vcombine.high %v225_v49, %v229_v50  ;;  %v233_v57 = vld [vmem:[%s20161_s1 + $0x5c0] sm:$0xff]  ;;  %v262_v20 = vld [vmem:[%s20161_s1 + $0x6a8] sm:$0xff] }
  0x32   :  { %9840 = vmatpush1.bf16.msra.mxu0 %v12926_v35  ;;  %10399 = vmatpush1.bf16.msra.mxu1 %v12928_v36  ;;  %v12993_v35 = vcombine.high %v202_v27, %v206_v28  ;;  %v214_v36 = vld [vmem:[%s20161_s1 + $0x528] sm:$0xff]  ;;  %v237_v58 = vld [vmem:[%s20161_s1 + $0x5e0] sm:$0xff] }
  0x33   :  { %9841 = vmatprep.subr.bf16.mxu0 %v12935_v37  ;;  %10400 = vmatprep.subr.bf16.mxu1 %v12937_v38  ;;  %v12990_v37 = vcombine.low %v201_v24, %v205_v25  ;;  %v12992_v38 = vcombine.low %v202_v27, %v206_v28  ;;  %v13023_v63 = vcombine.high %v233_v57, %v237_v58  ;;  %v241_v1 = vld [vmem:[%s20161_s1 + $0x600] sm:$0xff]  ;;  %v266_v27 = vld [vmem:[%s20161_s1 + $0x6c8] sm:$0xff] }
  0x34   :  { %v245_v2 = vld [vmem:[%s20161_s1 + $0x620] sm:$0xff]  ;;  %v13049_v24 = vcombine.high %v258_v19, %v262_v20  ;;  %v270_v28 = vld [vmem:[%s20161_s1 + $0x6e8] sm:$0xff] }
  0x35   :  { %v13031_v7 = vcombine.high %v241_v1, %v245_v2  ;;  %v253_v10 = vld [vmem:[%s20161_s1 + $0x660] sm:$0xff] }
  0x36   :  { %9842 = vmatpush1.bf16.msra.mxu0 %v12934_v43  ;;  %10401 = vmatpush1.bf16.msra.mxu1 %v12936_v44  ;;  %v13001_v43 = vcombine.high %v210_v34, %v214_v36  ;;  %v222_v44 = vld [vmem:[%s20161_s1 + $0x568] sm:$0xff]  ;;  %v257_v17 = vld [vmem:[%s20161_s1 + $0x680] sm:$0xff] }
  0x37   :  { %9843 = vmatprep.subr.bf16.mxu0 %v12943_v45  ;;  %10402 = vmatprep.subr.bf16.mxu1 %v12945_v46  ;;  %v12998_v45 = vcombine.low %v209_v32, %v213_v33  ;;  %v13000_v46 = vcombine.low %v210_v34, %v214_v36  ;;  %v13009_v48 = vcombine.high %v218_v42, %v222_v44  ;;  %v265_v25 = vld [vmem:[%s20161_s1 + $0x6c0] sm:$0xff]  ;;  %v278_v36 = vld [vmem:[%s20161_s1 + $0x728] sm:$0xff] }
  0x38   :  { %v13057_v32 = vcombine.high %v266_v27, %v270_v28  ;;  %v273_v33 = vld [vmem:[%s20161_s1 + $0x700] sm:$0xff] }
  0x39   :  { %v277_v34 = vld [vmem:[%s20161_s1 + $0x720] sm:$0xff] }
  0x3a   :  { %9844 = vmatpush1.bf16.msra.mxu0 %v12942_v51  ;;  %10403 = vmatpush1.bf16.msra.mxu1 %v12944_v52  ;;  %v226_v51 = vld [vmem:[%s20161_s1 + $0x588] sm:$0xff] }
  0x3b   :  { %9845 = vmatprep.subr.bf16.mxu0 %v12951_v53  ;;  %10404 = vmatprep.subr.bf16.mxu1 %v12953_v54  ;;  %v230_v52 = vld [vmem:[%s20161_s1 + $0x5a8] sm:$0xff]  ;;  %v13006_v53 = vcombine.low %v217_v40, %v221_v41  ;;  %v13008_v54 = vcombine.low %v218_v42, %v222_v44  ;;  %v281_v41 = vld [vmem:[%s20161_s1 + $0x740] sm:$0xff] }
  0x3c   :  { %v13017_v56 = vcombine.high %v226_v51, %v230_v52  ;;  %v285_v42 = vld [vmem:[%s20161_s1 + $0x760] sm:$0xff]  ;;  %v286_v44 = vld [vmem:[%s20161_s1 + $0x768] sm:$0xff] }
  0x3e   :  { %9846 = vmatpush1.bf16.msra.mxu0 %v12950_v59  ;;  %10405 = vmatpush1.bf16.msra.mxu1 %v12952_v60  ;;  %v234_v59 = vld [vmem:[%s20161_s1 + $0x5c8] sm:$0xff] }
  0x3f   :  { %9847 = vmatprep.subr.bf16.mxu0 %v12959_v61  ;;  %10406 = vmatprep.subr.bf16.mxu1 %v12961_v62  ;;  %v238_v60 = vld [vmem:[%s20161_s1 + $0x5e8] sm:$0xff]  ;;  %v13014_v61 = vcombine.low %v225_v49, %v229_v50  ;;  %v13016_v62 = vcombine.low %v226_v51, %v230_v52  ;;  %v289_v49 = vld [vmem:[%s20161_s1 + $0x780] sm:$0xff] }
  0x40   :  { %v13025_v0 = vcombine.high %v234_v59, %v238_v60  ;;  %v293_v50 = vld [vmem:[%s20161_s1 + $0x7a0] sm:$0xff]  ;;  %v290_v51 = vld [vmem:[%s20161_s1 + $0x788] sm:$0xff] }
  0x41   :  { %v294_v52 = vld [vmem:[%s20161_s1 + $0x7a8] sm:$0xff] }
  0x42   :  { %9848 = vmatpush1.bf16.msra.mxu0 %v12958_v3  ;;  %10407 = vmatpush1.bf16.msra.mxu1 %v12960_v4  ;;  %v242_v3 = vld [vmem:[%s20161_s1 + $0x608] sm:$0xff] }
  0x43   :  { %9860 = vmatprep.subr.bf16.mxu0 %v12967_v5  ;;  %10419 = vmatprep.subr.bf16.mxu1 %v12969_v6  ;;  %v246_v4 = vld [vmem:[%s20161_s1 + $0x628] sm:$0xff]  ;;  %v13022_v5 = vcombine.low %v233_v57, %v237_v58  ;;  %v13024_v6 = vcombine.low %v234_v59, %v238_v60  ;;  %v297_v57 = vld [vmem:[%s20161_s1 + $0x7c0] sm:$0xff] }
  0x44   :  { %v13033_v8 = vcombine.high %v242_v3, %v246_v4  ;;  %v301_v58 = vld [vmem:[%s20161_s1 + $0x7e0] sm:$0xff]  ;;  %v298_v59 = vld [vmem:[%s20161_s1 + $0x7c8] sm:$0xff] }
  0x45   :  { %9850 = vmatmul.mubr.bf16.vlgmr.msra.gmra.mrb[0].mxu0 %v14806_v9  ;;  %10409 = vmatmul.mubr.bf16.vlgmr.msra.gmra.mrb[0].mxu1 %v14806_v9  ;;  %v249_v9 = vld [vmem:[%s20161_s1 + $0x640] sm:$0xff]  ;;  %v302_v60 = vld [vmem:[%s20161_s1 + $0x7e8] sm:$0xff] }
  0x46   :  { %9861 = vmatpush1.bf16.msra.mxu0 %v12966_v12  ;;  %10420 = vmatpush1.bf16.msra.mxu1 %v12968_v13  ;;  %v254_v12 = vld [vmem:[%s20161_s1 + $0x668] sm:$0xff]  ;;  %v13030_v13 = vcombine.low %v241_v1, %v245_v2  ;;  %v13039_v15 = vcombine.high %v249_v9, %v253_v10  ;;  %v305_v1 = vld [vmem:[%s20161_s1 + $0x800] sm:$0xff] }
  0x47   :  { %9862 = vmatprep.subr.bf16.mxu0 %v12975_v14  ;;  %10421 = vmatprep.subr.bf16.mxu1 %v12977_v16  ;;  %v13032_v14 = vcombine.low %v242_v3, %v246_v4  ;;  %v13041_v16 = vcombine.high %v250_v11, %v254_v12  ;;  %v309_v2 = vld [vmem:[%s20161_s1 + $0x820] sm:$0xff]  ;;  %v306_v3 = vld [vmem:[%s20161_s1 + $0x808] sm:$0xff] }
  0x48   :  { %9892 = vmatprep.mubr.bf16.mxu0 %v14807_v18  ;;  %10451 = vmatprep.mubr.bf16.mxu1 %v14807_v18  ;;  %v261_v18 = vld [vmem:[%s20161_s1 + $0x6a0] sm:$0xff]  ;;  %v310_v4 = vld [vmem:[%s20161_s1 + $0x828] sm:$0xff] }
  0x4a   :  { %9863 = vmatpush1.bf16.msra.mxu0 %v12974_v21  ;;  %10422 = vmatpush1.bf16.msra.mxu1 %v12976_v22  ;;  %v13038_v21 = vcombine.low %v249_v9, %v253_v10  ;;  %v13040_v22 = vcombine.low %v250_v11, %v254_v12  ;;  %v313_v9 = vld [vmem:[%s20161_s1 + $0x840] sm:$0xff]  ;;  %v14809_v11 = vld [vmem:[%s20162_s0 + $0x8] ss:$100 sps:$4 sm:$0xff]  }
  0x4b   :  { %9864 = vmatprep.subr.bf16.mxu0 %v12983_v23  ;;  %10423 = vmatprep.subr.bf16.mxu1 %v12985_v26  ;;  %v13047_v23 = vcombine.high %v257_v17, %v261_v18  ;;  %v269_v26 = vld [vmem:[%s20161_s1 + $0x6e0] sm:$0xff]  ;;  %v314_v12 = vld [vmem:[%s20161_s1 + $0x848] sm:$0xff] }
  0x4c   :  { %v317_v10 = vld [vmem:[%s20161_s1 + $0x860] sm:$0xff] }
  0x4e   :  { %9865 = vmatpush1.bf16.msra.mxu0 %v12982_v29  ;;  %10424 = vmatpush1.bf16.msra.mxu1 %v12984_v30  ;;  %v13046_v29 = vcombine.low %v257_v17, %v261_v18  ;;  %v13048_v30 = vcombine.low %v258_v19, %v262_v20  ;;  %v321_v18 = vld [vmem:[%s20161_s1 + $0x880] sm:$0xff]  ;;  %v14810_v20 = vld [vmem:[%s20162_s0 + $0x14] ss:$100 sps:$4 sm:$0xff]  }
  0x4f   :  { %9866 = vmatprep.subr.bf16.mxu0 %v12991_v31  ;;  %10425 = vmatprep.subr.bf16.mxu1 %v12993_v35  ;;  %v13055_v31 = vcombine.high %v265_v25, %v269_v26  ;;  %v274_v35 = vld [vmem:[%s20161_s1 + $0x708] sm:$0xff]  ;;  %v325_v19 = vld [vmem:[%s20161_s1 + $0x8a0] sm:$0xff] }
  0x50   :  { %v13065_v40 = vcombine.high %v274_v35, %v278_v36 }
  0x52   :  { %9867 = vmatpush1.bf16.msra.mxu0 %v12990_v37  ;;  %10426 = vmatpush1.bf16.msra.mxu1 %v12992_v38  ;;  %v13054_v37 = vcombine.low %v265_v25, %v269_v26  ;;  %v13056_v38 = vcombine.low %v266_v27, %v270_v28  ;;  %v13111_v25 = vcombine.high %v321_v18, %v325_v19  ;;  %v329_v27 = vld [vmem:[%s20161_s1 + $0x8c0] sm:$0xff] }
  0x53   :  { %9868 = vmatprep.subr.bf16.mxu0 %v12999_v39  ;;  %10427 = vmatprep.subr.bf16.mxu1 %v13001_v43  ;;  %v13063_v39 = vcombine.high %v273_v33, %v277_v34  ;;  %v282_v43 = vld [vmem:[%s20161_s1 + $0x748] sm:$0xff]  ;;  %v333_v28 = vld [vmem:[%s20161_s1 + $0x8e0] sm:$0xff] }
  0x56   :  { %9869 = vmatpush1.bf16.msra.mxu0 %v12998_v45  ;;  %10428 = vmatpush1.bf16.msra.mxu1 %v13000_v46  ;;  %v13062_v45 = vcombine.low %v273_v33, %v277_v34  ;;  %v13064_v46 = vcombine.low %v274_v35, %v278_v36  ;;  %v13119_v33 = vcombine.high %v329_v27, %v333_v28  ;;  %v337_v35 = vld [vmem:[%s20161_s1 + $0x900] sm:$0xff] }
  0x57   :  { %9870 = vmatprep.subr.bf16.mxu0 %v13007_v47  ;;  %10429 = vmatprep.subr.bf16.mxu1 %v13009_v48  ;;  %v13071_v47 = vcombine.high %v281_v41, %v285_v42  ;;  %v13073_v48 = vcombine.high %v282_v43, %v286_v44  ;;  %v341_v36 = vld [vmem:[%s20161_s1 + $0x920] sm:$0xff] }
  0x5a   :  { %9871 = vmatpush1.bf16.msra.mxu0 %v13006_v53  ;;  %10430 = vmatpush1.bf16.msra.mxu1 %v13008_v54  ;;  %v13070_v53 = vcombine.low %v281_v41, %v285_v42  ;;  %v13072_v54 = vcombine.low %v282_v43, %v286_v44  ;;  %v13127_v41 = vcombine.high %v337_v35, %v341_v36  ;;  %v345_v43 = vld [vmem:[%s20161_s1 + $0x940] sm:$0xff] }
  0x5b   :  { %9872 = vmatprep.subr.bf16.mxu0 %v13015_v55  ;;  %10431 = vmatprep.subr.bf16.mxu1 %v13017_v56  ;;  %v13079_v55 = vcombine.high %v289_v49, %v293_v50  ;;  %v13081_v56 = vcombine.high %v290_v51, %v294_v52  ;;  %v349_v44 = vld [vmem:[%s20161_s1 + $0x960] sm:$0xff] }
  0x5e   :  { %9873 = vmatpush1.bf16.msra.mxu0 %v13014_v61  ;;  %10432 = vmatpush1.bf16.msra.mxu1 %v13016_v62  ;;  %v13078_v61 = vcombine.low %v289_v49, %v293_v50  ;;  %v13080_v62 = vcombine.low %v290_v51, %v294_v52  ;;  %v13135_v49 = vcombine.high %v345_v43, %v349_v44  ;;  %v353_v51 = vld [vmem:[%s20161_s1 + $0x980] sm:$0xff] }
  0x5f   :  { %9874 = vmatprep.subr.bf16.mxu0 %v13023_v63  ;;  %10433 = vmatprep.subr.bf16.mxu1 %v13025_v0  ;;  %v13087_v63 = vcombine.high %v297_v57, %v301_v58  ;;  %v13089_v0 = vcombine.high %v298_v59, %v302_v60  ;;  %v357_v52 = vld [vmem:[%s20161_s1 + $0x9a0] sm:$0xff] }
  0x62   :  { %9875 = vmatpush1.bf16.msra.mxu0 %v13022_v5  ;;  %10434 = vmatpush1.bf16.msra.mxu1 %v13024_v6  ;;  %v13086_v5 = vcombine.low %v297_v57, %v301_v58  ;;  %v13088_v6 = vcombine.low %v298_v59, %v302_v60  ;;  %v13143_v57 = vcombine.high %v353_v51, %v357_v52  ;;  %v361_v59 = vld [vmem:[%s20161_s1 + $0x9c0] sm:$0xff] }
  0x63   :  { %9876 = vmatprep.subr.bf16.mxu0 %v13031_v7  ;;  %10435 = vmatprep.subr.bf16.mxu1 %v13033_v8  ;;  %v13095_v7 = vcombine.high %v305_v1, %v309_v2  ;;  %v13097_v8 = vcombine.high %v306_v3, %v310_v4  ;;  %v365_v60 = vld [vmem:[%s20161_s1 + $0x9e0] sm:$0xff] }
  0x66   :  { %9877 = vmatpush1.bf16.msra.mxu0 %v13030_v13  ;;  %10436 = vmatpush1.bf16.msra.mxu1 %v13032_v14  ;;  %v318_v13 = vld [vmem:[%s20161_s1 + $0x868] sm:$0xff]  ;;  %v13094_v14 = vcombine.low %v305_v1, %v309_v2  ;;  %v13151_v1 = vcombine.high %v361_v59, %v365_v60 }
  0x67   :  { %9878 = vmatprep.subr.bf16.mxu0 %v13039_v15  ;;  %10437 = vmatprep.subr.bf16.mxu1 %v13041_v16  ;;  %v13096_v15 = vcombine.low %v306_v3, %v310_v4  ;;  %v13103_v16 = vcombine.high %v313_v9, %v317_v10  ;;  %v13105_v17 = vcombine.high %v314_v12, %v318_v13  ;;  %v369_v3 = vld [vmem:[%s20161_s1 + $0xa00] sm:$0xff] }
  0x68   :  { %v373_v4 = vld [vmem:[%s20161_s1 + $0xa20] sm:$0xff] }
  0x6a   :  { %9879 = vmatpush1.bf16.msra.mxu0 %v13038_v21  ;;  %10438 = vmatpush1.bf16.msra.mxu1 %v13040_v22  ;;  %v322_v21 = vld [vmem:[%s20161_s1 + $0x888] sm:$0xff] }
  0x6b   :  { %9880 = vmatprep.subr.bf16.mxu0 %v13047_v23  ;;  %10439 = vmatprep.subr.bf16.mxu1 %v13049_v24  ;;  %v326_v22 = vld [vmem:[%s20161_s1 + $0x8a8] sm:$0xff]  ;;  %v13102_v23 = vcombine.low %v313_v9, %v317_v10  ;;  %v13104_v24 = vcombine.low %v314_v12, %v318_v13  ;;  %v13159_v9 = vcombine.high %v369_v3, %v373_v4  ;;  %v381_v12 = vld [vmem:[%s20161_s1 + $0xa60] sm:$0xff] }
  0x6c   :  { %v13113_v26 = vcombine.high %v322_v21, %v326_v22  ;;  %v378_v13 = vld [vmem:[%s20161_s1 + $0xa48] sm:$0xff] }
  0x6e   :  { %9881 = vmatpush1.bf16.msra.mxu0 %v13046_v29  ;;  %10440 = vmatpush1.bf16.msra.mxu1 %v13048_v30  ;;  %v330_v29 = vld [vmem:[%s20161_s1 + $0x8c8] sm:$0xff] }
  0x6f   :  { %9882 = vmatprep.subr.bf16.mxu0 %v13055_v31  ;;  %10441 = vmatprep.subr.bf16.mxu1 %v13057_v32  ;;  %v334_v30 = vld [vmem:[%s20161_s1 + $0x8e8] sm:$0xff]  ;;  %v13110_v31 = vcombine.low %v321_v18, %v325_v19  ;;  %v13112_v32 = vcombine.low %v322_v21, %v326_v22  ;;  %v385_v19 = vld [vmem:[%s20161_s1 + $0xa80] sm:$0xff] }
  0x70   :  { %v13121_v34 = vcombine.high %v330_v29, %v334_v30  ;;  %v386_v21 = vld [vmem:[%s20161_s1 + $0xa88] sm:$0xff] }
  0x71   :  { %v390_v22 = vld [vmem:[%s20161_s1 + $0xaa8] sm:$0xff] }
  0x72   :  { %9883 = vmatpush1.bf16.msra.mxu0 %v13054_v37  ;;  %10442 = vmatpush1.bf16.msra.mxu1 %v13056_v38  ;;  %v338_v37 = vld [vmem:[%s20161_s1 + $0x908] sm:$0xff] }
  0x73   :  { %9884 = vmatprep.subr.bf16.mxu0 %v13063_v39  ;;  %10443 = vmatprep.subr.bf16.mxu1 %v13065_v40  ;;  %v342_v38 = vld [vmem:[%s20161_s1 + $0x928] sm:$0xff]  ;;  %v13118_v39 = vcombine.low %v329_v27, %v333_v28  ;;  %v13120_v40 = vcombine.low %v330_v29, %v334_v30  ;;  %v393_v27 = vld [vmem:[%s20161_s1 + $0xac0] sm:$0xff] }
  0x74   :  { %v13129_v42 = vcombine.high %v338_v37, %v342_v38  ;;  %v397_v28 = vld [vmem:[%s20161_s1 + $0xae0] sm:$0xff]  ;;  %v394_v29 = vld [vmem:[%s20161_s1 + $0xac8] sm:$0xff] }
  0x75   :  { %v398_v30 = vld [vmem:[%s20161_s1 + $0xae8] sm:$0xff] }
  0x76   :  { %9885 = vmatpush1.bf16.msra.mxu0 %v13062_v45  ;;  %10444 = vmatpush1.bf16.msra.mxu1 %v13064_v46  ;;  %v346_v45 = vld [vmem:[%s20161_s1 + $0x948] sm:$0xff] }
  0x77   :  { %9886 = vmatprep.subr.bf16.mxu0 %v13071_v47  ;;  %10445 = vmatprep.subr.bf16.mxu1 %v13073_v48  ;;  %v350_v46 = vld [vmem:[%s20161_s1 + $0x968] sm:$0xff]  ;;  %v13126_v47 = vcombine.low %v337_v35, %v341_v36  ;;  %v13128_v48 = vcombine.low %v338_v37, %v342_v38  ;;  %v401_v35 = vld [vmem:[%s20161_s1 + $0xb00] sm:$0xff] }
  0x78   :  { %v13137_v50 = vcombine.high %v346_v45, %v350_v46  ;;  %v405_v36 = vld [vmem:[%s20161_s1 + $0xb20] sm:$0xff]  ;;  %v402_v37 = vld [vmem:[%s20161_s1 + $0xb08] sm:$0xff] }
  0x79   :  { %v406_v38 = vld [vmem:[%s20161_s1 + $0xb28] sm:$0xff] }
  0x7a   :  { %9887 = vmatpush1.bf16.msra.mxu0 %v13070_v53  ;;  %10446 = vmatpush1.bf16.msra.mxu1 %v13072_v54  ;;  %v354_v53 = vld [vmem:[%s20161_s1 + $0x988] sm:$0xff] }
  0x7b   :  { %9888 = vmatprep.subr.bf16.mxu0 %v13079_v55  ;;  %10447 = vmatprep.subr.bf16.mxu1 %v13081_v56  ;;  %v358_v54 = vld [vmem:[%s20161_s1 + $0x9a8] sm:$0xff]  ;;  %v13134_v55 = vcombine.low %v345_v43, %v349_v44  ;;  %v13136_v56 = vcombine.low %v346_v45, %v350_v46  ;;  %v409_v43 = vld [vmem:[%s20161_s1 + $0xb40] sm:$0xff] }
  0x7c   :  { %v13145_v58 = vcombine.high %v354_v53, %v358_v54  ;;  %v413_v44 = vld [vmem:[%s20161_s1 + $0xb60] sm:$0xff]  ;;  %v410_v45 = vld [vmem:[%s20161_s1 + $0xb48] sm:$0xff] }
  0x7d   :  { %v414_v46 = vld [vmem:[%s20161_s1 + $0xb68] sm:$0xff] }
  0x7e   :  { %9889 = vmatpush1.bf16.msra.mxu0 %v13078_v61  ;;  %10448 = vmatpush1.bf16.msra.mxu1 %v13080_v62  ;;  %v362_v61 = vld [vmem:[%s20161_s1 + $0x9c8] sm:$0xff] }
  0x7f   :  { %9890 = vmatprep.subr.bf16.mxu0 %v13087_v63  ;;  %10449 = vmatprep.subr.bf16.mxu1 %v13089_v0  ;;  %v366_v62 = vld [vmem:[%s20161_s1 + $0x9e8] sm:$0xff]  ;;  %v13142_v63 = vcombine.low %v353_v51, %v357_v52  ;;  %v13144_v0 = vcombine.low %v354_v53, %v358_v54  ;;  %v417_v51 = vld [vmem:[%s20161_s1 + $0xb80] sm:$0xff] }
  0x80   :  { %v13153_v2 = vcombine.high %v362_v61, %v366_v62  ;;  %v421_v52 = vld [vmem:[%s20161_s1 + $0xba0] sm:$0xff]  ;;  %v418_v53 = vld [vmem:[%s20161_s1 + $0xb88] sm:$0xff] }
  0x81   :  { %v422_v54 = vld [vmem:[%s20161_s1 + $0xba8] sm:$0xff] }
  0x82   :  { %9891 = vmatpush1.bf16.msra.mxu0 %v13086_v5  ;;  %10450 = vmatpush1.bf16.msra.mxu1 %v13088_v6  ;;  %v370_v5 = vld [vmem:[%s20161_s1 + $0xa08] sm:$0xff] }
  0x83   :  { %9903 = vmatprep.subr.bf16.mxu0 %v13095_v7  ;;  %10462 = vmatprep.subr.bf16.mxu1 %v13097_v8  ;;  %v374_v6 = vld [vmem:[%s20161_s1 + $0xa28] sm:$0xff]  ;;  %v13150_v7 = vcombine.low %v361_v59, %v365_v60  ;;  %v13152_v8 = vcombine.low %v362_v61, %v366_v62  ;;  %v425_v59 = vld [vmem:[%s20161_s1 + $0xbc0] sm:$0xff] }
  0x84   :  { %v13161_v10 = vcombine.high %v370_v5, %v374_v6  ;;  %v429_v60 = vld [vmem:[%s20161_s1 + $0xbe0] sm:$0xff]  ;;  %v426_v61 = vld [vmem:[%s20161_s1 + $0xbc8] sm:$0xff] }
  0x85   :  { %9893 = vmatmul.mubr.bf16.vlgmr.msra.gmra.mrb[0].mxu0 %v14809_v11  ;;  %10452 = vmatmul.mubr.bf16.vlgmr.msra.gmra.mrb[0].mxu1 %v14809_v11  ;;  %v377_v11 = vld [vmem:[%s20161_s1 + $0xa40] sm:$0xff]  ;;  %v430_v62 = vld [vmem:[%s20161_s1 + $0xbe8] sm:$0xff] }
  0x86   :  { %9904 = vmatpush1.bf16.msra.mxu0 %v13094_v14  ;;  %10463 = vmatpush1.bf16.msra.mxu1 %v13096_v15  ;;  %v382_v14 = vld [vmem:[%s20161_s1 + $0xa68] sm:$0xff]  ;;  %v13158_v15 = vcombine.low %v369_v3, %v373_v4  ;;  %v433_v3 = vld [vmem:[%s20161_s1 + $0xc00] sm:$0xff] }
  0x87   :  { %9905 = vmatprep.subr.bf16.mxu0 %v13103_v16  ;;  %10464 = vmatprep.subr.bf16.mxu1 %v13105_v17  ;;  %v13160_v16 = vcombine.low %v370_v5, %v374_v6  ;;  %v13167_v17 = vcombine.high %v377_v11, %v381_v12  ;;  %v13169_v18 = vcombine.high %v378_v13, %v382_v14  ;;  %v437_v4 = vld [vmem:[%s20161_s1 + $0xc20] sm:$0xff]  ;;  %v434_v5 = vld [vmem:[%s20161_s1 + $0xc08] sm:$0xff] }
  0x88   :  { %9935 = vmatprep.mubr.bf16.mxu0 %v14810_v20  ;;  %10494 = vmatprep.mubr.bf16.mxu1 %v14810_v20  ;;  %v389_v20 = vld [vmem:[%s20161_s1 + $0xaa0] sm:$0xff]  ;;  %v438_v6 = vld [vmem:[%s20161_s1 + $0xc28] sm:$0xff] }
  0x8a   :  { %9906 = vmatpush1.bf16.msra.mxu0 %v13102_v23  ;;  %10465 = vmatpush1.bf16.msra.mxu1 %v13104_v24  ;;  %v13166_v23 = vcombine.low %v377_v11, %v381_v12  ;;  %v13168_v24 = vcombine.low %v378_v13, %v382_v14  ;;  %v441_v11 = vld [vmem:[%s20161_s1 + $0xc40] sm:$0xff]  ;;  %v14812_v13 = vld [vmem:[%s20162_s0 + $0x10] ss:$100 sps:$4 sm:$0xff]   ;;  %v442_v14 = vld [vmem:[%s20161_s1 + $0xc48] sm:$0xff] }
  0x8b   :  { %9907 = vmatprep.subr.bf16.mxu0 %v13111_v25  ;;  %10466 = vmatprep.subr.bf16.mxu1 %v13113_v26  ;;  %v13175_v25 = vcombine.high %v385_v19, %v389_v20  ;;  %v13177_v26 = vcombine.high %v386_v21, %v390_v22  ;;  %v445_v12 = vld [vmem:[%s20161_s1 + $0xc60] sm:$0xff] }
  0x8e   :  { %9908 = vmatpush1.bf16.msra.mxu0 %v13110_v31  ;;  %10467 = vmatpush1.bf16.msra.mxu1 %v13112_v32  ;;  %v13174_v31 = vcombine.low %v385_v19, %v389_v20  ;;  %v13176_v32 = vcombine.low %v386_v21, %v390_v22  ;;  %v449_v20 = vld [vmem:[%s20161_s1 + $0xc80] sm:$0xff] }
  0x8f   :  { %9909 = vmatprep.subr.bf16.mxu0 %v13119_v33  ;;  %10468 = vmatprep.subr.bf16.mxu1 %v13121_v34  ;;  %v13183_v33 = vcombine.high %v393_v27, %v397_v28  ;;  %v13185_v34 = vcombine.high %v394_v29, %v398_v30  ;;  %v453_v21 = vld [vmem:[%s20161_s1 + $0xca0] sm:$0xff] }
  0x90   :  { %v14813_v22 = vld [vmem:[%s20162_s0 + $0x1c] ss:$100 sps:$4 sm:$0xff]  }
  0x92   :  { %9910 = vmatpush1.bf16.msra.mxu0 %v13118_v39  ;;  %10469 = vmatpush1.bf16.msra.mxu1 %v13120_v40  ;;  %v13182_v39 = vcombine.low %v393_v27, %v397_v28  ;;  %v13184_v40 = vcombine.low %v394_v29, %v398_v30  ;;  %v13239_v27 = vcombine.high %v449_v20, %v453_v21  ;;  %v457_v29 = vld [vmem:[%s20161_s1 + $0xcc0] sm:$0xff] }
  0x93   :  { %9911 = vmatprep.subr.bf16.mxu0 %v13127_v41  ;;  %10470 = vmatprep.subr.bf16.mxu1 %v13129_v42  ;;  %v13191_v41 = vcombine.high %v401_v35, %v405_v36  ;;  %v13193_v42 = vcombine.high %v402_v37, %v406_v38  ;;  %v461_v30 = vld [vmem:[%s20161_s1 + $0xce0] sm:$0xff] }
  0x96   :  { %9912 = vmatpush1.bf16.msra.mxu0 %v13126_v47  ;;  %10471 = vmatpush1.bf16.msra.mxu1 %v13128_v48  ;;  %v13190_v47 = vcombine.low %v401_v35, %v405_v36  ;;  %v13192_v48 = vcombine.low %v402_v37, %v406_v38  ;;  %v13247_v35 = vcombine.high %v457_v29, %v461_v30  ;;  %v465_v37 = vld [vmem:[%s20161_s1 + $0xd00] sm:$0xff] }
  0x97   :  { %9913 = vmatprep.subr.bf16.mxu0 %v13135_v49  ;;  %10472 = vmatprep.subr.bf16.mxu1 %v13137_v50  ;;  %v13199_v49 = vcombine.high %v409_v43, %v413_v44  ;;  %v13201_v50 = vcombine.high %v410_v45, %v414_v46  ;;  %v469_v38 = vld [vmem:[%s20161_s1 + $0xd20] sm:$0xff] }
  0x9a   :  { %9914 = vmatpush1.bf16.msra.mxu0 %v13134_v55  ;;  %10473 = vmatpush1.bf16.msra.mxu1 %v13136_v56  ;;  %v13198_v55 = vcombine.low %v409_v43, %v413_v44  ;;  %v13200_v56 = vcombine.low %v410_v45, %v414_v46  ;;  %v13255_v43 = vcombine.high %v465_v37, %v469_v38  ;;  %v473_v45 = vld [vmem:[%s20161_s1 + $0xd40] sm:$0xff] }
  0x9b   :  { %9915 = vmatprep.subr.bf16.mxu0 %v13143_v57  ;;  %10474 = vmatprep.subr.bf16.mxu1 %v13145_v58  ;;  %v13207_v57 = vcombine.high %v417_v51, %v421_v52  ;;  %v13209_v58 = vcombine.high %v418_v53, %v422_v54  ;;  %v477_v46 = vld [vmem:[%s20161_s1 + $0xd60] sm:$0xff] }
  0x9e   :  { %9916 = vmatpush1.bf16.msra.mxu0 %v13142_v63  ;;  %10475 = vmatpush1.bf16.msra.mxu1 %v13144_v0  ;;  %v13206_v63 = vcombine.low %v417_v51, %v421_v52  ;;  %v13208_v0 = vcombine.low %v418_v53, %v422_v54  ;;  %v13263_v51 = vcombine.high %v473_v45, %v477_v46  ;;  %v481_v53 = vld [vmem:[%s20161_s1 + $0xd80] sm:$0xff] }
  0x9f   :  { %9917 = vmatprep.subr.bf16.mxu0 %v13151_v1  ;;  %10476 = vmatprep.subr.bf16.mxu1 %v13153_v2  ;;  %v13215_v1 = vcombine.high %v425_v59, %v429_v60  ;;  %v13217_v2 = vcombine.high %v426_v61, %v430_v62  ;;  %v485_v54 = vld [vmem:[%s20161_s1 + $0xda0] sm:$0xff] }
  0xa2   :  { %9918 = vmatpush1.bf16.msra.mxu0 %v13150_v7  ;;  %10477 = vmatpush1.bf16.msra.mxu1 %v13152_v8  ;;  %v13214_v7 = vcombine.low %v425_v59, %v429_v60  ;;  %v13216_v8 = vcombine.low %v426_v61, %v430_v62  ;;  %v13271_v59 = vcombine.high %v481_v53, %v485_v54  ;;  %v489_v61 = vld [vmem:[%s20161_s1 + $0xdc0] sm:$0xff] }
  0xa3   :  { %9919 = vmatprep.subr.bf16.mxu0 %v13159_v9  ;;  %10478 = vmatprep.subr.bf16.mxu1 %v13161_v10  ;;  %v13223_v9 = vcombine.high %v433_v3, %v437_v4  ;;  %v13225_v10 = vcombine.high %v434_v5, %v438_v6  ;;  %v493_v62 = vld [vmem:[%s20161_s1 + $0xde0] sm:$0xff] }
  0xa6   :  { %9920 = vmatpush1.bf16.msra.mxu0 %v13158_v15  ;;  %10479 = vmatpush1.bf16.msra.mxu1 %v13160_v16  ;;  %v446_v15 = vld [vmem:[%s20161_s1 + $0xc68] sm:$0xff]  ;;  %v13222_v16 = vcombine.low %v433_v3, %v437_v4  ;;  %v13279_v3 = vcombine.high %v489_v61, %v493_v62 }
  0xa7   :  { %9921 = vmatprep.subr.bf16.mxu0 %v13167_v17  ;;  %10480 = vmatprep.subr.bf16.mxu1 %v13169_v18  ;;  %v13224_v17 = vcombine.low %v434_v5, %v438_v6  ;;  %v13231_v18 = vcombine.high %v441_v11, %v445_v12  ;;  %v13233_v19 = vcombine.high %v442_v14, %v446_v15  ;;  %v497_v5 = vld [vmem:[%s20161_s1 + $0xe00] sm:$0xff] }
  0xa8   :  { %v501_v6 = vld [vmem:[%s20161_s1 + $0xe20] sm:$0xff] }
  0xaa   :  { %9922 = vmatpush1.bf16.msra.mxu0 %v13166_v23  ;;  %10481 = vmatpush1.bf16.msra.mxu1 %v13168_v24  ;;  %v450_v23 = vld [vmem:[%s20161_s1 + $0xc88] sm:$0xff] }
  0xab   :  { %9923 = vmatprep.subr.bf16.mxu0 %v13175_v25  ;;  %10482 = vmatprep.subr.bf16.mxu1 %v13177_v26  ;;  %v454_v24 = vld [vmem:[%s20161_s1 + $0xca8] sm:$0xff]  ;;  %v13230_v25 = vcombine.low %v441_v11, %v445_v12  ;;  %v13232_v26 = vcombine.low %v442_v14, %v446_v15  ;;  %v13287_v11 = vcombine.high %v497_v5, %v501_v6  ;;  %v509_v14 = vld [vmem:[%s20161_s1 + $0xe60] sm:$0xff] }
  0xac   :  { %v13241_v28 = vcombine.high %v450_v23, %v454_v24  ;;  %v506_v15 = vld [vmem:[%s20161_s1 + $0xe48] sm:$0xff] }
  0xae   :  { %9924 = vmatpush1.bf16.msra.mxu0 %v13174_v31  ;;  %10483 = vmatpush1.bf16.msra.mxu1 %v13176_v32  ;;  %v458_v31 = vld [vmem:[%s20161_s1 + $0xcc8] sm:$0xff] }
  0xaf   :  { %9925 = vmatprep.subr.bf16.mxu0 %v13183_v33  ;;  %10484 = vmatprep.subr.bf16.mxu1 %v13185_v34  ;;  %v462_v32 = vld [vmem:[%s20161_s1 + $0xce8] sm:$0xff]  ;;  %v13238_v33 = vcombine.low %v449_v20, %v453_v21  ;;  %v13240_v34 = vcombine.low %v450_v23, %v454_v24  ;;  %v513_v21 = vld [vmem:[%s20161_s1 + $0xe80] sm:$0xff] }
  0xb0   :  { %v13249_v36 = vcombine.high %v458_v31, %v462_v32  ;;  %v514_v23 = vld [vmem:[%s20161_s1 + $0xe88] sm:$0xff] }
  0xb1   :  { %v518_v24 = vld [vmem:[%s20161_s1 + $0xea8] sm:$0xff] }
  0xb2   :  { %9926 = vmatpush1.bf16.msra.mxu0 %v13182_v39  ;;  %10485 = vmatpush1.bf16.msra.mxu1 %v13184_v40  ;;  %v466_v39 = vld [vmem:[%s20161_s1 + $0xd08] sm:$0xff] }
  0xb3   :  { %9927 = vmatprep.subr.bf16.mxu0 %v13191_v41  ;;  %10486 = vmatprep.subr.bf16.mxu1 %v13193_v42  ;;  %v470_v40 = vld [vmem:[%s20161_s1 + $0xd28] sm:$0xff]  ;;  %v13246_v41 = vcombine.low %v457_v29, %v461_v30  ;;  %v13248_v42 = vcombine.low %v458_v31, %v462_v32  ;;  %v521_v29 = vld [vmem:[%s20161_s1 + $0xec0] sm:$0xff] }
  0xb4   :  { %v13257_v44 = vcombine.high %v466_v39, %v470_v40  ;;  %v525_v30 = vld [vmem:[%s20161_s1 + $0xee0] sm:$0xff]  ;;  %v522_v31 = vld [vmem:[%s20161_s1 + $0xec8] sm:$0xff] }
  0xb5   :  { %v526_v32 = vld [vmem:[%s20161_s1 + $0xee8] sm:$0xff] }
  0xb6   :  { %9928 = vmatpush1.bf16.msra.mxu0 %v13190_v47  ;;  %10487 = vmatpush1.bf16.msra.mxu1 %v13192_v48  ;;  %v474_v47 = vld [vmem:[%s20161_s1 + $0xd48] sm:$0xff] }
  0xb7   :  { %9929 = vmatprep.subr.bf16.mxu0 %v13199_v49  ;;  %10488 = vmatprep.subr.bf16.mxu1 %v13201_v50  ;;  %v478_v48 = vld [vmem:[%s20161_s1 + $0xd68] sm:$0xff]  ;;  %v13254_v49 = vcombine.low %v465_v37, %v469_v38  ;;  %v13256_v50 = vcombine.low %v466_v39, %v470_v40  ;;  %v529_v37 = vld [vmem:[%s20161_s1 + $0xf00] sm:$0xff] }
  0xb8   :  { %v13265_v52 = vcombine.high %v474_v47, %v478_v48  ;;  %v533_v38 = vld [vmem:[%s20161_s1 + $0xf20] sm:$0xff]  ;;  %v530_v39 = vld [vmem:[%s20161_s1 + $0xf08] sm:$0xff] }
  0xb9   :  { %v534_v40 = vld [vmem:[%s20161_s1 + $0xf28] sm:$0xff] }
  0xba   :  { %9930 = vmatpush1.bf16.msra.mxu0 %v13198_v55  ;;  %10489 = vmatpush1.bf16.msra.mxu1 %v13200_v56  ;;  %v482_v55 = vld [vmem:[%s20161_s1 + $0xd88] sm:$0xff] }
  0xbb   :  { %9931 = vmatprep.subr.bf16.mxu0 %v13207_v57  ;;  %10490 = vmatprep.subr.bf16.mxu1 %v13209_v58  ;;  %v486_v56 = vld [vmem:[%s20161_s1 + $0xda8] sm:$0xff]  ;;  %v13262_v57 = vcombine.low %v473_v45, %v477_v46  ;;  %v13264_v58 = vcombine.low %v474_v47, %v478_v48  ;;  %v537_v45 = vld [vmem:[%s20161_s1 + $0xf40] sm:$0xff] }
  0xbc   :  { %v13273_v60 = vcombine.high %v482_v55, %v486_v56  ;;  %v541_v46 = vld [vmem:[%s20161_s1 + $0xf60] sm:$0xff]  ;;  %v538_v47 = vld [vmem:[%s20161_s1 + $0xf48] sm:$0xff] }
  0xbd   :  { %v542_v48 = vld [vmem:[%s20161_s1 + $0xf68] sm:$0xff] }
  0xbe   :  { %9932 = vmatpush1.bf16.msra.mxu0 %v13206_v63  ;;  %10491 = vmatpush1.bf16.msra.mxu1 %v13208_v0  ;;  %v490_v63 = vld [vmem:[%s20161_s1 + $0xdc8] sm:$0xff] }
  0xbf   :  { %9933 = vmatprep.subr.bf16.mxu0 %v13215_v1  ;;  %10492 = vmatprep.subr.bf16.mxu1 %v13217_v2  ;;  %v494_v0 = vld [vmem:[%s20161_s1 + $0xde8] sm:$0xff]  ;;  %v13270_v1 = vcombine.low %v481_v53, %v485_v54  ;;  %v13272_v2 = vcombine.low %v482_v55, %v486_v56  ;;  %v545_v53 = vld [vmem:[%s20161_s1 + $0xf80] sm:$0xff] }
  0xc0   :  { %v13281_v4 = vcombine.high %v490_v63, %v494_v0  ;;  %v549_v54 = vld [vmem:[%s20161_s1 + $0xfa0] sm:$0xff]  ;;  %v546_v55 = vld [vmem:[%s20161_s1 + $0xf88] sm:$0xff] }
  0xc1   :  { %v550_v56 = vld [vmem:[%s20161_s1 + $0xfa8] sm:$0xff] }
  0xc2   :  { %9934 = vmatpush1.bf16.msra.mxu0 %v13214_v7  ;;  %10493 = vmatpush1.bf16.msra.mxu1 %v13216_v8  ;;  %v498_v7 = vld [vmem:[%s20161_s1 + $0xe08] sm:$0xff] }
  0xc3   :  { %9946 = vmatprep.subr.bf16.mxu0 %v13223_v9  ;;  %10505 = vmatprep.subr.bf16.mxu1 %v13225_v10  ;;  %v502_v8 = vld [vmem:[%s20161_s1 + $0xe28] sm:$0xff]  ;;  %v13278_v9 = vcombine.low %v489_v61, %v493_v62  ;;  %v13280_v10 = vcombine.low %v490_v63, %v494_v0  ;;  %v553_v61 = vld [vmem:[%s20161_s1 + $0xfc0] sm:$0xff] }
  0xc4   :  { %v13289_v12 = vcombine.high %v498_v7, %v502_v8  ;;  %v557_v62 = vld [vmem:[%s20161_s1 + $0xfe0] sm:$0xff]  ;;  %v554_v63 = vld [vmem:[%s20161_s1 + $0xfc8] sm:$0xff] }
  0xc5   :  { %9936 = vmatmul.mubr.bf16.vlgmr.msra.gmra.mrb[0].mxu0 %v14812_v13  ;;  %10495 = vmatmul.mubr.bf16.vlgmr.msra.gmra.mrb[0].mxu1 %v14812_v13  ;;  %v505_v13 = vld [vmem:[%s20161_s1 + $0xe40] sm:$0xff]  ;;  %v558_v0 = vld [vmem:[%s20161_s1 + $0xfe8] sm:$0xff] }
  0xc6   :  { %9947 = vmatpush1.bf16.msra.mxu0 %v13222_v16  ;;  %10506 = vmatpush1.bf16.msra.mxu1 %v13224_v17  ;;  %v510_v16 = vld [vmem:[%s20161_s1 + $0xe68] sm:$0xff]  ;;  %v13286_v17 = vcombine.low %v497_v5, %v501_v6  ;;  %v561_v5 = vld [vmem:[%s20161_s1 + $0x1000] sm:$0xff] }
  0xc7   :  { %9948 = vmatprep.subr.bf16.mxu0 %v13231_v18  ;;  %10507 = vmatprep.subr.bf16.mxu1 %v13233_v19  ;;  %v13288_v18 = vcombine.low %v498_v7, %v502_v8  ;;  %v13295_v19 = vcombine.high %v505_v13, %v509_v14  ;;  %v13297_v20 = vcombine.high %v506_v15, %v510_v16  ;;  %v565_v6 = vld [vmem:[%s20161_s1 + $0x1020] sm:$0xff]  ;;  %v562_v7 = vld [vmem:[%s20161_s1 + $0x1008] sm:$0xff] }
  0xc8   :  { %9978 = vmatprep.mubr.bf16.mxu0 %v14813_v22  ;;  %10537 = vmatprep.mubr.bf16.mxu1 %v14813_v22  ;;  %v517_v22 = vld [vmem:[%s20161_s1 + $0xea0] sm:$0xff]  ;;  %v566_v8 = vld [vmem:[%s20161_s1 + $0x1028] sm:$0xff] }
  0xca   :  { %9949 = vmatpush1.bf16.msra.mxu0 %v13230_v25  ;;  %10508 = vmatpush1.bf16.msra.mxu1 %v13232_v26  ;;  %v13294_v25 = vcombine.low %v505_v13, %v509_v14  ;;  %v13296_v26 = vcombine.low %v506_v15, %v510_v16  ;;  %v569_v13 = vld [vmem:[%s20161_s1 + $0x1040] sm:$0xff]  ;;  %v14815_v15 = vld [vmem:[%s20162_s0 + $0x18] ss:$100 sps:$4 sm:$0xff]   ;;  %v570_v16 = vld [vmem:[%s20161_s1 + $0x1048] sm:$0xff] }
  0xcb   :  { %9950 = vmatprep.subr.bf16.mxu0 %v13239_v27  ;;  %10509 = vmatprep.subr.bf16.mxu1 %v13241_v28  ;;  %v13303_v27 = vcombine.high %v513_v21, %v517_v22  ;;  %v13305_v28 = vcombine.high %v514_v23, %v518_v24  ;;  %v573_v14 = vld [vmem:[%s20161_s1 + $0x1060] sm:$0xff] }
  0xce   :  { %9951 = vmatpush1.bf16.msra.mxu0 %v13238_v33  ;;  %10510 = vmatpush1.bf16.msra.mxu1 %v13240_v34  ;;  %v13302_v33 = vcombine.low %v513_v21, %v517_v22  ;;  %v13304_v34 = vcombine.low %v514_v23, %v518_v24  ;;  %v577_v22 = vld [vmem:[%s20161_s1 + $0x1080] sm:$0xff] }
  0xcf   :  { %9952 = vmatprep.subr.bf16.mxu0 %v13247_v35  ;;  %10511 = vmatprep.subr.bf16.mxu1 %v13249_v36  ;;  %v13311_v35 = vcombine.high %v521_v29, %v525_v30  ;;  %v13313_v36 = vcombine.high %v522_v31, %v526_v32  ;;  %v581_v23 = vld [vmem:[%s20161_s1 + $0x10a0] sm:$0xff] }
  0xd0   :  { %v14816_v24 = vld [vmem:[%s20162_s0 + $0x24] ss:$100 sps:$4 sm:$0xff]  }
  0xd2   :  { %9953 = vmatpush1.bf16.msra.mxu0 %v13246_v41  ;;  %10512 = vmatpush1.bf16.msra.mxu1 %v13248_v42  ;;  %v13310_v41 = vcombine.low %v521_v29, %v525_v30  ;;  %v13312_v42 = vcombine.low %v522_v31, %v526_v32  ;;  %v13367_v29 = vcombine.high %v577_v22, %v581_v23  ;;  %v585_v31 = vld [vmem:[%s20161_s1 + $0x10c0] sm:$0xff] }
  0xd3   :  { %9954 = vmatprep.subr.bf16.mxu0 %v13255_v43  ;;  %10513 = vmatprep.subr.bf16.mxu1 %v13257_v44  ;;  %v13319_v43 = vcombine.high %v529_v37, %v533_v38  ;;  %v13321_v44 = vcombine.high %v530_v39, %v534_v40  ;;  %v589_v32 = vld [vmem:[%s20161_s1 + $0x10e0] sm:$0xff] }
  0xd6   :  { %9955 = vmatpush1.bf16.msra.mxu0 %v13254_v49  ;;  %10514 = vmatpush1.bf16.msra.mxu1 %v13256_v50  ;;  %v13318_v49 = vcombine.low %v529_v37, %v533_v38  ;;  %v13320_v50 = vcombine.low %v530_v39, %v534_v40  ;;  %v13375_v37 = vcombine.high %v585_v31, %v589_v32  ;;  %v593_v39 = vld [vmem:[%s20161_s1 + $0x1100] sm:$0xff] }
  0xd7   :  { %9956 = vmatprep.subr.bf16.mxu0 %v13263_v51  ;;  %10515 = vmatprep.subr.bf16.mxu1 %v13265_v52  ;;  %v13327_v51 = vcombine.high %v537_v45, %v541_v46  ;;  %v13329_v52 = vcombine.high %v538_v47, %v542_v48  ;;  %v597_v40 = vld [vmem:[%s20161_s1 + $0x1120] sm:$0xff] }
  0xda   :  { %9957 = vmatpush1.bf16.msra.mxu0 %v13262_v57  ;;  %10516 = vmatpush1.bf16.msra.mxu1 %v13264_v58  ;;  %v13326_v57 = vcombine.low %v537_v45, %v541_v46  ;;  %v13328_v58 = vcombine.low %v538_v47, %v542_v48  ;;  %v13383_v45 = vcombine.high %v593_v39, %v597_v40  ;;  %v601_v47 = vld [vmem:[%s20161_s1 + $0x1140] sm:$0xff] }
  0xdb   :  { %9958 = vmatprep.subr.bf16.mxu0 %v13271_v59  ;;  %10517 = vmatprep.subr.bf16.mxu1 %v13273_v60  ;;  %v13335_v59 = vcombine.high %v545_v53, %v549_v54  ;;  %v13337_v60 = vcombine.high %v546_v55, %v550_v56  ;;  %v605_v48 = vld [vmem:[%s20161_s1 + $0x1160] sm:$0xff] }
  0xde   :  { %9959 = vmatpush1.bf16.msra.mxu0 %v13270_v1  ;;  %10518 = vmatpush1.bf16.msra.mxu1 %v13272_v2  ;;  %v13334_v1 = vcombine.low %v545_v53, %v549_v54  ;;  %v13336_v2 = vcombine.low %v546_v55, %v550_v56  ;;  %v13391_v53 = vcombine.high %v601_v47, %v605_v48  ;;  %v609_v55 = vld [vmem:[%s20161_s1 + $0x1180] sm:$0xff] }
  0xdf   :  { %9960 = vmatprep.subr.bf16.mxu0 %v13279_v3  ;;  %10519 = vmatprep.subr.bf16.mxu1 %v13281_v4  ;;  %v13343_v3 = vcombine.high %v553_v61, %v557_v62  ;;  %v13345_v4 = vcombine.high %v554_v63, %v558_v0  ;;  %v613_v56 = vld [vmem:[%s20161_s1 + $0x11a0] sm:$0xff] }
  0xe2   :  { %9961 = vmatpush1.bf16.msra.mxu0 %v13278_v9  ;;  %10520 = vmatpush1.bf16.msra.mxu1 %v13280_v10  ;;  %v13342_v9 = vcombine.low %v553_v61, %v557_v62  ;;  %v13344_v10 = vcombine.low %v554_v63, %v558_v0  ;;  %v13399_v61 = vcombine.high %v609_v55, %v613_v56  ;;  %v617_v63 = vld [vmem:[%s20161_s1 + $0x11c0] sm:$0xff] }
  0xe3   :  { %9962 = vmatprep.subr.bf16.mxu0 %v13287_v11  ;;  %10521 = vmatprep.subr.bf16.mxu1 %v13289_v12  ;;  %v13351_v11 = vcombine.high %v561_v5, %v565_v6  ;;  %v13353_v12 = vcombine.high %v562_v7, %v566_v8  ;;  %v621_v0 = vld [vmem:[%s20161_s1 + $0x11e0] sm:$0xff] }
  0xe6   :  { %9963 = vmatpush1.bf16.msra.mxu0 %v13286_v17  ;;  %10522 = vmatpush1.bf16.msra.mxu1 %v13288_v18  ;;  %v574_v17 = vld [vmem:[%s20161_s1 + $0x1068] sm:$0xff]  ;;  %v13350_v18 = vcombine.low %v561_v5, %v565_v6  ;;  %v13407_v5 = vcombine.high %v617_v63, %v621_v0 }
  0xe7   :  { %9964 = vmatprep.subr.bf16.mxu0 %v13295_v19  ;;  %10523 = vmatprep.subr.bf16.mxu1 %v13297_v20  ;;  %v13352_v19 = vcombine.low %v562_v7, %v566_v8  ;;  %v13359_v20 = vcombine.high %v569_v13, %v573_v14  ;;  %v13361_v21 = vcombine.high %v570_v16, %v574_v17  ;;  %v625_v7 = vld [vmem:[%s20161_s1 + $0x1200] sm:$0xff] }
  0xe8   :  { %v629_v8 = vld [vmem:[%s20161_s1 + $0x1220] sm:$0xff] }
  0xea   :  { %9965 = vmatpush1.bf16.msra.mxu0 %v13294_v25  ;;  %10524 = vmatpush1.bf16.msra.mxu1 %v13296_v26  ;;  %v578_v25 = vld [vmem:[%s20161_s1 + $0x1088] sm:$0xff] }
  0xeb   :  { %9966 = vmatprep.subr.bf16.mxu0 %v13303_v27  ;;  %10525 = vmatprep.subr.bf16.mxu1 %v13305_v28  ;;  %v582_v26 = vld [vmem:[%s20161_s1 + $0x10a8] sm:$0xff]  ;;  %v13358_v27 = vcombine.low %v569_v13, %v573_v14  ;;  %v13360_v28 = vcombine.low %v570_v16, %v574_v17  ;;  %v13415_v13 = vcombine.high %v625_v7, %v629_v8  ;;  %v637_v16 = vld [vmem:[%s20161_s1 + $0x1260] sm:$0xff] }
  0xec   :  { %v13369_v30 = vcombine.high %v578_v25, %v582_v26  ;;  %v634_v17 = vld [vmem:[%s20161_s1 + $0x1248] sm:$0xff] }
  0xee   :  { %9967 = vmatpush1.bf16.msra.mxu0 %v13302_v33  ;;  %10526 = vmatpush1.bf16.msra.mxu1 %v13304_v34  ;;  %v586_v33 = vld [vmem:[%s20161_s1 + $0x10c8] sm:$0xff] }
  0xef   :  { %9968 = vmatprep.subr.bf16.mxu0 %v13311_v35  ;;  %10527 = vmatprep.subr.bf16.mxu1 %v13313_v36  ;;  %v590_v34 = vld [vmem:[%s20161_s1 + $0x10e8] sm:$0xff]  ;;  %v13366_v35 = vcombine.low %v577_v22, %v581_v23  ;;  %v13368_v36 = vcombine.low %v578_v25, %v582_v26  ;;  %v641_v23 = vld [vmem:[%s20161_s1 + $0x1280] sm:$0xff] }
  0xf0   :  { %v13377_v38 = vcombine.high %v586_v33, %v590_v34  ;;  %v642_v25 = vld [vmem:[%s20161_s1 + $0x1288] sm:$0xff] }
  0xf1   :  { %v646_v26 = vld [vmem:[%s20161_s1 + $0x12a8] sm:$0xff] }
  0xf2   :  { %9969 = vmatpush1.bf16.msra.mxu0 %v13310_v41  ;;  %10528 = vmatpush1.bf16.msra.mxu1 %v13312_v42  ;;  %v594_v41 = vld [vmem:[%s20161_s1 + $0x1108] sm:$0xff] }
  0xf3   :  { %9970 = vmatprep.subr.bf16.mxu0 %v13319_v43  ;;  %10529 = vmatprep.subr.bf16.mxu1 %v13321_v44  ;;  %v598_v42 = vld [vmem:[%s20161_s1 + $0x1128] sm:$0xff]  ;;  %v13374_v43 = vcombine.low %v585_v31, %v589_v32  ;;  %v13376_v44 = vcombine.low %v586_v33, %v590_v34  ;;  %v649_v31 = vld [vmem:[%s20161_s1 + $0x12c0] sm:$0xff] }
  0xf4   :  { %v13385_v46 = vcombine.high %v594_v41, %v598_v42  ;;  %v653_v32 = vld [vmem:[%s20161_s1 + $0x12e0] sm:$0xff]  ;;  %v650_v33 = vld [vmem:[%s20161_s1 + $0x12c8] sm:$0xff] }
  0xf5   :  { %v654_v34 = vld [vmem:[%s20161_s1 + $0x12e8] sm:$0xff] }
  0xf6   :  { %9971 = vmatpush1.bf16.msra.mxu0 %v13318_v49  ;;  %10530 = vmatpush1.bf16.msra.mxu1 %v13320_v50  ;;  %v602_v49 = vld [vmem:[%s20161_s1 + $0x1148] sm:$0xff] }
  0xf7   :  { %9972 = vmatprep.subr.bf16.mxu0 %v13327_v51  ;;  %10531 = vmatprep.subr.bf16.mxu1 %v13329_v52  ;;  %v606_v50 = vld [vmem:[%s20161_s1 + $0x1168] sm:$0xff]  ;;  %v13382_v51 = vcombine.low %v593_v39, %v597_v40  ;;  %v13384_v52 = vcombine.low %v594_v41, %v598_v42  ;;  %v657_v39 = vld [vmem:[%s20161_s1 + $0x1300] sm:$0xff] }
  0xf8   :  { %v13393_v54 = vcombine.high %v602_v49, %v606_v50  ;;  %v661_v40 = vld [vmem:[%s20161_s1 + $0x1320] sm:$0xff]  ;;  %v658_v41 = vld [vmem:[%s20161_s1 + $0x1308] sm:$0xff] }
  0xf9   :  { %v662_v42 = vld [vmem:[%s20161_s1 + $0x1328] sm:$0xff] }
  0xfa   :  { %9973 = vmatpush1.bf16.msra.mxu0 %v13326_v57  ;;  %10532 = vmatpush1.bf16.msra.mxu1 %v13328_v58  ;;  %v610_v57 = vld [vmem:[%s20161_s1 + $0x1188] sm:$0xff] }
  0xfb   :  { %9974 = vmatprep.subr.bf16.mxu0 %v13335_v59  ;;  %10533 = vmatprep.subr.bf16.mxu1 %v13337_v60  ;;  %v614_v58 = vld [vmem:[%s20161_s1 + $0x11a8] sm:$0xff]  ;;  %v13390_v59 = vcombine.low %v601_v47, %v605_v48  ;;  %v13392_v60 = vcombine.low %v602_v49, %v606_v50  ;;  %v665_v47 = vld [vmem:[%s20161_s1 + $0x1340] sm:$0xff] }
  0xfc   :  { %v13401_v62 = vcombine.high %v610_v57, %v614_v58  ;;  %v669_v48 = vld [vmem:[%s20161_s1 + $0x1360] sm:$0xff]  ;;  %v666_v49 = vld [vmem:[%s20161_s1 + $0x1348] sm:$0xff] }
  0xfd   :  { %v670_v50 = vld [vmem:[%s20161_s1 + $0x1368] sm:$0xff] }
  0xfe   :  { %9975 = vmatpush1.bf16.msra.mxu0 %v13334_v1  ;;  %10534 = vmatpush1.bf16.msra.mxu1 %v13336_v2  ;;  %v618_v1 = vld [vmem:[%s20161_s1 + $0x11c8] sm:$0xff] }
  0xff   :  { %9976 = vmatprep.subr.bf16.mxu0 %v13343_v3  ;;  %10535 = vmatprep.subr.bf16.mxu1 %v13345_v4  ;;  %v622_v2 = vld [vmem:[%s20161_s1 + $0x11e8] sm:$0xff]  ;;  %v13398_v3 = vcombine.low %v609_v55, %v613_v56  ;;  %v13400_v4 = vcombine.low %v610_v57, %v614_v58  ;;  %v673_v55 = vld [vmem:[%s20161_s1 + $0x1380] sm:$0xff] }
 0x100   :  { %v13409_v6 = vcombine.high %v618_v1, %v622_v2  ;;  %v677_v56 = vld [vmem:[%s20161_s1 + $0x13a0] sm:$0xff]  ;;  %v674_v57 = vld [vmem:[%s20161_s1 + $0x1388] sm:$0xff] }
 0x101   :  { %v678_v58 = vld [vmem:[%s20161_s1 + $0x13a8] sm:$0xff] }
 0x102   :  { %9977 = vmatpush1.bf16.msra.mxu0 %v13342_v9  ;;  %10536 = vmatpush1.bf16.msra.mxu1 %v13344_v10  ;;  %v626_v9 = vld [vmem:[%s20161_s1 + $0x1208] sm:$0xff] }
 0x103   :  { %9989 = vmatprep.subr.bf16.mxu0 %v13351_v11  ;;  %10548 = vmatprep.subr.bf16.mxu1 %v13353_v12  ;;  %v630_v10 = vld [vmem:[%s20161_s1 + $0x1228] sm:$0xff]  ;;  %v13406_v11 = vcombine.low %v617_v63, %v621_v0  ;;  %v13408_v12 = vcombine.low %v618_v1, %v622_v2  ;;  %v681_v63 = vld [vmem:[%s20161_s1 + $0x13c0] sm:$0xff] }
 0x104   :  { %v13417_v14 = vcombine.high %v626_v9, %v630_v10  ;;  %v685_v0 = vld [vmem:[%s20161_s1 + $0x13e0] sm:$0xff]  ;;  %v682_v1 = vld [vmem:[%s20161_s1 + $0x13c8] sm:$0xff] }
 0x105   :  { %9979 = vmatmul.mubr.bf16.vlgmr.msra.gmra.mrb[0].mxu0 %v14815_v15  ;;  %10538 = vmatmul.mubr.bf16.vlgmr.msra.gmra.mrb[0].mxu1 %v14815_v15  ;;  %v633_v15 = vld [vmem:[%s20161_s1 + $0x1240] sm:$0xff]  ;;  %v686_v2 = vld [vmem:[%s20161_s1 + $0x13e8] sm:$0xff] }
 0x106   :  { %9990 = vmatpush1.bf16.msra.mxu0 %v13350_v18  ;;  %10549 = vmatpush1.bf16.msra.mxu1 %v13352_v19  ;;  %v638_v18 = vld [vmem:[%s20161_s1 + $0x1268] sm:$0xff]  ;;  %v13414_v19 = vcombine.low %v625_v7, %v629_v8  ;;  %v689_v7 = vld [vmem:[%s20161_s1 + $0x1400] sm:$0xff] }
 0x107   :  { %9991 = vmatprep.subr.bf16.mxu0 %v13359_v20  ;;  %10550 = vmatprep.subr.bf16.mxu1 %v13361_v21  ;;  %v13416_v20 = vcombine.low %v626_v9, %v630_v10  ;;  %v13423_v21 = vcombine.high %v633_v15, %v637_v16  ;;  %v13425_v22 = vcombine.high %v634_v17, %v638_v18  ;;  %v693_v8 = vld [vmem:[%s20161_s1 + $0x1420] sm:$0xff]  ;;  %v690_v9 = vld [vmem:[%s20161_s1 + $0x1408] sm:$0xff] }
 0x108   :  { %10021 = vmatprep.mubr.bf16.mxu0 %v14816_v24  ;;  %10580 = vmatprep.mubr.bf16.mxu1 %v14816_v24  ;;  %v645_v24 = vld [vmem:[%s20161_s1 + $0x12a0] sm:$0xff]  ;;  %v694_v10 = vld [vmem:[%s20161_s1 + $0x1428] sm:$0xff] }
 0x10a   :  { %9992 = vmatpush1.bf16.msra.mxu0 %v13358_v27  ;;  %10551 = vmatpush1.bf16.msra.mxu1 %v13360_v28  ;;  %v13422_v27 = vcombine.low %v633_v15, %v637_v16  ;;  %v13424_v28 = vcombine.low %v634_v17, %v638_v18  ;;  %v697_v15 = vld [vmem:[%s20161_s1 + $0x1440] sm:$0xff]  ;;  %v698_v18 = vld [vmem:[%s20161_s1 + $0x1448] sm:$0xff] }
 0x10b   :  { %9993 = vmatprep.subr.bf16.mxu0 %v13367_v29  ;;  %10552 = vmatprep.subr.bf16.mxu1 %v13369_v30  ;;  %v13431_v29 = vcombine.high %v641_v23, %v645_v24  ;;  %v13433_v30 = vcombine.high %v642_v25, %v646_v26  ;;  %v701_v16 = vld [vmem:[%s20161_s1 + $0x1460] sm:$0xff] }
 0x10c   :  { %v14818_v17 = vld [vmem:[%s20162_s0 + $0x20] ss:$100 sps:$4 sm:$0xff]  }
 0x10e   :  { %9994 = vmatpush1.bf16.msra.mxu0 %v13366_v35  ;;  %10553 = vmatpush1.bf16.msra.mxu1 %v13368_v36  ;;  %v13430_v35 = vcombine.low %v641_v23, %v645_v24  ;;  %v13432_v36 = vcombine.low %v642_v25, %v646_v26  ;;  %v705_v24 = vld [vmem:[%s20161_s1 + $0x1480] sm:$0xff]  ;;  %v14819_v26 = vld [vmem:[%s20162_s0 + $0x2c] ss:$100 sps:$4 sm:$0xff]  }
 0x10f   :  { %9995 = vmatprep.subr.bf16.mxu0 %v13375_v37  ;;  %10554 = vmatprep.subr.bf16.mxu1 %v13377_v38  ;;  %v13439_v37 = vcombine.high %v649_v31, %v653_v32  ;;  %v13441_v38 = vcombine.high %v650_v33, %v654_v34  ;;  %v709_v25 = vld [vmem:[%s20161_s1 + $0x14a0] sm:$0xff] }
 0x112   :  { %9996 = vmatpush1.bf16.msra.mxu0 %v13374_v43  ;;  %10555 = vmatpush1.bf16.msra.mxu1 %v13376_v44  ;;  %v13438_v43 = vcombine.low %v649_v31, %v653_v32  ;;  %v13440_v44 = vcombine.low %v650_v33, %v654_v34  ;;  %v13495_v31 = vcombine.high %v705_v24, %v709_v25  ;;  %v713_v33 = vld [vmem:[%s20161_s1 + $0x14c0] sm:$0xff] }
 0x113   :  { %9997 = vmatprep.subr.bf16.mxu0 %v13383_v45  ;;  %10556 = vmatprep.subr.bf16.mxu1 %v13385_v46  ;;  %v13447_v45 = vcombine.high %v657_v39, %v661_v40  ;;  %v13449_v46 = vcombine.high %v658_v41, %v662_v42  ;;  %v717_v34 = vld [vmem:[%s20161_s1 + $0x14e0] sm:$0xff] }
 0x116   :  { %9998 = vmatpush1.bf16.msra.mxu0 %v13382_v51  ;;  %10557 = vmatpush1.bf16.msra.mxu1 %v13384_v52  ;;  %v13446_v51 = vcombine.low %v657_v39, %v661_v40  ;;  %v13448_v52 = vcombine.low %v658_v41, %v662_v42  ;;  %v13503_v39 = vcombine.high %v713_v33, %v717_v34  ;;  %v721_v41 = vld [vmem:[%s20161_s1 + $0x1500] sm:$0xff] }
 0x117   :  { %9999 = vmatprep.subr.bf16.mxu0 %v13391_v53  ;;  %10558 = vmatprep.subr.bf16.mxu1 %v13393_v54  ;;  %v13455_v53 = vcombine.high %v665_v47, %v669_v48  ;;  %v13457_v54 = vcombine.high %v666_v49, %v670_v50  ;;  %v725_v42 = vld [vmem:[%s20161_s1 + $0x1520] sm:$0xff] }
 0x11a   :  { %10000 = vmatpush1.bf16.msra.mxu0 %v13390_v59  ;;  %10559 = vmatpush1.bf16.msra.mxu1 %v13392_v60  ;;  %v13454_v59 = vcombine.low %v665_v47, %v669_v48  ;;  %v13456_v60 = vcombine.low %v666_v49, %v670_v50  ;;  %v13511_v47 = vcombine.high %v721_v41, %v725_v42  ;;  %v729_v49 = vld [vmem:[%s20161_s1 + $0x1540] sm:$0xff] }
 0x11b   :  { %10001 = vmatprep.subr.bf16.mxu0 %v13399_v61  ;;  %10560 = vmatprep.subr.bf16.mxu1 %v13401_v62  ;;  %v13463_v61 = vcombine.high %v673_v55, %v677_v56  ;;  %v13465_v62 = vcombine.high %v674_v57, %v678_v58  ;;  %v733_v50 = vld [vmem:[%s20161_s1 + $0x1560] sm:$0xff] }
 0x11e   :  { %10002 = vmatpush1.bf16.msra.mxu0 %v13398_v3  ;;  %10561 = vmatpush1.bf16.msra.mxu1 %v13400_v4  ;;  %v13462_v3 = vcombine.low %v673_v55, %v677_v56  ;;  %v13464_v4 = vcombine.low %v674_v57, %v678_v58  ;;  %v13519_v55 = vcombine.high %v729_v49, %v733_v50  ;;  %v737_v57 = vld [vmem:[%s20161_s1 + $0x1580] sm:$0xff] }
 0x11f   :  { %10003 = vmatprep.subr.bf16.mxu0 %v13407_v5  ;;  %10562 = vmatprep.subr.bf16.mxu1 %v13409_v6  ;;  %v13471_v5 = vcombine.high %v681_v63, %v685_v0  ;;  %v13473_v6 = vcombine.high %v682_v1, %v686_v2  ;;  %v741_v58 = vld [vmem:[%s20161_s1 + $0x15a0] sm:$0xff] }
 0x122   :  { %10004 = vmatpush1.bf16.msra.mxu0 %v13406_v11  ;;  %10563 = vmatpush1.bf16.msra.mxu1 %v13408_v12  ;;  %v13470_v11 = vcombine.low %v681_v63, %v685_v0  ;;  %v13472_v12 = vcombine.low %v682_v1, %v686_v2  ;;  %v13527_v63 = vcombine.high %v737_v57, %v741_v58  ;;  %v745_v1 = vld [vmem:[%s20161_s1 + $0x15c0] sm:$0xff] }
 0x123   :  { %10005 = vmatprep.subr.bf16.mxu0 %v13415_v13  ;;  %10564 = vmatprep.subr.bf16.mxu1 %v13417_v14  ;;  %v13479_v13 = vcombine.high %v689_v7, %v693_v8  ;;  %v13481_v14 = vcombine.high %v690_v9, %v694_v10  ;;  %v749_v2 = vld [vmem:[%s20161_s1 + $0x15e0] sm:$0xff] }
 0x126   :  { %10006 = vmatpush1.bf16.msra.mxu0 %v13414_v19  ;;  %10565 = vmatpush1.bf16.msra.mxu1 %v13416_v20  ;;  %v702_v19 = vld [vmem:[%s20161_s1 + $0x1468] sm:$0xff]  ;;  %v13478_v20 = vcombine.low %v689_v7, %v693_v8  ;;  %v13535_v7 = vcombine.high %v745_v1, %v749_v2 }
 0x127   :  { %10007 = vmatprep.subr.bf16.mxu0 %v13423_v21  ;;  %10566 = vmatprep.subr.bf16.mxu1 %v13425_v22  ;;  %v13480_v21 = vcombine.low %v690_v9, %v694_v10  ;;  %v13487_v22 = vcombine.high %v697_v15, %v701_v16  ;;  %v13489_v23 = vcombine.high %v698_v18, %v702_v19  ;;  %v753_v9 = vld [vmem:[%s20161_s1 + $0x1600] sm:$0xff] }
 0x128   :  { %v757_v10 = vld [vmem:[%s20161_s1 + $0x1620] sm:$0xff] }
 0x12a   :  { %10008 = vmatpush1.bf16.msra.mxu0 %v13422_v27  ;;  %10567 = vmatpush1.bf16.msra.mxu1 %v13424_v28  ;;  %v706_v27 = vld [vmem:[%s20161_s1 + $0x1488] sm:$0xff] }
 0x12b   :  { %10009 = vmatprep.subr.bf16.mxu0 %v13431_v29  ;;  %10568 = vmatprep.subr.bf16.mxu1 %v13433_v30  ;;  %v710_v28 = vld [vmem:[%s20161_s1 + $0x14a8] sm:$0xff]  ;;  %v13486_v29 = vcombine.low %v697_v15, %v701_v16  ;;  %v13488_v30 = vcombine.low %v698_v18, %v702_v19  ;;  %v13543_v15 = vcombine.high %v753_v9, %v757_v10  ;;  %v765_v18 = vld [vmem:[%s20161_s1 + $0x1660] sm:$0xff] }
 0x12c   :  { %v13497_v32 = vcombine.high %v706_v27, %v710_v28  ;;  %v762_v19 = vld [vmem:[%s20161_s1 + $0x1648] sm:$0xff] }
 0x12e   :  { %10010 = vmatpush1.bf16.msra.mxu0 %v13430_v35  ;;  %10569 = vmatpush1.bf16.msra.mxu1 %v13432_v36  ;;  %v714_v35 = vld [vmem:[%s20161_s1 + $0x14c8] sm:$0xff] }
 0x12f   :  { %10011 = vmatprep.subr.bf16.mxu0 %v13439_v37  ;;  %10570 = vmatprep.subr.bf16.mxu1 %v13441_v38  ;;  %v718_v36 = vld [vmem:[%s20161_s1 + $0x14e8] sm:$0xff]  ;;  %v13494_v37 = vcombine.low %v705_v24, %v709_v25  ;;  %v13496_v38 = vcombine.low %v706_v27, %v710_v28  ;;  %v769_v25 = vld [vmem:[%s20161_s1 + $0x1680] sm:$0xff] }
 0x130   :  { %v13505_v40 = vcombine.high %v714_v35, %v718_v36  ;;  %v770_v27 = vld [vmem:[%s20161_s1 + $0x1688] sm:$0xff] }
 0x131   :  { %v774_v28 = vld [vmem:[%s20161_s1 + $0x16a8] sm:$0xff] }
 0x132   :  { %10012 = vmatpush1.bf16.msra.mxu0 %v13438_v43  ;;  %10571 = vmatpush1.bf16.msra.mxu1 %v13440_v44  ;;  %v722_v43 = vld [vmem:[%s20161_s1 + $0x1508] sm:$0xff] }
 0x133   :  { %10013 = vmatprep.subr.bf16.mxu0 %v13447_v45  ;;  %10572 = vmatprep.subr.bf16.mxu1 %v13449_v46  ;;  %v726_v44 = vld [vmem:[%s20161_s1 + $0x1528] sm:$0xff]  ;;  %v13502_v45 = vcombine.low %v713_v33, %v717_v34  ;;  %v13504_v46 = vcombine.low %v714_v35, %v718_v36  ;;  %v777_v33 = vld [vmem:[%s20161_s1 + $0x16c0] sm:$0xff] }
 0x134   :  { %v13513_v48 = vcombine.high %v722_v43, %v726_v44  ;;  %v781_v34 = vld [vmem:[%s20161_s1 + $0x16e0] sm:$0xff]  ;;  %v778_v35 = vld [vmem:[%s20161_s1 + $0x16c8] sm:$0xff] }
 0x135   :  { %v782_v36 = vld [vmem:[%s20161_s1 + $0x16e8] sm:$0xff] }
 0x136   :  { %10014 = vmatpush1.bf16.msra.mxu0 %v13446_v51  ;;  %10573 = vmatpush1.bf16.msra.mxu1 %v13448_v52  ;;  %v730_v51 = vld [vmem:[%s20161_s1 + $0x1548] sm:$0xff] }
 0x137   :  { %10015 = vmatprep.subr.bf16.mxu0 %v13455_v53  ;;  %10574 = vmatprep.subr.bf16.mxu1 %v13457_v54  ;;  %v734_v52 = vld [vmem:[%s20161_s1 + $0x1568] sm:$0xff]  ;;  %v13510_v53 = vcombine.low %v721_v41, %v725_v42  ;;  %v13512_v54 = vcombine.low %v722_v43, %v726_v44  ;;  %v785_v41 = vld [vmem:[%s20161_s1 + $0x1700] sm:$0xff] }
 0x138   :  { %v13521_v56 = vcombine.high %v730_v51, %v734_v52  ;;  %v789_v42 = vld [vmem:[%s20161_s1 + $0x1720] sm:$0xff]  ;;  %v786_v43 = vld [vmem:[%s20161_s1 + $0x1708] sm:$0xff] }
 0x139   :  { %v790_v44 = vld [vmem:[%s20161_s1 + $0x1728] sm:$0xff] }
 0x13a   :  { %10016 = vmatpush1.bf16.msra.mxu0 %v13454_v59  ;;  %10575 = vmatpush1.bf16.msra.mxu1 %v13456_v60  ;;  %v738_v59 = vld [vmem:[%s20161_s1 + $0x1588] sm:$0xff] }
 0x13b   :  { %10017 = vmatprep.subr.bf16.mxu0 %v13463_v61  ;;  %10576 = vmatprep.subr.bf16.mxu1 %v13465_v62  ;;  %v742_v60 = vld [vmem:[%s20161_s1 + $0x15a8] sm:$0xff]  ;;  %v13518_v61 = vcombine.low %v729_v49, %v733_v50  ;;  %v13520_v62 = vcombine.low %v730_v51, %v734_v52  ;;  %v793_v49 = vld [vmem:[%s20161_s1 + $0x1740] sm:$0xff] }
 0x13c   :  { %v13529_v0 = vcombine.high %v738_v59, %v742_v60  ;;  %v797_v50 = vld [vmem:[%s20161_s1 + $0x1760] sm:$0xff]  ;;  %v794_v51 = vld [vmem:[%s20161_s1 + $0x1748] sm:$0xff] }
 0x13d   :  { %v798_v52 = vld [vmem:[%s20161_s1 + $0x1768] sm:$0xff] }
 0x13e   :  { %10018 = vmatpush1.bf16.msra.mxu0 %v13462_v3  ;;  %10577 = vmatpush1.bf16.msra.mxu1 %v13464_v4  ;;  %v746_v3 = vld [vmem:[%s20161_s1 + $0x15c8] sm:$0xff] }
 0x13f   :  { %10019 = vmatprep.subr.bf16.mxu0 %v13471_v5  ;;  %10578 = vmatprep.subr.bf16.mxu1 %v13473_v6  ;;  %v750_v4 = vld [vmem:[%s20161_s1 + $0x15e8] sm:$0xff]  ;;  %v13526_v5 = vcombine.low %v737_v57, %v741_v58  ;;  %v13528_v6 = vcombine.low %v738_v59, %v742_v60  ;;  %v801_v57 = vld [vmem:[%s20161_s1 + $0x1780] sm:$0xff] }
 0x140   :  { %v13537_v8 = vcombine.high %v746_v3, %v750_v4  ;;  %v805_v58 = vld [vmem:[%s20161_s1 + $0x17a0] sm:$0xff]  ;;  %v802_v59 = vld [vmem:[%s20161_s1 + $0x1788] sm:$0xff] }
 0x141   :  { %v806_v60 = vld [vmem:[%s20161_s1 + $0x17a8] sm:$0xff] }
 0x142   :  { %10020 = vmatpush1.bf16.msra.mxu0 %v13470_v11  ;;  %10579 = vmatpush1.bf16.msra.mxu1 %v13472_v12  ;;  %v754_v11 = vld [vmem:[%s20161_s1 + $0x1608] sm:$0xff] }
 0x143   :  { %10032 = vmatprep.subr.bf16.mxu0 %v13479_v13  ;;  %10591 = vmatprep.subr.bf16.mxu1 %v13481_v14  ;;  %v758_v12 = vld [vmem:[%s20161_s1 + $0x1628] sm:$0xff]  ;;  %v13534_v13 = vcombine.low %v745_v1, %v749_v2  ;;  %v13536_v14 = vcombine.low %v746_v3, %v750_v4  ;;  %v809_v1 = vld [vmem:[%s20161_s1 + $0x17c0] sm:$0xff] }
 0x144   :  { %v13545_v16 = vcombine.high %v754_v11, %v758_v12  ;;  %v813_v2 = vld [vmem:[%s20161_s1 + $0x17e0] sm:$0xff]  ;;  %v810_v3 = vld [vmem:[%s20161_s1 + $0x17c8] sm:$0xff] }
 0x145   :  { %10022 = vmatmul.mubr.bf16.vlgmr.msra.gmra.mrb[0].mxu0 %v14818_v17  ;;  %10581 = vmatmul.mubr.bf16.vlgmr.msra.gmra.mrb[0].mxu1 %v14818_v17  ;;  %v761_v17 = vld [vmem:[%s20161_s1 + $0x1640] sm:$0xff]  ;;  %v814_v4 = vld [vmem:[%s20161_s1 + $0x17e8] sm:$0xff] }
 0x146   :  { %10033 = vmatpush1.bf16.msra.mxu0 %v13478_v20  ;;  %10592 = vmatpush1.bf16.msra.mxu1 %v13480_v21  ;;  %v766_v20 = vld [vmem:[%s20161_s1 + $0x1668] sm:$0xff]  ;;  %v13542_v21 = vcombine.low %v753_v9, %v757_v10  ;;  %v817_v9 = vld [vmem:[%s20161_s1 + $0x1800] sm:$0xff] }
 0x147   :  { %10034 = vmatprep.subr.bf16.mxu0 %v13487_v22  ;;  %10593 = vmatprep.subr.bf16.mxu1 %v13489_v23  ;;  %v13544_v22 = vcombine.low %v754_v11, %v758_v12  ;;  %v13551_v23 = vcombine.high %v761_v17, %v765_v18  ;;  %v13553_v24 = vcombine.high %v762_v19, %v766_v20  ;;  %v821_v10 = vld [vmem:[%s20161_s1 + $0x1820] sm:$0xff]  ;;  %v818_v11 = vld [vmem:[%s20161_s1 + $0x1808] sm:$0xff] }
 0x148   :  { %10064 = vmatprep.mubr.bf16.mxu0 %v14819_v26  ;;  %10623 = vmatprep.mubr.bf16.mxu1 %v14819_v26  ;;  %v773_v26 = vld [vmem:[%s20161_s1 + $0x16a0] sm:$0xff]  ;;  %v822_v12 = vld [vmem:[%s20161_s1 + $0x1828] sm:$0xff] }
 0x14a   :  { %10035 = vmatpush1.bf16.msra.mxu0 %v13486_v29  ;;  %10594 = vmatpush1.bf16.msra.mxu1 %v13488_v30  ;;  %v13550_v29 = vcombine.low %v761_v17, %v765_v18  ;;  %v13552_v30 = vcombine.low %v762_v19, %v766_v20  ;;  %v825_v17 = vld [vmem:[%s20161_s1 + $0x1840] sm:$0xff]  ;;  %v14821_v19 = vld [vmem:[%s20162_s0 + $0x28] ss:$100 sps:$4 sm:$0xff]  }
 0x14b   :  { %10036 = vmatprep.subr.bf16.mxu0 %v13495_v31  ;;  %10595 = vmatprep.subr.bf16.mxu1 %v13497_v32  ;;  %v13559_v31 = vcombine.high %v769_v25, %v773_v26  ;;  %v13561_v32 = vcombine.high %v770_v27, %v774_v28  ;;  %v829_v18 = vld [vmem:[%s20161_s1 + $0x1860] sm:$0xff]  ;;  %v826_v20 = vld [vmem:[%s20161_s1 + $0x1848] sm:$0xff] }
 0x14e   :  { %10037 = vmatpush1.bf16.msra.mxu0 %v13494_v37  ;;  %10596 = vmatpush1.bf16.msra.mxu1 %v13496_v38  ;;  %v13558_v37 = vcombine.low %v769_v25, %v773_v26  ;;  %v13560_v38 = vcombine.low %v770_v27, %v774_v28  ;;  %v833_v26 = vld [vmem:[%s20161_s1 + $0x1880] sm:$0xff]  ;;  %v14822_v28 = vld [vmem:[%s20162_s0 + $0x34] ss:$100 sps:$4 sm:$0xff]  }
 0x14f   :  { %10038 = vmatprep.subr.bf16.mxu0 %v13503_v39  ;;  %10597 = vmatprep.subr.bf16.mxu1 %v13505_v40  ;;  %v13567_v39 = vcombine.high %v777_v33, %v781_v34  ;;  %v13569_v40 = vcombine.high %v778_v35, %v782_v36  ;;  %v837_v27 = vld [vmem:[%s20161_s1 + $0x18a0] sm:$0xff] }
 0x152   :  { %10039 = vmatpush1.bf16.msra.mxu0 %v13502_v45  ;;  %10598 = vmatpush1.bf16.msra.mxu1 %v13504_v46  ;;  %v13566_v45 = vcombine.low %v777_v33, %v781_v34  ;;  %v13568_v46 = vcombine.low %v778_v35, %v782_v36  ;;  %v13623_v33 = vcombine.high %v833_v26, %v837_v27  ;;  %v841_v35 = vld [vmem:[%s20161_s1 + $0x18c0] sm:$0xff] }
 0x153   :  { %10040 = vmatprep.subr.bf16.mxu0 %v13511_v47  ;;  %10599 = vmatprep.subr.bf16.mxu1 %v13513_v48  ;;  %v13575_v47 = vcombine.high %v785_v41, %v789_v42  ;;  %v13577_v48 = vcombine.high %v786_v43, %v790_v44  ;;  %v845_v36 = vld [vmem:[%s20161_s1 + $0x18e0] sm:$0xff] }
 0x156   :  { %10041 = vmatpush1.bf16.msra.mxu0 %v13510_v53  ;;  %10600 = vmatpush1.bf16.msra.mxu1 %v13512_v54  ;;  %v13574_v53 = vcombine.low %v785_v41, %v789_v42  ;;  %v13576_v54 = vcombine.low %v786_v43, %v790_v44  ;;  %v13631_v41 = vcombine.high %v841_v35, %v845_v36  ;;  %v849_v43 = vld [vmem:[%s20161_s1 + $0x1900] sm:$0xff] }
 0x157   :  { %10042 = vmatprep.subr.bf16.mxu0 %v13519_v55  ;;  %10601 = vmatprep.subr.bf16.mxu1 %v13521_v56  ;;  %v13583_v55 = vcombine.high %v793_v49, %v797_v50  ;;  %v13585_v56 = vcombine.high %v794_v51, %v798_v52  ;;  %v853_v44 = vld [vmem:[%s20161_s1 + $0x1920] sm:$0xff] }
 0x15a   :  { %10043 = vmatpush1.bf16.msra.mxu0 %v13518_v61  ;;  %10602 = vmatpush1.bf16.msra.mxu1 %v13520_v62  ;;  %v13582_v61 = vcombine.low %v793_v49, %v797_v50  ;;  %v13584_v62 = vcombine.low %v794_v51, %v798_v52  ;;  %v13639_v49 = vcombine.high %v849_v43, %v853_v44  ;;  %v857_v51 = vld [vmem:[%s20161_s1 + $0x1940] sm:$0xff] }
 0x15b   :  { %10044 = vmatprep.subr.bf16.mxu0 %v13527_v63  ;;  %10603 = vmatprep.subr.bf16.mxu1 %v13529_v0  ;;  %v13591_v63 = vcombine.high %v801_v57, %v805_v58  ;;  %v13593_v0 = vcombine.high %v802_v59, %v806_v60  ;;  %v861_v52 = vld [vmem:[%s20161_s1 + $0x1960] sm:$0xff] }
 0x15e   :  { %10045 = vmatpush1.bf16.msra.mxu0 %v13526_v5  ;;  %10604 = vmatpush1.bf16.msra.mxu1 %v13528_v6  ;;  %v13590_v5 = vcombine.low %v801_v57, %v805_v58  ;;  %v13592_v6 = vcombine.low %v802_v59, %v806_v60  ;;  %v13647_v57 = vcombine.high %v857_v51, %v861_v52  ;;  %v865_v59 = vld [vmem:[%s20161_s1 + $0x1980] sm:$0xff] }
 0x15f   :  { %10046 = vmatprep.subr.bf16.mxu0 %v13535_v7  ;;  %10605 = vmatprep.subr.bf16.mxu1 %v13537_v8  ;;  %v13599_v7 = vcombine.high %v809_v1, %v813_v2  ;;  %v13601_v8 = vcombine.high %v810_v3, %v814_v4  ;;  %v869_v60 = vld [vmem:[%s20161_s1 + $0x19a0] sm:$0xff] }
 0x162   :  { %10047 = vmatpush1.bf16.msra.mxu0 %v13534_v13  ;;  %10606 = vmatpush1.bf16.msra.mxu1 %v13536_v14  ;;  %v13598_v13 = vcombine.low %v809_v1, %v813_v2  ;;  %v13600_v14 = vcombine.low %v810_v3, %v814_v4  ;;  %v13655_v1 = vcombine.high %v865_v59, %v869_v60  ;;  %v873_v3 = vld [vmem:[%s20161_s1 + $0x19c0] sm:$0xff] }
 0x163   :  { %10048 = vmatprep.subr.bf16.mxu0 %v13543_v15  ;;  %10607 = vmatprep.subr.bf16.mxu1 %v13545_v16  ;;  %v13607_v15 = vcombine.high %v817_v9, %v821_v10  ;;  %v13609_v16 = vcombine.high %v818_v11, %v822_v12  ;;  %v877_v4 = vld [vmem:[%s20161_s1 + $0x19e0] sm:$0xff] }
 0x166   :  { %10049 = vmatpush1.bf16.msra.mxu0 %v13542_v21  ;;  %10608 = vmatpush1.bf16.msra.mxu1 %v13544_v22  ;;  %v830_v21 = vld [vmem:[%s20161_s1 + $0x1868] sm:$0xff]  ;;  %v13606_v22 = vcombine.low %v817_v9, %v821_v10  ;;  %v13663_v9 = vcombine.high %v873_v3, %v877_v4 }
 0x167   :  { %10050 = vmatprep.subr.bf16.mxu0 %v13551_v23  ;;  %10609 = vmatprep.subr.bf16.mxu1 %v13553_v24  ;;  %v13608_v23 = vcombine.low %v818_v11, %v822_v12  ;;  %v13615_v24 = vcombine.high %v825_v17, %v829_v18  ;;  %v13617_v25 = vcombine.high %v826_v20, %v830_v21  ;;  %v881_v11 = vld [vmem:[%s20161_s1 + $0x1a00] sm:$0xff] }
 0x168   :  { %v885_v12 = vld [vmem:[%s20161_s1 + $0x1a20] sm:$0xff] }
 0x16a   :  { %10051 = vmatpush1.bf16.msra.mxu0 %v13550_v29  ;;  %10610 = vmatpush1.bf16.msra.mxu1 %v13552_v30  ;;  %v834_v29 = vld [vmem:[%s20161_s1 + $0x1888] sm:$0xff] }
 0x16b   :  { %10052 = vmatprep.subr.bf16.mxu0 %v13559_v31  ;;  %10611 = vmatprep.subr.bf16.mxu1 %v13561_v32  ;;  %v838_v30 = vld [vmem:[%s20161_s1 + $0x18a8] sm:$0xff]  ;;  %v13614_v31 = vcombine.low %v825_v17, %v829_v18  ;;  %v13616_v32 = vcombine.low %v826_v20, %v830_v21  ;;  %v13671_v17 = vcombine.high %v881_v11, %v885_v12  ;;  %v893_v20 = vld [vmem:[%s20161_s1 + $0x1a60] sm:$0xff] }
 0x16c   :  { %v13625_v34 = vcombine.high %v834_v29, %v838_v30  ;;  %v890_v21 = vld [vmem:[%s20161_s1 + $0x1a48] sm:$0xff] }
 0x16e   :  { %10053 = vmatpush1.bf16.msra.mxu0 %v13558_v37  ;;  %10612 = vmatpush1.bf16.msra.mxu1 %v13560_v38  ;;  %v842_v37 = vld [vmem:[%s20161_s1 + $0x18c8] sm:$0xff] }
 0x16f   :  { %10054 = vmatprep.subr.bf16.mxu0 %v13567_v39  ;;  %10613 = vmatprep.subr.bf16.mxu1 %v13569_v40  ;;  %v846_v38 = vld [vmem:[%s20161_s1 + $0x18e8] sm:$0xff]  ;;  %v13622_v39 = vcombine.low %v833_v26, %v837_v27  ;;  %v13624_v40 = vcombine.low %v834_v29, %v838_v30  ;;  %v897_v27 = vld [vmem:[%s20161_s1 + $0x1a80] sm:$0xff] }
 0x170   :  { %v13633_v42 = vcombine.high %v842_v37, %v846_v38  ;;  %v898_v29 = vld [vmem:[%s20161_s1 + $0x1a88] sm:$0xff] }
 0x171   :  { %v902_v30 = vld [vmem:[%s20161_s1 + $0x1aa8] sm:$0xff] }
 0x172   :  { %10055 = vmatpush1.bf16.msra.mxu0 %v13566_v45  ;;  %10614 = vmatpush1.bf16.msra.mxu1 %v13568_v46  ;;  %v850_v45 = vld [vmem:[%s20161_s1 + $0x1908] sm:$0xff] }
 0x173   :  { %10056 = vmatprep.subr.bf16.mxu0 %v13575_v47  ;;  %10615 = vmatprep.subr.bf16.mxu1 %v13577_v48  ;;  %v854_v46 = vld [vmem:[%s20161_s1 + $0x1928] sm:$0xff]  ;;  %v13630_v47 = vcombine.low %v841_v35, %v845_v36  ;;  %v13632_v48 = vcombine.low %v842_v37, %v846_v38  ;;  %v905_v35 = vld [vmem:[%s20161_s1 + $0x1ac0] sm:$0xff] }
 0x174   :  { %v13641_v50 = vcombine.high %v850_v45, %v854_v46  ;;  %v909_v36 = vld [vmem:[%s20161_s1 + $0x1ae0] sm:$0xff]  ;;  %v906_v37 = vld [vmem:[%s20161_s1 + $0x1ac8] sm:$0xff] }
 0x175   :  { %v910_v38 = vld [vmem:[%s20161_s1 + $0x1ae8] sm:$0xff] }
 0x176   :  { %10057 = vmatpush1.bf16.msra.mxu0 %v13574_v53  ;;  %10616 = vmatpush1.bf16.msra.mxu1 %v13576_v54  ;;  %v858_v53 = vld [vmem:[%s20161_s1 + $0x1948] sm:$0xff] }
 0x177   :  { %10058 = vmatprep.subr.bf16.mxu0 %v13583_v55  ;;  %10617 = vmatprep.subr.bf16.mxu1 %v13585_v56  ;;  %v862_v54 = vld [vmem:[%s20161_s1 + $0x1968] sm:$0xff]  ;;  %v13638_v55 = vcombine.low %v849_v43, %v853_v44  ;;  %v13640_v56 = vcombine.low %v850_v45, %v854_v46  ;;  %v913_v43 = vld [vmem:[%s20161_s1 + $0x1b00] sm:$0xff] }
 0x178   :  { %v13649_v58 = vcombine.high %v858_v53, %v862_v54  ;;  %v917_v44 = vld [vmem:[%s20161_s1 + $0x1b20] sm:$0xff]  ;;  %v914_v45 = vld [vmem:[%s20161_s1 + $0x1b08] sm:$0xff] }
 0x179   :  { %v918_v46 = vld [vmem:[%s20161_s1 + $0x1b28] sm:$0xff] }
 0x17a   :  { %10059 = vmatpush1.bf16.msra.mxu0 %v13582_v61  ;;  %10618 = vmatpush1.bf16.msra.mxu1 %v13584_v62  ;;  %v866_v61 = vld [vmem:[%s20161_s1 + $0x1988] sm:$0xff] }
 0x17b   :  { %10060 = vmatprep.subr.bf16.mxu0 %v13591_v63  ;;  %10619 = vmatprep.subr.bf16.mxu1 %v13593_v0  ;;  %v870_v62 = vld [vmem:[%s20161_s1 + $0x19a8] sm:$0xff]  ;;  %v13646_v63 = vcombine.low %v857_v51, %v861_v52  ;;  %v13648_v0 = vcombine.low %v858_v53, %v862_v54  ;;  %v921_v51 = vld [vmem:[%s20161_s1 + $0x1b40] sm:$0xff] }
 0x17c   :  { %v13657_v2 = vcombine.high %v866_v61, %v870_v62  ;;  %v925_v52 = vld [vmem:[%s20161_s1 + $0x1b60] sm:$0xff]  ;;  %v922_v53 = vld [vmem:[%s20161_s1 + $0x1b48] sm:$0xff] }
 0x17d   :  { %v926_v54 = vld [vmem:[%s20161_s1 + $0x1b68] sm:$0xff] }
 0x17e   :  { %10061 = vmatpush1.bf16.msra.mxu0 %v13590_v5  ;;  %10620 = vmatpush1.bf16.msra.mxu1 %v13592_v6  ;;  %v874_v5 = vld [vmem:[%s20161_s1 + $0x19c8] sm:$0xff] }
 0x17f   :  { %10062 = vmatprep.subr.bf16.mxu0 %v13599_v7  ;;  %10621 = vmatprep.subr.bf16.mxu1 %v13601_v8  ;;  %v878_v6 = vld [vmem:[%s20161_s1 + $0x19e8] sm:$0xff]  ;;  %v13654_v7 = vcombine.low %v865_v59, %v869_v60  ;;  %v13656_v8 = vcombine.low %v866_v61, %v870_v62  ;;  %v929_v59 = vld [vmem:[%s20161_s1 + $0x1b80] sm:$0xff] }
 0x180   :  { %v13665_v10 = vcombine.high %v874_v5, %v878_v6  ;;  %v933_v60 = vld [vmem:[%s20161_s1 + $0x1ba0] sm:$0xff]  ;;  %v930_v61 = vld [vmem:[%s20161_s1 + $0x1b88] sm:$0xff] }
 0x181   :  { %v934_v62 = vld [vmem:[%s20161_s1 + $0x1ba8] sm:$0xff] }
 0x182   :  { %10063 = vmatpush1.bf16.msra.mxu0 %v13598_v13  ;;  %10622 = vmatpush1.bf16.msra.mxu1 %v13600_v14  ;;  %v882_v13 = vld [vmem:[%s20161_s1 + $0x1a08] sm:$0xff] }
 0x183   :  { %10075 = vmatprep.subr.bf16.mxu0 %v13607_v15  ;;  %10634 = vmatprep.subr.bf16.mxu1 %v13609_v16  ;;  %v886_v14 = vld [vmem:[%s20161_s1 + $0x1a28] sm:$0xff]  ;;  %v13662_v15 = vcombine.low %v873_v3, %v877_v4  ;;  %v13664_v16 = vcombine.low %v874_v5, %v878_v6  ;;  %v937_v3 = vld [vmem:[%s20161_s1 + $0x1bc0] sm:$0xff] }
 0x184   :  { %v13673_v18 = vcombine.high %v882_v13, %v886_v14  ;;  %v941_v4 = vld [vmem:[%s20161_s1 + $0x1be0] sm:$0xff]  ;;  %v938_v5 = vld [vmem:[%s20161_s1 + $0x1bc8] sm:$0xff] }
 0x185   :  { %10065 = vmatmul.mubr.bf16.vlgmr.msra.gmra.mrb[0].mxu0 %v14821_v19  ;;  %10624 = vmatmul.mubr.bf16.vlgmr.msra.gmra.mrb[0].mxu1 %v14821_v19  ;;  %v889_v19 = vld [vmem:[%s20161_s1 + $0x1a40] sm:$0xff]  ;;  %v942_v6 = vld [vmem:[%s20161_s1 + $0x1be8] sm:$0xff] }
 0x186   :  { %10076 = vmatpush1.bf16.msra.mxu0 %v13606_v22  ;;  %10635 = vmatpush1.bf16.msra.mxu1 %v13608_v23  ;;  %v894_v22 = vld [vmem:[%s20161_s1 + $0x1a68] sm:$0xff]  ;;  %v13670_v23 = vcombine.low %v881_v11, %v885_v12  ;;  %v945_v11 = vld [vmem:[%s20161_s1 + $0x1c00] sm:$0xff] }
 0x187   :  { %10077 = vmatprep.subr.bf16.mxu0 %v13615_v24  ;;  %10636 = vmatprep.subr.bf16.mxu1 %v13617_v25  ;;  %v13672_v24 = vcombine.low %v882_v13, %v886_v14  ;;  %v13679_v25 = vcombine.high %v889_v19, %v893_v20  ;;  %v13681_v26 = vcombine.high %v890_v21, %v894_v22  ;;  %v949_v12 = vld [vmem:[%s20161_s1 + $0x1c20] sm:$0xff]  ;;  %v946_v13 = vld [vmem:[%s20161_s1 + $0x1c08] sm:$0xff] }
 0x188   :  { %10107 = vmatprep.mubr.bf16.mxu0 %v14822_v28  ;;  %10666 = vmatprep.mubr.bf16.mxu1 %v14822_v28  ;;  %v901_v28 = vld [vmem:[%s20161_s1 + $0x1aa0] sm:$0xff]  ;;  %v950_v14 = vld [vmem:[%s20161_s1 + $0x1c28] sm:$0xff] }
 0x18a   :  { %10078 = vmatpush1.bf16.msra.mxu0 %v13614_v31  ;;  %10637 = vmatpush1.bf16.msra.mxu1 %v13616_v32  ;;  %v13678_v31 = vcombine.low %v889_v19, %v893_v20  ;;  %v13680_v32 = vcombine.low %v890_v21, %v894_v22  ;;  %v953_v19 = vld [vmem:[%s20161_s1 + $0x1c40] sm:$0xff]  ;;  %v14824_v21 = vld [vmem:[%s20162_s0 + $0x30] ss:$100 sps:$4 sm:$0xff]   ;;  %v954_v22 = vld [vmem:[%s20161_s1 + $0x1c48] sm:$0xff] }
 0x18b   :  { %10079 = vmatprep.subr.bf16.mxu0 %v13623_v33  ;;  %10638 = vmatprep.subr.bf16.mxu1 %v13625_v34  ;;  %v13687_v33 = vcombine.high %v897_v27, %v901_v28  ;;  %v13689_v34 = vcombine.high %v898_v29, %v902_v30  ;;  %v957_v20 = vld [vmem:[%s20161_s1 + $0x1c60] sm:$0xff] }
 0x18e   :  { %10080 = vmatpush1.bf16.msra.mxu0 %v13622_v39  ;;  %10639 = vmatpush1.bf16.msra.mxu1 %v13624_v40  ;;  %v13686_v39 = vcombine.low %v897_v27, %v901_v28  ;;  %v13688_v40 = vcombine.low %v898_v29, %v902_v30  ;;  %v961_v28 = vld [vmem:[%s20161_s1 + $0x1c80] sm:$0xff] }
 0x18f   :  { %10081 = vmatprep.subr.bf16.mxu0 %v13631_v41  ;;  %10640 = vmatprep.subr.bf16.mxu1 %v13633_v42  ;;  %v13695_v41 = vcombine.high %v905_v35, %v909_v36  ;;  %v13697_v42 = vcombine.high %v906_v37, %v910_v38  ;;  %v965_v29 = vld [vmem:[%s20161_s1 + $0x1ca0] sm:$0xff] }
 0x190   :  { %v14825_v30 = vld [vmem:[%s20162_s0 + $0x3c] ss:$100 sps:$4 sm:$0xff]  }
 0x192   :  { %10082 = vmatpush1.bf16.msra.mxu0 %v13630_v47  ;;  %10641 = vmatpush1.bf16.msra.mxu1 %v13632_v48  ;;  %v13694_v47 = vcombine.low %v905_v35, %v909_v36  ;;  %v13696_v48 = vcombine.low %v906_v37, %v910_v38  ;;  %v13751_v35 = vcombine.high %v961_v28, %v965_v29  ;;  %v969_v37 = vld [vmem:[%s20161_s1 + $0x1cc0] sm:$0xff] }
 0x193   :  { %10083 = vmatprep.subr.bf16.mxu0 %v13639_v49  ;;  %10642 = vmatprep.subr.bf16.mxu1 %v13641_v50  ;;  %v13703_v49 = vcombine.high %v913_v43, %v917_v44  ;;  %v13705_v50 = vcombine.high %v914_v45, %v918_v46  ;;  %v973_v38 = vld [vmem:[%s20161_s1 + $0x1ce0] sm:$0xff] }
 0x196   :  { %10084 = vmatpush1.bf16.msra.mxu0 %v13638_v55  ;;  %10643 = vmatpush1.bf16.msra.mxu1 %v13640_v56  ;;  %v13702_v55 = vcombine.low %v913_v43, %v917_v44  ;;  %v13704_v56 = vcombine.low %v914_v45, %v918_v46  ;;  %v13759_v43 = vcombine.high %v969_v37, %v973_v38  ;;  %v977_v45 = vld [vmem:[%s20161_s1 + $0x1d00] sm:$0xff] }
 0x197   :  { %10085 = vmatprep.subr.bf16.mxu0 %v13647_v57  ;;  %10644 = vmatprep.subr.bf16.mxu1 %v13649_v58  ;;  %v13711_v57 = vcombine.high %v921_v51, %v925_v52  ;;  %v13713_v58 = vcombine.high %v922_v53, %v926_v54  ;;  %v981_v46 = vld [vmem:[%s20161_s1 + $0x1d20] sm:$0xff] }
 0x19a   :  { %10086 = vmatpush1.bf16.msra.mxu0 %v13646_v63  ;;  %10645 = vmatpush1.bf16.msra.mxu1 %v13648_v0  ;;  %v13710_v63 = vcombine.low %v921_v51, %v925_v52  ;;  %v13712_v0 = vcombine.low %v922_v53, %v926_v54  ;;  %v13767_v51 = vcombine.high %v977_v45, %v981_v46  ;;  %v985_v53 = vld [vmem:[%s20161_s1 + $0x1d40] sm:$0xff] }
 0x19b   :  { %10087 = vmatprep.subr.bf16.mxu0 %v13655_v1  ;;  %10646 = vmatprep.subr.bf16.mxu1 %v13657_v2  ;;  %v13719_v1 = vcombine.high %v929_v59, %v933_v60  ;;  %v13721_v2 = vcombine.high %v930_v61, %v934_v62  ;;  %v989_v54 = vld [vmem:[%s20161_s1 + $0x1d60] sm:$0xff] }
 0x19e   :  { %10088 = vmatpush1.bf16.msra.mxu0 %v13654_v7  ;;  %10647 = vmatpush1.bf16.msra.mxu1 %v13656_v8  ;;  %v13718_v7 = vcombine.low %v929_v59, %v933_v60  ;;  %v13720_v8 = vcombine.low %v930_v61, %v934_v62  ;;  %v13775_v59 = vcombine.high %v985_v53, %v989_v54  ;;  %v993_v61 = vld [vmem:[%s20161_s1 + $0x1d80] sm:$0xff] }
 0x19f   :  { %10089 = vmatprep.subr.bf16.mxu0 %v13663_v9  ;;  %10648 = vmatprep.subr.bf16.mxu1 %v13665_v10  ;;  %v13727_v9 = vcombine.high %v937_v3, %v941_v4  ;;  %v13729_v10 = vcombine.high %v938_v5, %v942_v6  ;;  %v997_v62 = vld [vmem:[%s20161_s1 + $0x1da0] sm:$0xff] }
 0x1a2   :  { %10090 = vmatpush1.bf16.msra.mxu0 %v13662_v15  ;;  %10649 = vmatpush1.bf16.msra.mxu1 %v13664_v16  ;;  %v13726_v15 = vcombine.low %v937_v3, %v941_v4  ;;  %v13728_v16 = vcombine.low %v938_v5, %v942_v6  ;;  %v13783_v3 = vcombine.high %v993_v61, %v997_v62  ;;  %v1001_v5 = vld [vmem:[%s20161_s1 + $0x1dc0] sm:$0xff] }
 0x1a3   :  { %10091 = vmatprep.subr.bf16.mxu0 %v13671_v17  ;;  %10650 = vmatprep.subr.bf16.mxu1 %v13673_v18  ;;  %v13735_v17 = vcombine.high %v945_v11, %v949_v12  ;;  %v13737_v18 = vcombine.high %v946_v13, %v950_v14  ;;  %v1005_v6 = vld [vmem:[%s20161_s1 + $0x1de0] sm:$0xff] }
 0x1a6   :  { %10092 = vmatpush1.bf16.msra.mxu0 %v13670_v23  ;;  %10651 = vmatpush1.bf16.msra.mxu1 %v13672_v24  ;;  %v958_v23 = vld [vmem:[%s20161_s1 + $0x1c68] sm:$0xff]  ;;  %v13734_v24 = vcombine.low %v945_v11, %v949_v12  ;;  %v13791_v11 = vcombine.high %v1001_v5, %v1005_v6 }
 0x1a7   :  { %10093 = vmatprep.subr.bf16.mxu0 %v13679_v25  ;;  %10652 = vmatprep.subr.bf16.mxu1 %v13681_v26  ;;  %v13736_v25 = vcombine.low %v946_v13, %v950_v14  ;;  %v13743_v26 = vcombine.high %v953_v19, %v957_v20  ;;  %v13745_v27 = vcombine.high %v954_v22, %v958_v23  ;;  %v1009_v13 = vld [vmem:[%s20161_s1 + $0x1e00] sm:$0xff] }
 0x1a8   :  { %v1013_v14 = vld [vmem:[%s20161_s1 + $0x1e20] sm:$0xff] }
 0x1aa   :  { %10094 = vmatpush1.bf16.msra.mxu0 %v13678_v31  ;;  %10653 = vmatpush1.bf16.msra.mxu1 %v13680_v32  ;;  %v962_v31 = vld [vmem:[%s20161_s1 + $0x1c88] sm:$0xff] }
 0x1ab   :  { %10095 = vmatprep.subr.bf16.mxu0 %v13687_v33  ;;  %10654 = vmatprep.subr.bf16.mxu1 %v13689_v34  ;;  %v966_v32 = vld [vmem:[%s20161_s1 + $0x1ca8] sm:$0xff]  ;;  %v13742_v33 = vcombine.low %v953_v19, %v957_v20  ;;  %v13744_v34 = vcombine.low %v954_v22, %v958_v23  ;;  %v13799_v19 = vcombine.high %v1009_v13, %v1013_v14  ;;  %v1021_v22 = vld [vmem:[%s20161_s1 + $0x1e60] sm:$0xff] }
 0x1ac   :  { %v13753_v36 = vcombine.high %v962_v31, %v966_v32  ;;  %v1018_v23 = vld [vmem:[%s20161_s1 + $0x1e48] sm:$0xff] }
 0x1ae   :  { %10096 = vmatpush1.bf16.msra.mxu0 %v13686_v39  ;;  %10655 = vmatpush1.bf16.msra.mxu1 %v13688_v40  ;;  %v970_v39 = vld [vmem:[%s20161_s1 + $0x1cc8] sm:$0xff] }
 0x1af   :  { %10097 = vmatprep.subr.bf16.mxu0 %v13695_v41  ;;  %10656 = vmatprep.subr.bf16.mxu1 %v13697_v42  ;;  %v974_v40 = vld [vmem:[%s20161_s1 + $0x1ce8] sm:$0xff]  ;;  %v13750_v41 = vcombine.low %v961_v28, %v965_v29  ;;  %v13752_v42 = vcombine.low %v962_v31, %v966_v32  ;;  %v1025_v29 = vld [vmem:[%s20161_s1 + $0x1e80] sm:$0xff] }
 0x1b0   :  { %v13761_v44 = vcombine.high %v970_v39, %v974_v40  ;;  %v1026_v31 = vld [vmem:[%s20161_s1 + $0x1e88] sm:$0xff] }
 0x1b1   :  { %v1030_v32 = vld [vmem:[%s20161_s1 + $0x1ea8] sm:$0xff] }
 0x1b2   :  { %10098 = vmatpush1.bf16.msra.mxu0 %v13694_v47  ;;  %10657 = vmatpush1.bf16.msra.mxu1 %v13696_v48  ;;  %v978_v47 = vld [vmem:[%s20161_s1 + $0x1d08] sm:$0xff] }
 0x1b3   :  { %10099 = vmatprep.subr.bf16.mxu0 %v13703_v49  ;;  %10658 = vmatprep.subr.bf16.mxu1 %v13705_v50  ;;  %v982_v48 = vld [vmem:[%s20161_s1 + $0x1d28] sm:$0xff]  ;;  %v13758_v49 = vcombine.low %v969_v37, %v973_v38  ;;  %v13760_v50 = vcombine.low %v970_v39, %v974_v40  ;;  %v1033_v37 = vld [vmem:[%s20161_s1 + $0x1ec0] sm:$0xff] }
 0x1b4   :  { %v13769_v52 = vcombine.high %v978_v47, %v982_v48  ;;  %v1037_v38 = vld [vmem:[%s20161_s1 + $0x1ee0] sm:$0xff]  ;;  %v1034_v39 = vld [vmem:[%s20161_s1 + $0x1ec8] sm:$0xff] }
 0x1b5   :  { %v1038_v40 = vld [vmem:[%s20161_s1 + $0x1ee8] sm:$0xff] }
 0x1b6   :  { %10100 = vmatpush1.bf16.msra.mxu0 %v13702_v55  ;;  %10659 = vmatpush1.bf16.msra.mxu1 %v13704_v56  ;;  %v986_v55 = vld [vmem:[%s20161_s1 + $0x1d48] sm:$0xff] }
 0x1b7   :  { %10101 = vmatprep.subr.bf16.mxu0 %v13711_v57  ;;  %10660 = vmatprep.subr.bf16.mxu1 %v13713_v58  ;;  %v990_v56 = vld [vmem:[%s20161_s1 + $0x1d68] sm:$0xff]  ;;  %v13766_v57 = vcombine.low %v977_v45, %v981_v46  ;;  %v13768_v58 = vcombine.low %v978_v47, %v982_v48  ;;  %v1041_v45 = vld [vmem:[%s20161_s1 + $0x1f00] sm:$0xff] }
 0x1b8   :  { %v13777_v60 = vcombine.high %v986_v55, %v990_v56  ;;  %v1045_v46 = vld [vmem:[%s20161_s1 + $0x1f20] sm:$0xff]  ;;  %v1042_v47 = vld [vmem:[%s20161_s1 + $0x1f08] sm:$0xff] }
 0x1b9   :  { %v1046_v48 = vld [vmem:[%s20161_s1 + $0x1f28] sm:$0xff] }
 0x1ba   :  { %10102 = vmatpush1.bf16.msra.mxu0 %v13710_v63  ;;  %10661 = vmatpush1.bf16.msra.mxu1 %v13712_v0  ;;  %v994_v63 = vld [vmem:[%s20161_s1 + $0x1d88] sm:$0xff] }
 0x1bb   :  { %10103 = vmatprep.subr.bf16.mxu0 %v13719_v1  ;;  %10662 = vmatprep.subr.bf16.mxu1 %v13721_v2  ;;  %v998_v0 = vld [vmem:[%s20161_s1 + $0x1da8] sm:$0xff]  ;;  %v13774_v1 = vcombine.low %v985_v53, %v989_v54  ;;  %v13776_v2 = vcombine.low %v986_v55, %v990_v56  ;;  %v1049_v53 = vld [vmem:[%s20161_s1 + $0x1f40] sm:$0xff] }
 0x1bc   :  { %v13785_v4 = vcombine.high %v994_v63, %v998_v0  ;;  %v1053_v54 = vld [vmem:[%s20161_s1 + $0x1f60] sm:$0xff]  ;;  %v1050_v55 = vld [vmem:[%s20161_s1 + $0x1f48] sm:$0xff] }
 0x1bd   :  { %v1054_v56 = vld [vmem:[%s20161_s1 + $0x1f68] sm:$0xff] }
 0x1be   :  { %10104 = vmatpush1.bf16.msra.mxu0 %v13718_v7  ;;  %10663 = vmatpush1.bf16.msra.mxu1 %v13720_v8  ;;  %v1002_v7 = vld [vmem:[%s20161_s1 + $0x1dc8] sm:$0xff] }
 0x1bf   :  { %10105 = vmatprep.subr.bf16.mxu0 %v13727_v9  ;;  %10664 = vmatprep.subr.bf16.mxu1 %v13729_v10  ;;  %v1006_v8 = vld [vmem:[%s20161_s1 + $0x1de8] sm:$0xff]  ;;  %v13782_v9 = vcombine.low %v993_v61, %v997_v62  ;;  %v13784_v10 = vcombine.low %v994_v63, %v998_v0  ;;  %v1057_v61 = vld [vmem:[%s20161_s1 + $0x1f80] sm:$0xff] }
 0x1c0   :  { %v13793_v12 = vcombine.high %v1002_v7, %v1006_v8  ;;  %v1061_v62 = vld [vmem:[%s20161_s1 + $0x1fa0] sm:$0xff]  ;;  %v1058_v63 = vld [vmem:[%s20161_s1 + $0x1f88] sm:$0xff] }
 0x1c1   :  { %v1062_v0 = vld [vmem:[%s20161_s1 + $0x1fa8] sm:$0xff] }
 0x1c2   :  { %10106 = vmatpush1.bf16.msra.mxu0 %v13726_v15  ;;  %10665 = vmatpush1.bf16.msra.mxu1 %v13728_v16  ;;  %v1010_v15 = vld [vmem:[%s20161_s1 + $0x1e08] sm:$0xff] }
 0x1c3   :  { %10118 = vmatprep.subr.bf16.mxu0 %v13735_v17  ;;  %10677 = vmatprep.subr.bf16.mxu1 %v13737_v18  ;;  %v1014_v16 = vld [vmem:[%s20161_s1 + $0x1e28] sm:$0xff]  ;;  %v13790_v17 = vcombine.low %v1001_v5, %v1005_v6  ;;  %v13792_v18 = vcombine.low %v1002_v7, %v1006_v8  ;;  %v1065_v5 = vld [vmem:[%s20161_s1 + $0x1fc0] sm:$0xff] }
 0x1c4   :  { %v13801_v20 = vcombine.high %v1010_v15, %v1014_v16  ;;  %v1069_v6 = vld [vmem:[%s20161_s1 + $0x1fe0] sm:$0xff]  ;;  %v1066_v7 = vld [vmem:[%s20161_s1 + $0x1fc8] sm:$0xff] }
 0x1c5   :  { %10108 = vmatmul.mubr.bf16.vlgmr.msra.gmra.mrb[0].mxu0 %v14824_v21  ;;  %10667 = vmatmul.mubr.bf16.vlgmr.msra.gmra.mrb[0].mxu1 %v14824_v21  ;;  %v1017_v21 = vld [vmem:[%s20161_s1 + $0x1e40] sm:$0xff]  ;;  %v1070_v8 = vld [vmem:[%s20161_s1 + $0x1fe8] sm:$0xff] }
 0x1c6   :  { %10119 = vmatpush1.bf16.msra.mxu0 %v13734_v24  ;;  %10678 = vmatpush1.bf16.msra.mxu1 %v13736_v25  ;;  %v1022_v24 = vld [vmem:[%s20161_s1 + $0x1e68] sm:$0xff]  ;;  %v13798_v25 = vcombine.low %v1009_v13, %v1013_v14  ;;  %v1073_v13 = vld [vmem:[%s20161_s1 + $0x2000] sm:$0xff] }
 0x1c7   :  { %10120 = vmatprep.subr.bf16.mxu0 %v13743_v26  ;;  %10679 = vmatprep.subr.bf16.mxu1 %v13745_v27  ;;  %v13800_v26 = vcombine.low %v1010_v15, %v1014_v16  ;;  %v13807_v27 = vcombine.high %v1017_v21, %v1021_v22  ;;  %v13809_v28 = vcombine.high %v1018_v23, %v1022_v24  ;;  %v1077_v14 = vld [vmem:[%s20161_s1 + $0x2020] sm:$0xff]  ;;  %v1074_v15 = vld [vmem:[%s20161_s1 + $0x2008] sm:$0xff] }
 0x1c8   :  { %10150 = vmatprep.mubr.bf16.mxu0 %v14825_v30  ;;  %10709 = vmatprep.mubr.bf16.mxu1 %v14825_v30  ;;  %v1029_v30 = vld [vmem:[%s20161_s1 + $0x1ea0] sm:$0xff]  ;;  %v1078_v16 = vld [vmem:[%s20161_s1 + $0x2028] sm:$0xff] }
 0x1ca   :  { %10121 = vmatpush1.bf16.msra.mxu0 %v13742_v33  ;;  %10680 = vmatpush1.bf16.msra.mxu1 %v13744_v34  ;;  %v13806_v33 = vcombine.low %v1017_v21, %v1021_v22  ;;  %v13808_v34 = vcombine.low %v1018_v23, %v1022_v24  ;;  %v1081_v21 = vld [vmem:[%s20161_s1 + $0x2040] sm:$0xff]  ;;  %v14827_v23 = vld [vmem:[%s20162_s0 + $0x38] ss:$100 sps:$4 sm:$0xff]   ;;  %v1082_v24 = vld [vmem:[%s20161_s1 + $0x2048] sm:$0xff] }
 0x1cb   :  { %10122 = vmatprep.subr.bf16.mxu0 %v13751_v35  ;;  %10681 = vmatprep.subr.bf16.mxu1 %v13753_v36  ;;  %v13815_v35 = vcombine.high %v1025_v29, %v1029_v30  ;;  %v13817_v36 = vcombine.high %v1026_v31, %v1030_v32  ;;  %v1085_v22 = vld [vmem:[%s20161_s1 + $0x2060] sm:$0xff] }
 0x1ce   :  { %10123 = vmatpush1.bf16.msra.mxu0 %v13750_v41  ;;  %10682 = vmatpush1.bf16.msra.mxu1 %v13752_v42  ;;  %v13814_v41 = vcombine.low %v1025_v29, %v1029_v30  ;;  %v13816_v42 = vcombine.low %v1026_v31, %v1030_v32  ;;  %v1089_v30 = vld [vmem:[%s20161_s1 + $0x2080] sm:$0xff] }
 0x1cf   :  { %10124 = vmatprep.subr.bf16.mxu0 %v13759_v43  ;;  %10683 = vmatprep.subr.bf16.mxu1 %v13761_v44  ;;  %v13823_v43 = vcombine.high %v1033_v37, %v1037_v38  ;;  %v13825_v44 = vcombine.high %v1034_v39, %v1038_v40  ;;  %v1093_v31 = vld [vmem:[%s20161_s1 + $0x20a0] sm:$0xff] }
 0x1d0   :  { %v14828_v32 = vld [vmem:[%s20162_s0 + $0x44] ss:$100 sps:$4 sm:$0xff]  }
 0x1d2   :  { %10125 = vmatpush1.bf16.msra.mxu0 %v13758_v49  ;;  %10684 = vmatpush1.bf16.msra.mxu1 %v13760_v50  ;;  %v13822_v49 = vcombine.low %v1033_v37, %v1037_v38  ;;  %v13824_v50 = vcombine.low %v1034_v39, %v1038_v40  ;;  %v13879_v37 = vcombine.high %v1089_v30, %v1093_v31  ;;  %v1097_v39 = vld [vmem:[%s20161_s1 + $0x20c0] sm:$0xff] }
 0x1d3   :  { %10126 = vmatprep.subr.bf16.mxu0 %v13767_v51  ;;  %10685 = vmatprep.subr.bf16.mxu1 %v13769_v52  ;;  %v13831_v51 = vcombine.high %v1041_v45, %v1045_v46  ;;  %v13833_v52 = vcombine.high %v1042_v47, %v1046_v48  ;;  %v1101_v40 = vld [vmem:[%s20161_s1 + $0x20e0] sm:$0xff] }
 0x1d6   :  { %10127 = vmatpush1.bf16.msra.mxu0 %v13766_v57  ;;  %10686 = vmatpush1.bf16.msra.mxu1 %v13768_v58  ;;  %v13830_v57 = vcombine.low %v1041_v45, %v1045_v46  ;;  %v13832_v58 = vcombine.low %v1042_v47, %v1046_v48  ;;  %v13887_v45 = vcombine.high %v1097_v39, %v1101_v40  ;;  %v1105_v47 = vld [vmem:[%s20161_s1 + $0x2100] sm:$0xff] }
 0x1d7   :  { %10128 = vmatprep.subr.bf16.mxu0 %v13775_v59  ;;  %10687 = vmatprep.subr.bf16.mxu1 %v13777_v60  ;;  %v13839_v59 = vcombine.high %v1049_v53, %v1053_v54  ;;  %v13841_v60 = vcombine.high %v1050_v55, %v1054_v56  ;;  %v1109_v48 = vld [vmem:[%s20161_s1 + $0x2120] sm:$0xff] }
 0x1da   :  { %10129 = vmatpush1.bf16.msra.mxu0 %v13774_v1  ;;  %10688 = vmatpush1.bf16.msra.mxu1 %v13776_v2  ;;  %v13838_v1 = vcombine.low %v1049_v53, %v1053_v54  ;;  %v13840_v2 = vcombine.low %v1050_v55, %v1054_v56  ;;  %v13895_v53 = vcombine.high %v1105_v47, %v1109_v48  ;;  %v1113_v55 = vld [vmem:[%s20161_s1 + $0x2140] sm:$0xff] }
 0x1db   :  { %10130 = vmatprep.subr.bf16.mxu0 %v13783_v3  ;;  %10689 = vmatprep.subr.bf16.mxu1 %v13785_v4  ;;  %v13847_v3 = vcombine.high %v1057_v61, %v1061_v62  ;;  %v13849_v4 = vcombine.high %v1058_v63, %v1062_v0  ;;  %v1117_v56 = vld [vmem:[%s20161_s1 + $0x2160] sm:$0xff] }
 0x1de   :  { %10131 = vmatpush1.bf16.msra.mxu0 %v13782_v9  ;;  %10690 = vmatpush1.bf16.msra.mxu1 %v13784_v10  ;;  %v13846_v9 = vcombine.low %v1057_v61, %v1061_v62  ;;  %v13848_v10 = vcombine.low %v1058_v63, %v1062_v0  ;;  %v13903_v61 = vcombine.high %v1113_v55, %v1117_v56  ;;  %v1121_v63 = vld [vmem:[%s20161_s1 + $0x2180] sm:$0xff] }
 0x1df   :  { %10132 = vmatprep.subr.bf16.mxu0 %v13791_v11  ;;  %10691 = vmatprep.subr.bf16.mxu1 %v13793_v12  ;;  %v13855_v11 = vcombine.high %v1065_v5, %v1069_v6  ;;  %v13857_v12 = vcombine.high %v1066_v7, %v1070_v8  ;;  %v1125_v0 = vld [vmem:[%s20161_s1 + $0x21a0] sm:$0xff] }
 0x1e2   :  { %10133 = vmatpush1.bf16.msra.mxu0 %v13790_v17  ;;  %10692 = vmatpush1.bf16.msra.mxu1 %v13792_v18  ;;  %v13854_v17 = vcombine.low %v1065_v5, %v1069_v6  ;;  %v13856_v18 = vcombine.low %v1066_v7, %v1070_v8  ;;  %v13911_v5 = vcombine.high %v1121_v63, %v1125_v0  ;;  %v1129_v7 = vld [vmem:[%s20161_s1 + $0x21c0] sm:$0xff] }
 0x1e3   :  { %10134 = vmatprep.subr.bf16.mxu0 %v13799_v19  ;;  %10693 = vmatprep.subr.bf16.mxu1 %v13801_v20  ;;  %v13863_v19 = vcombine.high %v1073_v13, %v1077_v14  ;;  %v13865_v20 = vcombine.high %v1074_v15, %v1078_v16  ;;  %v1133_v8 = vld [vmem:[%s20161_s1 + $0x21e0] sm:$0xff] }
 0x1e6   :  { %10135 = vmatpush1.bf16.msra.mxu0 %v13798_v25  ;;  %10694 = vmatpush1.bf16.msra.mxu1 %v13800_v26  ;;  %v1086_v25 = vld [vmem:[%s20161_s1 + $0x2068] sm:$0xff]  ;;  %v13862_v26 = vcombine.low %v1073_v13, %v1077_v14  ;;  %v13919_v13 = vcombine.high %v1129_v7, %v1133_v8 }
 0x1e7   :  { %10136 = vmatprep.subr.bf16.mxu0 %v13807_v27  ;;  %10695 = vmatprep.subr.bf16.mxu1 %v13809_v28  ;;  %v13864_v27 = vcombine.low %v1074_v15, %v1078_v16  ;;  %v13871_v28 = vcombine.high %v1081_v21, %v1085_v22  ;;  %v13873_v29 = vcombine.high %v1082_v24, %v1086_v25  ;;  %v1137_v15 = vld [vmem:[%s20161_s1 + $0x2200] sm:$0xff] }
 0x1e8   :  { %v1141_v16 = vld [vmem:[%s20161_s1 + $0x2220] sm:$0xff] }
 0x1ea   :  { %10137 = vmatpush1.bf16.msra.mxu0 %v13806_v33  ;;  %10696 = vmatpush1.bf16.msra.mxu1 %v13808_v34  ;;  %v1090_v33 = vld [vmem:[%s20161_s1 + $0x2088] sm:$0xff] }
 0x1eb   :  { %10138 = vmatprep.subr.bf16.mxu0 %v13815_v35  ;;  %10697 = vmatprep.subr.bf16.mxu1 %v13817_v36  ;;  %v1094_v34 = vld [vmem:[%s20161_s1 + $0x20a8] sm:$0xff]  ;;  %v13870_v35 = vcombine.low %v1081_v21, %v1085_v22  ;;  %v13872_v36 = vcombine.low %v1082_v24, %v1086_v25  ;;  %v13927_v21 = vcombine.high %v1137_v15, %v1141_v16  ;;  %v1149_v24 = vld [vmem:[%s20161_s1 + $0x2260] sm:$0xff] }
 0x1ec   :  { %v13881_v38 = vcombine.high %v1090_v33, %v1094_v34  ;;  %v1146_v25 = vld [vmem:[%s20161_s1 + $0x2248] sm:$0xff] }
 0x1ee   :  { %10139 = vmatpush1.bf16.msra.mxu0 %v13814_v41  ;;  %10698 = vmatpush1.bf16.msra.mxu1 %v13816_v42  ;;  %v1098_v41 = vld [vmem:[%s20161_s1 + $0x20c8] sm:$0xff] }
 0x1ef   :  { %10140 = vmatprep.subr.bf16.mxu0 %v13823_v43  ;;  %10699 = vmatprep.subr.bf16.mxu1 %v13825_v44  ;;  %v1102_v42 = vld [vmem:[%s20161_s1 + $0x20e8] sm:$0xff]  ;;  %v13878_v43 = vcombine.low %v1089_v30, %v1093_v31  ;;  %v13880_v44 = vcombine.low %v1090_v33, %v1094_v34  ;;  %v1153_v31 = vld [vmem:[%s20161_s1 + $0x2280] sm:$0xff] }
 0x1f0   :  { %v13889_v46 = vcombine.high %v1098_v41, %v1102_v42  ;;  %v1154_v33 = vld [vmem:[%s20161_s1 + $0x2288] sm:$0xff] }
 0x1f1   :  { %v1158_v34 = vld [vmem:[%s20161_s1 + $0x22a8] sm:$0xff] }
 0x1f2   :  { %10141 = vmatpush1.bf16.msra.mxu0 %v13822_v49  ;;  %10700 = vmatpush1.bf16.msra.mxu1 %v13824_v50  ;;  %v1106_v49 = vld [vmem:[%s20161_s1 + $0x2108] sm:$0xff] }
 0x1f3   :  { %10142 = vmatprep.subr.bf16.mxu0 %v13831_v51  ;;  %10701 = vmatprep.subr.bf16.mxu1 %v13833_v52  ;;  %v1110_v50 = vld [vmem:[%s20161_s1 + $0x2128] sm:$0xff]  ;;  %v13886_v51 = vcombine.low %v1097_v39, %v1101_v40  ;;  %v13888_v52 = vcombine.low %v1098_v41, %v1102_v42  ;;  %v1161_v39 = vld [vmem:[%s20161_s1 + $0x22c0] sm:$0xff] }
 0x1f4   :  { %v13897_v54 = vcombine.high %v1106_v49, %v1110_v50  ;;  %v1165_v40 = vld [vmem:[%s20161_s1 + $0x22e0] sm:$0xff]  ;;  %v1162_v41 = vld [vmem:[%s20161_s1 + $0x22c8] sm:$0xff] }
 0x1f5   :  { %v1166_v42 = vld [vmem:[%s20161_s1 + $0x22e8] sm:$0xff] }
 0x1f6   :  { %10143 = vmatpush1.bf16.msra.mxu0 %v13830_v57  ;;  %10702 = vmatpush1.bf16.msra.mxu1 %v13832_v58  ;;  %v1114_v57 = vld [vmem:[%s20161_s1 + $0x2148] sm:$0xff] }
 0x1f7   :  { %10144 = vmatprep.subr.bf16.mxu0 %v13839_v59  ;;  %10703 = vmatprep.subr.bf16.mxu1 %v13841_v60  ;;  %v1118_v58 = vld [vmem:[%s20161_s1 + $0x2168] sm:$0xff]  ;;  %v13894_v59 = vcombine.low %v1105_v47, %v1109_v48  ;;  %v13896_v60 = vcombine.low %v1106_v49, %v1110_v50  ;;  %v1169_v47 = vld [vmem:[%s20161_s1 + $0x2300] sm:$0xff] }
 0x1f8   :  { %v13905_v62 = vcombine.high %v1114_v57, %v1118_v58  ;;  %v1173_v48 = vld [vmem:[%s20161_s1 + $0x2320] sm:$0xff]  ;;  %v1170_v49 = vld [vmem:[%s20161_s1 + $0x2308] sm:$0xff] }
 0x1f9   :  { %v1174_v50 = vld [vmem:[%s20161_s1 + $0x2328] sm:$0xff] }
 0x1fa   :  { %10145 = vmatpush1.bf16.msra.mxu0 %v13838_v1  ;;  %10704 = vmatpush1.bf16.msra.mxu1 %v13840_v2  ;;  %v1122_v1 = vld [vmem:[%s20161_s1 + $0x2188] sm:$0xff] }
 0x1fb   :  { %10146 = vmatprep.subr.bf16.mxu0 %v13847_v3  ;;  %10705 = vmatprep.subr.bf16.mxu1 %v13849_v4  ;;  %v1126_v2 = vld [vmem:[%s20161_s1 + $0x21a8] sm:$0xff]  ;;  %v13902_v3 = vcombine.low %v1113_v55, %v1117_v56  ;;  %v13904_v4 = vcombine.low %v1114_v57, %v1118_v58  ;;  %v1177_v55 = vld [vmem:[%s20161_s1 + $0x2340] sm:$0xff] }
 0x1fc   :  { %v13913_v6 = vcombine.high %v1122_v1, %v1126_v2  ;;  %v1181_v56 = vld [vmem:[%s20161_s1 + $0x2360] sm:$0xff]  ;;  %v1178_v57 = vld [vmem:[%s20161_s1 + $0x2348] sm:$0xff] }
 0x1fd   :  { %v1182_v58 = vld [vmem:[%s20161_s1 + $0x2368] sm:$0xff] }
 0x1fe   :  { %10147 = vmatpush1.bf16.msra.mxu0 %v13846_v9  ;;  %10706 = vmatpush1.bf16.msra.mxu1 %v13848_v10  ;;  %v1130_v9 = vld [vmem:[%s20161_s1 + $0x21c8] sm:$0xff] }
 0x1ff   :  { %10148 = vmatprep.subr.bf16.mxu0 %v13855_v11  ;;  %10707 = vmatprep.subr.bf16.mxu1 %v13857_v12  ;;  %v1134_v10 = vld [vmem:[%s20161_s1 + $0x21e8] sm:$0xff]  ;;  %v13910_v11 = vcombine.low %v1121_v63, %v1125_v0  ;;  %v13912_v12 = vcombine.low %v1122_v1, %v1126_v2  ;;  %v1185_v63 = vld [vmem:[%s20161_s1 + $0x2380] sm:$0xff] }
 0x200   :  { %v13921_v14 = vcombine.high %v1130_v9, %v1134_v10  ;;  %v1189_v0 = vld [vmem:[%s20161_s1 + $0x23a0] sm:$0xff]  ;;  %v1186_v1 = vld [vmem:[%s20161_s1 + $0x2388] sm:$0xff] }
 0x201   :  { %v1190_v2 = vld [vmem:[%s20161_s1 + $0x23a8] sm:$0xff] }
 0x202   :  { %10149 = vmatpush1.bf16.msra.mxu0 %v13854_v17  ;;  %10708 = vmatpush1.bf16.msra.mxu1 %v13856_v18  ;;  %v1138_v17 = vld [vmem:[%s20161_s1 + $0x2208] sm:$0xff] }
 0x203   :  { %10161 = vmatprep.subr.bf16.mxu0 %v13863_v19  ;;  %10720 = vmatprep.subr.bf16.mxu1 %v13865_v20  ;;  %v1142_v18 = vld [vmem:[%s20161_s1 + $0x2228] sm:$0xff]  ;;  %v13918_v19 = vcombine.low %v1129_v7, %v1133_v8  ;;  %v13920_v20 = vcombine.low %v1130_v9, %v1134_v10  ;;  %v1193_v7 = vld [vmem:[%s20161_s1 + $0x23c0] sm:$0xff] }
 0x204   :  { %v13929_v22 = vcombine.high %v1138_v17, %v1142_v18  ;;  %v1197_v8 = vld [vmem:[%s20161_s1 + $0x23e0] sm:$0xff]  ;;  %v1194_v9 = vld [vmem:[%s20161_s1 + $0x23c8] sm:$0xff] }
 0x205   :  { %10151 = vmatmul.mubr.bf16.vlgmr.msra.gmra.mrb[0].mxu0 %v14827_v23  ;;  %10710 = vmatmul.mubr.bf16.vlgmr.msra.gmra.mrb[0].mxu1 %v14827_v23  ;;  %v1145_v23 = vld [vmem:[%s20161_s1 + $0x2240] sm:$0xff]  ;;  %v1198_v10 = vld [vmem:[%s20161_s1 + $0x23e8] sm:$0xff] }
 0x206   :  { %10162 = vmatpush1.bf16.msra.mxu0 %v13862_v26  ;;  %10721 = vmatpush1.bf16.msra.mxu1 %v13864_v27  ;;  %v1150_v26 = vld [vmem:[%s20161_s1 + $0x2268] sm:$0xff]  ;;  %v13926_v27 = vcombine.low %v1137_v15, %v1141_v16  ;;  %v1201_v15 = vld [vmem:[%s20161_s1 + $0x2400] sm:$0xff] }
 0x207   :  { %10163 = vmatprep.subr.bf16.mxu0 %v13871_v28  ;;  %10722 = vmatprep.subr.bf16.mxu1 %v13873_v29  ;;  %v13928_v28 = vcombine.low %v1138_v17, %v1142_v18  ;;  %v13935_v29 = vcombine.high %v1145_v23, %v1149_v24  ;;  %v13937_v30 = vcombine.high %v1146_v25, %v1150_v26  ;;  %v1205_v16 = vld [vmem:[%s20161_s1 + $0x2420] sm:$0xff]  ;;  %v1202_v17 = vld [vmem:[%s20161_s1 + $0x2408] sm:$0xff] }
 0x208   :  { %10193 = vmatprep.mubr.bf16.mxu0 %v14828_v32  ;;  %10752 = vmatprep.mubr.bf16.mxu1 %v14828_v32  ;;  %v1157_v32 = vld [vmem:[%s20161_s1 + $0x22a0] sm:$0xff]  ;;  %v1206_v18 = vld [vmem:[%s20161_s1 + $0x2428] sm:$0xff] }
 0x20a   :  { %10164 = vmatpush1.bf16.msra.mxu0 %v13870_v35  ;;  %10723 = vmatpush1.bf16.msra.mxu1 %v13872_v36  ;;  %v13934_v35 = vcombine.low %v1145_v23, %v1149_v24  ;;  %v13936_v36 = vcombine.low %v1146_v25, %v1150_v26  ;;  %v1209_v23 = vld [vmem:[%s20161_s1 + $0x2440] sm:$0xff]  ;;  %v1210_v26 = vld [vmem:[%s20161_s1 + $0x2448] sm:$0xff] }
 0x20b   :  { %10165 = vmatprep.subr.bf16.mxu0 %v13879_v37  ;;  %10724 = vmatprep.subr.bf16.mxu1 %v13881_v38  ;;  %v13943_v37 = vcombine.high %v1153_v31, %v1157_v32  ;;  %v13945_v38 = vcombine.high %v1154_v33, %v1158_v34  ;;  %v1213_v24 = vld [vmem:[%s20161_s1 + $0x2460] sm:$0xff] }
 0x20c   :  { %v14830_v25 = vld [vmem:[%s20162_s0 + $0x40] ss:$100 sps:$4 sm:$0xff]  }
 0x20e   :  { %10166 = vmatpush1.bf16.msra.mxu0 %v13878_v43  ;;  %10725 = vmatpush1.bf16.msra.mxu1 %v13880_v44  ;;  %v13942_v43 = vcombine.low %v1153_v31, %v1157_v32  ;;  %v13944_v44 = vcombine.low %v1154_v33, %v1158_v34  ;;  %v1217_v32 = vld [vmem:[%s20161_s1 + $0x2480] sm:$0xff]  ;;  %v14831_v34 = vld [vmem:[%s20162_s0 + $0x4c] ss:$100 sps:$4 sm:$0xff]  }
 0x20f   :  { %10167 = vmatprep.subr.bf16.mxu0 %v13887_v45  ;;  %10726 = vmatprep.subr.bf16.mxu1 %v13889_v46  ;;  %v13951_v45 = vcombine.high %v1161_v39, %v1165_v40  ;;  %v13953_v46 = vcombine.high %v1162_v41, %v1166_v42  ;;  %v1221_v33 = vld [vmem:[%s20161_s1 + $0x24a0] sm:$0xff] }
 0x212   :  { %10168 = vmatpush1.bf16.msra.mxu0 %v13886_v51  ;;  %10727 = vmatpush1.bf16.msra.mxu1 %v13888_v52  ;;  %v13950_v51 = vcombine.low %v1161_v39, %v1165_v40  ;;  %v13952_v52 = vcombine.low %v1162_v41, %v1166_v42  ;;  %v14007_v39 = vcombine.high %v1217_v32, %v1221_v33  ;;  %v1225_v41 = vld [vmem:[%s20161_s1 + $0x24c0] sm:$0xff] }
 0x213   :  { %10169 = vmatprep.subr.bf16.mxu0 %v13895_v53  ;;  %10728 = vmatprep.subr.bf16.mxu1 %v13897_v54  ;;  %v13959_v53 = vcombine.high %v1169_v47, %v1173_v48  ;;  %v13961_v54 = vcombine.high %v1170_v49, %v1174_v50  ;;  %v1229_v42 = vld [vmem:[%s20161_s1 + $0x24e0] sm:$0xff] }
 0x216   :  { %10170 = vmatpush1.bf16.msra.mxu0 %v13894_v59  ;;  %10729 = vmatpush1.bf16.msra.mxu1 %v13896_v60  ;;  %v13958_v59 = vcombine.low %v1169_v47, %v1173_v48  ;;  %v13960_v60 = vcombine.low %v1170_v49, %v1174_v50  ;;  %v14015_v47 = vcombine.high %v1225_v41, %v1229_v42  ;;  %v1233_v49 = vld [vmem:[%s20161_s1 + $0x2500] sm:$0xff] }
 0x217   :  { %10171 = vmatprep.subr.bf16.mxu0 %v13903_v61  ;;  %10730 = vmatprep.subr.bf16.mxu1 %v13905_v62  ;;  %v13967_v61 = vcombine.high %v1177_v55, %v1181_v56  ;;  %v13969_v62 = vcombine.high %v1178_v57, %v1182_v58  ;;  %v1237_v50 = vld [vmem:[%s20161_s1 + $0x2520] sm:$0xff] }
 0x21a   :  { %10172 = vmatpush1.bf16.msra.mxu0 %v13902_v3  ;;  %10731 = vmatpush1.bf16.msra.mxu1 %v13904_v4  ;;  %v13966_v3 = vcombine.low %v1177_v55, %v1181_v56  ;;  %v13968_v4 = vcombine.low %v1178_v57, %v1182_v58  ;;  %v14023_v55 = vcombine.high %v1233_v49, %v1237_v50  ;;  %v1241_v57 = vld [vmem:[%s20161_s1 + $0x2540] sm:$0xff] }
 0x21b   :  { %10173 = vmatprep.subr.bf16.mxu0 %v13911_v5  ;;  %10732 = vmatprep.subr.bf16.mxu1 %v13913_v6  ;;  %v13975_v5 = vcombine.high %v1185_v63, %v1189_v0  ;;  %v13977_v6 = vcombine.high %v1186_v1, %v1190_v2  ;;  %v1245_v58 = vld [vmem:[%s20161_s1 + $0x2560] sm:$0xff] }
 0x21e   :  { %10174 = vmatpush1.bf16.msra.mxu0 %v13910_v11  ;;  %10733 = vmatpush1.bf16.msra.mxu1 %v13912_v12  ;;  %v13974_v11 = vcombine.low %v1185_v63, %v1189_v0  ;;  %v13976_v12 = vcombine.low %v1186_v1, %v1190_v2  ;;  %v14031_v63 = vcombine.high %v1241_v57, %v1245_v58  ;;  %v1249_v1 = vld [vmem:[%s20161_s1 + $0x2580] sm:$0xff] }
 0x21f   :  { %10175 = vmatprep.subr.bf16.mxu0 %v13919_v13  ;;  %10734 = vmatprep.subr.bf16.mxu1 %v13921_v14  ;;  %v13983_v13 = vcombine.high %v1193_v7, %v1197_v8  ;;  %v13985_v14 = vcombine.high %v1194_v9, %v1198_v10  ;;  %v1253_v2 = vld [vmem:[%s20161_s1 + $0x25a0] sm:$0xff] }
 0x222   :  { %10176 = vmatpush1.bf16.msra.mxu0 %v13918_v19  ;;  %10735 = vmatpush1.bf16.msra.mxu1 %v13920_v20  ;;  %v13982_v19 = vcombine.low %v1193_v7, %v1197_v8  ;;  %v13984_v20 = vcombine.low %v1194_v9, %v1198_v10  ;;  %v14039_v7 = vcombine.high %v1249_v1, %v1253_v2  ;;  %v1257_v9 = vld [vmem:[%s20161_s1 + $0x25c0] sm:$0xff] }
 0x223   :  { %10177 = vmatprep.subr.bf16.mxu0 %v13927_v21  ;;  %10736 = vmatprep.subr.bf16.mxu1 %v13929_v22  ;;  %v13991_v21 = vcombine.high %v1201_v15, %v1205_v16  ;;  %v13993_v22 = vcombine.high %v1202_v17, %v1206_v18  ;;  %v1261_v10 = vld [vmem:[%s20161_s1 + $0x25e0] sm:$0xff] }
 0x226   :  { %10178 = vmatpush1.bf16.msra.mxu0 %v13926_v27  ;;  %10737 = vmatpush1.bf16.msra.mxu1 %v13928_v28  ;;  %v1214_v27 = vld [vmem:[%s20161_s1 + $0x2468] sm:$0xff]  ;;  %v13990_v28 = vcombine.low %v1201_v15, %v1205_v16  ;;  %v14047_v15 = vcombine.high %v1257_v9, %v1261_v10 }
 0x227   :  { %10179 = vmatprep.subr.bf16.mxu0 %v13935_v29  ;;  %10738 = vmatprep.subr.bf16.mxu1 %v13937_v30  ;;  %v13992_v29 = vcombine.low %v1202_v17, %v1206_v18  ;;  %v13999_v30 = vcombine.high %v1209_v23, %v1213_v24  ;;  %v14001_v31 = vcombine.high %v1210_v26, %v1214_v27  ;;  %v1265_v17 = vld [vmem:[%s20161_s1 + $0x2600] sm:$0xff] }
 0x228   :  { %v1269_v18 = vld [vmem:[%s20161_s1 + $0x2620] sm:$0xff] }
 0x22a   :  { %10180 = vmatpush1.bf16.msra.mxu0 %v13934_v35  ;;  %10739 = vmatpush1.bf16.msra.mxu1 %v13936_v36  ;;  %v1218_v35 = vld [vmem:[%s20161_s1 + $0x2488] sm:$0xff] }
 0x22b   :  { %10181 = vmatprep.subr.bf16.mxu0 %v13943_v37  ;;  %10740 = vmatprep.subr.bf16.mxu1 %v13945_v38  ;;  %v1222_v36 = vld [vmem:[%s20161_s1 + $0x24a8] sm:$0xff]  ;;  %v13998_v37 = vcombine.low %v1209_v23, %v1213_v24  ;;  %v14000_v38 = vcombine.low %v1210_v26, %v1214_v27  ;;  %v14055_v23 = vcombine.high %v1265_v17, %v1269_v18  ;;  %v1277_v26 = vld [vmem:[%s20161_s1 + $0x2660] sm:$0xff] }
 0x22c   :  { %v14009_v40 = vcombine.high %v1218_v35, %v1222_v36  ;;  %v1274_v27 = vld [vmem:[%s20161_s1 + $0x2648] sm:$0xff] }
 0x22e   :  { %10182 = vmatpush1.bf16.msra.mxu0 %v13942_v43  ;;  %10741 = vmatpush1.bf16.msra.mxu1 %v13944_v44  ;;  %v1226_v43 = vld [vmem:[%s20161_s1 + $0x24c8] sm:$0xff] }
 0x22f   :  { %10183 = vmatprep.subr.bf16.mxu0 %v13951_v45  ;;  %10742 = vmatprep.subr.bf16.mxu1 %v13953_v46  ;;  %v1230_v44 = vld [vmem:[%s20161_s1 + $0x24e8] sm:$0xff]  ;;  %v14006_v45 = vcombine.low %v1217_v32, %v1221_v33  ;;  %v14008_v46 = vcombine.low %v1218_v35, %v1222_v36  ;;  %v1281_v33 = vld [vmem:[%s20161_s1 + $0x2680] sm:$0xff] }
 0x230   :  { %v14017_v48 = vcombine.high %v1226_v43, %v1230_v44  ;;  %v1282_v35 = vld [vmem:[%s20161_s1 + $0x2688] sm:$0xff] }
 0x231   :  { %v1286_v36 = vld [vmem:[%s20161_s1 + $0x26a8] sm:$0xff] }
 0x232   :  { %10184 = vmatpush1.bf16.msra.mxu0 %v13950_v51  ;;  %10743 = vmatpush1.bf16.msra.mxu1 %v13952_v52  ;;  %v1234_v51 = vld [vmem:[%s20161_s1 + $0x2508] sm:$0xff] }
 0x233   :  { %10185 = vmatprep.subr.bf16.mxu0 %v13959_v53  ;;  %10744 = vmatprep.subr.bf16.mxu1 %v13961_v54  ;;  %v1238_v52 = vld [vmem:[%s20161_s1 + $0x2528] sm:$0xff]  ;;  %v14014_v53 = vcombine.low %v1225_v41, %v1229_v42  ;;  %v14016_v54 = vcombine.low %v1226_v43, %v1230_v44  ;;  %v1289_v41 = vld [vmem:[%s20161_s1 + $0x26c0] sm:$0xff] }
 0x234   :  { %v14025_v56 = vcombine.high %v1234_v51, %v1238_v52  ;;  %v1293_v42 = vld [vmem:[%s20161_s1 + $0x26e0] sm:$0xff]  ;;  %v1290_v43 = vld [vmem:[%s20161_s1 + $0x26c8] sm:$0xff] }
 0x235   :  { %v1294_v44 = vld [vmem:[%s20161_s1 + $0x26e8] sm:$0xff] }
 0x236   :  { %10186 = vmatpush1.bf16.msra.mxu0 %v13958_v59  ;;  %10745 = vmatpush1.bf16.msra.mxu1 %v13960_v60  ;;  %v1242_v59 = vld [vmem:[%s20161_s1 + $0x2548] sm:$0xff] }
 0x237   :  { %10187 = vmatprep.subr.bf16.mxu0 %v13967_v61  ;;  %10746 = vmatprep.subr.bf16.mxu1 %v13969_v62  ;;  %v1246_v60 = vld [vmem:[%s20161_s1 + $0x2568] sm:$0xff]  ;;  %v14022_v61 = vcombine.low %v1233_v49, %v1237_v50  ;;  %v14024_v62 = vcombine.low %v1234_v51, %v1238_v52  ;;  %v1297_v49 = vld [vmem:[%s20161_s1 + $0x2700] sm:$0xff] }
 0x238   :  { %v14033_v0 = vcombine.high %v1242_v59, %v1246_v60  ;;  %v1301_v50 = vld [vmem:[%s20161_s1 + $0x2720] sm:$0xff]  ;;  %v1298_v51 = vld [vmem:[%s20161_s1 + $0x2708] sm:$0xff] }
 0x239   :  { %v1302_v52 = vld [vmem:[%s20161_s1 + $0x2728] sm:$0xff] }
 0x23a   :  { %10188 = vmatpush1.bf16.msra.mxu0 %v13966_v3  ;;  %10747 = vmatpush1.bf16.msra.mxu1 %v13968_v4  ;;  %v1250_v3 = vld [vmem:[%s20161_s1 + $0x2588] sm:$0xff] }
 0x23b   :  { %10189 = vmatprep.subr.bf16.mxu0 %v13975_v5  ;;  %10748 = vmatprep.subr.bf16.mxu1 %v13977_v6  ;;  %v1254_v4 = vld [vmem:[%s20161_s1 + $0x25a8] sm:$0xff]  ;;  %v14030_v5 = vcombine.low %v1241_v57, %v1245_v58  ;;  %v14032_v6 = vcombine.low %v1242_v59, %v1246_v60  ;;  %v1305_v57 = vld [vmem:[%s20161_s1 + $0x2740] sm:$0xff] }
 0x23c   :  { %v14041_v8 = vcombine.high %v1250_v3, %v1254_v4  ;;  %v1309_v58 = vld [vmem:[%s20161_s1 + $0x2760] sm:$0xff]  ;;  %v1306_v59 = vld [vmem:[%s20161_s1 + $0x2748] sm:$0xff] }
 0x23d   :  { %v1310_v60 = vld [vmem:[%s20161_s1 + $0x2768] sm:$0xff] }
 0x23e   :  { %10190 = vmatpush1.bf16.msra.mxu0 %v13974_v11  ;;  %10749 = vmatpush1.bf16.msra.mxu1 %v13976_v12  ;;  %v1258_v11 = vld [vmem:[%s20161_s1 + $0x25c8] sm:$0xff] }
 0x23f   :  { %10191 = vmatprep.subr.bf16.mxu0 %v13983_v13  ;;  %10750 = vmatprep.subr.bf16.mxu1 %v13985_v14  ;;  %v1262_v12 = vld [vmem:[%s20161_s1 + $0x25e8] sm:$0xff]  ;;  %v14038_v13 = vcombine.low %v1249_v1, %v1253_v2  ;;  %v14040_v14 = vcombine.low %v1250_v3, %v1254_v4  ;;  %v1313_v1 = vld [vmem:[%s20161_s1 + $0x2780] sm:$0xff] }
 0x240   :  { %v14049_v16 = vcombine.high %v1258_v11, %v1262_v12  ;;  %v1317_v2 = vld [vmem:[%s20161_s1 + $0x27a0] sm:$0xff]  ;;  %v1314_v3 = vld [vmem:[%s20161_s1 + $0x2788] sm:$0xff] }
 0x241   :  { %v1318_v4 = vld [vmem:[%s20161_s1 + $0x27a8] sm:$0xff] }
 0x242   :  { %10192 = vmatpush1.bf16.msra.mxu0 %v13982_v19  ;;  %10751 = vmatpush1.bf16.msra.mxu1 %v13984_v20  ;;  %v1266_v19 = vld [vmem:[%s20161_s1 + $0x2608] sm:$0xff] }
 0x243   :  { %10204 = vmatprep.subr.bf16.mxu0 %v13991_v21  ;;  %10763 = vmatprep.subr.bf16.mxu1 %v13993_v22  ;;  %v1270_v20 = vld [vmem:[%s20161_s1 + $0x2628] sm:$0xff]  ;;  %v14046_v21 = vcombine.low %v1257_v9, %v1261_v10  ;;  %v14048_v22 = vcombine.low %v1258_v11, %v1262_v12  ;;  %v1321_v9 = vld [vmem:[%s20161_s1 + $0x27c0] sm:$0xff] }
 0x244   :  { %v14057_v24 = vcombine.high %v1266_v19, %v1270_v20  ;;  %v1325_v10 = vld [vmem:[%s20161_s1 + $0x27e0] sm:$0xff]  ;;  %v1322_v11 = vld [vmem:[%s20161_s1 + $0x27c8] sm:$0xff] }
 0x245   :  { %10194 = vmatmul.mubr.bf16.vlgmr.msra.gmra.mrb[0].mxu0 %v14830_v25  ;;  %10753 = vmatmul.mubr.bf16.vlgmr.msra.gmra.mrb[0].mxu1 %v14830_v25  ;;  %v1273_v25 = vld [vmem:[%s20161_s1 + $0x2640] sm:$0xff]  ;;  %v1326_v12 = vld [vmem:[%s20161_s1 + $0x27e8] sm:$0xff] }
 0x246   :  { %10205 = vmatpush1.bf16.msra.mxu0 %v13990_v28  ;;  %10764 = vmatpush1.bf16.msra.mxu1 %v13992_v29  ;;  %v1278_v28 = vld [vmem:[%s20161_s1 + $0x2668] sm:$0xff]  ;;  %v14054_v29 = vcombine.low %v1265_v17, %v1269_v18  ;;  %v1329_v17 = vld [vmem:[%s20161_s1 + $0x2800] sm:$0xff] }
 0x247   :  { %10206 = vmatprep.subr.bf16.mxu0 %v13999_v30  ;;  %10765 = vmatprep.subr.bf16.mxu1 %v14001_v31  ;;  %v14056_v30 = vcombine.low %v1266_v19, %v1270_v20  ;;  %v14063_v31 = vcombine.high %v1273_v25, %v1277_v26  ;;  %v14065_v32 = vcombine.high %v1274_v27, %v1278_v28  ;;  %v1333_v18 = vld [vmem:[%s20161_s1 + $0x2820] sm:$0xff]  ;;  %v1330_v19 = vld [vmem:[%s20161_s1 + $0x2808] sm:$0xff] }
 0x248   :  { %10236 = vmatprep.mubr.bf16.mxu0 %v14831_v34  ;;  %10795 = vmatprep.mubr.bf16.mxu1 %v14831_v34  ;;  %v1285_v34 = vld [vmem:[%s20161_s1 + $0x26a0] sm:$0xff]  ;;  %v1334_v20 = vld [vmem:[%s20161_s1 + $0x2828] sm:$0xff] }
 0x24a   :  { %10207 = vmatpush1.bf16.msra.mxu0 %v13998_v37  ;;  %10766 = vmatpush1.bf16.msra.mxu1 %v14000_v38  ;;  %v14062_v37 = vcombine.low %v1273_v25, %v1277_v26  ;;  %v14064_v38 = vcombine.low %v1274_v27, %v1278_v28  ;;  %v1337_v25 = vld [vmem:[%s20161_s1 + $0x2840] sm:$0xff]  ;;  %v14833_v27 = vld [vmem:[%s20162_s0 + $0x48] ss:$100 sps:$4 sm:$0xff]  }
 0x24b   :  { %10208 = vmatprep.subr.bf16.mxu0 %v14007_v39  ;;  %10767 = vmatprep.subr.bf16.mxu1 %v14009_v40  ;;  %v14071_v39 = vcombine.high %v1281_v33, %v1285_v34  ;;  %v14073_v40 = vcombine.high %v1282_v35, %v1286_v36  ;;  %v1341_v26 = vld [vmem:[%s20161_s1 + $0x2860] sm:$0xff]  ;;  %v1338_v28 = vld [vmem:[%s20161_s1 + $0x2848] sm:$0xff] }
 0x24e   :  { %10209 = vmatpush1.bf16.msra.mxu0 %v14006_v45  ;;  %10768 = vmatpush1.bf16.msra.mxu1 %v14008_v46  ;;  %v14070_v45 = vcombine.low %v1281_v33, %v1285_v34  ;;  %v14072_v46 = vcombine.low %v1282_v35, %v1286_v36  ;;  %v1345_v34 = vld [vmem:[%s20161_s1 + $0x2880] sm:$0xff]  ;;  %v14834_v36 = vld [vmem:[%s20162_s0 + $0x54] ss:$100 sps:$4 sm:$0xff]  }
 0x24f   :  { %10210 = vmatprep.subr.bf16.mxu0 %v14015_v47  ;;  %10769 = vmatprep.subr.bf16.mxu1 %v14017_v48  ;;  %v14079_v47 = vcombine.high %v1289_v41, %v1293_v42  ;;  %v14081_v48 = vcombine.high %v1290_v43, %v1294_v44  ;;  %v1349_v35 = vld [vmem:[%s20161_s1 + $0x28a0] sm:$0xff] }
 0x252   :  { %10211 = vmatpush1.bf16.msra.mxu0 %v14014_v53  ;;  %10770 = vmatpush1.bf16.msra.mxu1 %v14016_v54  ;;  %v14078_v53 = vcombine.low %v1289_v41, %v1293_v42  ;;  %v14080_v54 = vcombine.low %v1290_v43, %v1294_v44  ;;  %v14135_v41 = vcombine.high %v1345_v34, %v1349_v35  ;;  %v1353_v43 = vld [vmem:[%s20161_s1 + $0x28c0] sm:$0xff] }
 0x253   :  { %10212 = vmatprep.subr.bf16.mxu0 %v14023_v55  ;;  %10771 = vmatprep.subr.bf16.mxu1 %v14025_v56  ;;  %v14087_v55 = vcombine.high %v1297_v49, %v1301_v50  ;;  %v14089_v56 = vcombine.high %v1298_v51, %v1302_v52  ;;  %v1357_v44 = vld [vmem:[%s20161_s1 + $0x28e0] sm:$0xff] }
 0x256   :  { %10213 = vmatpush1.bf16.msra.mxu0 %v14022_v61  ;;  %10772 = vmatpush1.bf16.msra.mxu1 %v14024_v62  ;;  %v14086_v61 = vcombine.low %v1297_v49, %v1301_v50  ;;  %v14088_v62 = vcombine.low %v1298_v51, %v1302_v52  ;;  %v14143_v49 = vcombine.high %v1353_v43, %v1357_v44  ;;  %v1361_v51 = vld [vmem:[%s20161_s1 + $0x2900] sm:$0xff] }
 0x257   :  { %10214 = vmatprep.subr.bf16.mxu0 %v14031_v63  ;;  %10773 = vmatprep.subr.bf16.mxu1 %v14033_v0  ;;  %v14095_v63 = vcombine.high %v1305_v57, %v1309_v58  ;;  %v14097_v0 = vcombine.high %v1306_v59, %v1310_v60  ;;  %v1365_v52 = vld [vmem:[%s20161_s1 + $0x2920] sm:$0xff] }
 0x25a   :  { %10215 = vmatpush1.bf16.msra.mxu0 %v14030_v5  ;;  %10774 = vmatpush1.bf16.msra.mxu1 %v14032_v6  ;;  %v14094_v5 = vcombine.low %v1305_v57, %v1309_v58  ;;  %v14096_v6 = vcombine.low %v1306_v59, %v1310_v60  ;;  %v14151_v57 = vcombine.high %v1361_v51, %v1365_v52  ;;  %v1369_v59 = vld [vmem:[%s20161_s1 + $0x2940] sm:$0xff] }
 0x25b   :  { %10216 = vmatprep.subr.bf16.mxu0 %v14039_v7  ;;  %10775 = vmatprep.subr.bf16.mxu1 %v14041_v8  ;;  %v14103_v7 = vcombine.high %v1313_v1, %v1317_v2  ;;  %v14105_v8 = vcombine.high %v1314_v3, %v1318_v4  ;;  %v1373_v60 = vld [vmem:[%s20161_s1 + $0x2960] sm:$0xff] }
 0x25e   :  { %10217 = vmatpush1.bf16.msra.mxu0 %v14038_v13  ;;  %10776 = vmatpush1.bf16.msra.mxu1 %v14040_v14  ;;  %v14102_v13 = vcombine.low %v1313_v1, %v1317_v2  ;;  %v14104_v14 = vcombine.low %v1314_v3, %v1318_v4  ;;  %v14159_v1 = vcombine.high %v1369_v59, %v1373_v60  ;;  %v1377_v3 = vld [vmem:[%s20161_s1 + $0x2980] sm:$0xff] }
 0x25f   :  { %10218 = vmatprep.subr.bf16.mxu0 %v14047_v15  ;;  %10777 = vmatprep.subr.bf16.mxu1 %v14049_v16  ;;  %v14111_v15 = vcombine.high %v1321_v9, %v1325_v10  ;;  %v14113_v16 = vcombine.high %v1322_v11, %v1326_v12  ;;  %v1381_v4 = vld [vmem:[%s20161_s1 + $0x29a0] sm:$0xff] }
 0x262   :  { %10219 = vmatpush1.bf16.msra.mxu0 %v14046_v21  ;;  %10778 = vmatpush1.bf16.msra.mxu1 %v14048_v22  ;;  %v14110_v21 = vcombine.low %v1321_v9, %v1325_v10  ;;  %v14112_v22 = vcombine.low %v1322_v11, %v1326_v12  ;;  %v14167_v9 = vcombine.high %v1377_v3, %v1381_v4  ;;  %v1385_v11 = vld [vmem:[%s20161_s1 + $0x29c0] sm:$0xff] }
 0x263   :  { %10220 = vmatprep.subr.bf16.mxu0 %v14055_v23  ;;  %10779 = vmatprep.subr.bf16.mxu1 %v14057_v24  ;;  %v14119_v23 = vcombine.high %v1329_v17, %v1333_v18  ;;  %v14121_v24 = vcombine.high %v1330_v19, %v1334_v20  ;;  %v1389_v12 = vld [vmem:[%s20161_s1 + $0x29e0] sm:$0xff] }
 0x266   :  { %10221 = vmatpush1.bf16.msra.mxu0 %v14054_v29  ;;  %10780 = vmatpush1.bf16.msra.mxu1 %v14056_v30  ;;  %v1342_v29 = vld [vmem:[%s20161_s1 + $0x2868] sm:$0xff]  ;;  %v14118_v30 = vcombine.low %v1329_v17, %v1333_v18  ;;  %v14175_v17 = vcombine.high %v1385_v11, %v1389_v12 }
 0x267   :  { %10222 = vmatprep.subr.bf16.mxu0 %v14063_v31  ;;  %10781 = vmatprep.subr.bf16.mxu1 %v14065_v32  ;;  %v14120_v31 = vcombine.low %v1330_v19, %v1334_v20  ;;  %v14127_v32 = vcombine.high %v1337_v25, %v1341_v26  ;;  %v14129_v33 = vcombine.high %v1338_v28, %v1342_v29  ;;  %v1393_v19 = vld [vmem:[%s20161_s1 + $0x2a00] sm:$0xff] }
 0x268   :  { %v1397_v20 = vld [vmem:[%s20161_s1 + $0x2a20] sm:$0xff] }
 0x26a   :  { %10223 = vmatpush1.bf16.msra.mxu0 %v14062_v37  ;;  %10782 = vmatpush1.bf16.msra.mxu1 %v14064_v38  ;;  %v1346_v37 = vld [vmem:[%s20161_s1 + $0x2888] sm:$0xff] }
 0x26b   :  { %10224 = vmatprep.subr.bf16.mxu0 %v14071_v39  ;;  %10783 = vmatprep.subr.bf16.mxu1 %v14073_v40  ;;  %v1350_v38 = vld [vmem:[%s20161_s1 + $0x28a8] sm:$0xff]  ;;  %v14126_v39 = vcombine.low %v1337_v25, %v1341_v26  ;;  %v14128_v40 = vcombine.low %v1338_v28, %v1342_v29  ;;  %v14183_v25 = vcombine.high %v1393_v19, %v1397_v20  ;;  %v1405_v28 = vld [vmem:[%s20161_s1 + $0x2a60] sm:$0xff] }
 0x26c   :  { %v14137_v42 = vcombine.high %v1346_v37, %v1350_v38  ;;  %v1402_v29 = vld [vmem:[%s20161_s1 + $0x2a48] sm:$0xff] }
 0x26e   :  { %10225 = vmatpush1.bf16.msra.mxu0 %v14070_v45  ;;  %10784 = vmatpush1.bf16.msra.mxu1 %v14072_v46  ;;  %v1354_v45 = vld [vmem:[%s20161_s1 + $0x28c8] sm:$0xff] }
 0x26f   :  { %10226 = vmatprep.subr.bf16.mxu0 %v14079_v47  ;;  %10785 = vmatprep.subr.bf16.mxu1 %v14081_v48  ;;  %v1358_v46 = vld [vmem:[%s20161_s1 + $0x28e8] sm:$0xff]  ;;  %v14134_v47 = vcombine.low %v1345_v34, %v1349_v35  ;;  %v14136_v48 = vcombine.low %v1346_v37, %v1350_v38  ;;  %v1409_v35 = vld [vmem:[%s20161_s1 + $0x2a80] sm:$0xff]  ;;  %v14931_v37 = vmov 0  }
 0x270   :  { %v14145_v50 = vcombine.high %v1354_v45, %v1358_v46  ;;  %14803 = vset.pattern.permute.xlu1 %v14931_v37  ;;  %v1410_v38 = vld [vmem:[%s20161_s1 + $0x2a88] sm:$0xff]  ;;  %14802 = vset.pattern.permute.xlu0 %v14931_v37 }
 0x272   :  { %10227 = vmatpush1.bf16.msra.mxu0 %v14078_v53  ;;  %10786 = vmatpush1.bf16.msra.mxu1 %v14080_v54  ;;  %v1362_v53 = vld [vmem:[%s20161_s1 + $0x2908] sm:$0xff] }
 0x273   :  { %10228 = vmatprep.subr.bf16.mxu0 %v14087_v55  ;;  %10787 = vmatprep.subr.bf16.mxu1 %v14089_v56  ;;  %v1366_v54 = vld [vmem:[%s20161_s1 + $0x2928] sm:$0xff]  ;;  %v14142_v55 = vcombine.low %v1353_v43, %v1357_v44  ;;  %v14144_v56 = vcombine.low %v1354_v45, %v1358_v46  ;;  %v1417_v44 = vld [vmem:[%s20161_s1 + $0x2ac0] sm:$0xff] }
 0x274   :  { %v14153_v58 = vcombine.high %v1362_v53, %v1366_v54  ;;  %v1421_v45 = vld [vmem:[%s20161_s1 + $0x2ae0] sm:$0xff]  ;;  %v1418_v46 = vld [vmem:[%s20161_s1 + $0x2ac8] sm:$0xff] }
 0x276   :  { %10229 = vmatpush1.bf16.msra.mxu0 %v14086_v61  ;;  %10788 = vmatpush1.bf16.msra.mxu1 %v14088_v62  ;;  %v1370_v61 = vld [vmem:[%s20161_s1 + $0x2948] sm:$0xff] }
 0x277   :  { %10230 = vmatprep.subr.bf16.mxu0 %v14095_v63  ;;  %10789 = vmatprep.subr.bf16.mxu1 %v14097_v0  ;;  %v1374_v62 = vld [vmem:[%s20161_s1 + $0x2968] sm:$0xff]  ;;  %v14150_v63 = vcombine.low %v1361_v51, %v1365_v52  ;;  %v14152_v0 = vcombine.low %v1362_v53, %v1366_v54  ;;  %v1425_v52 = vld [vmem:[%s20161_s1 + $0x2b00] sm:$0xff] }
 0x278   :  { %v14161_v2 = vcombine.high %v1370_v61, %v1374_v62  ;;  %v1429_v53 = vld [vmem:[%s20161_s1 + $0x2b20] sm:$0xff]  ;;  %v1426_v54 = vld [vmem:[%s20161_s1 + $0x2b08] sm:$0xff] }
 0x27a   :  { %10231 = vmatpush1.bf16.msra.mxu0 %v14094_v5  ;;  %10790 = vmatpush1.bf16.msra.mxu1 %v14096_v6  ;;  %v1378_v5 = vld [vmem:[%s20161_s1 + $0x2988] sm:$0xff] }
 0x27b   :  { %10232 = vmatprep.subr.bf16.mxu0 %v14103_v7  ;;  %10791 = vmatprep.subr.bf16.mxu1 %v14105_v8  ;;  %v1382_v6 = vld [vmem:[%s20161_s1 + $0x29a8] sm:$0xff]  ;;  %v14158_v7 = vcombine.low %v1369_v59, %v1373_v60  ;;  %v14160_v8 = vcombine.low %v1370_v61, %v1374_v62  ;;  %v1433_v60 = vld [vmem:[%s20161_s1 + $0x2b40] sm:$0xff] }
 0x27c   :  { %v14169_v10 = vcombine.high %v1378_v5, %v1382_v6  ;;  %v1437_v61 = vld [vmem:[%s20161_s1 + $0x2b60] sm:$0xff]  ;;  %v1434_v62 = vld [vmem:[%s20161_s1 + $0x2b48] sm:$0xff] }
 0x27e   :  { %10233 = vmatpush1.bf16.msra.mxu0 %v14102_v13  ;;  %10792 = vmatpush1.bf16.msra.mxu1 %v14104_v14  ;;  %v1386_v13 = vld [vmem:[%s20161_s1 + $0x29c8] sm:$0xff] }
 0x27f   :  { %10234 = vmatprep.subr.bf16.mxu0 %v14111_v15  ;;  %10793 = vmatprep.subr.bf16.mxu1 %v14113_v16  ;;  %v1390_v14 = vld [vmem:[%s20161_s1 + $0x29e8] sm:$0xff]  ;;  %v14166_v15 = vcombine.low %v1377_v3, %v1381_v4  ;;  %v14168_v16 = vcombine.low %v1378_v5, %v1382_v6  ;;  %v1441_v4 = vld [vmem:[%s20161_s1 + $0x2b80] sm:$0xff] }
 0x280   :  { %v14177_v18 = vcombine.high %v1386_v13, %v1390_v14  ;;  %v1445_v5 = vld [vmem:[%s20161_s1 + $0x2ba0] sm:$0xff]  ;;  %v1442_v6 = vld [vmem:[%s20161_s1 + $0x2b88] sm:$0xff] }
 0x282   :  { %10235 = vmatpush1.bf16.msra.mxu0 %v14110_v21  ;;  %10794 = vmatpush1.bf16.msra.mxu1 %v14112_v22  ;;  %v1394_v21 = vld [vmem:[%s20161_s1 + $0x2a08] sm:$0xff] }
 0x283   :  { %10247 = vmatprep.subr.bf16.mxu0 %v14119_v23  ;;  %10806 = vmatprep.subr.bf16.mxu1 %v14121_v24  ;;  %v1398_v22 = vld [vmem:[%s20161_s1 + $0x2a28] sm:$0xff]  ;;  %v14174_v23 = vcombine.low %v1385_v11, %v1389_v12  ;;  %v14176_v24 = vcombine.low %v1386_v13, %v1390_v14  ;;  %v1449_v12 = vld [vmem:[%s20161_s1 + $0x2bc0] sm:$0xff] }
 0x284   :  { %v14185_v26 = vcombine.high %v1394_v21, %v1398_v22  ;;  %v1453_v13 = vld [vmem:[%s20161_s1 + $0x2be0] sm:$0xff]  ;;  %v1450_v14 = vld [vmem:[%s20161_s1 + $0x2bc8] sm:$0xff] }
 0x285   :  { %10237 = vmatmul.mubr.bf16.vlgmr.msra.gmra.mrb[0].mxu0 %v14833_v27  ;;  %10796 = vmatmul.mubr.bf16.vlgmr.msra.gmra.mrb[0].mxu1 %v14833_v27  ;;  %v1401_v27 = vld [vmem:[%s20161_s1 + $0x2a40] sm:$0xff] }
 0x286   :  { %10248 = vmatpush1.bf16.msra.mxu0 %v14118_v30  ;;  %10807 = vmatpush1.bf16.msra.mxu1 %v14120_v31  ;;  %v1406_v30 = vld [vmem:[%s20161_s1 + $0x2a68] sm:$0xff]  ;;  %v14182_v31 = vcombine.low %v1393_v19, %v1397_v20  ;;  %v1457_v20 = vld [vmem:[%s20161_s1 + $0x2c00] sm:$0xff] }
 0x287   :  { %10249 = vmatprep.subr.bf16.mxu0 %v14127_v32  ;;  %10808 = vmatprep.subr.bf16.mxu1 %v14129_v33  ;;  %v14184_v32 = vcombine.low %v1394_v21, %v1398_v22  ;;  %v14191_v33 = vcombine.high %v1401_v27, %v1405_v28  ;;  %v14193_v34 = vcombine.high %v1402_v29, %v1406_v30  ;;  %v1461_v21 = vld [vmem:[%s20161_s1 + $0x2c20] sm:$0xff]  ;;  %v1458_v22 = vld [vmem:[%s20161_s1 + $0x2c08] sm:$0xff] }
 0x288   :  { %10279 = vmatprep.mubr.bf16.mxu0 %v14834_v36  ;;  %10838 = vmatprep.mubr.bf16.mxu1 %v14834_v36  ;;  %v1413_v36 = vld [vmem:[%s20161_s1 + $0x2aa0] sm:$0xff] }
 0x28a   :  { %10250 = vmatpush1.bf16.msra.mxu0 %v14126_v39  ;;  %10809 = vmatpush1.bf16.msra.mxu1 %v14128_v40  ;;  %v1414_v39 = vld [vmem:[%s20161_s1 + $0x2aa8] sm:$0xff]  ;;  %v14190_v40 = vcombine.low %v1401_v27, %v1405_v28  ;;  %v1465_v28 = vld [vmem:[%s20161_s1 + $0x2c40] sm:$0xff] }
 0x28b   :  { %10251 = vmatprep.subr.bf16.mxu0 %v14135_v41  ;;  %10810 = vmatprep.subr.bf16.mxu1 %v14137_v42  ;;  %v14192_v41 = vcombine.low %v1402_v29, %v1406_v30  ;;  %v14199_v42 = vcombine.high %v1409_v35, %v1413_v36  ;;  %v14201_v43 = vcombine.high %v1410_v38, %v1414_v39  ;;  %v1469_v29 = vld [vmem:[%s20161_s1 + $0x2c60] sm:$0xff]  ;;  %v14836_v30 = vld [vmem:[%s20162_s0 + $0x50] ss:$100 sps:$4 sm:$0xff]  }
 0x28e   :  { %10252 = vmatpush1.bf16.msra.mxu0 %v14134_v47  ;;  %10811 = vmatpush1.bf16.msra.mxu1 %v14136_v48  ;;  %v1422_v47 = vld [vmem:[%s20161_s1 + $0x2ae8] sm:$0xff]  ;;  %v14198_v48 = vcombine.low %v1409_v35, %v1413_v36  ;;  %v14255_v35 = vcombine.high %v1465_v28, %v1469_v29 }
 0x28f   :  { %10253 = vmatprep.subr.bf16.mxu0 %v14143_v49  ;;  %10812 = vmatprep.subr.bf16.mxu1 %v14145_v50  ;;  %v14200_v49 = vcombine.low %v1410_v38, %v1414_v39  ;;  %v14207_v50 = vcombine.high %v1417_v44, %v1421_v45  ;;  %v14209_v51 = vcombine.high %v1418_v46, %v1422_v47  ;;  %v1473_v38 = vld [vmem:[%s20161_s1 + $0x2c80] sm:$0xff] }
 0x290   :  { %v1477_v39 = vld [vmem:[%s20161_s1 + $0x2ca0] sm:$0xff] }
 0x292   :  { %10254 = vmatpush1.bf16.msra.mxu0 %v14142_v55  ;;  %10813 = vmatpush1.bf16.msra.mxu1 %v14144_v56  ;;  %v1430_v55 = vld [vmem:[%s20161_s1 + $0x2b28] sm:$0xff]  ;;  %v14206_v56 = vcombine.low %v1417_v44, %v1421_v45  ;;  %v14263_v45 = vcombine.high %v1473_v38, %v1477_v39 }
 0x293   :  { %10255 = vmatprep.subr.bf16.mxu0 %v14151_v57  ;;  %10814 = vmatprep.subr.bf16.mxu1 %v14153_v58  ;;  %v14208_v57 = vcombine.low %v1418_v46, %v1422_v47  ;;  %v14215_v58 = vcombine.high %v1425_v52, %v1429_v53  ;;  %v14217_v59 = vcombine.high %v1426_v54, %v1430_v55  ;;  %v1481_v47 = vld [vmem:[%s20161_s1 + $0x2cc0] sm:$0xff] }
 0x296   :  { %10256 = vmatpush1.bf16.msra.mxu0 %v14150_v63  ;;  %10815 = vmatpush1.bf16.msra.mxu1 %v14152_v0  ;;  %v1438_v63 = vld [vmem:[%s20161_s1 + $0x2b68] sm:$0xff]  ;;  %v14214_v0 = vcombine.low %v1425_v52, %v1429_v53 }
 0x297   :  { %10257 = vmatprep.subr.bf16.mxu0 %v14159_v1  ;;  %10816 = vmatprep.subr.bf16.mxu1 %v14161_v2  ;;  %v14216_v1 = vcombine.low %v1426_v54, %v1430_v55  ;;  %v14223_v2 = vcombine.high %v1433_v60, %v1437_v61  ;;  %v14225_v3 = vcombine.high %v1434_v62, %v1438_v63  ;;  %v1489_v55 = vld [vmem:[%s20161_s1 + $0x2d00] sm:$0xff] }
 0x29a   :  { %10258 = vmatpush1.bf16.msra.mxu0 %v14158_v7  ;;  %10817 = vmatpush1.bf16.msra.mxu1 %v14160_v8  ;;  %v1446_v7 = vld [vmem:[%s20161_s1 + $0x2ba8] sm:$0xff]  ;;  %v14222_v8 = vcombine.low %v1433_v60, %v1437_v61 }
 0x29b   :  { %10259 = vmatprep.subr.bf16.mxu0 %v14167_v9  ;;  %10818 = vmatprep.subr.bf16.mxu1 %v14169_v10  ;;  %v14224_v9 = vcombine.low %v1434_v62, %v1438_v63  ;;  %v14231_v10 = vcombine.high %v1441_v4, %v1445_v5  ;;  %v14233_v11 = vcombine.high %v1442_v6, %v1446_v7  ;;  %v1497_v63 = vld [vmem:[%s20161_s1 + $0x2d40] sm:$0xff] }
 0x29e   :  { %10260 = vmatpush1.bf16.msra.mxu0 %v14166_v15  ;;  %10819 = vmatpush1.bf16.msra.mxu1 %v14168_v16  ;;  %v1454_v15 = vld [vmem:[%s20161_s1 + $0x2be8] sm:$0xff]  ;;  %v14230_v16 = vcombine.low %v1441_v4, %v1445_v5 }
 0x29f   :  { %10261 = vmatprep.subr.bf16.mxu0 %v14175_v17  ;;  %10820 = vmatprep.subr.bf16.mxu1 %v14177_v18  ;;  %v14232_v17 = vcombine.low %v1442_v6, %v1446_v7  ;;  %v14239_v18 = vcombine.high %v1449_v12, %v1453_v13  ;;  %v14241_v19 = vcombine.high %v1450_v14, %v1454_v15  ;;  %v1505_v7 = vld [vmem:[%s20161_s1 + $0x2d80] sm:$0xff] }
 0x2a2   :  { %10262 = vmatpush1.bf16.msra.mxu0 %v14174_v23  ;;  %10821 = vmatpush1.bf16.msra.mxu1 %v14176_v24  ;;  %v1462_v23 = vld [vmem:[%s20161_s1 + $0x2c28] sm:$0xff]  ;;  %v14238_v24 = vcombine.low %v1449_v12, %v1453_v13 }
 0x2a3   :  { %10263 = vmatprep.subr.bf16.mxu0 %v14183_v25  ;;  %10822 = vmatprep.subr.bf16.mxu1 %v14185_v26  ;;  %v14240_v25 = vcombine.low %v1450_v14, %v1454_v15  ;;  %v14247_v26 = vcombine.high %v1457_v20, %v1461_v21  ;;  %v14249_v27 = vcombine.high %v1458_v22, %v1462_v23  ;;  %v1513_v15 = vld [vmem:[%s20161_s1 + $0x2dc0] sm:$0xff] }
 0x2a6   :  { %10264 = vmatpush1.bf16.msra.mxu0 %v14182_v31  ;;  %10823 = vmatpush1.bf16.msra.mxu1 %v14184_v32  ;;  %v1466_v31 = vld [vmem:[%s20161_s1 + $0x2c48] sm:$0xff] }
 0x2a7   :  { %10265 = vmatprep.subr.bf16.mxu0 %v14191_v33  ;;  %10824 = vmatprep.subr.bf16.mxu1 %v14193_v34  ;;  %v1470_v32 = vld [vmem:[%s20161_s1 + $0x2c68] sm:$0xff]  ;;  %v14246_v33 = vcombine.low %v1457_v20, %v1461_v21  ;;  %v14248_v34 = vcombine.low %v1458_v22, %v1462_v23  ;;  %v1521_v23 = vld [vmem:[%s20161_s1 + $0x2e00] sm:$0xff] }
 0x2a8   :  { %v14257_v36 = vcombine.high %v1466_v31, %v1470_v32  ;;  %v14256_v44 = vcombine.low %v1466_v31, %v1470_v32  ;;  %v1529_v31 = vld [vmem:[%s20161_s1 + $0x2e40] sm:$0xff] }
 0x2a9   :  { %v1533_v32 = vld [vmem:[%s20161_s1 + $0x2e60] sm:$0xff] }
 0x2aa   :  { %10266 = vmatpush1.bf16.msra.mxu0 %v14190_v40  ;;  %10825 = vmatpush1.bf16.msra.mxu1 %v14192_v41  ;;  %v14837_v40 = vld [vmem:[%s20162_s0 + $0x5c] ss:$100 sps:$4 sm:$0xff]   ;;  %v1474_v41 = vld [vmem:[%s20161_s1 + $0x2c88] sm:$0xff] }
 0x2ab   :  { %10267 = vmatprep.subr.bf16.mxu0 %v14199_v42  ;;  %10826 = vmatprep.subr.bf16.mxu1 %v14201_v43  ;;  %v1478_v42 = vld [vmem:[%s20161_s1 + $0x2ca8] sm:$0xff]  ;;  %v14254_v43 = vcombine.low %v1465_v28, %v1469_v29 }
 0x2ac   :  { %v14265_v46 = vcombine.high %v1474_v41, %v1478_v42  ;;  %v14264_v52 = vcombine.low %v1474_v41, %v1478_v42  ;;  %v1541_v41 = vld [vmem:[%s20161_s1 + $0x2ea0] sm:$0xff]  ;;  %v1538_v42 = vld [vmem:[%s20161_s1 + $0x2e88] sm:$0xff] }
 0x2ae   :  { %10268 = vmatpush1.bf16.msra.mxu0 %v14198_v48  ;;  %10827 = vmatpush1.bf16.msra.mxu1 %v14200_v49  ;;  %v1485_v48 = vld [vmem:[%s20161_s1 + $0x2ce0] sm:$0xff]  ;;  %v1482_v49 = vld [vmem:[%s20161_s1 + $0x2cc8] sm:$0xff] }
 0x2af   :  { %10269 = vmatprep.subr.bf16.mxu0 %v14207_v50  ;;  %10828 = vmatprep.subr.bf16.mxu1 %v14209_v51  ;;  %v1486_v50 = vld [vmem:[%s20161_s1 + $0x2ce8] sm:$0xff]  ;;  %v14262_v51 = vcombine.low %v1473_v38, %v1477_v39  ;;  %v14271_v53 = vcombine.high %v1481_v47, %v1485_v48  ;;  %v14319_v38 = vcombine.high %v1529_v31, %v1533_v32 }
 0x2b0   :  { %v14273_v54 = vcombine.high %v1482_v49, %v1486_v50  ;;  %v14272_v60 = vcombine.low %v1482_v49, %v1486_v50  ;;  %v1549_v49 = vld [vmem:[%s20161_s1 + $0x2ee0] sm:$0xff]  ;;  %v1546_v50 = vld [vmem:[%s20161_s1 + $0x2ec8] sm:$0xff] }
 0x2b2   :  { %10270 = vmatpush1.bf16.msra.mxu0 %v14206_v56  ;;  %10829 = vmatpush1.bf16.msra.mxu1 %v14208_v57  ;;  %v1493_v56 = vld [vmem:[%s20161_s1 + $0x2d20] sm:$0xff]  ;;  %v1490_v57 = vld [vmem:[%s20161_s1 + $0x2d08] sm:$0xff] }
 0x2b3   :  { %10271 = vmatprep.subr.bf16.mxu0 %v14215_v58  ;;  %10830 = vmatprep.subr.bf16.mxu1 %v14217_v59  ;;  %v1494_v58 = vld [vmem:[%s20161_s1 + $0x2d28] sm:$0xff]  ;;  %v14270_v59 = vcombine.low %v1481_v47, %v1485_v48  ;;  %v14279_v61 = vcombine.high %v1489_v55, %v1493_v56  ;;  %v1545_v48 = vld [vmem:[%s20161_s1 + $0x2ec0] sm:$0xff] }
 0x2b4   :  { %v14281_v62 = vcombine.high %v1490_v57, %v1494_v58  ;;  %v14280_v4 = vcombine.low %v1490_v57, %v1494_v58  ;;  %v1557_v57 = vld [vmem:[%s20161_s1 + $0x2f20] sm:$0xff]  ;;  %v1554_v58 = vld [vmem:[%s20161_s1 + $0x2f08] sm:$0xff] }
 0x2b6   :  { %10272 = vmatpush1.bf16.msra.mxu0 %v14214_v0  ;;  %10831 = vmatpush1.bf16.msra.mxu1 %v14216_v1  ;;  %v1501_v0 = vld [vmem:[%s20161_s1 + $0x2d60] sm:$0xff]  ;;  %v1498_v1 = vld [vmem:[%s20161_s1 + $0x2d48] sm:$0xff] }
 0x2b7   :  { %10273 = vmatprep.subr.bf16.mxu0 %v14223_v2  ;;  %10832 = vmatprep.subr.bf16.mxu1 %v14225_v3  ;;  %v1502_v2 = vld [vmem:[%s20161_s1 + $0x2d68] sm:$0xff]  ;;  %v14278_v3 = vcombine.low %v1489_v55, %v1493_v56  ;;  %v14287_v5 = vcombine.high %v1497_v63, %v1501_v0  ;;  %v1553_v56 = vld [vmem:[%s20161_s1 + $0x2f00] sm:$0xff] }
 0x2b8   :  { %v14289_v6 = vcombine.high %v1498_v1, %v1502_v2  ;;  %v14288_v12 = vcombine.low %v1498_v1, %v1502_v2  ;;  %v1565_v1 = vld [vmem:[%s20161_s1 + $0x2f60] sm:$0xff]  ;;  %v1562_v2 = vld [vmem:[%s20161_s1 + $0x2f48] sm:$0xff] }
 0x2ba   :  { %10274 = vmatpush1.bf16.msra.mxu0 %v14222_v8  ;;  %10833 = vmatpush1.bf16.msra.mxu1 %v14224_v9  ;;  %v1509_v8 = vld [vmem:[%s20161_s1 + $0x2da0] sm:$0xff]  ;;  %v1506_v9 = vld [vmem:[%s20161_s1 + $0x2d88] sm:$0xff] }
 0x2bb   :  { %10275 = vmatprep.subr.bf16.mxu0 %v14231_v10  ;;  %10834 = vmatprep.subr.bf16.mxu1 %v14233_v11  ;;  %v1510_v10 = vld [vmem:[%s20161_s1 + $0x2da8] sm:$0xff]  ;;  %v14286_v11 = vcombine.low %v1497_v63, %v1501_v0  ;;  %v14295_v13 = vcombine.high %v1505_v7, %v1509_v8  ;;  %v1561_v0 = vld [vmem:[%s20161_s1 + $0x2f40] sm:$0xff] }
 0x2bc   :  { %v14297_v14 = vcombine.high %v1506_v9, %v1510_v10  ;;  %v14296_v20 = vcombine.low %v1506_v9, %v1510_v10  ;;  %v1573_v9 = vld [vmem:[%s20161_s1 + $0x2fa0] sm:$0xff]  ;;  %v1570_v10 = vld [vmem:[%s20161_s1 + $0x2f88] sm:$0xff] }
 0x2be   :  { %10276 = vmatpush1.bf16.msra.mxu0 %v14230_v16  ;;  %10835 = vmatpush1.bf16.msra.mxu1 %v14232_v17  ;;  %v1517_v16 = vld [vmem:[%s20161_s1 + $0x2de0] sm:$0xff]  ;;  %v1514_v17 = vld [vmem:[%s20161_s1 + $0x2dc8] sm:$0xff] }
 0x2bf   :  { %10277 = vmatprep.subr.bf16.mxu0 %v14239_v18  ;;  %10836 = vmatprep.subr.bf16.mxu1 %v14241_v19  ;;  %v1518_v18 = vld [vmem:[%s20161_s1 + $0x2de8] sm:$0xff]  ;;  %v14294_v19 = vcombine.low %v1505_v7, %v1509_v8  ;;  %v14303_v21 = vcombine.high %v1513_v15, %v1517_v16  ;;  %v1569_v8 = vld [vmem:[%s20161_s1 + $0x2f80] sm:$0xff] }
 0x2c0   :  { %v14305_v22 = vcombine.high %v1514_v17, %v1518_v18  ;;  %v14304_v28 = vcombine.low %v1514_v17, %v1518_v18  ;;  %v1581_v17 = vld [vmem:[%s20161_s1 + $0x2fe0] sm:$0xff]  ;;  %v1578_v18 = vld [vmem:[%s20161_s1 + $0x2fc8] sm:$0xff] }
 0x2c2   :  { %10278 = vmatpush1.bf16.msra.mxu0 %v14238_v24  ;;  %10837 = vmatpush1.bf16.msra.mxu1 %v14240_v25  ;;  %v1525_v24 = vld [vmem:[%s20161_s1 + $0x2e20] sm:$0xff]  ;;  %v1522_v25 = vld [vmem:[%s20161_s1 + $0x2e08] sm:$0xff] }
 0x2c3   :  { %10290 = vmatprep.subr.bf16.mxu0 %v14247_v26  ;;  %10849 = vmatprep.subr.bf16.mxu1 %v14249_v27  ;;  %v1526_v26 = vld [vmem:[%s20161_s1 + $0x2e28] sm:$0xff]  ;;  %v14302_v27 = vcombine.low %v1513_v15, %v1517_v16  ;;  %v14311_v29 = vcombine.high %v1521_v23, %v1525_v24  ;;  %v1577_v16 = vld [vmem:[%s20161_s1 + $0x2fc0] sm:$0xff] }
 0x2c5   :  { %10280 = vmatmul.mubr.bf16.vlgmr.msra.gmra.mrb[0].mxu0 %v14836_v30  ;;  %10839 = vmatmul.mubr.bf16.vlgmr.msra.gmra.mrb[0].mxu1 %v14836_v30  ;;  %v14313_v30 = vcombine.high %v1522_v25, %v1526_v26 }
 0x2c6   :  { %10291 = vmatpush1.bf16.msra.mxu0 %v14246_v33  ;;  %10850 = vmatpush1.bf16.msra.mxu1 %v14248_v34  ;;  %v1530_v33 = vld [vmem:[%s20161_s1 + $0x2e48] sm:$0xff] }
 0x2c7   :  { %10292 = vmatprep.subr.bf16.mxu0 %v14255_v35  ;;  %10851 = vmatprep.subr.bf16.mxu1 %v14257_v36  ;;  %v1534_v34 = vld [vmem:[%s20161_s1 + $0x2e68] sm:$0xff]  ;;  %v14310_v35 = vcombine.low %v1521_v23, %v1525_v24  ;;  %v14312_v36 = vcombine.low %v1522_v25, %v1526_v26  ;;  %v1585_v24 = vld [vmem:[%s20161_s1 + $0x3000] sm:$0xff] }
 0x2c8   :  { %10322 = vmatprep.mubr.bf16.mxu0 %v14837_v40  ;;  %10881 = vmatprep.mubr.bf16.mxu1 %v14837_v40  ;;  %v14321_v39 = vcombine.high %v1530_v33, %v1534_v34  ;;  %v1537_v40 = vld [vmem:[%s20161_s1 + $0x2e80] sm:$0xff]  ;;  %v1586_v26 = vld [vmem:[%s20161_s1 + $0x3008] sm:$0xff] }
 0x2c9   :  { %v1589_v25 = vld [vmem:[%s20161_s1 + $0x3020] sm:$0xff] }
 0x2ca   :  { %10293 = vmatpush1.bf16.msra.mxu0 %v14254_v43  ;;  %10852 = vmatpush1.bf16.msra.mxu1 %v14256_v44  ;;  %v1542_v43 = vld [vmem:[%s20161_s1 + $0x2ea8] sm:$0xff]  ;;  %v14318_v44 = vcombine.low %v1529_v31, %v1533_v32  ;;  %v1593_v32 = vld [vmem:[%s20161_s1 + $0x3040] sm:$0xff] }
 0x2cb   :  { %10294 = vmatprep.subr.bf16.mxu0 %v14263_v45  ;;  %10853 = vmatprep.subr.bf16.mxu1 %v14265_v46  ;;  %v14320_v45 = vcombine.low %v1530_v33, %v1534_v34  ;;  %v14327_v46 = vcombine.high %v1537_v40, %v1541_v41  ;;  %v14329_v47 = vcombine.high %v1538_v42, %v1542_v43  ;;  %v1597_v33 = vld [vmem:[%s20161_s1 + $0x3060] sm:$0xff]  ;;  %v14839_v34 = vld [vmem:[%s20162_s0 + $0x58] ss:$100 sps:$4 sm:$0xff]  }
 0x2ce   :  { %10295 = vmatpush1.bf16.msra.mxu0 %v14262_v51  ;;  %10854 = vmatpush1.bf16.msra.mxu1 %v14264_v52  ;;  %v1550_v51 = vld [vmem:[%s20161_s1 + $0x2ee8] sm:$0xff]  ;;  %v14326_v52 = vcombine.low %v1537_v40, %v1541_v41  ;;  %v14383_v40 = vcombine.high %v1593_v32, %v1597_v33 }
 0x2cf   :  { %10296 = vmatprep.subr.bf16.mxu0 %v14271_v53  ;;  %10855 = vmatprep.subr.bf16.mxu1 %v14273_v54  ;;  %v14328_v53 = vcombine.low %v1538_v42, %v1542_v43  ;;  %v14335_v54 = vcombine.high %v1545_v48, %v1549_v49  ;;  %v14337_v55 = vcombine.high %v1546_v50, %v1550_v51  ;;  %v1601_v42 = vld [vmem:[%s20161_s1 + $0x3080] sm:$0xff] }
 0x2d0   :  { %v1605_v43 = vld [vmem:[%s20161_s1 + $0x30a0] sm:$0xff] }
 0x2d2   :  { %10297 = vmatpush1.bf16.msra.mxu0 %v14270_v59  ;;  %10856 = vmatpush1.bf16.msra.mxu1 %v14272_v60  ;;  %v1558_v59 = vld [vmem:[%s20161_s1 + $0x2f28] sm:$0xff]  ;;  %v14334_v60 = vcombine.low %v1545_v48, %v1549_v49  ;;  %v14391_v48 = vcombine.high %v1601_v42, %v1605_v43 }
 0x2d3   :  { %10298 = vmatprep.subr.bf16.mxu0 %v14279_v61  ;;  %10857 = vmatprep.subr.bf16.mxu1 %v14281_v62  ;;  %v14336_v61 = vcombine.low %v1546_v50, %v1550_v51  ;;  %v14343_v62 = vcombine.high %v1553_v56, %v1557_v57  ;;  %v14345_v63 = vcombine.high %v1554_v58, %v1558_v59  ;;  %v1609_v50 = vld [vmem:[%s20161_s1 + $0x30c0] sm:$0xff] }
 0x2d4   :  { %v1613_v51 = vld [vmem:[%s20161_s1 + $0x30e0] sm:$0xff] }
 0x2d6   :  { %10299 = vmatpush1.bf16.msra.mxu0 %v14278_v3  ;;  %10858 = vmatpush1.bf16.msra.mxu1 %v14280_v4  ;;  %v1566_v3 = vld [vmem:[%s20161_s1 + $0x2f68] sm:$0xff]  ;;  %v14342_v4 = vcombine.low %v1553_v56, %v1557_v57  ;;  %v14399_v56 = vcombine.high %v1609_v50, %v1613_v51 }
 0x2d7   :  { %10300 = vmatprep.subr.bf16.mxu0 %v14287_v5  ;;  %10859 = vmatprep.subr.bf16.mxu1 %v14289_v6  ;;  %v14344_v5 = vcombine.low %v1554_v58, %v1558_v59  ;;  %v14351_v6 = vcombine.high %v1561_v0, %v1565_v1  ;;  %v14353_v7 = vcombine.high %v1562_v2, %v1566_v3  ;;  %v1617_v58 = vld [vmem:[%s20161_s1 + $0x3100] sm:$0xff] }
 0x2d8   :  { %v1621_v59 = vld [vmem:[%s20161_s1 + $0x3120] sm:$0xff] }
 0x2da   :  { %10301 = vmatpush1.bf16.msra.mxu0 %v14286_v11  ;;  %10860 = vmatpush1.bf16.msra.mxu1 %v14288_v12  ;;  %v1574_v11 = vld [vmem:[%s20161_s1 + $0x2fa8] sm:$0xff]  ;;  %v14350_v12 = vcombine.low %v1561_v0, %v1565_v1  ;;  %v14407_v0 = vcombine.high %v1617_v58, %v1621_v59 }
 0x2db   :  { %10302 = vmatprep.subr.bf16.mxu0 %v14295_v13  ;;  %10861 = vmatprep.subr.bf16.mxu1 %v14297_v14  ;;  %v14352_v13 = vcombine.low %v1562_v2, %v1566_v3  ;;  %v14359_v14 = vcombine.high %v1569_v8, %v1573_v9  ;;  %v14361_v15 = vcombine.high %v1570_v10, %v1574_v11  ;;  %v1625_v2 = vld [vmem:[%s20161_s1 + $0x3140] sm:$0xff] }
 0x2dc   :  { %v1629_v3 = vld [vmem:[%s20161_s1 + $0x3160] sm:$0xff] }
 0x2de   :  { %10303 = vmatpush1.bf16.msra.mxu0 %v14294_v19  ;;  %10862 = vmatpush1.bf16.msra.mxu1 %v14296_v20  ;;  %v1582_v19 = vld [vmem:[%s20161_s1 + $0x2fe8] sm:$0xff]  ;;  %v14358_v20 = vcombine.low %v1569_v8, %v1573_v9  ;;  %v14415_v8 = vcombine.high %v1625_v2, %v1629_v3 }
 0x2df   :  { %10304 = vmatprep.subr.bf16.mxu0 %v14303_v21  ;;  %10863 = vmatprep.subr.bf16.mxu1 %v14305_v22  ;;  %v14360_v21 = vcombine.low %v1570_v10, %v1574_v11  ;;  %v14367_v22 = vcombine.high %v1577_v16, %v1581_v17  ;;  %v14369_v23 = vcombine.high %v1578_v18, %v1582_v19  ;;  %v1633_v10 = vld [vmem:[%s20161_s1 + $0x3180] sm:$0xff] }
 0x2e0   :  { %v1637_v11 = vld [vmem:[%s20161_s1 + $0x31a0] sm:$0xff] }
 0x2e2   :  { %10305 = vmatpush1.bf16.msra.mxu0 %v14302_v27  ;;  %10864 = vmatpush1.bf16.msra.mxu1 %v14304_v28  ;;  %v1590_v27 = vld [vmem:[%s20161_s1 + $0x3028] sm:$0xff]  ;;  %v14366_v28 = vcombine.low %v1577_v16, %v1581_v17  ;;  %v14423_v16 = vcombine.high %v1633_v10, %v1637_v11 }
 0x2e3   :  { %10306 = vmatprep.subr.bf16.mxu0 %v14311_v29  ;;  %10865 = vmatprep.subr.bf16.mxu1 %v14313_v30  ;;  %v14368_v29 = vcombine.low %v1578_v18, %v1582_v19  ;;  %v14375_v30 = vcombine.high %v1585_v24, %v1589_v25  ;;  %v14377_v31 = vcombine.high %v1586_v26, %v1590_v27  ;;  %v1641_v18 = vld [vmem:[%s20161_s1 + $0x31c0] sm:$0xff] }
 0x2e4   :  { %v1645_v19 = vld [vmem:[%s20161_s1 + $0x31e0] sm:$0xff] }
 0x2e6   :  { %10307 = vmatpush1.bf16.msra.mxu0 %v14310_v35  ;;  %10866 = vmatpush1.bf16.msra.mxu1 %v14312_v36  ;;  %v1594_v35 = vld [vmem:[%s20161_s1 + $0x3048] sm:$0xff] }
 0x2e7   :  { %10308 = vmatprep.subr.bf16.mxu0 %v14319_v38  ;;  %10867 = vmatprep.subr.bf16.mxu1 %v14321_v39  ;;  %v1598_v36 = vld [vmem:[%s20161_s1 + $0x3068] sm:$0xff]  ;;  %v14374_v38 = vcombine.low %v1585_v24, %v1589_v25  ;;  %v14376_v39 = vcombine.low %v1586_v26, %v1590_v27  ;;  %v14431_v24 = vcombine.high %v1641_v18, %v1645_v19  ;;  %v51_v26 = vld [vmem:[%s20161_s1 + $0x10] sm:$0xff] }
 0x2e8   :  { %v14385_v41 = vcombine.high %v1594_v35, %v1598_v36  ;;  %v55_v27 = vld [vmem:[%s20161_s1 + $0x30] sm:$0xff] }
 0x2ea   :  { %10309 = vmatpush1.bf16.msra.mxu0 %v14318_v44  ;;  %10868 = vmatpush1.bf16.msra.mxu1 %v14320_v45  ;;  %v1602_v44 = vld [vmem:[%s20161_s1 + $0x3088] sm:$0xff] }
 0x2eb   :  { %10310 = vmatprep.subr.bf16.mxu0 %v14327_v46  ;;  %10869 = vmatprep.subr.bf16.mxu1 %v14329_v47  ;;  %v1606_v45 = vld [vmem:[%s20161_s1 + $0x30a8] sm:$0xff]  ;;  %v14382_v46 = vcombine.low %v1593_v32, %v1597_v33  ;;  %v14384_v47 = vcombine.low %v1594_v35, %v1598_v36  ;;  %v12843_v32 = vcombine.high %v51_v26, %v55_v27  ;;  %v63_v35 = vld [vmem:[%s20161_s1 + $0x70] sm:$0xff]  ;;  %v14840_v36 = vld [vmem:[%s20162_s0 + $0x60] ss:$100 sps:$4 sm:$0xff]  }
 0x2ec   :  { %v14393_v49 = vcombine.high %v1602_v44, %v1606_v45 }
 0x2ee   :  { %10311 = vmatpush1.bf16.msra.mxu0 %v14326_v52  ;;  %10870 = vmatpush1.bf16.msra.mxu1 %v14328_v53  ;;  %v1610_v52 = vld [vmem:[%s20161_s1 + $0x30c8] sm:$0xff] }
 0x2ef   :  { %10312 = vmatprep.subr.bf16.mxu0 %v14335_v54  ;;  %10871 = vmatprep.subr.bf16.mxu1 %v14337_v55  ;;  %v1614_v53 = vld [vmem:[%s20161_s1 + $0x30e8] sm:$0xff]  ;;  %v14390_v54 = vcombine.low %v1601_v42, %v1605_v43  ;;  %v14392_v55 = vcombine.low %v1602_v44, %v1606_v45  ;;  %v67_v44 = vld [vmem:[%s20161_s1 + $0x90] sm:$0xff] }
 0x2f0   :  { %v14401_v57 = vcombine.high %v1610_v52, %v1614_v53  ;;  %v71_v45 = vld [vmem:[%s20161_s1 + $0xb0] sm:$0xff] }
 0x2f2   :  { %10313 = vmatpush1.bf16.msra.mxu0 %v14334_v60  ;;  %10872 = vmatpush1.bf16.msra.mxu1 %v14336_v61  ;;  %v1618_v60 = vld [vmem:[%s20161_s1 + $0x3108] sm:$0xff] }
 0x2f3   :  { %10314 = vmatprep.subr.bf16.mxu0 %v14343_v62  ;;  %10873 = vmatprep.subr.bf16.mxu1 %v14345_v63  ;;  %v1622_v61 = vld [vmem:[%s20161_s1 + $0x3128] sm:$0xff]  ;;  %v14398_v62 = vcombine.low %v1609_v50, %v1613_v51  ;;  %v14400_v63 = vcombine.low %v1610_v52, %v1614_v53  ;;  %v12859_v50 = vcombine.high %v67_v44, %v71_v45  ;;  %v75_v52 = vld [vmem:[%s20161_s1 + $0xd0] sm:$0xff] }
 0x2f4   :  { %v14409_v1 = vcombine.high %v1618_v60, %v1622_v61  ;;  %v79_v53 = vld [vmem:[%s20161_s1 + $0xf0] sm:$0xff] }
 0x2f6   :  { %10315 = vmatpush1.bf16.msra.mxu0 %v14342_v4  ;;  %10874 = vmatpush1.bf16.msra.mxu1 %v14344_v5  ;;  %v1626_v4 = vld [vmem:[%s20161_s1 + $0x3148] sm:$0xff] }
 0x2f7   :  { %10316 = vmatprep.subr.bf16.mxu0 %v14351_v6  ;;  %10875 = vmatprep.subr.bf16.mxu1 %v14353_v7  ;;  %v1630_v5 = vld [vmem:[%s20161_s1 + $0x3168] sm:$0xff]  ;;  %v14406_v6 = vcombine.low %v1617_v58, %v1621_v59  ;;  %v14408_v7 = vcombine.low %v1618_v60, %v1622_v61  ;;  %v12867_v59 = vcombine.high %v75_v52, %v79_v53  ;;  %v83_v61 = vld [vmem:[%s20161_s1 + $0x110] sm:$0xff] }
 0x2f8   :  { %v14417_v9 = vcombine.high %v1626_v4, %v1630_v5 }
 0x2fa   :  { %10317 = vmatpush1.bf16.msra.mxu0 %v14350_v12  ;;  %10876 = vmatpush1.bf16.msra.mxu1 %v14352_v13  ;;  %v1634_v12 = vld [vmem:[%s20161_s1 + $0x3188] sm:$0xff] }
 0x2fb   :  { %10318 = vmatprep.subr.bf16.mxu0 %v14359_v14  ;;  %10877 = vmatprep.subr.bf16.mxu1 %v14361_v15  ;;  %v1638_v13 = vld [vmem:[%s20161_s1 + $0x31a8] sm:$0xff]  ;;  %v14414_v14 = vcombine.low %v1625_v2, %v1629_v3  ;;  %v14416_v15 = vcombine.low %v1626_v4, %v1630_v5  ;;  %v91_v5 = vld [vmem:[%s20161_s1 + $0x150] sm:$0xff] }
 0x2fc   :  { %v14425_v17 = vcombine.high %v1634_v12, %v1638_v13 }
 0x2fe   :  { %10319 = vmatpush1.bf16.msra.mxu0 %v14358_v20  ;;  %10878 = vmatpush1.bf16.msra.mxu1 %v14360_v21  ;;  %v1642_v20 = vld [vmem:[%s20161_s1 + $0x31c8] sm:$0xff] }
 0x2ff   :  { %10320 = vmatprep.subr.bf16.mxu0 %v14367_v22  ;;  %10879 = vmatprep.subr.bf16.mxu1 %v14369_v23  ;;  %v1646_v21 = vld [vmem:[%s20161_s1 + $0x31e8] sm:$0xff]  ;;  %v14422_v22 = vcombine.low %v1633_v10, %v1637_v11  ;;  %v14424_v23 = vcombine.low %v1634_v12, %v1638_v13  ;;  %v99_v13 = vld [vmem:[%s20161_s1 + $0x190] sm:$0xff] }
 0x300   :  { %v14433_v25 = vcombine.high %v1642_v20, %v1646_v21 }
 0x302   :  { %10321 = vmatpush1.bf16.msra.mxu0 %v14366_v28  ;;  %10880 = vmatpush1.bf16.msra.mxu1 %v14368_v29  ;;  %v52_v28 = vld [vmem:[%s20161_s1 + $0x18] sm:$0xff] }
 0x303   :  { %10333 = vmatprep.subr.bf16.mxu0 %v14375_v30  ;;  %10892 = vmatprep.subr.bf16.mxu1 %v14377_v31  ;;  %v56_v29 = vld [vmem:[%s20161_s1 + $0x38] sm:$0xff]  ;;  %v14430_v30 = vcombine.low %v1641_v18, %v1645_v19  ;;  %v14432_v31 = vcombine.low %v1642_v20, %v1646_v21  ;;  %v107_v21 = vld [vmem:[%s20161_s1 + $0x1d0] sm:$0xff] }
 0x304   :  { %v12845_v33 = vcombine.high %v52_v28, %v56_v29 }
 0x305   :  { %10323 = vmatmul.mubr.bf16.vlgmr.msra.gmra.mrb[0].mxu0 %v14839_v34  ;;  %10882 = vmatmul.mubr.bf16.vlgmr.msra.gmra.mrb[0].mxu1 %v14839_v34  ;;  %v59_v34 = vld [vmem:[%s20161_s1 + $0x50] sm:$0xff] }
 0x306   :  { %10334 = vmatpush1.bf16.msra.mxu0 %v14374_v38  ;;  %10893 = vmatpush1.bf16.msra.mxu1 %v14376_v39  ;;  %v60_v38 = vld [vmem:[%s20161_s1 + $0x58] sm:$0xff]  ;;  %v12851_v42 = vcombine.high %v59_v34, %v63_v35 }
 0x307   :  { %10335 = vmatprep.subr.bf16.mxu0 %v14383_v40  ;;  %10894 = vmatprep.subr.bf16.mxu1 %v14385_v41  ;;  %v64_v39 = vld [vmem:[%s20161_s1 + $0x78] sm:$0xff]  ;;  %v12842_v40 = vcombine.low %v51_v26, %v55_v27  ;;  %v12844_v41 = vcombine.low %v52_v28, %v56_v29  ;;  %v115_v29 = vld [vmem:[%s20161_s1 + $0x210] sm:$0xff] }
 0x308   :  { %10365 = vmatprep.mubr.bf16.mxu0 %v14931_v37  ;;  %10924 = vmatprep.mubr.bf16.mxu1 %v14931_v37  ;;  %v12853_v43 = vcombine.high %v60_v38, %v64_v39 }
 0x30a   :  { %10336 = vmatpush1.bf16.msra.mxu0 %v14382_v46  ;;  %10895 = vmatpush1.bf16.msra.mxu1 %v14384_v47  ;;  %v68_v46 = vld [vmem:[%s20161_s1 + $0x98] sm:$0xff] }
 0x30b   :  { %10337 = vmatprep.subr.bf16.mxu0 %v14391_v48  ;;  %10896 = vmatprep.subr.bf16.mxu1 %v14393_v49  ;;  %v72_v47 = vld [vmem:[%s20161_s1 + $0xb8] sm:$0xff]  ;;  %v12850_v48 = vcombine.low %v59_v34, %v63_v35  ;;  %v12852_v49 = vcombine.low %v60_v38, %v64_v39  ;;  %v123_v38 = vld [vmem:[%s20161_s1 + $0x250] sm:$0xff] }
 0x30c   :  { %v12861_v51 = vcombine.high %v68_v46, %v72_v47  ;;  %v12860_v58 = vcombine.low %v68_v46, %v72_v47  ;;  %v127_v39 = vld [vmem:[%s20161_s1 + $0x270] sm:$0xff] }
 0x30d   :  { %v131_v46 = vld [vmem:[%s20161_s1 + $0x290] sm:$0xff] }
 0x30e   :  { %10338 = vmatpush1.bf16.msra.mxu0 %v14390_v54  ;;  %10897 = vmatpush1.bf16.msra.mxu1 %v14392_v55  ;;  %v14905_v54 = vld [vmem:[%s20162_s0 + $0x4] ss:$100 sps:$4 sm:$0xff]   ;;  %v76_v55 = vld [vmem:[%s20161_s1 + $0xd8] sm:$0xff]  ;;  %v135_v47 = vld [vmem:[%s20161_s1 + $0x2b0] sm:$0xff] }
 0x30f   :  { %10339 = vmatprep.subr.bf16.mxu0 %v14399_v56  ;;  %10898 = vmatprep.subr.bf16.mxu1 %v14401_v57  ;;  %v80_v56 = vld [vmem:[%s20161_s1 + $0xf8] sm:$0xff]  ;;  %v12858_v57 = vcombine.low %v67_v44, %v71_v45  ;;  %v12915_v44 = vcombine.high %v123_v38, %v127_v39 }
 0x310   :  { %v12869_v60 = vcombine.high %v76_v55, %v80_v56  ;;  %v12868_v2 = vcombine.low %v76_v55, %v80_v56  ;;  %v143_v55 = vld [vmem:[%s20161_s1 + $0x2f0] sm:$0xff]  ;;  %v140_v56 = vld [vmem:[%s20161_s1 + $0x2d8] sm:$0xff] }
 0x312   :  { %10340 = vmatpush1.bf16.msra.mxu0 %v14398_v62  ;;  %10899 = vmatpush1.bf16.msra.mxu1 %v14400_v63  ;;  %v87_v62 = vld [vmem:[%s20161_s1 + $0x130] sm:$0xff]  ;;  %v84_v63 = vld [vmem:[%s20161_s1 + $0x118] sm:$0xff] }
 0x313   :  { %10341 = vmatprep.subr.bf16.mxu0 %v14407_v0  ;;  %10900 = vmatprep.subr.bf16.mxu1 %v14409_v1  ;;  %v88_v0 = vld [vmem:[%s20161_s1 + $0x138] sm:$0xff]  ;;  %v12866_v1 = vcombine.low %v75_v52, %v79_v53  ;;  %v12875_v3 = vcombine.high %v83_v61, %v87_v62  ;;  %v12923_v52 = vcombine.high %v131_v46, %v135_v47 }
 0x314   :  { %v12877_v4 = vcombine.high %v84_v63, %v88_v0  ;;  %v12876_v10 = vcombine.low %v84_v63, %v88_v0  ;;  %v151_v63 = vld [vmem:[%s20161_s1 + $0x330] sm:$0xff]  ;;  %v148_v0 = vld [vmem:[%s20161_s1 + $0x318] sm:$0xff] }
 0x316   :  { %10342 = vmatpush1.bf16.msra.mxu0 %v14406_v6  ;;  %10901 = vmatpush1.bf16.msra.mxu1 %v14408_v7  ;;  %v95_v6 = vld [vmem:[%s20161_s1 + $0x170] sm:$0xff]  ;;  %v92_v7 = vld [vmem:[%s20161_s1 + $0x158] sm:$0xff] }
 0x317   :  { %10343 = vmatprep.subr.bf16.mxu0 %v14415_v8  ;;  %10902 = vmatprep.subr.bf16.mxu1 %v14417_v9  ;;  %v96_v8 = vld [vmem:[%s20161_s1 + $0x178] sm:$0xff]  ;;  %v12874_v9 = vcombine.low %v83_v61, %v87_v62  ;;  %v12883_v11 = vcombine.high %v91_v5, %v95_v6  ;;  %v147_v62 = vld [vmem:[%s20161_s1 + $0x310] sm:$0xff] }
 0x318   :  { %v12885_v12 = vcombine.high %v92_v7, %v96_v8  ;;  %v12884_v18 = vcombine.low %v92_v7, %v96_v8  ;;  %v159_v7 = vld [vmem:[%s20161_s1 + $0x370] sm:$0xff]  ;;  %v156_v8 = vld [vmem:[%s20161_s1 + $0x358] sm:$0xff] }
 0x31a   :  { %10344 = vmatpush1.bf16.msra.mxu0 %v14414_v14  ;;  %10903 = vmatpush1.bf16.msra.mxu1 %v14416_v15  ;;  %v103_v14 = vld [vmem:[%s20161_s1 + $0x1b0] sm:$0xff]  ;;  %v100_v15 = vld [vmem:[%s20161_s1 + $0x198] sm:$0xff] }
 0x31b   :  { %10345 = vmatprep.subr.bf16.mxu0 %v14423_v16  ;;  %10904 = vmatprep.subr.bf16.mxu1 %v14425_v17  ;;  %v104_v16 = vld [vmem:[%s20161_s1 + $0x1b8] sm:$0xff]  ;;  %v12882_v17 = vcombine.low %v91_v5, %v95_v6  ;;  %v12891_v19 = vcombine.high %v99_v13, %v103_v14  ;;  %v155_v6 = vld [vmem:[%s20161_s1 + $0x350] sm:$0xff] }
 0x31c   :  { %v12893_v20 = vcombine.high %v100_v15, %v104_v16  ;;  %v12892_v26 = vcombine.low %v100_v15, %v104_v16  ;;  %v167_v15 = vld [vmem:[%s20161_s1 + $0x3b0] sm:$0xff]  ;;  %v164_v16 = vld [vmem:[%s20161_s1 + $0x398] sm:$0xff] }
 0x31e   :  { %10346 = vmatpush1.bf16.msra.mxu0 %v14422_v22  ;;  %10905 = vmatpush1.bf16.msra.mxu1 %v14424_v23  ;;  %v111_v22 = vld [vmem:[%s20161_s1 + $0x1f0] sm:$0xff]  ;;  %v108_v23 = vld [vmem:[%s20161_s1 + $0x1d8] sm:$0xff] }
 0x31f   :  { %10347 = vmatprep.subr.bf16.mxu0 %v14431_v24  ;;  %10906 = vmatprep.subr.bf16.mxu1 %v14433_v25  ;;  %v112_v24 = vld [vmem:[%s20161_s1 + $0x1f8] sm:$0xff]  ;;  %v12890_v25 = vcombine.low %v99_v13, %v103_v14  ;;  %v12899_v27 = vcombine.high %v107_v21, %v111_v22  ;;  %v163_v14 = vld [vmem:[%s20161_s1 + $0x390] sm:$0xff] }
 0x320   :  { %v12901_v28 = vcombine.high %v108_v23, %v112_v24  ;;  %v12900_v34 = vcombine.low %v108_v23, %v112_v24  ;;  %v175_v23 = vld [vmem:[%s20161_s1 + $0x3f0] sm:$0xff]  ;;  %v172_v24 = vld [vmem:[%s20161_s1 + $0x3d8] sm:$0xff] }
 0x322   :  { %10348 = vmatpush1.bf16.msra.mxu0 %v14430_v30  ;;  %10907 = vmatpush1.bf16.msra.mxu1 %v14432_v31  ;;  %v119_v30 = vld [vmem:[%s20161_s1 + $0x230] sm:$0xff]  ;;  %v116_v31 = vld [vmem:[%s20161_s1 + $0x218] sm:$0xff] }
 0x323   :  { %10935 = vmatprep.subr.bf16.mxu0 %v12843_v32  ;;  %11494 = vmatprep.subr.bf16.mxu1 %v12845_v33  ;;  %v120_v32 = vld [vmem:[%s20161_s1 + $0x238] sm:$0xff]  ;;  %v12898_v33 = vcombine.low %v107_v21, %v111_v22  ;;  %v12907_v35 = vcombine.high %v115_v29, %v119_v30  ;;  %v171_v22 = vld [vmem:[%s20161_s1 + $0x3d0] sm:$0xff] }
 0x325   :  { %10366 = vmatmul.mubr.bf16.vlgmr.msra.gmra.mrb[0].mxu0 %v14840_v36  ;;  %10925 = vmatmul.mubr.bf16.vlgmr.msra.gmra.mrb[0].mxu1 %v14840_v36  ;;  %v12909_v36 = vcombine.high %v116_v31, %v120_v32 }
 0x326   :  { %10936 = vmatpush1.bf16.msra.mxu0 %v12842_v40  ;;  %11495 = vmatpush1.bf16.msra.mxu1 %v12844_v41  ;;  %v124_v40 = vld [vmem:[%s20161_s1 + $0x258] sm:$0xff] }
 0x327   :  { %10937 = vmatprep.subr.bf16.mxu0 %v12851_v42  ;;  %11496 = vmatprep.subr.bf16.mxu1 %v12853_v43  ;;  %v128_v41 = vld [vmem:[%s20161_s1 + $0x278] sm:$0xff]  ;;  %v12906_v42 = vcombine.low %v115_v29, %v119_v30  ;;  %v12908_v43 = vcombine.low %v116_v31, %v120_v32  ;;  %v179_v30 = vld [vmem:[%s20161_s1 + $0x410] sm:$0xff] }
 0x328   :  { %10967 = vmatprep.mubr.bf16.mxu0 %v14905_v54  ;;  %11526 = vmatprep.mubr.bf16.mxu1 %v14905_v54  ;;  %v12917_v45 = vcombine.high %v124_v40, %v128_v41  ;;  %v139_v54 = vld [vmem:[%s20161_s1 + $0x2d0] sm:$0xff]  ;;  %v180_v32 = vld [vmem:[%s20161_s1 + $0x418] sm:$0xff] }
 0x329   :  { %v183_v31 = vld [vmem:[%s20161_s1 + $0x430] sm:$0xff] }
 0x32a   :  { %10938 = vmatpush1.bf16.msra.mxu0 %v12850_v48  ;;  %11497 = vmatpush1.bf16.msra.mxu1 %v12852_v49  ;;  %v132_v48 = vld [vmem:[%s20161_s1 + $0x298] sm:$0xff] }
 0x32b   :  { %10939 = vmatprep.subr.bf16.mxu0 %v12859_v50  ;;  %11498 = vmatprep.subr.bf16.mxu1 %v12861_v51  ;;  %v136_v49 = vld [vmem:[%s20161_s1 + $0x2b8] sm:$0xff]  ;;  %v12914_v50 = vcombine.low %v123_v38, %v127_v39  ;;  %v12916_v51 = vcombine.low %v124_v40, %v128_v41  ;;  %v187_v39 = vld [vmem:[%s20161_s1 + $0x450] sm:$0xff] }
 0x32c   :  { %v12925_v53 = vcombine.high %v132_v48, %v136_v49  ;;  %v191_v40 = vld [vmem:[%s20161_s1 + $0x470] sm:$0xff]  ;;  %v188_v41 = vld [vmem:[%s20161_s1 + $0x458] sm:$0xff] }
 0x32e   :  { %10940 = vmatpush1.bf16.msra.mxu0 %v12858_v57  ;;  %11499 = vmatpush1.bf16.msra.mxu1 %v12860_v58  ;;  %v144_v57 = vld [vmem:[%s20161_s1 + $0x2f8] sm:$0xff]  ;;  %v12922_v58 = vcombine.low %v131_v46, %v135_v47  ;;  %v195_v47 = vld [vmem:[%s20161_s1 + $0x490] sm:$0xff] }
 0x32f   :  { %10941 = vmatprep.subr.bf16.mxu0 %v12867_v59  ;;  %11500 = vmatprep.subr.bf16.mxu1 %v12869_v60  ;;  %v12924_v59 = vcombine.low %v132_v48, %v136_v49  ;;  %v12931_v60 = vcombine.high %v139_v54, %v143_v55  ;;  %v12933_v61 = vcombine.high %v140_v56, %v144_v57  ;;  %v199_v48 = vld [vmem:[%s20161_s1 + $0x4b0] sm:$0xff]  ;;  %v14906_v49 = vld [vmem:[%s20162_s0] ss:$100 sps:$4 sm:$0xff]  }
 0x332   :  { %10942 = vmatpush1.bf16.msra.mxu0 %v12866_v1  ;;  %11501 = vmatpush1.bf16.msra.mxu1 %v12868_v2  ;;  %v152_v1 = vld [vmem:[%s20161_s1 + $0x338] sm:$0xff]  ;;  %v12930_v2 = vcombine.low %v139_v54, %v143_v55  ;;  %v12987_v54 = vcombine.high %v195_v47, %v199_v48 }
 0x333   :  { %10943 = vmatprep.subr.bf16.mxu0 %v12875_v3  ;;  %11502 = vmatprep.subr.bf16.mxu1 %v12877_v4  ;;  %v12932_v3 = vcombine.low %v140_v56, %v144_v57  ;;  %v12939_v4 = vcombine.high %v147_v62, %v151_v63  ;;  %v12941_v5 = vcombine.high %v148_v0, %v152_v1  ;;  %v203_v56 = vld [vmem:[%s20161_s1 + $0x4d0] sm:$0xff] }
 0x334   :  { %v207_v57 = vld [vmem:[%s20161_s1 + $0x4f0] sm:$0xff] }
 0x336   :  { %10944 = vmatpush1.bf16.msra.mxu0 %v12874_v9  ;;  %11503 = vmatpush1.bf16.msra.mxu1 %v12876_v10  ;;  %v160_v9 = vld [vmem:[%s20161_s1 + $0x378] sm:$0xff]  ;;  %v12938_v10 = vcombine.low %v147_v62, %v151_v63  ;;  %v12995_v63 = vcombine.high %v203_v56, %v207_v57 }
 0x337   :  { %10945 = vmatprep.subr.bf16.mxu0 %v12883_v11  ;;  %11504 = vmatprep.subr.bf16.mxu1 %v12885_v12  ;;  %v12940_v11 = vcombine.low %v148_v0, %v152_v1  ;;  %v12947_v12 = vcombine.high %v155_v6, %v159_v7  ;;  %v12949_v13 = vcombine.high %v156_v8, %v160_v9  ;;  %v211_v1 = vld [vmem:[%s20161_s1 + $0x510] sm:$0xff] }
 0x33a   :  { %10946 = vmatpush1.bf16.msra.mxu0 %v12882_v17  ;;  %11505 = vmatpush1.bf16.msra.mxu1 %v12884_v18  ;;  %v168_v17 = vld [vmem:[%s20161_s1 + $0x3b8] sm:$0xff]  ;;  %v12946_v18 = vcombine.low %v155_v6, %v159_v7 }
 0x33b   :  { %10947 = vmatprep.subr.bf16.mxu0 %v12891_v19  ;;  %11506 = vmatprep.subr.bf16.mxu1 %v12893_v20  ;;  %v12948_v19 = vcombine.low %v156_v8, %v160_v9  ;;  %v12955_v20 = vcombine.high %v163_v14, %v167_v15  ;;  %v12957_v21 = vcombine.high %v164_v16, %v168_v17  ;;  %v219_v9 = vld [vmem:[%s20161_s1 + $0x550] sm:$0xff] }
 0x33e   :  { %10948 = vmatpush1.bf16.msra.mxu0 %v12890_v25  ;;  %11507 = vmatpush1.bf16.msra.mxu1 %v12892_v26  ;;  %v176_v25 = vld [vmem:[%s20161_s1 + $0x3f8] sm:$0xff]  ;;  %v12954_v26 = vcombine.low %v163_v14, %v167_v15 }
 0x33f   :  { %10949 = vmatprep.subr.bf16.mxu0 %v12899_v27  ;;  %11508 = vmatprep.subr.bf16.mxu1 %v12901_v28  ;;  %v12956_v27 = vcombine.low %v164_v16, %v168_v17  ;;  %v12963_v28 = vcombine.high %v171_v22, %v175_v23  ;;  %v12965_v29 = vcombine.high %v172_v24, %v176_v25  ;;  %v227_v17 = vld [vmem:[%s20161_s1 + $0x590] sm:$0xff] }
 0x342   :  { %10950 = vmatpush1.bf16.msra.mxu0 %v12898_v33  ;;  %11509 = vmatpush1.bf16.msra.mxu1 %v12900_v34  ;;  %v184_v33 = vld [vmem:[%s20161_s1 + $0x438] sm:$0xff]  ;;  %v12962_v34 = vcombine.low %v171_v22, %v175_v23 }
 0x343   :  { %10951 = vmatprep.subr.bf16.mxu0 %v12907_v35  ;;  %11510 = vmatprep.subr.bf16.mxu1 %v12909_v36  ;;  %v12964_v35 = vcombine.low %v172_v24, %v176_v25  ;;  %v12971_v36 = vcombine.high %v179_v30, %v183_v31  ;;  %v12973_v38 = vcombine.high %v180_v32, %v184_v33  ;;  %v235_v25 = vld [vmem:[%s20161_s1 + $0x5d0] sm:$0xff] }
 0x346   :  { %10952 = vmatpush1.bf16.msra.mxu0 %v12906_v42  ;;  %11511 = vmatpush1.bf16.msra.mxu1 %v12908_v43  ;;  %v192_v42 = vld [vmem:[%s20161_s1 + $0x478] sm:$0xff]  ;;  %v12970_v43 = vcombine.low %v179_v30, %v183_v31 }
 0x347   :  { %10953 = vmatprep.subr.bf16.mxu0 %v12915_v44  ;;  %11512 = vmatprep.subr.bf16.mxu1 %v12917_v45  ;;  %v12972_v44 = vcombine.low %v180_v32, %v184_v33  ;;  %v12979_v45 = vcombine.high %v187_v39, %v191_v40  ;;  %v12981_v46 = vcombine.high %v188_v41, %v192_v42  ;;  %v243_v33 = vld [vmem:[%s20161_s1 + $0x610] sm:$0xff] }
 0x34a   :  { %10954 = vmatpush1.bf16.msra.mxu0 %v12914_v50  ;;  %11513 = vmatpush1.bf16.msra.mxu1 %v12916_v51  ;;  %v196_v50 = vld [vmem:[%s20161_s1 + $0x498] sm:$0xff] }
 0x34b   :  { %10955 = vmatprep.subr.bf16.mxu0 %v12923_v52  ;;  %11514 = vmatprep.subr.bf16.mxu1 %v12925_v53  ;;  %v200_v51 = vld [vmem:[%s20161_s1 + $0x4b8] sm:$0xff]  ;;  %v12978_v52 = vcombine.low %v187_v39, %v191_v40  ;;  %v12980_v53 = vcombine.low %v188_v41, %v192_v42  ;;  %v251_v42 = vld [vmem:[%s20161_s1 + $0x650] sm:$0xff] }
 0x34c   :  { %v12989_v55 = vcombine.high %v196_v50, %v200_v51  ;;  %v12988_v62 = vcombine.low %v196_v50, %v200_v51  ;;  %v259_v50 = vld [vmem:[%s20161_s1 + $0x690] sm:$0xff] }
 0x34d   :  { %v263_v51 = vld [vmem:[%s20161_s1 + $0x6b0] sm:$0xff] }
 0x34e   :  { %10956 = vmatpush1.bf16.msra.mxu0 %v12922_v58  ;;  %11515 = vmatpush1.bf16.msra.mxu1 %v12924_v59  ;;  %v14907_v58 = vld [vmem:[%s20162_s0 + $0xc] ss:$100 sps:$4 sm:$0xff]   ;;  %v204_v59 = vld [vmem:[%s20161_s1 + $0x4d8] sm:$0xff] }
 0x34f   :  { %10957 = vmatprep.subr.bf16.mxu0 %v12931_v60  ;;  %11516 = vmatprep.subr.bf16.mxu1 %v12933_v61  ;;  %v208_v60 = vld [vmem:[%s20161_s1 + $0x4f8] sm:$0xff]  ;;  %v12986_v61 = vcombine.low %v195_v47, %v199_v48 }
 0x350   :  { %v12997_v0 = vcombine.high %v204_v59, %v208_v60  ;;  %v12996_v6 = vcombine.low %v204_v59, %v208_v60  ;;  %v271_v59 = vld [vmem:[%s20161_s1 + $0x6f0] sm:$0xff]  ;;  %v268_v60 = vld [vmem:[%s20161_s1 + $0x6d8] sm:$0xff] }
 0x352   :  { %10958 = vmatpush1.bf16.msra.mxu0 %v12930_v2  ;;  %11517 = vmatpush1.bf16.msra.mxu1 %v12932_v3  ;;  %v215_v2 = vld [vmem:[%s20161_s1 + $0x530] sm:$0xff]  ;;  %v212_v3 = vld [vmem:[%s20161_s1 + $0x518] sm:$0xff] }
 0x353   :  { %10959 = vmatprep.subr.bf16.mxu0 %v12939_v4  ;;  %11518 = vmatprep.subr.bf16.mxu1 %v12941_v5  ;;  %v216_v4 = vld [vmem:[%s20161_s1 + $0x538] sm:$0xff]  ;;  %v12994_v5 = vcombine.low %v203_v56, %v207_v57  ;;  %v13003_v7 = vcombine.high %v211_v1, %v215_v2  ;;  %v13051_v56 = vcombine.high %v259_v50, %v263_v51 }
 0x354   :  { %v13005_v8 = vcombine.high %v212_v3, %v216_v4  ;;  %v13004_v14 = vcombine.low %v212_v3, %v216_v4  ;;  %v279_v3 = vld [vmem:[%s20161_s1 + $0x730] sm:$0xff]  ;;  %v276_v4 = vld [vmem:[%s20161_s1 + $0x718] sm:$0xff] }
 0x356   :  { %10960 = vmatpush1.bf16.msra.mxu0 %v12938_v10  ;;  %11519 = vmatpush1.bf16.msra.mxu1 %v12940_v11  ;;  %v223_v10 = vld [vmem:[%s20161_s1 + $0x570] sm:$0xff]  ;;  %v220_v11 = vld [vmem:[%s20161_s1 + $0x558] sm:$0xff] }
 0x357   :  { %10961 = vmatprep.subr.bf16.mxu0 %v12947_v12  ;;  %11520 = vmatprep.subr.bf16.mxu1 %v12949_v13  ;;  %v224_v12 = vld [vmem:[%s20161_s1 + $0x578] sm:$0xff]  ;;  %v13002_v13 = vcombine.low %v211_v1, %v215_v2  ;;  %v13011_v15 = vcombine.high %v219_v9, %v223_v10  ;;  %v275_v2 = vld [vmem:[%s20161_s1 + $0x710] sm:$0xff] }
 0x358   :  { %v13013_v16 = vcombine.high %v220_v11, %v224_v12  ;;  %v13012_v22 = vcombine.low %v220_v11, %v224_v12  ;;  %v287_v11 = vld [vmem:[%s20161_s1 + $0x770] sm:$0xff]  ;;  %v284_v12 = vld [vmem:[%s20161_s1 + $0x758] sm:$0xff] }
 0x35a   :  { %10962 = vmatpush1.bf16.msra.mxu0 %v12946_v18  ;;  %11521 = vmatpush1.bf16.msra.mxu1 %v12948_v19  ;;  %v231_v18 = vld [vmem:[%s20161_s1 + $0x5b0] sm:$0xff]  ;;  %v228_v19 = vld [vmem:[%s20161_s1 + $0x598] sm:$0xff] }
 0x35b   :  { %10963 = vmatprep.subr.bf16.mxu0 %v12955_v20  ;;  %11522 = vmatprep.subr.bf16.mxu1 %v12957_v21  ;;  %v232_v20 = vld [vmem:[%s20161_s1 + $0x5b8] sm:$0xff]  ;;  %v13010_v21 = vcombine.low %v219_v9, %v223_v10  ;;  %v13019_v23 = vcombine.high %v227_v17, %v231_v18  ;;  %v283_v10 = vld [vmem:[%s20161_s1 + $0x750] sm:$0xff] }
 0x35c   :  { %v13021_v24 = vcombine.high %v228_v19, %v232_v20  ;;  %v13020_v30 = vcombine.low %v228_v19, %v232_v20  ;;  %v295_v19 = vld [vmem:[%s20161_s1 + $0x7b0] sm:$0xff]  ;;  %v292_v20 = vld [vmem:[%s20161_s1 + $0x798] sm:$0xff] }
 0x35e   :  { %10964 = vmatpush1.bf16.msra.mxu0 %v12954_v26  ;;  %11523 = vmatpush1.bf16.msra.mxu1 %v12956_v27  ;;  %v239_v26 = vld [vmem:[%s20161_s1 + $0x5f0] sm:$0xff]  ;;  %v236_v27 = vld [vmem:[%s20161_s1 + $0x5d8] sm:$0xff] }
 0x35f   :  { %10965 = vmatprep.subr.bf16.mxu0 %v12963_v28  ;;  %11524 = vmatprep.subr.bf16.mxu1 %v12965_v29  ;;  %v240_v28 = vld [vmem:[%s20161_s1 + $0x5f8] sm:$0xff]  ;;  %v13018_v29 = vcombine.low %v227_v17, %v231_v18  ;;  %v13027_v31 = vcombine.high %v235_v25, %v239_v26  ;;  %v291_v18 = vld [vmem:[%s20161_s1 + $0x790] sm:$0xff] }
 0x360   :  { %v13029_v32 = vcombine.high %v236_v27, %v240_v28  ;;  %v13028_v39 = vcombine.low %v236_v27, %v240_v28  ;;  %v303_v27 = vld [vmem:[%s20161_s1 + $0x7f0] sm:$0xff]  ;;  %v300_v28 = vld [vmem:[%s20161_s1 + $0x7d8] sm:$0xff] }
 0x362   :  { %10966 = vmatpush1.bf16.msra.mxu0 %v12962_v34  ;;  %11525 = vmatpush1.bf16.msra.mxu1 %v12964_v35  ;;  %v247_v34 = vld [vmem:[%s20161_s1 + $0x630] sm:$0xff]  ;;  %v244_v35 = vld [vmem:[%s20161_s1 + $0x618] sm:$0xff] }
 0x363   :  { %10978 = vmatprep.subr.bf16.mxu0 %v12971_v36  ;;  %11537 = vmatprep.subr.bf16.mxu1 %v12973_v38  ;;  %v248_v36 = vld [vmem:[%s20161_s1 + $0x638] sm:$0xff]  ;;  %v13026_v38 = vcombine.low %v235_v25, %v239_v26  ;;  %v13035_v40 = vcombine.high %v243_v33, %v247_v34  ;;  %v299_v26 = vld [vmem:[%s20161_s1 + $0x7d0] sm:$0xff] }
 0x364   :  { %v13037_v41 = vcombine.high %v244_v35, %v248_v36  ;;  %v13036_v47 = vcombine.low %v244_v35, %v248_v36  ;;  %v311_v35 = vld [vmem:[%s20161_s1 + $0x830] sm:$0xff]  ;;  %v308_v36 = vld [vmem:[%s20161_s1 + $0x818] sm:$0xff] }
 0x365   :  { %10968 = vmatmul.mubr.bf16.vlgmr.msra.gmra.mrb[4].mxu0 %v14906_v49  ;;  %11527 = vmatmul.mubr.bf16.vlgmr.msra.gmra.mrb[4].mxu1 %v14906_v49 }
 0x366   :  { %10979 = vmatpush1.bf16.msra.mxu0 %v12970_v43  ;;  %11538 = vmatpush1.bf16.msra.mxu1 %v12972_v44  ;;  %v255_v43 = vld [vmem:[%s20161_s1 + $0x670] sm:$0xff]  ;;  %v252_v44 = vld [vmem:[%s20161_s1 + $0x658] sm:$0xff] }
 0x367   :  { %10980 = vmatprep.subr.bf16.mxu0 %v12979_v45  ;;  %11539 = vmatprep.subr.bf16.mxu1 %v12981_v46  ;;  %v256_v45 = vld [vmem:[%s20161_s1 + $0x678] sm:$0xff]  ;;  %v13034_v46 = vcombine.low %v243_v33, %v247_v34  ;;  %v13043_v48 = vcombine.high %v251_v42, %v255_v43  ;;  %v307_v34 = vld [vmem:[%s20161_s1 + $0x810] sm:$0xff] }
 0x368   :  { %11010 = vmatprep.mubr.bf16.mxu0 %v14907_v58  ;;  %11569 = vmatprep.mubr.bf16.mxu1 %v14907_v58  ;;  %v13045_v49 = vcombine.high %v252_v44, %v256_v45  ;;  %v267_v58 = vld [vmem:[%s20161_s1 + $0x6d0] sm:$0xff] }
 0x36a   :  { %10981 = vmatpush1.bf16.msra.mxu0 %v12978_v52  ;;  %11540 = vmatpush1.bf16.msra.mxu1 %v12980_v53  ;;  %v260_v52 = vld [vmem:[%s20161_s1 + $0x698] sm:$0xff] }
 0x36b   :  { %10982 = vmatprep.subr.bf16.mxu0 %v12987_v54  ;;  %11541 = vmatprep.subr.bf16.mxu1 %v12989_v55  ;;  %v264_v53 = vld [vmem:[%s20161_s1 + $0x6b8] sm:$0xff]  ;;  %v13042_v54 = vcombine.low %v251_v42, %v255_v43  ;;  %v13044_v55 = vcombine.low %v252_v44, %v256_v45  ;;  %v315_v43 = vld [vmem:[%s20161_s1 + $0x850] sm:$0xff] }
 0x36c   :  { %v13053_v57 = vcombine.high %v260_v52, %v264_v53  ;;  %v319_v44 = vld [vmem:[%s20161_s1 + $0x870] sm:$0xff]  ;;  %v316_v45 = vld [vmem:[%s20161_s1 + $0x858] sm:$0xff] }
 0x36e   :  { %10983 = vmatpush1.bf16.msra.mxu0 %v12986_v61  ;;  %11542 = vmatpush1.bf16.msra.mxu1 %v12988_v62  ;;  %v272_v61 = vld [vmem:[%s20161_s1 + $0x6f8] sm:$0xff]  ;;  %v13050_v62 = vcombine.low %v259_v50, %v263_v51  ;;  %v323_v51 = vld [vmem:[%s20161_s1 + $0x890] sm:$0xff] }
 0x36f   :  { %10984 = vmatprep.subr.bf16.mxu0 %v12995_v63  ;;  %11543 = vmatprep.subr.bf16.mxu1 %v12997_v0  ;;  %v13052_v63 = vcombine.low %v260_v52, %v264_v53  ;;  %v13059_v0 = vcombine.high %v267_v58, %v271_v59  ;;  %v13061_v1 = vcombine.high %v268_v60, %v272_v61  ;;  %v327_v52 = vld [vmem:[%s20161_s1 + $0x8b0] sm:$0xff]  ;;  %v14908_v53 = vld [vmem:[%s20162_s0 + $0x8] ss:$100 sps:$4 sm:$0xff]  }
 0x372   :  { %10985 = vmatpush1.bf16.msra.mxu0 %v12994_v5  ;;  %11544 = vmatpush1.bf16.msra.mxu1 %v12996_v6  ;;  %v280_v5 = vld [vmem:[%s20161_s1 + $0x738] sm:$0xff]  ;;  %v13058_v6 = vcombine.low %v267_v58, %v271_v59  ;;  %v13115_v58 = vcombine.high %v323_v51, %v327_v52 }
 0x373   :  { %10986 = vmatprep.subr.bf16.mxu0 %v13003_v7  ;;  %11545 = vmatprep.subr.bf16.mxu1 %v13005_v8  ;;  %v13060_v7 = vcombine.low %v268_v60, %v272_v61  ;;  %v13067_v8 = vcombine.high %v275_v2, %v279_v3  ;;  %v13069_v9 = vcombine.high %v276_v4, %v280_v5  ;;  %v331_v60 = vld [vmem:[%s20161_s1 + $0x8d0] sm:$0xff] }
 0x374   :  { %v335_v61 = vld [vmem:[%s20161_s1 + $0x8f0] sm:$0xff] }
 0x376   :  { %10987 = vmatpush1.bf16.msra.mxu0 %v13002_v13  ;;  %11546 = vmatpush1.bf16.msra.mxu1 %v13004_v14  ;;  %v288_v13 = vld [vmem:[%s20161_s1 + $0x778] sm:$0xff]  ;;  %v13066_v14 = vcombine.low %v275_v2, %v279_v3  ;;  %v13123_v3 = vcombine.high %v331_v60, %v335_v61 }
 0x377   :  { %10988 = vmatprep.subr.bf16.mxu0 %v13011_v15  ;;  %11547 = vmatprep.subr.bf16.mxu1 %v13013_v16  ;;  %v13068_v15 = vcombine.low %v276_v4, %v280_v5  ;;  %v13075_v16 = vcombine.high %v283_v10, %v287_v11  ;;  %v13077_v17 = vcombine.high %v284_v12, %v288_v13  ;;  %v339_v5 = vld [vmem:[%s20161_s1 + $0x910] sm:$0xff] }
 0x37a   :  { %10989 = vmatpush1.bf16.msra.mxu0 %v13010_v21  ;;  %11548 = vmatpush1.bf16.msra.mxu1 %v13012_v22  ;;  %v296_v21 = vld [vmem:[%s20161_s1 + $0x7b8] sm:$0xff]  ;;  %v13074_v22 = vcombine.low %v283_v10, %v287_v11 }
 0x37b   :  { %10990 = vmatprep.subr.bf16.mxu0 %v13019_v23  ;;  %11549 = vmatprep.subr.bf16.mxu1 %v13021_v24  ;;  %v13076_v23 = vcombine.low %v284_v12, %v288_v13  ;;  %v13083_v24 = vcombine.high %v291_v18, %v295_v19  ;;  %v13085_v25 = vcombine.high %v292_v20, %v296_v21  ;;  %v347_v13 = vld [vmem:[%s20161_s1 + $0x950] sm:$0xff] }
 0x37e   :  { %10991 = vmatpush1.bf16.msra.mxu0 %v13018_v29  ;;  %11550 = vmatpush1.bf16.msra.mxu1 %v13020_v30  ;;  %v304_v29 = vld [vmem:[%s20161_s1 + $0x7f8] sm:$0xff]  ;;  %v13082_v30 = vcombine.low %v291_v18, %v295_v19 }
 0x37f   :  { %10992 = vmatprep.subr.bf16.mxu0 %v13027_v31  ;;  %11551 = vmatprep.subr.bf16.mxu1 %v13029_v32  ;;  %v13084_v31 = vcombine.low %v292_v20, %v296_v21  ;;  %v13091_v32 = vcombine.high %v299_v26, %v303_v27  ;;  %v13093_v33 = vcombine.high %v300_v28, %v304_v29  ;;  %v355_v21 = vld [vmem:[%s20161_s1 + $0x990] sm:$0xff] }
 0x382   :  { %10993 = vmatpush1.bf16.msra.mxu0 %v13026_v38  ;;  %11552 = vmatpush1.bf16.msra.mxu1 %v13028_v39  ;;  %v312_v38 = vld [vmem:[%s20161_s1 + $0x838] sm:$0xff]  ;;  %v13090_v39 = vcombine.low %v299_v26, %v303_v27 }
 0x383   :  { %10994 = vmatprep.subr.bf16.mxu0 %v13035_v40  ;;  %11553 = vmatprep.subr.bf16.mxu1 %v13037_v41  ;;  %v13092_v40 = vcombine.low %v300_v28, %v304_v29  ;;  %v13099_v41 = vcombine.high %v307_v34, %v311_v35  ;;  %v13101_v42 = vcombine.high %v308_v36, %v312_v38  ;;  %v363_v29 = vld [vmem:[%s20161_s1 + $0x9d0] sm:$0xff] }
 0x386   :  { %10995 = vmatpush1.bf16.msra.mxu0 %v13034_v46  ;;  %11554 = vmatpush1.bf16.msra.mxu1 %v13036_v47  ;;  %v320_v46 = vld [vmem:[%s20161_s1 + $0x878] sm:$0xff]  ;;  %v13098_v47 = vcombine.low %v307_v34, %v311_v35 }
 0x387   :  { %10996 = vmatprep.subr.bf16.mxu0 %v13043_v48  ;;  %11555 = vmatprep.subr.bf16.mxu1 %v13045_v49  ;;  %v13100_v48 = vcombine.low %v308_v36, %v312_v38  ;;  %v13107_v49 = vcombine.high %v315_v43, %v319_v44  ;;  %v13109_v50 = vcombine.high %v316_v45, %v320_v46  ;;  %v371_v38 = vld [vmem:[%s20161_s1 + $0xa10] sm:$0xff] }
 0x38a   :  { %10997 = vmatpush1.bf16.msra.mxu0 %v13042_v54  ;;  %11556 = vmatpush1.bf16.msra.mxu1 %v13044_v55  ;;  %v324_v54 = vld [vmem:[%s20161_s1 + $0x898] sm:$0xff] }
 0x38b   :  { %10998 = vmatprep.subr.bf16.mxu0 %v13051_v56  ;;  %11557 = vmatprep.subr.bf16.mxu1 %v13053_v57  ;;  %v328_v55 = vld [vmem:[%s20161_s1 + $0x8b8] sm:$0xff]  ;;  %v13106_v56 = vcombine.low %v315_v43, %v319_v44  ;;  %v13108_v57 = vcombine.low %v316_v45, %v320_v46  ;;  %v379_v46 = vld [vmem:[%s20161_s1 + $0xa50] sm:$0xff] }
 0x38c   :  { %v13117_v59 = vcombine.high %v324_v54, %v328_v55  ;;  %v13116_v2 = vcombine.low %v324_v54, %v328_v55  ;;  %v387_v54 = vld [vmem:[%s20161_s1 + $0xa90] sm:$0xff] }
 0x38d   :  { %v391_v55 = vld [vmem:[%s20161_s1 + $0xab0] sm:$0xff] }
 0x38e   :  { %10999 = vmatpush1.bf16.msra.mxu0 %v13050_v62  ;;  %11558 = vmatpush1.bf16.msra.mxu1 %v13052_v63  ;;  %v14909_v62 = vld [vmem:[%s20162_s0 + $0x14] ss:$100 sps:$4 sm:$0xff]  }
 0x38f   :  { %11000 = vmatprep.subr.bf16.mxu0 %v13059_v0  ;;  %11559 = vmatprep.subr.bf16.mxu1 %v13061_v1  ;;  %v332_v63 = vld [vmem:[%s20161_s1 + $0x8d8] sm:$0xff]  ;;  %v13114_v1 = vcombine.low %v323_v51, %v327_v52 }
 0x390   :  { %v336_v0 = vld [vmem:[%s20161_s1 + $0x8f8] sm:$0xff] }
 0x391   :  { %v13125_v4 = vcombine.high %v332_v63, %v336_v0  ;;  %v13124_v10 = vcombine.low %v332_v63, %v336_v0  ;;  %v399_v63 = vld [vmem:[%s20161_s1 + $0xaf0] sm:$0xff]  ;;  %v396_v0 = vld [vmem:[%s20161_s1 + $0xad8] sm:$0xff] }
 0x392   :  { %11001 = vmatpush1.bf16.msra.mxu0 %v13058_v6  ;;  %11560 = vmatpush1.bf16.msra.mxu1 %v13060_v7  ;;  %v343_v6 = vld [vmem:[%s20161_s1 + $0x930] sm:$0xff]  ;;  %v340_v7 = vld [vmem:[%s20161_s1 + $0x918] sm:$0xff] }
 0x393   :  { %11002 = vmatprep.subr.bf16.mxu0 %v13067_v8  ;;  %11561 = vmatprep.subr.bf16.mxu1 %v13069_v9  ;;  %v344_v8 = vld [vmem:[%s20161_s1 + $0x938] sm:$0xff]  ;;  %v13122_v9 = vcombine.low %v331_v60, %v335_v61  ;;  %v13131_v11 = vcombine.high %v339_v5, %v343_v6  ;;  %v13179_v60 = vcombine.high %v387_v54, %v391_v55 }
 0x394   :  { %v13133_v12 = vcombine.high %v340_v7, %v344_v8  ;;  %v13132_v18 = vcombine.low %v340_v7, %v344_v8  ;;  %v407_v7 = vld [vmem:[%s20161_s1 + $0xb30] sm:$0xff]  ;;  %v404_v8 = vld [vmem:[%s20161_s1 + $0xb18] sm:$0xff] }
 0x396   :  { %11003 = vmatpush1.bf16.msra.mxu0 %v13066_v14  ;;  %11562 = vmatpush1.bf16.msra.mxu1 %v13068_v15  ;;  %v351_v14 = vld [vmem:[%s20161_s1 + $0x970] sm:$0xff]  ;;  %v348_v15 = vld [vmem:[%s20161_s1 + $0x958] sm:$0xff] }
 0x397   :  { %11004 = vmatprep.subr.bf16.mxu0 %v13075_v16  ;;  %11563 = vmatprep.subr.bf16.mxu1 %v13077_v17  ;;  %v352_v16 = vld [vmem:[%s20161_s1 + $0x978] sm:$0xff]  ;;  %v13130_v17 = vcombine.low %v339_v5, %v343_v6  ;;  %v13139_v19 = vcombine.high %v347_v13, %v351_v14  ;;  %v403_v6 = vld [vmem:[%s20161_s1 + $0xb10] sm:$0xff] }
 0x398   :  { %v13141_v20 = vcombine.high %v348_v15, %v352_v16  ;;  %v13140_v26 = vcombine.low %v348_v15, %v352_v16  ;;  %v415_v15 = vld [vmem:[%s20161_s1 + $0xb70] sm:$0xff]  ;;  %v412_v16 = vld [vmem:[%s20161_s1 + $0xb58] sm:$0xff] }
 0x39a   :  { %11005 = vmatpush1.bf16.msra.mxu0 %v13074_v22  ;;  %11564 = vmatpush1.bf16.msra.mxu1 %v13076_v23  ;;  %v359_v22 = vld [vmem:[%s20161_s1 + $0x9b0] sm:$0xff]  ;;  %v356_v23 = vld [vmem:[%s20161_s1 + $0x998] sm:$0xff] }
 0x39b   :  { %11006 = vmatprep.subr.bf16.mxu0 %v13083_v24  ;;  %11565 = vmatprep.subr.bf16.mxu1 %v13085_v25  ;;  %v360_v24 = vld [vmem:[%s20161_s1 + $0x9b8] sm:$0xff]  ;;  %v13138_v25 = vcombine.low %v347_v13, %v351_v14  ;;  %v13147_v27 = vcombine.high %v355_v21, %v359_v22  ;;  %v411_v14 = vld [vmem:[%s20161_s1 + $0xb50] sm:$0xff] }
 0x39c   :  { %v13149_v28 = vcombine.high %v356_v23, %v360_v24  ;;  %v13148_v34 = vcombine.low %v356_v23, %v360_v24  ;;  %v423_v23 = vld [vmem:[%s20161_s1 + $0xbb0] sm:$0xff]  ;;  %v420_v24 = vld [vmem:[%s20161_s1 + $0xb98] sm:$0xff] }
 0x39e   :  { %11007 = vmatpush1.bf16.msra.mxu0 %v13082_v30  ;;  %11566 = vmatpush1.bf16.msra.mxu1 %v13084_v31  ;;  %v367_v30 = vld [vmem:[%s20161_s1 + $0x9f0] sm:$0xff]  ;;  %v364_v31 = vld [vmem:[%s20161_s1 + $0x9d8] sm:$0xff] }
 0x39f   :  { %11008 = vmatprep.subr.bf16.mxu0 %v13091_v32  ;;  %11567 = vmatprep.subr.bf16.mxu1 %v13093_v33  ;;  %v368_v32 = vld [vmem:[%s20161_s1 + $0x9f8] sm:$0xff]  ;;  %v13146_v33 = vcombine.low %v355_v21, %v359_v22  ;;  %v13155_v35 = vcombine.high %v363_v29, %v367_v30  ;;  %v419_v22 = vld [vmem:[%s20161_s1 + $0xb90] sm:$0xff] }
 0x3a0   :  { %v13157_v36 = vcombine.high %v364_v31, %v368_v32  ;;  %v13156_v43 = vcombine.low %v364_v31, %v368_v32  ;;  %v431_v31 = vld [vmem:[%s20161_s1 + $0xbf0] sm:$0xff]  ;;  %v428_v32 = vld [vmem:[%s20161_s1 + $0xbd8] sm:$0xff] }
 0x3a2   :  { %11009 = vmatpush1.bf16.msra.mxu0 %v13090_v39  ;;  %11568 = vmatpush1.bf16.msra.mxu1 %v13092_v40  ;;  %v375_v39 = vld [vmem:[%s20161_s1 + $0xa30] sm:$0xff]  ;;  %v372_v40 = vld [vmem:[%s20161_s1 + $0xa18] sm:$0xff] }
 0x3a3   :  { %11021 = vmatprep.subr.bf16.mxu0 %v13099_v41  ;;  %11580 = vmatprep.subr.bf16.mxu1 %v13101_v42  ;;  %v376_v41 = vld [vmem:[%s20161_s1 + $0xa38] sm:$0xff]  ;;  %v13154_v42 = vcombine.low %v363_v29, %v367_v30  ;;  %v13163_v44 = vcombine.high %v371_v38, %v375_v39  ;;  %v427_v30 = vld [vmem:[%s20161_s1 + $0xbd0] sm:$0xff] }
 0x3a4   :  { %v13165_v45 = vcombine.high %v372_v40, %v376_v41  ;;  %v13164_v51 = vcombine.low %v372_v40, %v376_v41  ;;  %v439_v40 = vld [vmem:[%s20161_s1 + $0xc30] sm:$0xff]  ;;  %v436_v41 = vld [vmem:[%s20161_s1 + $0xc18] sm:$0xff] }
 0x3a5   :  { %11011 = vmatmul.mubr.bf16.vlgmr.msra.gmra.mrb[4].mxu0 %v14908_v53  ;;  %11570 = vmatmul.mubr.bf16.vlgmr.msra.gmra.mrb[4].mxu1 %v14908_v53 }
 0x3a6   :  { %11022 = vmatpush1.bf16.msra.mxu0 %v13098_v47  ;;  %11581 = vmatpush1.bf16.msra.mxu1 %v13100_v48  ;;  %v383_v47 = vld [vmem:[%s20161_s1 + $0xa70] sm:$0xff]  ;;  %v380_v48 = vld [vmem:[%s20161_s1 + $0xa58] sm:$0xff] }
 0x3a7   :  { %11023 = vmatprep.subr.bf16.mxu0 %v13107_v49  ;;  %11582 = vmatprep.subr.bf16.mxu1 %v13109_v50  ;;  %v384_v49 = vld [vmem:[%s20161_s1 + $0xa78] sm:$0xff]  ;;  %v13162_v50 = vcombine.low %v371_v38, %v375_v39  ;;  %v13171_v52 = vcombine.high %v379_v46, %v383_v47  ;;  %v435_v39 = vld [vmem:[%s20161_s1 + $0xc10] sm:$0xff] }
 0x3a8   :  { %11053 = vmatprep.mubr.bf16.mxu0 %v14909_v62  ;;  %11612 = vmatprep.mubr.bf16.mxu1 %v14909_v62  ;;  %v13173_v53 = vcombine.high %v380_v48, %v384_v49  ;;  %v395_v62 = vld [vmem:[%s20161_s1 + $0xad0] sm:$0xff] }
 0x3aa   :  { %11024 = vmatpush1.bf16.msra.mxu0 %v13106_v56  ;;  %11583 = vmatpush1.bf16.msra.mxu1 %v13108_v57  ;;  %v388_v56 = vld [vmem:[%s20161_s1 + $0xa98] sm:$0xff] }
 0x3ab   :  { %11025 = vmatprep.subr.bf16.mxu0 %v13115_v58  ;;  %11584 = vmatprep.subr.bf16.mxu1 %v13117_v59  ;;  %v392_v57 = vld [vmem:[%s20161_s1 + $0xab8] sm:$0xff]  ;;  %v13170_v58 = vcombine.low %v379_v46, %v383_v47  ;;  %v13172_v59 = vcombine.low %v380_v48, %v384_v49  ;;  %v443_v47 = vld [vmem:[%s20161_s1 + $0xc50] sm:$0xff] }
 0x3ac   :  { %v13181_v61 = vcombine.high %v388_v56, %v392_v57  ;;  %v447_v48 = vld [vmem:[%s20161_s1 + $0xc70] sm:$0xff]  ;;  %v444_v49 = vld [vmem:[%s20161_s1 + $0xc58] sm:$0xff] }
 0x3ae   :  { %11026 = vmatpush1.bf16.msra.mxu0 %v13114_v1  ;;  %11585 = vmatpush1.bf16.msra.mxu1 %v13116_v2  ;;  %v400_v1 = vld [vmem:[%s20161_s1 + $0xaf8] sm:$0xff]  ;;  %v13178_v2 = vcombine.low %v387_v54, %v391_v55  ;;  %v451_v55 = vld [vmem:[%s20161_s1 + $0xc90] sm:$0xff] }
 0x3af   :  { %11027 = vmatprep.subr.bf16.mxu0 %v13123_v3  ;;  %11586 = vmatprep.subr.bf16.mxu1 %v13125_v4  ;;  %v13180_v3 = vcombine.low %v388_v56, %v392_v57  ;;  %v13187_v4 = vcombine.high %v395_v62, %v399_v63  ;;  %v13189_v5 = vcombine.high %v396_v0, %v400_v1  ;;  %v455_v56 = vld [vmem:[%s20161_s1 + $0xcb0] sm:$0xff] }
 0x3b0   :  { %v14910_v57 = vld [vmem:[%s20162_s0 + $0x10] ss:$100 sps:$4 sm:$0xff]  }
 0x3b2   :  { %11028 = vmatpush1.bf16.msra.mxu0 %v13122_v9  ;;  %11587 = vmatpush1.bf16.msra.mxu1 %v13124_v10  ;;  %v408_v9 = vld [vmem:[%s20161_s1 + $0xb38] sm:$0xff]  ;;  %v13186_v10 = vcombine.low %v395_v62, %v399_v63  ;;  %v13243_v62 = vcombine.high %v451_v55, %v455_v56 }
 0x3b3   :  { %11029 = vmatprep.subr.bf16.mxu0 %v13131_v11  ;;  %11588 = vmatprep.subr.bf16.mxu1 %v13133_v12  ;;  %v13188_v11 = vcombine.low %v396_v0, %v400_v1  ;;  %v13195_v12 = vcombine.high %v403_v6, %v407_v7  ;;  %v13197_v13 = vcombine.high %v404_v8, %v408_v9  ;;  %v459_v0 = vld [vmem:[%s20161_s1 + $0xcd0] sm:$0xff] }
 0x3b4   :  { %v463_v1 = vld [vmem:[%s20161_s1 + $0xcf0] sm:$0xff] }
 0x3b6   :  { %11030 = vmatpush1.bf16.msra.mxu0 %v13130_v17  ;;  %11589 = vmatpush1.bf16.msra.mxu1 %v13132_v18  ;;  %v416_v17 = vld [vmem:[%s20161_s1 + $0xb78] sm:$0xff]  ;;  %v13194_v18 = vcombine.low %v403_v6, %v407_v7  ;;  %v13242_v6 = vcombine.low %v451_v55, %v455_v56 }
 0x3b7   :  { %11031 = vmatprep.subr.bf16.mxu0 %v13139_v19  ;;  %11590 = vmatprep.subr.bf16.mxu1 %v13141_v20  ;;  %v13196_v19 = vcombine.low %v404_v8, %v408_v9  ;;  %v13203_v20 = vcombine.high %v411_v14, %v415_v15  ;;  %v13205_v21 = vcombine.high %v412_v16, %v416_v17 }
 0x3b8   :  { %v13251_v8 = vcombine.high %v459_v0, %v463_v1 }
 0x3ba   :  { %11032 = vmatpush1.bf16.msra.mxu0 %v13138_v25  ;;  %11591 = vmatpush1.bf16.msra.mxu1 %v13140_v26  ;;  %v424_v25 = vld [vmem:[%s20161_s1 + $0xbb8] sm:$0xff]  ;;  %v13202_v26 = vcombine.low %v411_v14, %v415_v15  ;;  %v13250_v15 = vcombine.low %v459_v0, %v463_v1 }
 0x3bb   :  { %11033 = vmatprep.subr.bf16.mxu0 %v13147_v27  ;;  %11592 = vmatprep.subr.bf16.mxu1 %v13149_v28  ;;  %v13204_v27 = vcombine.low %v412_v16, %v416_v17  ;;  %v13211_v28 = vcombine.high %v419_v22, %v423_v23  ;;  %v13213_v29 = vcombine.high %v420_v24, %v424_v25 }
 0x3be   :  { %11034 = vmatpush1.bf16.msra.mxu0 %v13146_v33  ;;  %11593 = vmatpush1.bf16.msra.mxu1 %v13148_v34  ;;  %v432_v33 = vld [vmem:[%s20161_s1 + $0xbf8] sm:$0xff]  ;;  %v13210_v34 = vcombine.low %v419_v22, %v423_v23 }
 0x3bf   :  { %11035 = vmatprep.subr.bf16.mxu0 %v13155_v35  ;;  %11594 = vmatprep.subr.bf16.mxu1 %v13157_v36  ;;  %v13212_v35 = vcombine.low %v420_v24, %v424_v25  ;;  %v13219_v36 = vcombine.high %v427_v30, %v431_v31  ;;  %v13221_v38 = vcombine.high %v428_v32, %v432_v33  ;;  %v476_v22 = vld [vmem:[%s20161_s1 + $0xd58] sm:$0xff]  ;;  %v1649_v25 = vld [vmem:[%s20163_s2] sm:$0xff] }
 0x3c0   :  { %v480_v23 = vld [vmem:[%s20161_s1 + $0xd78] sm:$0xff] }
 0x3c2   :  { %11036 = vmatpush1.bf16.msra.mxu0 %v13154_v42  ;;  %11595 = vmatpush1.bf16.msra.mxu1 %v13156_v43  ;;  %v440_v42 = vld [vmem:[%s20161_s1 + $0xc38] sm:$0xff]  ;;  %v13218_v43 = vcombine.low %v427_v30, %v431_v31  ;;  %v13269_v31 = vcombine.high %v476_v22, %v480_v23 }
 0x3c3   :  { %11037 = vmatprep.subr.bf16.mxu0 %v13163_v44  ;;  %11596 = vmatprep.subr.bf16.mxu1 %v13165_v45  ;;  %v13220_v44 = vcombine.low %v428_v32, %v432_v33  ;;  %v13227_v45 = vcombine.high %v435_v39, %v439_v40  ;;  %v13229_v46 = vcombine.high %v436_v41, %v440_v42  ;;  %v483_v32 = vld [vmem:[%s20161_s1 + $0xd90] sm:$0xff] }
 0x3c4   :  { %v487_v33 = vld [vmem:[%s20161_s1 + $0xdb0] sm:$0xff] }
 0x3c6   :  { %11038 = vmatpush1.bf16.msra.mxu0 %v13162_v50  ;;  %11597 = vmatpush1.bf16.msra.mxu1 %v13164_v51  ;;  %v448_v50 = vld [vmem:[%s20161_s1 + $0xc78] sm:$0xff]  ;;  %v13226_v51 = vcombine.low %v435_v39, %v439_v40 }
 0x3c7   :  { %11039 = vmatprep.subr.bf16.mxu0 %v13171_v52  ;;  %11598 = vmatprep.subr.bf16.mxu1 %v13173_v53  ;;  %v13228_v52 = vcombine.low %v436_v41, %v440_v42  ;;  %v13235_v53 = vcombine.high %v443_v47, %v447_v48  ;;  %v13237_v54 = vcombine.high %v444_v49, %v448_v50 }
 0x3c8   :  { %v13268_v42 = vcombine.low %v476_v22, %v480_v23 }
 0x3ca   :  { %11040 = vmatpush1.bf16.msra.mxu0 %v13170_v58  ;;  %11599 = vmatpush1.bf16.msra.mxu1 %v13172_v59  ;;  %v452_v58 = vld [vmem:[%s20161_s1 + $0xc98] sm:$0xff] }
 0x3cb   :  { %11041 = vmatprep.subr.bf16.mxu0 %v13179_v60  ;;  %11600 = vmatprep.subr.bf16.mxu1 %v13181_v61  ;;  %v456_v59 = vld [vmem:[%s20161_s1 + $0xcb8] sm:$0xff]  ;;  %v13234_v60 = vcombine.low %v443_v47, %v447_v48  ;;  %v13236_v61 = vcombine.low %v444_v49, %v448_v50  ;;  %v495_v47 = vld [vmem:[%s20161_s1 + $0xdf0] sm:$0xff] }
 0x3cc   :  { %v13245_v63 = vcombine.high %v452_v58, %v456_v59  ;;  %v13244_v7 = vcombine.low %v452_v58, %v456_v59 }
 0x3ce   :  { %11042 = vmatpush1.bf16.msra.mxu0 %v13178_v2  ;;  %11601 = vmatpush1.bf16.msra.mxu1 %v13180_v3  ;;  %v14911_v2 = vld [vmem:[%s20162_s0 + $0x1c] ss:$100 sps:$4 sm:$0xff]  }
 0x3cf   :  { %11043 = vmatprep.subr.bf16.mxu0 %v13187_v4  ;;  %11602 = vmatprep.subr.bf16.mxu1 %v13189_v5  ;;  %v460_v3 = vld [vmem:[%s20161_s1 + $0xcd8] sm:$0xff]  ;;  %v1651_v5 = vlaneseq }
 0x3d0   :  { %v464_v4 = vld [vmem:[%s20161_s1 + $0xcf8] sm:$0xff] }
 0x3d1   :  { %v13253_v9 = vcombine.high %v460_v3, %v464_v4  ;;  %v18104_v14 = vshrl.u32 %v1651_v5, 7  ;;  %v13252_v16 = vcombine.low %v460_v3, %v464_v4 }
 0x3d2   :  { %11044 = vmatpush1.bf16.msra.mxu0 %v13186_v10  ;;  %11603 = vmatpush1.bf16.msra.mxu1 %v13188_v11  ;;  %v467_v10 = vld [vmem:[%s20161_s1 + $0xd10] sm:$0xff] }
 0x3d3   :  { %11045 = vmatprep.subr.bf16.mxu0 %v13195_v12  ;;  %11604 = vmatprep.subr.bf16.mxu1 %v13197_v13  ;;  %v471_v11 = vld [vmem:[%s20161_s1 + $0xd30] sm:$0xff]  ;;  %v468_v12 = vld [vmem:[%s20161_s1 + $0xd18] sm:$0xff]  ;;  %vm12765_vm0 = vcmp.lt.s32.totalorder %v18104_v14, 2 }
 0x3d4   :  { %v472_v13 = vld [vmem:[%s20161_s1 + $0xd38] sm:$0xff]  ;;  %v13259_v17 = vcombine.high %v467_v10, %v471_v11  ;;  %v13258_v24 = vcombine.low %v467_v10, %v471_v11 }
 0x3d6   :  { %11046 = vmatpush1.bf16.msra.mxu0 %v13194_v18  ;;  %11605 = vmatpush1.bf16.msra.mxu1 %v13196_v19  ;;  %v13261_v18 = vcombine.high %v468_v12, %v472_v13  ;;  %v475_v19 = vld [vmem:[%s20161_s1 + $0xd50] sm:$0xff] }
 0x3d7   :  { %11047 = vmatprep.subr.bf16.mxu0 %v13203_v20  ;;  %11606 = vmatprep.subr.bf16.mxu1 %v13205_v21  ;;  %v479_v20 = vld [vmem:[%s20161_s1 + $0xd70] sm:$0xff]  ;;  %v1653_v21 = vsub.s32 0, %v18104_v14 }
 0x3d8   :  { %v13267_v30 = vcombine.high %v475_v19, %v479_v20  ;;  %v13266_v40 = vcombine.low %v475_v19, %v479_v20 }
 0x3da   :  { %11048 = vmatpush1.bf16.msra.mxu0 %v13202_v26  ;;  %11607 = vmatpush1.bf16.msra.mxu1 %v13204_v27  ;;  %v1661_v26 = vsub.s32 2, %v18104_v14  ;;  %v1657_v27 = vsub.s32 1, %v18104_v14 }
 0x3db   :  { %11049 = vmatprep.subr.bf16.mxu0 %v13211_v28  ;;  %11608 = vmatprep.subr.bf16.mxu1 %v13213_v29  ;;  %v13260_v28 = vcombine.low %v468_v12, %v472_v13  ;;  %v1665_v29 = vsub.s32 3, %v18104_v14  ;;  %v500_v12 = vld [vmem:[%s20161_s1 + $0xe18] sm:$0xff] }
 0x3dc   :  { %v1658_v39 = vrot.slane %v1649_v25, %v1657_v27  ;;  %v504_v13 = vld [vmem:[%s20161_s1 + $0xe38] sm:$0xff]  ;;  %v511_v27 = vld [vmem:[%s20161_s1 + $0xe70] sm:$0xff] }
 0x3dd   :  { %v1666_v41 = vrot.slane %v1649_v25, %v1665_v29  ;;  %v508_v29 = vld [vmem:[%s20161_s1 + $0xe58] sm:$0xff] }
 0x3de   :  { %11050 = vmatpush1.bf16.msra.mxu0 %v13210_v34  ;;  %11609 = vmatpush1.bf16.msra.mxu1 %v13212_v35  ;;  %v1654_v34 = vrot.slane %v1649_v25, %v1653_v21  ;;  %v484_v35 = vld [vmem:[%s20161_s1 + $0xd98] sm:$0xff] }
 0x3df   :  { %11051 = vmatprep.subr.bf16.mxu0 %v13219_v36  ;;  %11610 = vmatprep.subr.bf16.mxu1 %v13221_v38  ;;  %v488_v36 = vld [vmem:[%s20161_s1 + $0xdb8] sm:$0xff]  ;;  %v1662_v38 = vrot.slane %v1649_v25, %v1661_v26  ;;  %v13293_v25 = vcombine.high %v500_v12, %v504_v13  ;;  %v507_v26 = vld [vmem:[%s20161_s1 + $0xe50] sm:$0xff] }
 0x3e0   :  { %v13276_v58 = vcombine.low %v484_v35, %v488_v36 }
 0x3e2   :  { %11052 = vmatpush1.bf16.msra.mxu0 %v13218_v43  ;;  %11611 = vmatpush1.bf16.msra.mxu1 %v13220_v44  ;;  %v13275_v43 = vcombine.high %v483_v32, %v487_v33 }
 0x3e3   :  { %11064 = vmatprep.subr.bf16.mxu0 %v13227_v45  ;;  %11623 = vmatprep.subr.bf16.mxu1 %v13229_v46  ;;  %v13277_v45 = vcombine.high %v484_v35, %v488_v36  ;;  %v491_v46 = vld [vmem:[%s20161_s1 + $0xdd0] sm:$0xff] }
 0x3e4   :  { %v13282_v3 = vcombine.low %v491_v46, %v495_v47  ;;  %v515_v35 = vld [vmem:[%s20161_s1 + $0xe90] sm:$0xff] }
 0x3e5   :  { %11054 = vmatmul.mubr.bf16.vlgmr.msra.gmra.mrb[4].mxu0 %v14910_v57  ;;  %11613 = vmatmul.mubr.bf16.vlgmr.msra.gmra.mrb[4].mxu1 %v14910_v57  ;;  %v13274_v57 = vcombine.low %v483_v32, %v487_v33  ;;  %v13292_v32 = vcombine.low %v500_v12, %v504_v13  ;;  %v13299_v33 = vcombine.high %v507_v26, %v511_v27  ;;  %v519_v36 = vld [vmem:[%s20161_s1 + $0xeb0] sm:$0xff] }
 0x3e6   :  { %11065 = vmatpush1.bf16.msra.mxu0 %v13226_v51  ;;  %11624 = vmatpush1.bf16.msra.mxu1 %v13228_v52  ;;  %v492_v51 = vld [vmem:[%s20161_s1 + $0xdd8] sm:$0xff]  ;;  %v555_v13 = vld [vmem:[%s20161_s1 + $0xfd0] sm:$0xff] }
 0x3e7   :  { %11066 = vmatprep.subr.bf16.mxu0 %v13235_v53  ;;  %11625 = vmatprep.subr.bf16.mxu1 %v13237_v54  ;;  %v496_v52 = vld [vmem:[%s20161_s1 + $0xdf8] sm:$0xff] }
 0x3e8   :  { %11096 = vmatprep.mubr.bf16.mxu0 %v14911_v2  ;;  %11655 = vmatprep.mubr.bf16.mxu1 %v14911_v2  ;;  %v13285_v4 = vcombine.high %v492_v51, %v496_v52  ;;  %v13284_v11 = vcombine.low %v492_v51, %v496_v52  ;;  %v531_v52 = vld [vmem:[%s20161_s1 + $0xf10] sm:$0xff] }
 0x3ea   :  { %11067 = vmatpush1.bf16.msra.mxu0 %v13234_v60  ;;  %11626 = vmatpush1.bf16.msra.mxu1 %v13236_v61 }
 0x3eb   :  { %11068 = vmatprep.subr.bf16.mxu0 %v13243_v62  ;;  %11627 = vmatprep.subr.bf16.mxu1 %v13245_v63  ;;  %v13283_v63 = vcombine.high %v491_v46, %v495_v47  ;;  %v524_v46 = vld [vmem:[%s20161_s1 + $0xed8] sm:$0xff] }
 0x3ec   :  { %v528_v47 = vld [vmem:[%s20161_s1 + $0xef8] sm:$0xff] }
 0x3ed   :  { %v13317_v51 = vcombine.high %v524_v46, %v528_v47 }
 0x3ee   :  { %11069 = vmatpush1.bf16.msra.mxu0 %v13242_v6  ;;  %11628 = vmatpush1.bf16.msra.mxu1 %v13244_v7  ;;  %v499_v6 = vld [vmem:[%s20161_s1 + $0xe10] sm:$0xff] }
 0x3ef   :  { %11070 = vmatprep.subr.bf16.mxu0 %v13251_v8  ;;  %11629 = vmatprep.subr.bf16.mxu1 %v13253_v9  ;;  %v503_v7 = vld [vmem:[%s20161_s1 + $0xe30] sm:$0xff] }
 0x3f0   :  { %v13291_v22 = vcombine.high %v499_v6, %v503_v7 }
 0x3f2   :  { %11071 = vmatpush1.bf16.msra.mxu0 %v13250_v15  ;;  %11630 = vmatpush1.bf16.msra.mxu1 %v13252_v16 }
 0x3f3   :  { %11072 = vmatprep.subr.bf16.mxu0 %v13259_v17  ;;  %11631 = vmatprep.subr.bf16.mxu1 %v13261_v18 }
 0x3f6   :  { %11073 = vmatpush1.bf16.msra.mxu0 %v13258_v24  ;;  %11632 = vmatpush1.bf16.msra.mxu1 %v13260_v28 }
 0x3f7   :  { %11074 = vmatprep.subr.bf16.mxu0 %v13267_v30  ;;  %11633 = vmatprep.subr.bf16.mxu1 %v13269_v31  ;;  %v512_v30 = vld [vmem:[%s20161_s1 + $0xe78] sm:$0xff]  ;;  %v13290_v31 = vcombine.low %v499_v6, %v503_v7  ;;  %v551_v6 = vld [vmem:[%s20161_s1 + $0xfb0] sm:$0xff] }
 0x3f8   :  { %v10367_v44 = vpop.f32.mrb[0].mxu0  ;;  %v10926_v49 = vpop.f32.mrb[0].mxu1  ;;  %v548_v7 = vld [vmem:[%s20161_s1 + $0xf98] sm:$0xff] }
 0x3f9   :  { %v14591_v48 = vadd.f32 %v10367_v44, %v1654_v34  ;;  %v10369_v50 = vpop.f32.mrb[1].mxu0  ;;  %v14595_v53 = vadd.f32 %v10926_v49, %v1662_v38  ;;  %v10928_v55 = vpop.f32.mrb[1].mxu1  ;;  %v523_v44 = vld [vmem:[%s20161_s1 + $0xed0] sm:$0xff] }
 0x3fa   :  { %v14592_v54 = vadd.f32 %v10369_v50, %v1658_v39  ;;  %v10371_v56 = vpop.f32.mrb[2].mxu0  ;;  %11075 = vmatpush1.bf16.msra.mxu0 %v13266_v40  ;;  %v14596_v59 = vadd.f32 %v10928_v55, %v1666_v41  ;;  %v10930_v61 = vpop.f32.mrb[2].mxu1  ;;  %11634 = vmatpush1.bf16.msra.mxu1 %v13268_v42  ;;  %v13298_v40 = vcombine.low %v507_v26, %v511_v27  ;;  %v536_v55 = vld [vmem:[%s20161_s1 + $0xf38] sm:$0xff]  ;;  %v567_v26 = vld [vmem:[%s20161_s1 + $0x1030] sm:$0xff] }
 0x3fb   :  { %v14593_v60 = vadd.f32 %v10371_v56, %v1654_v34  ;;  %v10373_v62 = vpop.f32.mrb[3].mxu0  ;;  %11076 = vmatprep.subr.bf16.mxu0 %v13275_v43  ;;  %v14597_v0 = vadd.f32 %v10930_v61, %v1662_v38  ;;  %v10932_v2 = vpop.f32.mrb[3].mxu1  ;;  %11635 = vmatprep.subr.bf16.mxu1 %v13277_v45  ;;  %v12053_v8 = vmax.f32 %v14591_v48, 0.0  ;;  %v12055_v15 = vmax.f32 %v14595_v53, 0.0  ;;  %v516_v38 = vld [vmem:[%s20161_s1 + $0xe98] sm:$0xff]  ;;  %v527_v45 = vld [vmem:[%s20161_s1 + $0xef0] sm:$0xff] }
 0x3fc   :  { %v14594_v1 = vadd.f32 %v10373_v62, %v1658_v39  ;;  %v14598_v10 = vadd.f32 %v10932_v2, %v1666_v41  ;;  %v12054_v16 = vmax.f32 %v14592_v54, 0.0  ;;  %v12056_v19 = vmax.f32 %v14596_v59, 0.0  ;;  %v520_v39 = vld [vmem:[%s20161_s1 + $0xeb8] sm:$0xff]  ;;  %v535_v53 = vld [vmem:[%s20161_s1 + $0xf30] sm:$0xff] }
 0x3fd   :  { %v12061_v9 = vmax.f32 %v14593_v60, 0.0  ;;  %v12063_v17 = vmax.f32 %v14597_v0, 0.0  ;;  %v13301_v34 = vcombine.high %v508_v29, %v512_v30  ;;  %v13300_v41 = vcombine.low %v508_v29, %v512_v30  ;;  %v532_v54 = vld [vmem:[%s20161_s1 + $0xf18] sm:$0xff]  ;;  %v539_v60 = vld [vmem:[%s20161_s1 + $0xf50] sm:$0xff] }
 0x3fe   :  { %v12062_v18 = vmax.f32 %v14594_v1, 0.0  ;;  %11077 = vmatpush1.bf16.msra.mxu0 %v13274_v57  ;;  %v12064_v21 = vmax.f32 %v14598_v10, 0.0  ;;  %11636 = vmatpush1.bf16.msra.mxu1 %v13276_v58  ;;  %v13307_v42 = vcombine.high %v515_v35, %v519_v36  ;;  %v13309_v43 = vcombine.high %v516_v38, %v520_v39  ;;  %v543_v61 = vld [vmem:[%s20161_s1 + $0xf70] sm:$0xff]  ;;  %v540_v62 = vld [vmem:[%s20161_s1 + $0xf58] sm:$0xff] }
 0x3ff   :  { %v18161_v20 = vpack.c.bf16 %v12061_v9, %v12053_v8  ;;  %11078 = vmatprep.subr.bf16.mxu0 %v13283_v63  ;;  %v18163_v23 = vpack.c.bf16 %v12063_v17, %v12055_v15  ;;  %11637 = vmatprep.subr.bf16.mxu1 %v13285_v4  ;;  %v13306_v48 = vcombine.low %v515_v35, %v519_v36  ;;  %v544_v63 = vld [vmem:[%s20161_s1 + $0xf78] sm:$0xff]  ;;  %v547_v4 = vld [vmem:[%s20161_s1 + $0xf90] sm:$0xff] }
 0x400   :  { %v18165_v24 = vpack.c.bf16 %v12062_v18, %v12054_v16  ;;  %v18173_v28 = vpack.c.bf16 %v12064_v21, %v12056_v19  ;;  %v13308_v49 = vcombine.low %v516_v38, %v520_v39  ;;  %v13315_v50 = vcombine.high %v523_v44, %v527_v45  ;;  %v552_v8 = vld [vmem:[%s20161_s1 + $0xfb8] sm:$0xff]  ;;  %v559_v15 = vld [vmem:[%s20161_s1 + $0xff0] sm:$0xff] }
 0x401   :  { %v13314_v56 = vcombine.low %v523_v44, %v527_v45  ;;  %v13316_v57 = vcombine.low %v524_v46, %v528_v47  ;;  %v13323_v58 = vcombine.high %v531_v52, %v535_v53  ;;  %v13325_v59 = vcombine.high %v532_v54, %v536_v55  ;;  %v556_v16 = vld [vmem:[%s20161_s1 + $0xfd8] sm:$0xff]  ;;  %v575_v35 = vld [vmem:[%s20161_s1 + $0x1070] sm:$0xff] }
 0x402   :  { %11079 = vmatpush1.bf16.msra.mxu0 %v13282_v3  ;;  %11638 = vmatpush1.bf16.msra.mxu1 %v13284_v11  ;;  %v13322_v0 = vcombine.low %v531_v52, %v535_v53  ;;  %v13324_v1 = vcombine.low %v532_v54, %v536_v55  ;;  %v13331_v2 = vcombine.high %v539_v60, %v543_v61  ;;  %v560_v17 = vld [vmem:[%s20161_s1 + $0xff8] sm:$0xff]  ;;  %v583_v44 = vld [vmem:[%s20161_s1 + $0x10b0] sm:$0xff]  ;;  %v14913_v54 = vld [vmem:[%s20162_s0 + $0x24] ss:$100 sps:$4 sm:$0xff]  }
 0x403   :  { %11080 = vmatprep.subr.bf16.mxu0 %v13291_v22  ;;  %11639 = vmatprep.subr.bf16.mxu1 %v13293_v25  ;;  %v13333_v3 = vcombine.high %v540_v62, %v544_v63  ;;  %v13330_v9 = vcombine.low %v539_v60, %v543_v61  ;;  %v13332_v10 = vcombine.low %v540_v62, %v544_v63  ;;  %v563_v25 = vld [vmem:[%s20161_s1 + $0x1010] sm:$0xff]  ;;  %v564_v27 = vld [vmem:[%s20161_s1 + $0x1018] sm:$0xff] }
 0x404   :  { %v13339_v11 = vcombine.high %v547_v4, %v551_v6  ;;  %v13341_v12 = vcombine.high %v548_v7, %v552_v8  ;;  %v13338_v18 = vcombine.low %v547_v4, %v551_v6  ;;  %v13340_v19 = vcombine.low %v548_v7, %v552_v8  ;;  %v568_v29 = vld [vmem:[%s20161_s1 + $0x1038] sm:$0xff]  ;;  %v587_v52 = vld [vmem:[%s20161_s1 + $0x10d0] sm:$0xff] }
 0x405   :  { %v13347_v21 = vcombine.high %v555_v13, %v559_v15  ;;  %v13349_v22 = vcombine.high %v556_v16, %v560_v17  ;;  %v13346_v30 = vcombine.low %v555_v13, %v559_v15  ;;  %v572_v36 = vld [vmem:[%s20161_s1 + $0x1058] sm:$0xff]  ;;  %v13354_v39 = vcombine.low %v563_v25, %v567_v26  ;;  %v591_v53 = vld [vmem:[%s20161_s1 + $0x10f0] sm:$0xff] }
 0x406   :  { %11081 = vmatpush1.bf16.msra.mxu0 %v13290_v31  ;;  %11640 = vmatpush1.bf16.msra.mxu1 %v13292_v32  ;;  %v13348_v31 = vcombine.low %v556_v16, %v560_v17  ;;  %v13355_v32 = vcombine.high %v563_v25, %v567_v26  ;;  %v576_v38 = vld [vmem:[%s20161_s1 + $0x1078] sm:$0xff]  ;;  %v595_v61 = vld [vmem:[%s20161_s1 + $0x1110] sm:$0xff] }
 0x407   :  { %11082 = vmatprep.subr.bf16.mxu0 %v13299_v33  ;;  %11641 = vmatprep.subr.bf16.mxu1 %v13301_v34  ;;  %v13357_v33 = vcombine.high %v564_v27, %v568_v29  ;;  %v571_v34 = vld [vmem:[%s20161_s1 + $0x1050] sm:$0xff]  ;;  %v14912_v45 = vld [vmem:[%s20162_s0 + $0x18] ss:$100 sps:$4 sm:$0xff]  }
 0x408   :  { %v580_v46 = vld [vmem:[%s20161_s1 + $0x1098] sm:$0xff]  ;;  %v599_v62 = vld [vmem:[%s20161_s1 + $0x1130] sm:$0xff] }
 0x409   :  { %v584_v47 = vld [vmem:[%s20161_s1 + $0x10b8] sm:$0xff]  ;;  %v603_v6 = vld [vmem:[%s20161_s1 + $0x1150] sm:$0xff] }
 0x40a   :  { %11083 = vmatpush1.bf16.msra.mxu0 %v13298_v40  ;;  %11642 = vmatpush1.bf16.msra.mxu1 %v13300_v41  ;;  %v13356_v40 = vcombine.low %v564_v27, %v568_v29  ;;  %v13363_v41 = vcombine.high %v571_v34, %v575_v35  ;;  %v588_v55 = vld [vmem:[%s20161_s1 + $0x10d8] sm:$0xff]  ;;  %v607_v7 = vld [vmem:[%s20161_s1 + $0x1170] sm:$0xff] }
 0x40b   :  { %11084 = vmatprep.subr.bf16.mxu0 %v13307_v42  ;;  %11643 = vmatprep.subr.bf16.mxu1 %v13309_v43  ;;  %v13365_v42 = vcombine.high %v572_v36, %v576_v38  ;;  %v579_v43 = vld [vmem:[%s20161_s1 + $0x1090] sm:$0xff]  ;;  %v596_v63 = vld [vmem:[%s20161_s1 + $0x1118] sm:$0xff] }
 0x40c   :  { %v604_v8 = vld [vmem:[%s20161_s1 + $0x1158] sm:$0xff]  ;;  %v611_v15 = vld [vmem:[%s20161_s1 + $0x1190] sm:$0xff] }
 0x40d   :  { %v615_v16 = vld [vmem:[%s20161_s1 + $0x11b0] sm:$0xff]  ;;  %v612_v17 = vld [vmem:[%s20161_s1 + $0x1198] sm:$0xff] }
 0x40e   :  { %11085 = vmatpush1.bf16.msra.mxu0 %v13306_v48  ;;  %11644 = vmatpush1.bf16.msra.mxu1 %v13308_v49  ;;  %v13362_v48 = vcombine.low %v571_v34, %v575_v35  ;;  %v13364_v49 = vcombine.low %v572_v36, %v576_v38  ;;  %v619_v26 = vld [vmem:[%s20161_s1 + $0x11d0] sm:$0xff]  ;;  %v620_v29 = vld [vmem:[%s20161_s1 + $0x11d8] sm:$0xff] }
 0x40f   :  { %11086 = vmatprep.subr.bf16.mxu0 %v13315_v50  ;;  %11645 = vmatprep.subr.bf16.mxu1 %v13317_v51  ;;  %v13371_v50 = vcombine.high %v579_v43, %v583_v44  ;;  %v13373_v51 = vcombine.high %v580_v46, %v584_v47  ;;  %v623_v27 = vld [vmem:[%s20161_s1 + $0x11f0] sm:$0xff]  ;;  %v628_v38 = vld [vmem:[%s20161_s1 + $0x1218] sm:$0xff] }
 0x410   :  { %v627_v35 = vld [vmem:[%s20161_s1 + $0x1210] sm:$0xff] }
 0x411   :  { %v631_v36 = vld [vmem:[%s20161_s1 + $0x1230] sm:$0xff] }
 0x412   :  { %11087 = vmatpush1.bf16.msra.mxu0 %v13314_v56  ;;  %11646 = vmatpush1.bf16.msra.mxu1 %v13316_v57  ;;  %v592_v56 = vld [vmem:[%s20161_s1 + $0x10f8] sm:$0xff]  ;;  %v13370_v57 = vcombine.low %v579_v43, %v583_v44  ;;  %v635_v44 = vld [vmem:[%s20161_s1 + $0x1250] sm:$0xff] }
 0x413   :  { %11088 = vmatprep.subr.bf16.mxu0 %v13323_v58  ;;  %11647 = vmatprep.subr.bf16.mxu1 %v13325_v59  ;;  %v13372_v58 = vcombine.low %v580_v46, %v584_v47  ;;  %v13379_v59 = vcombine.high %v587_v52, %v591_v53  ;;  %v13381_v60 = vcombine.high %v588_v55, %v592_v56  ;;  %v636_v46 = vld [vmem:[%s20161_s1 + $0x1258] sm:$0xff] }
 0x414   :  { %v640_v47 = vld [vmem:[%s20161_s1 + $0x1278] sm:$0xff] }
 0x416   :  { %11089 = vmatpush1.bf16.msra.mxu0 %v13322_v0  ;;  %11648 = vmatpush1.bf16.msra.mxu1 %v13324_v1  ;;  %v600_v0 = vld [vmem:[%s20161_s1 + $0x1138] sm:$0xff]  ;;  %v13378_v1 = vcombine.low %v587_v52, %v591_v53  ;;  %v643_v52 = vld [vmem:[%s20161_s1 + $0x1290] sm:$0xff] }
 0x417   :  { %11090 = vmatprep.subr.bf16.mxu0 %v13331_v2  ;;  %11649 = vmatprep.subr.bf16.mxu1 %v13333_v3  ;;  %v13380_v2 = vcombine.low %v588_v55, %v592_v56  ;;  %v13387_v3 = vcombine.high %v595_v61, %v599_v62  ;;  %v13389_v4 = vcombine.high %v596_v63, %v600_v0  ;;  %v647_v53 = vld [vmem:[%s20161_s1 + $0x12b0] sm:$0xff]  ;;  %v648_v55 = vld [vmem:[%s20161_s1 + $0x12b8] sm:$0xff] }
 0x41a   :  { %11091 = vmatpush1.bf16.msra.mxu0 %v13330_v9  ;;  %11650 = vmatpush1.bf16.msra.mxu1 %v13332_v10  ;;  %v608_v9 = vld [vmem:[%s20161_s1 + $0x1178] sm:$0xff]  ;;  %v13386_v10 = vcombine.low %v595_v61, %v599_v62  ;;  %v655_v61 = vld [vmem:[%s20161_s1 + $0x12f0] sm:$0xff] }
 0x41b   :  { %11092 = vmatprep.subr.bf16.mxu0 %v13339_v11  ;;  %11651 = vmatprep.subr.bf16.mxu1 %v13341_v12  ;;  %v13388_v11 = vcombine.low %v596_v63, %v600_v0  ;;  %v13395_v12 = vcombine.high %v603_v6, %v607_v7  ;;  %v13397_v13 = vcombine.high %v604_v8, %v608_v9  ;;  %v652_v62 = vld [vmem:[%s20161_s1 + $0x12d8] sm:$0xff] }
 0x41c   :  { %v656_v63 = vld [vmem:[%s20161_s1 + $0x12f8] sm:$0xff]  ;;  %v13434_v0 = vcombine.low %v643_v52, %v647_v53 }
 0x41e   :  { %11093 = vmatpush1.bf16.msra.mxu0 %v13338_v18  ;;  %11652 = vmatpush1.bf16.msra.mxu1 %v13340_v19  ;;  %v616_v18 = vld [vmem:[%s20161_s1 + $0x11b8] sm:$0xff]  ;;  %v13394_v19 = vcombine.low %v603_v6, %v607_v7  ;;  %v663_v6 = vld [vmem:[%s20161_s1 + $0x1330] sm:$0xff] }
 0x41f   :  { %11094 = vmatprep.subr.bf16.mxu0 %v13347_v21  ;;  %11653 = vmatprep.subr.bf16.mxu1 %v13349_v22  ;;  %v13396_v21 = vcombine.low %v604_v8, %v608_v9  ;;  %v13403_v22 = vcombine.high %v611_v15, %v615_v16  ;;  %v13405_v25 = vcombine.high %v612_v17, %v616_v18  ;;  %v660_v7 = vld [vmem:[%s20161_s1 + $0x1318] sm:$0xff] }
 0x420   :  { %v664_v8 = vld [vmem:[%s20161_s1 + $0x1338] sm:$0xff] }
 0x422   :  { %11095 = vmatpush1.bf16.msra.mxu0 %v13346_v30  ;;  %11654 = vmatpush1.bf16.msra.mxu1 %v13348_v31  ;;  %v624_v30 = vld [vmem:[%s20161_s1 + $0x11f8] sm:$0xff]  ;;  %v13402_v31 = vcombine.low %v611_v15, %v615_v16  ;;  %v671_v15 = vld [vmem:[%s20161_s1 + $0x1370] sm:$0xff] }
 0x423   :  { %11107 = vmatprep.subr.bf16.mxu0 %v13355_v32  ;;  %11666 = vmatprep.subr.bf16.mxu1 %v13357_v33  ;;  %v13404_v32 = vcombine.low %v612_v17, %v616_v18  ;;  %v13411_v33 = vcombine.high %v619_v26, %v623_v27  ;;  %v13413_v34 = vcombine.high %v620_v29, %v624_v30  ;;  %v668_v16 = vld [vmem:[%s20161_s1 + $0x1358] sm:$0xff] }
 0x424   :  { %v672_v17 = vld [vmem:[%s20161_s1 + $0x1378] sm:$0xff] }
 0x425   :  { %11097 = vmatmul.mubr.bf16.vlgmr.msra.gmra.mrb[4].mxu0 %v14912_v45  ;;  %11656 = vmatmul.mubr.bf16.vlgmr.msra.gmra.mrb[4].mxu1 %v14912_v45  ;;  %v639_v45 = vld [vmem:[%s20161_s1 + $0x1270] sm:$0xff] }
 0x426   :  { %11108 = vmatpush1.bf16.msra.mxu0 %v13354_v39  ;;  %11667 = vmatpush1.bf16.msra.mxu1 %v13356_v40  ;;  %v632_v39 = vld [vmem:[%s20161_s1 + $0x1238] sm:$0xff]  ;;  %v13410_v40 = vcombine.low %v619_v26, %v623_v27  ;;  %v13426_v56 = vcombine.low %v635_v44, %v639_v45  ;;  %v679_v26 = vld [vmem:[%s20161_s1 + $0x13b0] sm:$0xff] }
 0x427   :  { %11109 = vmatprep.subr.bf16.mxu0 %v13363_v41  ;;  %11668 = vmatprep.subr.bf16.mxu1 %v13365_v42  ;;  %v13412_v41 = vcombine.low %v620_v29, %v624_v30  ;;  %v13419_v42 = vcombine.high %v627_v35, %v631_v36  ;;  %v13421_v43 = vcombine.high %v628_v38, %v632_v39  ;;  %v676_v27 = vld [vmem:[%s20161_s1 + $0x1398] sm:$0xff] }
 0x428   :  { %11139 = vmatprep.mubr.bf16.mxu0 %v14913_v54  ;;  %11698 = vmatprep.mubr.bf16.mxu1 %v14913_v54  ;;  %v644_v54 = vld [vmem:[%s20161_s1 + $0x1298] sm:$0xff] }
 0x429   :  { %v680_v29 = vld [vmem:[%s20161_s1 + $0x13b8] sm:$0xff] }
 0x42a   :  { %11110 = vmatpush1.bf16.msra.mxu0 %v13362_v48  ;;  %11669 = vmatpush1.bf16.msra.mxu1 %v13364_v49  ;;  %v13418_v48 = vcombine.low %v627_v35, %v631_v36  ;;  %v13420_v49 = vcombine.low %v628_v38, %v632_v39  ;;  %v687_v35 = vld [vmem:[%s20161_s1 + $0x13f0] sm:$0xff]  ;;  %v684_v36 = vld [vmem:[%s20161_s1 + $0x13d8] sm:$0xff] }
 0x42b   :  { %11111 = vmatprep.subr.bf16.mxu0 %v13371_v50  ;;  %11670 = vmatprep.subr.bf16.mxu1 %v13373_v51  ;;  %v13427_v50 = vcombine.high %v635_v44, %v639_v45  ;;  %v13429_v51 = vcombine.high %v636_v46, %v640_v47  ;;  %v688_v38 = vld [vmem:[%s20161_s1 + $0x13f8] sm:$0xff]  ;;  %v695_v44 = vld [vmem:[%s20161_s1 + $0x1430] sm:$0xff] }
 0x42c   :  { %v692_v45 = vld [vmem:[%s20161_s1 + $0x1418] sm:$0xff] }
 0x42e   :  { %11112 = vmatpush1.bf16.msra.mxu0 %v13370_v57  ;;  %11671 = vmatpush1.bf16.msra.mxu1 %v13372_v58  ;;  %v13428_v57 = vcombine.low %v636_v46, %v640_v47  ;;  %v13435_v58 = vcombine.high %v643_v52, %v647_v53  ;;  %v696_v46 = vld [vmem:[%s20161_s1 + $0x1438] sm:$0xff]  ;;  %v703_v52 = vld [vmem:[%s20161_s1 + $0x1470] sm:$0xff] }
 0x42f   :  { %11113 = vmatprep.subr.bf16.mxu0 %v13379_v59  ;;  %11672 = vmatprep.subr.bf16.mxu1 %v13381_v60  ;;  %v13437_v59 = vcombine.high %v644_v54, %v648_v55  ;;  %v651_v60 = vld [vmem:[%s20161_s1 + $0x12d0] sm:$0xff]  ;;  %v700_v53 = vld [vmem:[%s20161_s1 + $0x1458] sm:$0xff] }
 0x430   :  { %v13442_v9 = vcombine.low %v651_v60, %v655_v61 }
 0x432   :  { %11114 = vmatpush1.bf16.msra.mxu0 %v13378_v1  ;;  %11673 = vmatpush1.bf16.msra.mxu1 %v13380_v2  ;;  %v13436_v1 = vcombine.low %v644_v54, %v648_v55  ;;  %v13443_v2 = vcombine.high %v651_v60, %v655_v61  ;;  %v704_v54 = vld [vmem:[%s20161_s1 + $0x1478] sm:$0xff]  ;;  %v711_v60 = vld [vmem:[%s20161_s1 + $0x14b0] sm:$0xff]  ;;  %v14914_v61 = vld [vmem:[%s20162_s0 + $0x20] ss:$100 sps:$4 sm:$0xff]  }
 0x433   :  { %11115 = vmatprep.subr.bf16.mxu0 %v13387_v3  ;;  %11674 = vmatprep.subr.bf16.mxu1 %v13389_v4  ;;  %v13445_v3 = vcombine.high %v652_v62, %v656_v63  ;;  %v659_v4 = vld [vmem:[%s20161_s1 + $0x1310] sm:$0xff] }
 0x434   :  { %v13450_v18 = vcombine.low %v659_v4, %v663_v6 }
 0x436   :  { %11116 = vmatpush1.bf16.msra.mxu0 %v13386_v10  ;;  %11675 = vmatpush1.bf16.msra.mxu1 %v13388_v11  ;;  %v13444_v10 = vcombine.low %v652_v62, %v656_v63  ;;  %v13451_v11 = vcombine.high %v659_v4, %v663_v6  ;;  %v708_v62 = vld [vmem:[%s20161_s1 + $0x1498] sm:$0xff]  ;;  %v715_v4 = vld [vmem:[%s20161_s1 + $0x14d0] sm:$0xff] }
 0x437   :  { %11117 = vmatprep.subr.bf16.mxu0 %v13395_v12  ;;  %11676 = vmatprep.subr.bf16.mxu1 %v13397_v13  ;;  %v13453_v12 = vcombine.high %v660_v7, %v664_v8  ;;  %v667_v13 = vld [vmem:[%s20161_s1 + $0x1350] sm:$0xff]  ;;  %v712_v63 = vld [vmem:[%s20161_s1 + $0x14b8] sm:$0xff] }
 0x438   :  { %v13458_v30 = vcombine.low %v667_v13, %v671_v15  ;;  %v719_v6 = vld [vmem:[%s20161_s1 + $0x14f0] sm:$0xff] }
 0x43a   :  { %11118 = vmatpush1.bf16.msra.mxu0 %v13394_v19  ;;  %11677 = vmatpush1.bf16.msra.mxu1 %v13396_v21  ;;  %v13452_v19 = vcombine.low %v660_v7, %v664_v8  ;;  %v13459_v21 = vcombine.high %v667_v13, %v671_v15  ;;  %v14915_v7 = vld [vmem:[%s20162_s0 + $0x2c] ss:$100 sps:$4 sm:$0xff]   ;;  %v716_v8 = vld [vmem:[%s20161_s1 + $0x14d8] sm:$0xff] }
 0x43b   :  { %11119 = vmatprep.subr.bf16.mxu0 %v13403_v22  ;;  %11678 = vmatprep.subr.bf16.mxu1 %v13405_v25  ;;  %v13461_v22 = vcombine.high %v668_v16, %v672_v17  ;;  %v675_v25 = vld [vmem:[%s20161_s1 + $0x1390] sm:$0xff] }
 0x43c   :  { %v13466_v39 = vcombine.low %v675_v25, %v679_v26  ;;  %v723_v15 = vld [vmem:[%s20161_s1 + $0x1510] sm:$0xff] }
 0x43e   :  { %11120 = vmatpush1.bf16.msra.mxu0 %v13402_v31  ;;  %11679 = vmatpush1.bf16.msra.mxu1 %v13404_v32  ;;  %v13460_v31 = vcombine.low %v668_v16, %v672_v17  ;;  %v13467_v32 = vcombine.high %v675_v25, %v679_v26  ;;  %v727_v16 = vld [vmem:[%s20161_s1 + $0x1530] sm:$0xff]  ;;  %v724_v17 = vld [vmem:[%s20161_s1 + $0x1518] sm:$0xff] }
 0x43f   :  { %11121 = vmatprep.subr.bf16.mxu0 %v13411_v33  ;;  %11680 = vmatprep.subr.bf16.mxu1 %v13413_v34  ;;  %v13469_v33 = vcombine.high %v676_v27, %v680_v29  ;;  %v683_v34 = vld [vmem:[%s20161_s1 + $0x13d0] sm:$0xff] }
 0x440   :  { %v13474_v47 = vcombine.low %v683_v34, %v687_v35  ;;  %v731_v26 = vld [vmem:[%s20161_s1 + $0x1550] sm:$0xff] }
 0x442   :  { %11122 = vmatpush1.bf16.msra.mxu0 %v13410_v40  ;;  %11681 = vmatpush1.bf16.msra.mxu1 %v13412_v41  ;;  %v13468_v40 = vcombine.low %v676_v27, %v680_v29  ;;  %v13475_v41 = vcombine.high %v683_v34, %v687_v35  ;;  %v735_v27 = vld [vmem:[%s20161_s1 + $0x1570] sm:$0xff]  ;;  %v732_v29 = vld [vmem:[%s20161_s1 + $0x1558] sm:$0xff] }
 0x443   :  { %11123 = vmatprep.subr.bf16.mxu0 %v13419_v42  ;;  %11682 = vmatprep.subr.bf16.mxu1 %v13421_v43  ;;  %v13477_v42 = vcombine.high %v684_v36, %v688_v38  ;;  %v691_v43 = vld [vmem:[%s20161_s1 + $0x1410] sm:$0xff] }
 0x444   :  { %v13482_v55 = vcombine.low %v691_v43, %v695_v44  ;;  %v739_v35 = vld [vmem:[%s20161_s1 + $0x1590] sm:$0xff] }
 0x446   :  { %11124 = vmatpush1.bf16.msra.mxu0 %v13418_v48  ;;  %11683 = vmatpush1.bf16.msra.mxu1 %v13420_v49  ;;  %v13476_v48 = vcombine.low %v684_v36, %v688_v38  ;;  %v13483_v49 = vcombine.high %v691_v43, %v695_v44  ;;  %v743_v36 = vld [vmem:[%s20161_s1 + $0x15b0] sm:$0xff]  ;;  %v740_v38 = vld [vmem:[%s20161_s1 + $0x1598] sm:$0xff] }
 0x447   :  { %11125 = vmatprep.subr.bf16.mxu0 %v13427_v50  ;;  %11684 = vmatprep.subr.bf16.mxu1 %v13429_v51  ;;  %v13485_v50 = vcombine.high %v692_v45, %v696_v46  ;;  %v699_v51 = vld [vmem:[%s20161_s1 + $0x1450] sm:$0xff] }
 0x448   :  { %v747_v44 = vld [vmem:[%s20161_s1 + $0x15d0] sm:$0xff] }
 0x44a   :  { %11126 = vmatpush1.bf16.msra.mxu0 %v13426_v56  ;;  %11685 = vmatpush1.bf16.msra.mxu1 %v13428_v57  ;;  %v13484_v56 = vcombine.low %v692_v45, %v696_v46  ;;  %v13491_v57 = vcombine.high %v699_v51, %v703_v52  ;;  %v751_v45 = vld [vmem:[%s20161_s1 + $0x15f0] sm:$0xff]  ;;  %v748_v46 = vld [vmem:[%s20161_s1 + $0x15d8] sm:$0xff] }
 0x44b   :  { %11127 = vmatprep.subr.bf16.mxu0 %v13435_v58  ;;  %11686 = vmatprep.subr.bf16.mxu1 %v13437_v59  ;;  %v13493_v58 = vcombine.high %v700_v53, %v704_v54  ;;  %v707_v59 = vld [vmem:[%s20161_s1 + $0x1490] sm:$0xff] }
 0x44e   :  { %11128 = vmatpush1.bf16.msra.mxu0 %v13434_v0  ;;  %11687 = vmatpush1.bf16.msra.mxu1 %v13436_v1  ;;  %v13490_v0 = vcombine.low %v699_v51, %v703_v52  ;;  %v13492_v1 = vcombine.low %v700_v53, %v704_v54  ;;  %v755_v52 = vld [vmem:[%s20161_s1 + $0x1610] sm:$0xff]  ;;  %v756_v54 = vld [vmem:[%s20161_s1 + $0x1618] sm:$0xff] }
 0x44f   :  { %11129 = vmatprep.subr.bf16.mxu0 %v13443_v2  ;;  %11688 = vmatprep.subr.bf16.mxu1 %v13445_v3  ;;  %v13499_v2 = vcombine.high %v707_v59, %v711_v60  ;;  %v13501_v3 = vcombine.high %v708_v62, %v712_v63  ;;  %v759_v53 = vld [vmem:[%s20161_s1 + $0x1630] sm:$0xff] }
 0x452   :  { %11130 = vmatpush1.bf16.msra.mxu0 %v13442_v9  ;;  %11689 = vmatpush1.bf16.msra.mxu1 %v13444_v10  ;;  %v720_v9 = vld [vmem:[%s20161_s1 + $0x14f8] sm:$0xff]  ;;  %v13498_v10 = vcombine.low %v707_v59, %v711_v60  ;;  %v763_v60 = vld [vmem:[%s20161_s1 + $0x1650] sm:$0xff] }
 0x453   :  { %11131 = vmatprep.subr.bf16.mxu0 %v13451_v11  ;;  %11690 = vmatprep.subr.bf16.mxu1 %v13453_v12  ;;  %v13500_v11 = vcombine.low %v708_v62, %v712_v63  ;;  %v13507_v12 = vcombine.high %v715_v4, %v719_v6  ;;  %v13509_v13 = vcombine.high %v716_v8, %v720_v9  ;;  %v764_v62 = vld [vmem:[%s20161_s1 + $0x1658] sm:$0xff] }
 0x454   :  { %v768_v63 = vld [vmem:[%s20161_s1 + $0x1678] sm:$0xff] }
 0x456   :  { %11132 = vmatpush1.bf16.msra.mxu0 %v13450_v18  ;;  %11691 = vmatpush1.bf16.msra.mxu1 %v13452_v19  ;;  %v728_v18 = vld [vmem:[%s20161_s1 + $0x1538] sm:$0xff]  ;;  %v13506_v19 = vcombine.low %v715_v4, %v719_v6  ;;  %v771_v4 = vld [vmem:[%s20161_s1 + $0x1690] sm:$0xff] }
 0x457   :  { %11133 = vmatprep.subr.bf16.mxu0 %v13459_v21  ;;  %11692 = vmatprep.subr.bf16.mxu1 %v13461_v22  ;;  %v13508_v21 = vcombine.low %v716_v8, %v720_v9  ;;  %v13515_v22 = vcombine.high %v723_v15, %v727_v16  ;;  %v13517_v25 = vcombine.high %v724_v17, %v728_v18  ;;  %v775_v6 = vld [vmem:[%s20161_s1 + $0x16b0] sm:$0xff]  ;;  %v776_v8 = vld [vmem:[%s20161_s1 + $0x16b8] sm:$0xff] }
 0x45a   :  { %11134 = vmatpush1.bf16.msra.mxu0 %v13458_v30  ;;  %11693 = vmatpush1.bf16.msra.mxu1 %v13460_v31  ;;  %v736_v30 = vld [vmem:[%s20161_s1 + $0x1578] sm:$0xff]  ;;  %v13514_v31 = vcombine.low %v723_v15, %v727_v16  ;;  %v783_v15 = vld [vmem:[%s20161_s1 + $0x16f0] sm:$0xff] }
 0x45b   :  { %11135 = vmatprep.subr.bf16.mxu0 %v13467_v32  ;;  %11694 = vmatprep.subr.bf16.mxu1 %v13469_v33  ;;  %v13516_v32 = vcombine.low %v724_v17, %v728_v18  ;;  %v13523_v33 = vcombine.high %v731_v26, %v735_v27  ;;  %v13525_v34 = vcombine.high %v732_v29, %v736_v30  ;;  %v780_v16 = vld [vmem:[%s20161_s1 + $0x16d8] sm:$0xff] }
 0x45c   :  { %v784_v17 = vld [vmem:[%s20161_s1 + $0x16f8] sm:$0xff]  ;;  %v13562_v18 = vcombine.low %v771_v4, %v775_v6 }
 0x45e   :  { %11136 = vmatpush1.bf16.msra.mxu0 %v13466_v39  ;;  %11695 = vmatpush1.bf16.msra.mxu1 %v13468_v40  ;;  %v744_v39 = vld [vmem:[%s20161_s1 + $0x15b8] sm:$0xff]  ;;  %v13522_v40 = vcombine.low %v731_v26, %v735_v27  ;;  %v791_v26 = vld [vmem:[%s20161_s1 + $0x1730] sm:$0xff] }
 0x45f   :  { %11137 = vmatprep.subr.bf16.mxu0 %v13475_v41  ;;  %11696 = vmatprep.subr.bf16.mxu1 %v13477_v42  ;;  %v13524_v41 = vcombine.low %v732_v29, %v736_v30  ;;  %v13531_v42 = vcombine.high %v739_v35, %v743_v36  ;;  %v13533_v43 = vcombine.high %v740_v38, %v744_v39  ;;  %v788_v27 = vld [vmem:[%s20161_s1 + $0x1718] sm:$0xff] }
 0x460   :  { %v792_v29 = vld [vmem:[%s20161_s1 + $0x1738] sm:$0xff] }
 0x462   :  { %11138 = vmatpush1.bf16.msra.mxu0 %v13474_v47  ;;  %11697 = vmatpush1.bf16.msra.mxu1 %v13476_v48  ;;  %v752_v47 = vld [vmem:[%s20161_s1 + $0x15f8] sm:$0xff]  ;;  %v13530_v48 = vcombine.low %v739_v35, %v743_v36  ;;  %v799_v35 = vld [vmem:[%s20161_s1 + $0x1770] sm:$0xff] }
 0x463   :  { %11150 = vmatprep.subr.bf16.mxu0 %v13483_v49  ;;  %11709 = vmatprep.subr.bf16.mxu1 %v13485_v50  ;;  %v13532_v49 = vcombine.low %v740_v38, %v744_v39  ;;  %v13539_v50 = vcombine.high %v747_v44, %v751_v45  ;;  %v13541_v51 = vcombine.high %v748_v46, %v752_v47  ;;  %v796_v36 = vld [vmem:[%s20161_s1 + $0x1758] sm:$0xff] }
 0x464   :  { %v800_v38 = vld [vmem:[%s20161_s1 + $0x1778] sm:$0xff] }
 0x465   :  { %11140 = vmatmul.mubr.bf16.vlgmr.msra.gmra.mrb[4].mxu0 %v14914_v61  ;;  %11699 = vmatmul.mubr.bf16.vlgmr.msra.gmra.mrb[4].mxu1 %v14914_v61  ;;  %v767_v61 = vld [vmem:[%s20161_s1 + $0x1670] sm:$0xff] }
 0x466   :  { %11151 = vmatpush1.bf16.msra.mxu0 %v13482_v55  ;;  %11710 = vmatpush1.bf16.msra.mxu1 %v13484_v56  ;;  %v760_v55 = vld [vmem:[%s20161_s1 + $0x1638] sm:$0xff]  ;;  %v13538_v56 = vcombine.low %v747_v44, %v751_v45  ;;  %v13554_v9 = vcombine.low %v763_v60, %v767_v61  ;;  %v807_v44 = vld [vmem:[%s20161_s1 + $0x17b0] sm:$0xff] }
 0x467   :  { %11152 = vmatprep.subr.bf16.mxu0 %v13491_v57  ;;  %11711 = vmatprep.subr.bf16.mxu1 %v13493_v58  ;;  %v13540_v57 = vcombine.low %v748_v46, %v752_v47  ;;  %v13547_v58 = vcombine.high %v755_v52, %v759_v53  ;;  %v13549_v59 = vcombine.high %v756_v54, %v760_v55  ;;  %v804_v45 = vld [vmem:[%s20161_s1 + $0x1798] sm:$0xff] }
 0x468   :  { %11182 = vmatprep.mubr.bf16.mxu0 %v14915_v7  ;;  %11741 = vmatprep.mubr.bf16.mxu1 %v14915_v7  ;;  %v772_v7 = vld [vmem:[%s20161_s1 + $0x1698] sm:$0xff] }
 0x469   :  { %v808_v46 = vld [vmem:[%s20161_s1 + $0x17b8] sm:$0xff] }
 0x46a   :  { %11153 = vmatpush1.bf16.msra.mxu0 %v13490_v0  ;;  %11712 = vmatpush1.bf16.msra.mxu1 %v13492_v1  ;;  %v13546_v0 = vcombine.low %v755_v52, %v759_v53  ;;  %v13548_v1 = vcombine.low %v756_v54, %v760_v55  ;;  %v815_v52 = vld [vmem:[%s20161_s1 + $0x17f0] sm:$0xff]  ;;  %v812_v53 = vld [vmem:[%s20161_s1 + $0x17d8] sm:$0xff] }
 0x46b   :  { %11154 = vmatprep.subr.bf16.mxu0 %v13499_v2  ;;  %11713 = vmatprep.subr.bf16.mxu1 %v13501_v3  ;;  %v13555_v2 = vcombine.high %v763_v60, %v767_v61  ;;  %v13557_v3 = vcombine.high %v764_v62, %v768_v63  ;;  %v816_v54 = vld [vmem:[%s20161_s1 + $0x17f8] sm:$0xff]  ;;  %v823_v60 = vld [vmem:[%s20161_s1 + $0x1830] sm:$0xff] }
 0x46c   :  { %v820_v61 = vld [vmem:[%s20161_s1 + $0x1818] sm:$0xff] }
 0x46e   :  { %11155 = vmatpush1.bf16.msra.mxu0 %v13498_v10  ;;  %11714 = vmatpush1.bf16.msra.mxu1 %v13500_v11  ;;  %v13556_v10 = vcombine.low %v764_v62, %v768_v63  ;;  %v13563_v11 = vcombine.high %v771_v4, %v775_v6  ;;  %v824_v62 = vld [vmem:[%s20161_s1 + $0x1838] sm:$0xff]  ;;  %v831_v4 = vld [vmem:[%s20161_s1 + $0x1870] sm:$0xff] }
 0x46f   :  { %11156 = vmatprep.subr.bf16.mxu0 %v13507_v12  ;;  %11715 = vmatprep.subr.bf16.mxu1 %v13509_v13  ;;  %v13565_v12 = vcombine.high %v772_v7, %v776_v8  ;;  %v779_v13 = vld [vmem:[%s20161_s1 + $0x16d0] sm:$0xff]  ;;  %v828_v6 = vld [vmem:[%s20161_s1 + $0x1858] sm:$0xff] }
 0x470   :  { %v13570_v30 = vcombine.low %v779_v13, %v783_v15 }
 0x472   :  { %11157 = vmatpush1.bf16.msra.mxu0 %v13506_v19  ;;  %11716 = vmatpush1.bf16.msra.mxu1 %v13508_v21  ;;  %v13564_v19 = vcombine.low %v772_v7, %v776_v8  ;;  %v13571_v21 = vcombine.high %v779_v13, %v783_v15  ;;  %v832_v7 = vld [vmem:[%s20161_s1 + $0x1878] sm:$0xff]  ;;  %v839_v13 = vld [vmem:[%s20161_s1 + $0x18b0] sm:$0xff]  ;;  %v14916_v15 = vld [vmem:[%s20162_s0 + $0x28] ss:$100 sps:$4 sm:$0xff]  }
 0x473   :  { %11158 = vmatprep.subr.bf16.mxu0 %v13515_v22  ;;  %11717 = vmatprep.subr.bf16.mxu1 %v13517_v25  ;;  %v13573_v22 = vcombine.high %v780_v16, %v784_v17  ;;  %v787_v25 = vld [vmem:[%s20161_s1 + $0x1710] sm:$0xff] }
 0x474   :  { %v13578_v39 = vcombine.low %v787_v25, %v791_v26 }
 0x476   :  { %11159 = vmatpush1.bf16.msra.mxu0 %v13514_v31  ;;  %11718 = vmatpush1.bf16.msra.mxu1 %v13516_v32  ;;  %v13572_v31 = vcombine.low %v780_v16, %v784_v17  ;;  %v13579_v32 = vcombine.high %v787_v25, %v791_v26  ;;  %v836_v16 = vld [vmem:[%s20161_s1 + $0x1898] sm:$0xff]  ;;  %v843_v25 = vld [vmem:[%s20161_s1 + $0x18d0] sm:$0xff] }
 0x477   :  { %11160 = vmatprep.subr.bf16.mxu0 %v13523_v33  ;;  %11719 = vmatprep.subr.bf16.mxu1 %v13525_v34  ;;  %v13581_v33 = vcombine.high %v788_v27, %v792_v29  ;;  %v795_v34 = vld [vmem:[%s20161_s1 + $0x1750] sm:$0xff]  ;;  %v840_v17 = vld [vmem:[%s20161_s1 + $0x18b8] sm:$0xff] }
 0x478   :  { %v13586_v47 = vcombine.low %v795_v34, %v799_v35  ;;  %v847_v26 = vld [vmem:[%s20161_s1 + $0x18f0] sm:$0xff] }
 0x47a   :  { %11161 = vmatpush1.bf16.msra.mxu0 %v13522_v40  ;;  %11720 = vmatpush1.bf16.msra.mxu1 %v13524_v41  ;;  %v13580_v40 = vcombine.low %v788_v27, %v792_v29  ;;  %v13587_v41 = vcombine.high %v795_v34, %v799_v35  ;;  %v14917_v27 = vld [vmem:[%s20162_s0 + $0x34] ss:$100 sps:$4 sm:$0xff]  }
 0x47b   :  { %11162 = vmatprep.subr.bf16.mxu0 %v13531_v42  ;;  %11721 = vmatprep.subr.bf16.mxu1 %v13533_v43  ;;  %v13589_v42 = vcombine.high %v796_v36, %v800_v38  ;;  %v803_v43 = vld [vmem:[%s20161_s1 + $0x1790] sm:$0xff]  ;;  %v844_v29 = vld [vmem:[%s20161_s1 + $0x18d8] sm:$0xff] }
 0x47c   :  { %v13594_v55 = vcombine.low %v803_v43, %v807_v44  ;;  %v851_v35 = vld [vmem:[%s20161_s1 + $0x1910] sm:$0xff] }
 0x47e   :  { %11163 = vmatpush1.bf16.msra.mxu0 %v13530_v48  ;;  %11722 = vmatpush1.bf16.msra.mxu1 %v13532_v49  ;;  %v13588_v48 = vcombine.low %v796_v36, %v800_v38  ;;  %v13595_v49 = vcombine.high %v803_v43, %v807_v44  ;;  %v855_v36 = vld [vmem:[%s20161_s1 + $0x1930] sm:$0xff]  ;;  %v852_v38 = vld [vmem:[%s20161_s1 + $0x1918] sm:$0xff] }
 0x47f   :  { %11164 = vmatprep.subr.bf16.mxu0 %v13539_v50  ;;  %11723 = vmatprep.subr.bf16.mxu1 %v13541_v51  ;;  %v13597_v50 = vcombine.high %v804_v45, %v808_v46  ;;  %v811_v51 = vld [vmem:[%s20161_s1 + $0x17d0] sm:$0xff] }
 0x480   :  { %v13602_v63 = vcombine.low %v811_v51, %v815_v52  ;;  %v859_v44 = vld [vmem:[%s20161_s1 + $0x1950] sm:$0xff] }
 0x482   :  { %11165 = vmatpush1.bf16.msra.mxu0 %v13538_v56  ;;  %11724 = vmatpush1.bf16.msra.mxu1 %v13540_v57  ;;  %v13596_v56 = vcombine.low %v804_v45, %v808_v46  ;;  %v13603_v57 = vcombine.high %v811_v51, %v815_v52  ;;  %v863_v45 = vld [vmem:[%s20161_s1 + $0x1970] sm:$0xff]  ;;  %v860_v46 = vld [vmem:[%s20161_s1 + $0x1958] sm:$0xff] }
 0x483   :  { %11166 = vmatprep.subr.bf16.mxu0 %v13547_v58  ;;  %11725 = vmatprep.subr.bf16.mxu1 %v13549_v59  ;;  %v13605_v58 = vcombine.high %v812_v53, %v816_v54  ;;  %v819_v59 = vld [vmem:[%s20161_s1 + $0x1810] sm:$0xff] }
 0x484   :  { %v13610_v8 = vcombine.low %v819_v59, %v823_v60  ;;  %v867_v52 = vld [vmem:[%s20161_s1 + $0x1990] sm:$0xff] }
 0x486   :  { %11167 = vmatpush1.bf16.msra.mxu0 %v13546_v0  ;;  %11726 = vmatpush1.bf16.msra.mxu1 %v13548_v1  ;;  %v13604_v0 = vcombine.low %v812_v53, %v816_v54  ;;  %v13611_v1 = vcombine.high %v819_v59, %v823_v60  ;;  %v871_v53 = vld [vmem:[%s20161_s1 + $0x19b0] sm:$0xff]  ;;  %v868_v54 = vld [vmem:[%s20161_s1 + $0x1998] sm:$0xff] }
 0x487   :  { %11168 = vmatprep.subr.bf16.mxu0 %v13555_v2  ;;  %11727 = vmatprep.subr.bf16.mxu1 %v13557_v3  ;;  %v13613_v2 = vcombine.high %v820_v61, %v824_v62  ;;  %v827_v3 = vld [vmem:[%s20161_s1 + $0x1850] sm:$0xff] }
 0x488   :  { %v875_v60 = vld [vmem:[%s20161_s1 + $0x19d0] sm:$0xff] }
 0x48a   :  { %11169 = vmatpush1.bf16.msra.mxu0 %v13554_v9  ;;  %11728 = vmatpush1.bf16.msra.mxu1 %v13556_v10  ;;  %v13612_v9 = vcombine.low %v820_v61, %v824_v62  ;;  %v13619_v10 = vcombine.high %v827_v3, %v831_v4  ;;  %v879_v61 = vld [vmem:[%s20161_s1 + $0x19f0] sm:$0xff]  ;;  %v876_v62 = vld [vmem:[%s20161_s1 + $0x19d8] sm:$0xff] }
 0x48b   :  { %11170 = vmatprep.subr.bf16.mxu0 %v13563_v11  ;;  %11729 = vmatprep.subr.bf16.mxu1 %v13565_v12  ;;  %v13621_v11 = vcombine.high %v828_v6, %v832_v7  ;;  %v835_v12 = vld [vmem:[%s20161_s1 + $0x1890] sm:$0xff] }
 0x48e   :  { %11171 = vmatpush1.bf16.msra.mxu0 %v13562_v18  ;;  %11730 = vmatpush1.bf16.msra.mxu1 %v13564_v19  ;;  %v13618_v18 = vcombine.low %v827_v3, %v831_v4  ;;  %v13620_v19 = vcombine.low %v828_v6, %v832_v7  ;;  %v883_v4 = vld [vmem:[%s20161_s1 + $0x1a10] sm:$0xff]  ;;  %v884_v7 = vld [vmem:[%s20161_s1 + $0x1a18] sm:$0xff] }
 0x48f   :  { %11172 = vmatprep.subr.bf16.mxu0 %v13571_v21  ;;  %11731 = vmatprep.subr.bf16.mxu1 %v13573_v22  ;;  %v13627_v21 = vcombine.high %v835_v12, %v839_v13  ;;  %v13629_v22 = vcombine.high %v836_v16, %v840_v17  ;;  %v887_v6 = vld [vmem:[%s20161_s1 + $0x1a30] sm:$0xff] }
 0x492   :  { %11173 = vmatpush1.bf16.msra.mxu0 %v13570_v30  ;;  %11732 = vmatpush1.bf16.msra.mxu1 %v13572_v31  ;;  %v848_v30 = vld [vmem:[%s20161_s1 + $0x18f8] sm:$0xff]  ;;  %v13626_v31 = vcombine.low %v835_v12, %v839_v13  ;;  %v891_v13 = vld [vmem:[%s20161_s1 + $0x1a50] sm:$0xff] }
 0x493   :  { %11174 = vmatprep.subr.bf16.mxu0 %v13579_v32  ;;  %11733 = vmatprep.subr.bf16.mxu1 %v13581_v33  ;;  %v13628_v32 = vcombine.low %v836_v16, %v840_v17  ;;  %v13635_v33 = vcombine.high %v843_v25, %v847_v26  ;;  %v13637_v34 = vcombine.high %v844_v29, %v848_v30  ;;  %v892_v16 = vld [vmem:[%s20161_s1 + $0x1a58] sm:$0xff] }
 0x494   :  { %v896_v17 = vld [vmem:[%s20161_s1 + $0x1a78] sm:$0xff] }
 0x496   :  { %11175 = vmatpush1.bf16.msra.mxu0 %v13578_v39  ;;  %11734 = vmatpush1.bf16.msra.mxu1 %v13580_v40  ;;  %v856_v39 = vld [vmem:[%s20161_s1 + $0x1938] sm:$0xff]  ;;  %v13634_v40 = vcombine.low %v843_v25, %v847_v26  ;;  %v899_v25 = vld [vmem:[%s20161_s1 + $0x1a90] sm:$0xff] }
 0x497   :  { %11176 = vmatprep.subr.bf16.mxu0 %v13587_v41  ;;  %11735 = vmatprep.subr.bf16.mxu1 %v13589_v42  ;;  %v13636_v41 = vcombine.low %v844_v29, %v848_v30  ;;  %v13643_v42 = vcombine.high %v851_v35, %v855_v36  ;;  %v13645_v43 = vcombine.high %v852_v38, %v856_v39  ;;  %v903_v26 = vld [vmem:[%s20161_s1 + $0x1ab0] sm:$0xff]  ;;  %v904_v29 = vld [vmem:[%s20161_s1 + $0x1ab8] sm:$0xff] }
 0x49a   :  { %11177 = vmatpush1.bf16.msra.mxu0 %v13586_v47  ;;  %11736 = vmatpush1.bf16.msra.mxu1 %v13588_v48  ;;  %v864_v47 = vld [vmem:[%s20161_s1 + $0x1978] sm:$0xff]  ;;  %v13642_v48 = vcombine.low %v851_v35, %v855_v36  ;;  %v911_v35 = vld [vmem:[%s20161_s1 + $0x1af0] sm:$0xff] }
 0x49b   :  { %11178 = vmatprep.subr.bf16.mxu0 %v13595_v49  ;;  %11737 = vmatprep.subr.bf16.mxu1 %v13597_v50  ;;  %v13644_v49 = vcombine.low %v852_v38, %v856_v39  ;;  %v13651_v50 = vcombine.high %v859_v44, %v863_v45  ;;  %v13653_v51 = vcombine.high %v860_v46, %v864_v47  ;;  %v908_v36 = vld [vmem:[%s20161_s1 + $0x1ad8] sm:$0xff] }
 0x49c   :  { %v912_v38 = vld [vmem:[%s20161_s1 + $0x1af8] sm:$0xff]  ;;  %v13690_v39 = vcombine.low %v899_v25, %v903_v26 }
 0x49e   :  { %11179 = vmatpush1.bf16.msra.mxu0 %v13594_v55  ;;  %11738 = vmatpush1.bf16.msra.mxu1 %v13596_v56  ;;  %v872_v55 = vld [vmem:[%s20161_s1 + $0x19b8] sm:$0xff]  ;;  %v13650_v56 = vcombine.low %v859_v44, %v863_v45  ;;  %v919_v44 = vld [vmem:[%s20161_s1 + $0x1b30] sm:$0xff] }
 0x49f   :  { %11180 = vmatprep.subr.bf16.mxu0 %v13603_v57  ;;  %11739 = vmatprep.subr.bf16.mxu1 %v13605_v58  ;;  %v13652_v57 = vcombine.low %v860_v46, %v864_v47  ;;  %v13659_v58 = vcombine.high %v867_v52, %v871_v53  ;;  %v13661_v59 = vcombine.high %v868_v54, %v872_v55  ;;  %v916_v45 = vld [vmem:[%s20161_s1 + $0x1b18] sm:$0xff] }
 0x4a0   :  { %v920_v46 = vld [vmem:[%s20161_s1 + $0x1b38] sm:$0xff] }
 0x4a2   :  { %11181 = vmatpush1.bf16.msra.mxu0 %v13602_v63  ;;  %11740 = vmatpush1.bf16.msra.mxu1 %v13604_v0  ;;  %v880_v63 = vld [vmem:[%s20161_s1 + $0x19f8] sm:$0xff]  ;;  %v13658_v0 = vcombine.low %v867_v52, %v871_v53  ;;  %v927_v52 = vld [vmem:[%s20161_s1 + $0x1b70] sm:$0xff] }
 0x4a3   :  { %11193 = vmatprep.subr.bf16.mxu0 %v13611_v1  ;;  %11752 = vmatprep.subr.bf16.mxu1 %v13613_v2  ;;  %v13660_v1 = vcombine.low %v868_v54, %v872_v55  ;;  %v13667_v2 = vcombine.high %v875_v60, %v879_v61  ;;  %v13669_v3 = vcombine.high %v876_v62, %v880_v63  ;;  %v924_v53 = vld [vmem:[%s20161_s1 + $0x1b58] sm:$0xff] }
 0x4a4   :  { %v928_v54 = vld [vmem:[%s20161_s1 + $0x1b78] sm:$0xff] }
 0x4a5   :  { %11183 = vmatmul.mubr.bf16.vlgmr.msra.gmra.mrb[4].mxu0 %v14916_v15  ;;  %11742 = vmatmul.mubr.bf16.vlgmr.msra.gmra.mrb[4].mxu1 %v14916_v15  ;;  %v895_v15 = vld [vmem:[%s20161_s1 + $0x1a70] sm:$0xff] }
 0x4a6   :  { %11194 = vmatpush1.bf16.msra.mxu0 %v13610_v8  ;;  %11753 = vmatpush1.bf16.msra.mxu1 %v13612_v9  ;;  %v888_v8 = vld [vmem:[%s20161_s1 + $0x1a38] sm:$0xff]  ;;  %v13666_v9 = vcombine.low %v875_v60, %v879_v61  ;;  %v13682_v30 = vcombine.low %v891_v13, %v895_v15  ;;  %v935_v60 = vld [vmem:[%s20161_s1 + $0x1bb0] sm:$0xff] }
 0x4a7   :  { %11195 = vmatprep.subr.bf16.mxu0 %v13619_v10  ;;  %11754 = vmatprep.subr.bf16.mxu1 %v13621_v11  ;;  %v13668_v10 = vcombine.low %v876_v62, %v880_v63  ;;  %v13675_v11 = vcombine.high %v883_v4, %v887_v6  ;;  %v13677_v12 = vcombine.high %v884_v7, %v888_v8  ;;  %v932_v61 = vld [vmem:[%s20161_s1 + $0x1b98] sm:$0xff] }
 0x4a8   :  { %11225 = vmatprep.mubr.bf16.mxu0 %v14917_v27  ;;  %11784 = vmatprep.mubr.bf16.mxu1 %v14917_v27  ;;  %v900_v27 = vld [vmem:[%s20161_s1 + $0x1a98] sm:$0xff] }
 0x4a9   :  { %v936_v62 = vld [vmem:[%s20161_s1 + $0x1bb8] sm:$0xff] }
 0x4aa   :  { %11196 = vmatpush1.bf16.msra.mxu0 %v13618_v18  ;;  %11755 = vmatpush1.bf16.msra.mxu1 %v13620_v19  ;;  %v13674_v18 = vcombine.low %v883_v4, %v887_v6  ;;  %v13676_v19 = vcombine.low %v884_v7, %v888_v8  ;;  %v943_v4 = vld [vmem:[%s20161_s1 + $0x1bf0] sm:$0xff]  ;;  %v940_v6 = vld [vmem:[%s20161_s1 + $0x1bd8] sm:$0xff] }
 0x4ab   :  { %11197 = vmatprep.subr.bf16.mxu0 %v13627_v21  ;;  %11756 = vmatprep.subr.bf16.mxu1 %v13629_v22  ;;  %v13683_v21 = vcombine.high %v891_v13, %v895_v15  ;;  %v13685_v22 = vcombine.high %v892_v16, %v896_v17  ;;  %v944_v7 = vld [vmem:[%s20161_s1 + $0x1bf8] sm:$0xff]  ;;  %v951_v13 = vld [vmem:[%s20161_s1 + $0x1c30] sm:$0xff] }
 0x4ac   :  { %v948_v15 = vld [vmem:[%s20161_s1 + $0x1c18] sm:$0xff] }
 0x4ae   :  { %11198 = vmatpush1.bf16.msra.mxu0 %v13626_v31  ;;  %11757 = vmatpush1.bf16.msra.mxu1 %v13628_v32  ;;  %v13684_v31 = vcombine.low %v892_v16, %v896_v17  ;;  %v13691_v32 = vcombine.high %v899_v25, %v903_v26  ;;  %v952_v16 = vld [vmem:[%s20161_s1 + $0x1c38] sm:$0xff]  ;;  %v959_v25 = vld [vmem:[%s20161_s1 + $0x1c70] sm:$0xff] }
 0x4af   :  { %11199 = vmatprep.subr.bf16.mxu0 %v13635_v33  ;;  %11758 = vmatprep.subr.bf16.mxu1 %v13637_v34  ;;  %v13693_v33 = vcombine.high %v900_v27, %v904_v29  ;;  %v907_v34 = vld [vmem:[%s20161_s1 + $0x1ad0] sm:$0xff]  ;;  %v956_v26 = vld [vmem:[%s20161_s1 + $0x1c58] sm:$0xff] }
 0x4b0   :  { %v13698_v47 = vcombine.low %v907_v34, %v911_v35 }
 0x4b2   :  { %11200 = vmatpush1.bf16.msra.mxu0 %v13634_v40  ;;  %11759 = vmatpush1.bf16.msra.mxu1 %v13636_v41  ;;  %v13692_v40 = vcombine.low %v900_v27, %v904_v29  ;;  %v13699_v41 = vcombine.high %v907_v34, %v911_v35  ;;  %v960_v27 = vld [vmem:[%s20161_s1 + $0x1c78] sm:$0xff]  ;;  %v967_v34 = vld [vmem:[%s20161_s1 + $0x1cb0] sm:$0xff] }
 0x4b3   :  { %11201 = vmatprep.subr.bf16.mxu0 %v13643_v42  ;;  %11760 = vmatprep.subr.bf16.mxu1 %v13645_v43  ;;  %v13701_v42 = vcombine.high %v908_v36, %v912_v38  ;;  %v915_v43 = vld [vmem:[%s20161_s1 + $0x1b10] sm:$0xff] }
 0x4b4   :  { %v13706_v55 = vcombine.low %v915_v43, %v919_v44  ;;  %v14918_v35 = vld [vmem:[%s20162_s0 + $0x30] ss:$100 sps:$4 sm:$0xff]  }
 0x4b6   :  { %11202 = vmatpush1.bf16.msra.mxu0 %v13642_v48  ;;  %11761 = vmatpush1.bf16.msra.mxu1 %v13644_v49  ;;  %v13700_v48 = vcombine.low %v908_v36, %v912_v38  ;;  %v13707_v49 = vcombine.high %v915_v43, %v919_v44  ;;  %v964_v36 = vld [vmem:[%s20161_s1 + $0x1c98] sm:$0xff]  ;;  %v971_v43 = vld [vmem:[%s20161_s1 + $0x1cd0] sm:$0xff] }
 0x4b7   :  { %11203 = vmatprep.subr.bf16.mxu0 %v13651_v50  ;;  %11762 = vmatprep.subr.bf16.mxu1 %v13653_v51  ;;  %v13709_v50 = vcombine.high %v916_v45, %v920_v46  ;;  %v923_v51 = vld [vmem:[%s20161_s1 + $0x1b50] sm:$0xff]  ;;  %v968_v38 = vld [vmem:[%s20161_s1 + $0x1cb8] sm:$0xff] }
 0x4b8   :  { %v13714_v63 = vcombine.low %v923_v51, %v927_v52  ;;  %v975_v44 = vld [vmem:[%s20161_s1 + $0x1cf0] sm:$0xff] }
 0x4ba   :  { %11204 = vmatpush1.bf16.msra.mxu0 %v13650_v56  ;;  %11763 = vmatpush1.bf16.msra.mxu1 %v13652_v57  ;;  %v13708_v56 = vcombine.low %v916_v45, %v920_v46  ;;  %v13715_v57 = vcombine.high %v923_v51, %v927_v52  ;;  %v14919_v45 = vld [vmem:[%s20162_s0 + $0x3c] ss:$100 sps:$4 sm:$0xff]   ;;  %v979_v52 = vld [vmem:[%s20161_s1 + $0x1d10] sm:$0xff] }
 0x4bb   :  { %11205 = vmatprep.subr.bf16.mxu0 %v13659_v58  ;;  %11764 = vmatprep.subr.bf16.mxu1 %v13661_v59  ;;  %v13717_v58 = vcombine.high %v924_v53, %v928_v54  ;;  %v931_v59 = vld [vmem:[%s20161_s1 + $0x1b90] sm:$0xff]  ;;  %v972_v46 = vld [vmem:[%s20161_s1 + $0x1cd8] sm:$0xff] }
 0x4bc   :  { %v13722_v8 = vcombine.low %v931_v59, %v935_v60 }
 0x4be   :  { %11206 = vmatpush1.bf16.msra.mxu0 %v13658_v0  ;;  %11765 = vmatpush1.bf16.msra.mxu1 %v13660_v1  ;;  %v13716_v0 = vcombine.low %v924_v53, %v928_v54  ;;  %v13723_v1 = vcombine.high %v931_v59, %v935_v60  ;;  %v983_v53 = vld [vmem:[%s20161_s1 + $0x1d30] sm:$0xff]  ;;  %v980_v54 = vld [vmem:[%s20161_s1 + $0x1d18] sm:$0xff] }
 0x4bf   :  { %11207 = vmatprep.subr.bf16.mxu0 %v13667_v2  ;;  %11766 = vmatprep.subr.bf16.mxu1 %v13669_v3  ;;  %v13725_v2 = vcombine.high %v932_v61, %v936_v62  ;;  %v939_v3 = vld [vmem:[%s20161_s1 + $0x1bd0] sm:$0xff] }
 0x4c0   :  { %v13730_v17 = vcombine.low %v939_v3, %v943_v4  ;;  %v987_v60 = vld [vmem:[%s20161_s1 + $0x1d50] sm:$0xff] }
 0x4c2   :  { %11208 = vmatpush1.bf16.msra.mxu0 %v13666_v9  ;;  %11767 = vmatpush1.bf16.msra.mxu1 %v13668_v10  ;;  %v13724_v9 = vcombine.low %v932_v61, %v936_v62  ;;  %v13731_v10 = vcombine.high %v939_v3, %v943_v4  ;;  %v991_v61 = vld [vmem:[%s20161_s1 + $0x1d70] sm:$0xff]  ;;  %v988_v62 = vld [vmem:[%s20161_s1 + $0x1d58] sm:$0xff] }
 0x4c3   :  { %11209 = vmatprep.subr.bf16.mxu0 %v13675_v11  ;;  %11768 = vmatprep.subr.bf16.mxu1 %v13677_v12  ;;  %v13733_v11 = vcombine.high %v940_v6, %v944_v7  ;;  %v947_v12 = vld [vmem:[%s20161_s1 + $0x1c10] sm:$0xff] }
 0x4c4   :  { %v13738_v29 = vcombine.low %v947_v12, %v951_v13  ;;  %v995_v4 = vld [vmem:[%s20161_s1 + $0x1d90] sm:$0xff] }
 0x4c6   :  { %11210 = vmatpush1.bf16.msra.mxu0 %v13674_v18  ;;  %11769 = vmatpush1.bf16.msra.mxu1 %v13676_v19  ;;  %v13732_v18 = vcombine.low %v940_v6, %v944_v7  ;;  %v13739_v19 = vcombine.high %v947_v12, %v951_v13  ;;  %v999_v6 = vld [vmem:[%s20161_s1 + $0x1db0] sm:$0xff]  ;;  %v996_v7 = vld [vmem:[%s20161_s1 + $0x1d98] sm:$0xff] }
 0x4c7   :  { %11211 = vmatprep.subr.bf16.mxu0 %v13683_v21  ;;  %11770 = vmatprep.subr.bf16.mxu1 %v13685_v22  ;;  %v13741_v21 = vcombine.high %v948_v15, %v952_v16  ;;  %v955_v22 = vld [vmem:[%s20161_s1 + $0x1c50] sm:$0xff] }
 0x4c8   :  { %v1003_v13 = vld [vmem:[%s20161_s1 + $0x1dd0] sm:$0xff] }
 0x4ca   :  { %11212 = vmatpush1.bf16.msra.mxu0 %v13682_v30  ;;  %11771 = vmatpush1.bf16.msra.mxu1 %v13684_v31  ;;  %v13740_v30 = vcombine.low %v948_v15, %v952_v16  ;;  %v13747_v31 = vcombine.high %v955_v22, %v959_v25  ;;  %v1007_v15 = vld [vmem:[%s20161_s1 + $0x1df0] sm:$0xff]  ;;  %v1004_v16 = vld [vmem:[%s20161_s1 + $0x1dd8] sm:$0xff] }
 0x4cb   :  { %11213 = vmatprep.subr.bf16.mxu0 %v13691_v32  ;;  %11772 = vmatprep.subr.bf16.mxu1 %v13693_v33  ;;  %v13749_v32 = vcombine.high %v956_v26, %v960_v27  ;;  %v963_v33 = vld [vmem:[%s20161_s1 + $0x1c90] sm:$0xff] }
 0x4ce   :  { %11214 = vmatpush1.bf16.msra.mxu0 %v13690_v39  ;;  %11773 = vmatpush1.bf16.msra.mxu1 %v13692_v40  ;;  %v13746_v39 = vcombine.low %v955_v22, %v959_v25  ;;  %v13748_v40 = vcombine.low %v956_v26, %v960_v27  ;;  %v1011_v25 = vld [vmem:[%s20161_s1 + $0x1e10] sm:$0xff]  ;;  %v1012_v27 = vld [vmem:[%s20161_s1 + $0x1e18] sm:$0xff] }
 0x4cf   :  { %11215 = vmatprep.subr.bf16.mxu0 %v13699_v41  ;;  %11774 = vmatprep.subr.bf16.mxu1 %v13701_v42  ;;  %v13755_v41 = vcombine.high %v963_v33, %v967_v34  ;;  %v13757_v42 = vcombine.high %v964_v36, %v968_v38  ;;  %v1015_v26 = vld [vmem:[%s20161_s1 + $0x1e30] sm:$0xff] }
 0x4d2   :  { %11216 = vmatpush1.bf16.msra.mxu0 %v13698_v47  ;;  %11775 = vmatpush1.bf16.msra.mxu1 %v13700_v48  ;;  %v976_v47 = vld [vmem:[%s20161_s1 + $0x1cf8] sm:$0xff]  ;;  %v13754_v48 = vcombine.low %v963_v33, %v967_v34  ;;  %v1019_v34 = vld [vmem:[%s20161_s1 + $0x1e50] sm:$0xff] }
 0x4d3   :  { %11217 = vmatprep.subr.bf16.mxu0 %v13707_v49  ;;  %11776 = vmatprep.subr.bf16.mxu1 %v13709_v50  ;;  %v13756_v49 = vcombine.low %v964_v36, %v968_v38  ;;  %v13763_v50 = vcombine.high %v971_v43, %v975_v44  ;;  %v13765_v51 = vcombine.high %v972_v46, %v976_v47  ;;  %v1020_v36 = vld [vmem:[%s20161_s1 + $0x1e58] sm:$0xff] }
 0x4d4   :  { %v1024_v38 = vld [vmem:[%s20161_s1 + $0x1e78] sm:$0xff] }
 0x4d6   :  { %11218 = vmatpush1.bf16.msra.mxu0 %v13706_v55  ;;  %11777 = vmatpush1.bf16.msra.mxu1 %v13708_v56  ;;  %v984_v55 = vld [vmem:[%s20161_s1 + $0x1d38] sm:$0xff]  ;;  %v13762_v56 = vcombine.low %v971_v43, %v975_v44  ;;  %v1027_v43 = vld [vmem:[%s20161_s1 + $0x1e90] sm:$0xff] }
 0x4d7   :  { %11219 = vmatprep.subr.bf16.mxu0 %v13715_v57  ;;  %11778 = vmatprep.subr.bf16.mxu1 %v13717_v58  ;;  %v13764_v57 = vcombine.low %v972_v46, %v976_v47  ;;  %v13771_v58 = vcombine.high %v979_v52, %v983_v53  ;;  %v13773_v59 = vcombine.high %v980_v54, %v984_v55  ;;  %v1031_v44 = vld [vmem:[%s20161_s1 + $0x1eb0] sm:$0xff]  ;;  %v1032_v46 = vld [vmem:[%s20161_s1 + $0x1eb8] sm:$0xff] }
 0x4da   :  { %11220 = vmatpush1.bf16.msra.mxu0 %v13714_v63  ;;  %11779 = vmatpush1.bf16.msra.mxu1 %v13716_v0  ;;  %v992_v63 = vld [vmem:[%s20161_s1 + $0x1d78] sm:$0xff]  ;;  %v13770_v0 = vcombine.low %v979_v52, %v983_v53  ;;  %v1039_v52 = vld [vmem:[%s20161_s1 + $0x1ef0] sm:$0xff] }
 0x4db   :  { %11221 = vmatprep.subr.bf16.mxu0 %v13723_v1  ;;  %11780 = vmatprep.subr.bf16.mxu1 %v13725_v2  ;;  %v13772_v1 = vcombine.low %v980_v54, %v984_v55  ;;  %v13779_v2 = vcombine.high %v987_v60, %v991_v61  ;;  %v13781_v3 = vcombine.high %v988_v62, %v992_v63  ;;  %v1036_v53 = vld [vmem:[%s20161_s1 + $0x1ed8] sm:$0xff] }
 0x4dc   :  { %v1040_v54 = vld [vmem:[%s20161_s1 + $0x1ef8] sm:$0xff]  ;;  %v13818_v55 = vcombine.low %v1027_v43, %v1031_v44 }
 0x4de   :  { %11222 = vmatpush1.bf16.msra.mxu0 %v13722_v8  ;;  %11781 = vmatpush1.bf16.msra.mxu1 %v13724_v9  ;;  %v1000_v8 = vld [vmem:[%s20161_s1 + $0x1db8] sm:$0xff]  ;;  %v13778_v9 = vcombine.low %v987_v60, %v991_v61  ;;  %v1047_v60 = vld [vmem:[%s20161_s1 + $0x1f30] sm:$0xff] }
 0x4df   :  { %11223 = vmatprep.subr.bf16.mxu0 %v13731_v10  ;;  %11782 = vmatprep.subr.bf16.mxu1 %v13733_v11  ;;  %v13780_v10 = vcombine.low %v988_v62, %v992_v63  ;;  %v13787_v11 = vcombine.high %v995_v4, %v999_v6  ;;  %v13789_v12 = vcombine.high %v996_v7, %v1000_v8  ;;  %v1044_v61 = vld [vmem:[%s20161_s1 + $0x1f18] sm:$0xff] }
 0x4e0   :  { %v1048_v62 = vld [vmem:[%s20161_s1 + $0x1f38] sm:$0xff] }
 0x4e2   :  { %11224 = vmatpush1.bf16.msra.mxu0 %v13730_v17  ;;  %11783 = vmatpush1.bf16.msra.mxu1 %v13732_v18  ;;  %v1008_v17 = vld [vmem:[%s20161_s1 + $0x1df8] sm:$0xff]  ;;  %v13786_v18 = vcombine.low %v995_v4, %v999_v6  ;;  %v1055_v4 = vld [vmem:[%s20161_s1 + $0x1f70] sm:$0xff] }
 0x4e3   :  { %11236 = vmatprep.subr.bf16.mxu0 %v13739_v19  ;;  %11795 = vmatprep.subr.bf16.mxu1 %v13741_v21  ;;  %v13788_v19 = vcombine.low %v996_v7, %v1000_v8  ;;  %v13795_v21 = vcombine.high %v1003_v13, %v1007_v15  ;;  %v13797_v22 = vcombine.high %v1004_v16, %v1008_v17  ;;  %v1052_v6 = vld [vmem:[%s20161_s1 + $0x1f58] sm:$0xff] }
 0x4e4   :  { %v1056_v7 = vld [vmem:[%s20161_s1 + $0x1f78] sm:$0xff] }
 0x4e5   :  { %11226 = vmatmul.mubr.bf16.vlgmr.msra.gmra.mrb[4].mxu0 %v14918_v35  ;;  %11785 = vmatmul.mubr.bf16.vlgmr.msra.gmra.mrb[4].mxu1 %v14918_v35  ;;  %v1023_v35 = vld [vmem:[%s20161_s1 + $0x1e70] sm:$0xff] }
 0x4e6   :  { %11237 = vmatpush1.bf16.msra.mxu0 %v13738_v29  ;;  %11796 = vmatpush1.bf16.msra.mxu1 %v13740_v30  ;;  %v1016_v29 = vld [vmem:[%s20161_s1 + $0x1e38] sm:$0xff]  ;;  %v13794_v30 = vcombine.low %v1003_v13, %v1007_v15  ;;  %v13810_v47 = vcombine.low %v1019_v34, %v1023_v35  ;;  %v1063_v13 = vld [vmem:[%s20161_s1 + $0x1fb0] sm:$0xff] }
 0x4e7   :  { %11238 = vmatprep.subr.bf16.mxu0 %v13747_v31  ;;  %11797 = vmatprep.subr.bf16.mxu1 %v13749_v32  ;;  %v13796_v31 = vcombine.low %v1004_v16, %v1008_v17  ;;  %v13803_v32 = vcombine.high %v1011_v25, %v1015_v26  ;;  %v13805_v33 = vcombine.high %v1012_v27, %v1016_v29  ;;  %v1060_v15 = vld [vmem:[%s20161_s1 + $0x1f98] sm:$0xff] }
 0x4e8   :  { %11268 = vmatprep.mubr.bf16.mxu0 %v14919_v45  ;;  %11827 = vmatprep.mubr.bf16.mxu1 %v14919_v45  ;;  %v1028_v45 = vld [vmem:[%s20161_s1 + $0x1e98] sm:$0xff] }
 0x4e9   :  { %v1064_v16 = vld [vmem:[%s20161_s1 + $0x1fb8] sm:$0xff] }
 0x4ea   :  { %11239 = vmatpush1.bf16.msra.mxu0 %v13746_v39  ;;  %11798 = vmatpush1.bf16.msra.mxu1 %v13748_v40  ;;  %v13802_v39 = vcombine.low %v1011_v25, %v1015_v26  ;;  %v13804_v40 = vcombine.low %v1012_v27, %v1016_v29  ;;  %v1071_v25 = vld [vmem:[%s20161_s1 + $0x1ff0] sm:$0xff]  ;;  %v1068_v26 = vld [vmem:[%s20161_s1 + $0x1fd8] sm:$0xff] }
 0x4eb   :  { %11240 = vmatprep.subr.bf16.mxu0 %v13755_v41  ;;  %11799 = vmatprep.subr.bf16.mxu1 %v13757_v42  ;;  %v13811_v41 = vcombine.high %v1019_v34, %v1023_v35  ;;  %v13813_v42 = vcombine.high %v1020_v36, %v1024_v38  ;;  %v1072_v27 = vld [vmem:[%s20161_s1 + $0x1ff8] sm:$0xff]  ;;  %v1079_v34 = vld [vmem:[%s20161_s1 + $0x2030] sm:$0xff] }
 0x4ec   :  { %v1076_v35 = vld [vmem:[%s20161_s1 + $0x2018] sm:$0xff] }
 0x4ee   :  { %11241 = vmatpush1.bf16.msra.mxu0 %v13754_v48  ;;  %11800 = vmatpush1.bf16.msra.mxu1 %v13756_v49  ;;  %v13812_v48 = vcombine.low %v1020_v36, %v1024_v38  ;;  %v13819_v49 = vcombine.high %v1027_v43, %v1031_v44  ;;  %v1080_v36 = vld [vmem:[%s20161_s1 + $0x2038] sm:$0xff]  ;;  %v1087_v43 = vld [vmem:[%s20161_s1 + $0x2070] sm:$0xff] }
 0x4ef   :  { %11242 = vmatprep.subr.bf16.mxu0 %v13763_v50  ;;  %11801 = vmatprep.subr.bf16.mxu1 %v13765_v51  ;;  %v13821_v50 = vcombine.high %v1028_v45, %v1032_v46  ;;  %v1035_v51 = vld [vmem:[%s20161_s1 + $0x1ed0] sm:$0xff]  ;;  %v1084_v44 = vld [vmem:[%s20161_s1 + $0x2058] sm:$0xff] }
 0x4f0   :  { %v13826_v63 = vcombine.low %v1035_v51, %v1039_v52 }
 0x4f2   :  { %11243 = vmatpush1.bf16.msra.mxu0 %v13762_v56  ;;  %11802 = vmatpush1.bf16.msra.mxu1 %v13764_v57  ;;  %v13820_v56 = vcombine.low %v1028_v45, %v1032_v46  ;;  %v13827_v57 = vcombine.high %v1035_v51, %v1039_v52  ;;  %v1088_v45 = vld [vmem:[%s20161_s1 + $0x2078] sm:$0xff]  ;;  %v1095_v51 = vld [vmem:[%s20161_s1 + $0x20b0] sm:$0xff] }
 0x4f3   :  { %11244 = vmatprep.subr.bf16.mxu0 %v13771_v58  ;;  %11803 = vmatprep.subr.bf16.mxu1 %v13773_v59  ;;  %v13829_v58 = vcombine.high %v1036_v53, %v1040_v54  ;;  %v1043_v59 = vld [vmem:[%s20161_s1 + $0x1f10] sm:$0xff]  ;;  %v14920_v52 = vld [vmem:[%s20162_s0 + $0x38] ss:$100 sps:$4 sm:$0xff]  }
 0x4f4   :  { %v13834_v8 = vcombine.low %v1043_v59, %v1047_v60 }
 0x4f6   :  { %11245 = vmatpush1.bf16.msra.mxu0 %v13770_v0  ;;  %11804 = vmatpush1.bf16.msra.mxu1 %v13772_v1  ;;  %v13828_v0 = vcombine.low %v1036_v53, %v1040_v54  ;;  %v13835_v1 = vcombine.high %v1043_v59, %v1047_v60  ;;  %v1092_v53 = vld [vmem:[%s20161_s1 + $0x2098] sm:$0xff]  ;;  %v1099_v59 = vld [vmem:[%s20161_s1 + $0x20d0] sm:$0xff] }
 0x4f7   :  { %11246 = vmatprep.subr.bf16.mxu0 %v13779_v2  ;;  %11805 = vmatprep.subr.bf16.mxu1 %v13781_v3  ;;  %v13837_v2 = vcombine.high %v1044_v61, %v1048_v62  ;;  %v1051_v3 = vld [vmem:[%s20161_s1 + $0x1f50] sm:$0xff]  ;;  %v1096_v54 = vld [vmem:[%s20161_s1 + $0x20b8] sm:$0xff] }
 0x4f8   :  { %v13842_v17 = vcombine.low %v1051_v3, %v1055_v4  ;;  %v1103_v60 = vld [vmem:[%s20161_s1 + $0x20f0] sm:$0xff] }
 0x4fa   :  { %11247 = vmatpush1.bf16.msra.mxu0 %v13778_v9  ;;  %11806 = vmatpush1.bf16.msra.mxu1 %v13780_v10  ;;  %v13836_v9 = vcombine.low %v1044_v61, %v1048_v62  ;;  %v13843_v10 = vcombine.high %v1051_v3, %v1055_v4  ;;  %v14921_v61 = vld [vmem:[%s20162_s0 + $0x44] ss:$100 sps:$4 sm:$0xff]   ;;  %v1100_v62 = vld [vmem:[%s20161_s1 + $0x20d8] sm:$0xff]  ;;  %v1107_v4 = vld [vmem:[%s20161_s1 + $0x2110] sm:$0xff] }
 0x4fb   :  { %11248 = vmatprep.subr.bf16.mxu0 %v13787_v11  ;;  %11807 = vmatprep.subr.bf16.mxu1 %v13789_v12  ;;  %v13845_v11 = vcombine.high %v1052_v6, %v1056_v7  ;;  %v1059_v12 = vld [vmem:[%s20161_s1 + $0x1f90] sm:$0xff] }
 0x4fc   :  { %v13850_v29 = vcombine.low %v1059_v12, %v1063_v13 }
 0x4fe   :  { %11249 = vmatpush1.bf16.msra.mxu0 %v13786_v18  ;;  %11808 = vmatpush1.bf16.msra.mxu1 %v13788_v19  ;;  %v13844_v18 = vcombine.low %v1052_v6, %v1056_v7  ;;  %v13851_v19 = vcombine.high %v1059_v12, %v1063_v13  ;;  %v1111_v6 = vld [vmem:[%s20161_s1 + $0x2130] sm:$0xff]  ;;  %v1108_v7 = vld [vmem:[%s20161_s1 + $0x2118] sm:$0xff] }
 0x4ff   :  { %11250 = vmatprep.subr.bf16.mxu0 %v13795_v21  ;;  %11809 = vmatprep.subr.bf16.mxu1 %v13797_v22  ;;  %v13853_v21 = vcombine.high %v1060_v15, %v1064_v16  ;;  %v1067_v22 = vld [vmem:[%s20161_s1 + $0x1fd0] sm:$0xff] }
 0x500   :  { %v13858_v38 = vcombine.low %v1067_v22, %v1071_v25  ;;  %v1115_v13 = vld [vmem:[%s20161_s1 + $0x2150] sm:$0xff] }
 0x502   :  { %11251 = vmatpush1.bf16.msra.mxu0 %v13794_v30  ;;  %11810 = vmatpush1.bf16.msra.mxu1 %v13796_v31  ;;  %v13852_v30 = vcombine.low %v1060_v15, %v1064_v16  ;;  %v13859_v31 = vcombine.high %v1067_v22, %v1071_v25  ;;  %v1119_v15 = vld [vmem:[%s20161_s1 + $0x2170] sm:$0xff]  ;;  %v1116_v16 = vld [vmem:[%s20161_s1 + $0x2158] sm:$0xff] }
 0x503   :  { %11252 = vmatprep.subr.bf16.mxu0 %v13803_v32  ;;  %11811 = vmatprep.subr.bf16.mxu1 %v13805_v33  ;;  %v13861_v32 = vcombine.high %v1068_v26, %v1072_v27  ;;  %v1075_v33 = vld [vmem:[%s20161_s1 + $0x2010] sm:$0xff] }
 0x504   :  { %v13866_v46 = vcombine.low %v1075_v33, %v1079_v34  ;;  %v1123_v25 = vld [vmem:[%s20161_s1 + $0x2190] sm:$0xff] }
 0x506   :  { %11253 = vmatpush1.bf16.msra.mxu0 %v13802_v39  ;;  %11812 = vmatpush1.bf16.msra.mxu1 %v13804_v40  ;;  %v13860_v39 = vcombine.low %v1068_v26, %v1072_v27  ;;  %v13867_v40 = vcombine.high %v1075_v33, %v1079_v34  ;;  %v1127_v26 = vld [vmem:[%s20161_s1 + $0x21b0] sm:$0xff]  ;;  %v1124_v27 = vld [vmem:[%s20161_s1 + $0x2198] sm:$0xff] }
 0x507   :  { %11254 = vmatprep.subr.bf16.mxu0 %v13811_v41  ;;  %11813 = vmatprep.subr.bf16.mxu1 %v13813_v42  ;;  %v13869_v41 = vcombine.high %v1076_v35, %v1080_v36  ;;  %v1083_v42 = vld [vmem:[%s20161_s1 + $0x2050] sm:$0xff] }
 0x508   :  { %v1131_v34 = vld [vmem:[%s20161_s1 + $0x21d0] sm:$0xff] }
 0x50a   :  { %11255 = vmatpush1.bf16.msra.mxu0 %v13810_v47  ;;  %11814 = vmatpush1.bf16.msra.mxu1 %v13812_v48  ;;  %v13868_v47 = vcombine.low %v1076_v35, %v1080_v36  ;;  %v13875_v48 = vcombine.high %v1083_v42, %v1087_v43  ;;  %v1135_v35 = vld [vmem:[%s20161_s1 + $0x21f0] sm:$0xff]  ;;  %v1132_v36 = vld [vmem:[%s20161_s1 + $0x21d8] sm:$0xff] }
 0x50b   :  { %11256 = vmatprep.subr.bf16.mxu0 %v13819_v49  ;;  %11815 = vmatprep.subr.bf16.mxu1 %v13821_v50  ;;  %v13877_v49 = vcombine.high %v1084_v44, %v1088_v45  ;;  %v1091_v50 = vld [vmem:[%s20161_s1 + $0x2090] sm:$0xff] }
 0x50e   :  { %11257 = vmatpush1.bf16.msra.mxu0 %v13818_v55  ;;  %11816 = vmatpush1.bf16.msra.mxu1 %v13820_v56  ;;  %v13874_v55 = vcombine.low %v1083_v42, %v1087_v43  ;;  %v13876_v56 = vcombine.low %v1084_v44, %v1088_v45  ;;  %v1139_v43 = vld [vmem:[%s20161_s1 + $0x2210] sm:$0xff]  ;;  %v1140_v45 = vld [vmem:[%s20161_s1 + $0x2218] sm:$0xff] }
 0x50f   :  { %11258 = vmatprep.subr.bf16.mxu0 %v13827_v57  ;;  %11817 = vmatprep.subr.bf16.mxu1 %v13829_v58  ;;  %v13883_v57 = vcombine.high %v1091_v50, %v1095_v51  ;;  %v13885_v58 = vcombine.high %v1092_v53, %v1096_v54  ;;  %v1143_v44 = vld [vmem:[%s20161_s1 + $0x2230] sm:$0xff] }
 0x512   :  { %11259 = vmatpush1.bf16.msra.mxu0 %v13826_v63  ;;  %11818 = vmatpush1.bf16.msra.mxu1 %v13828_v0  ;;  %v1104_v63 = vld [vmem:[%s20161_s1 + $0x20f8] sm:$0xff]  ;;  %v13882_v0 = vcombine.low %v1091_v50, %v1095_v51  ;;  %v1147_v51 = vld [vmem:[%s20161_s1 + $0x2250] sm:$0xff] }
 0x513   :  { %11260 = vmatprep.subr.bf16.mxu0 %v13835_v1  ;;  %11819 = vmatprep.subr.bf16.mxu1 %v13837_v2  ;;  %v13884_v1 = vcombine.low %v1092_v53, %v1096_v54  ;;  %v13891_v2 = vcombine.high %v1099_v59, %v1103_v60  ;;  %v13893_v3 = vcombine.high %v1100_v62, %v1104_v63  ;;  %v1148_v53 = vld [vmem:[%s20161_s1 + $0x2258] sm:$0xff] }
 0x514   :  { %v1152_v54 = vld [vmem:[%s20161_s1 + $0x2278] sm:$0xff] }
 0x516   :  { %11261 = vmatpush1.bf16.msra.mxu0 %v13834_v8  ;;  %11820 = vmatpush1.bf16.msra.mxu1 %v13836_v9  ;;  %v1112_v8 = vld [vmem:[%s20161_s1 + $0x2138] sm:$0xff]  ;;  %v13890_v9 = vcombine.low %v1099_v59, %v1103_v60  ;;  %v1155_v59 = vld [vmem:[%s20161_s1 + $0x2290] sm:$0xff] }
 0x517   :  { %11262 = vmatprep.subr.bf16.mxu0 %v13843_v10  ;;  %11821 = vmatprep.subr.bf16.mxu1 %v13845_v11  ;;  %v13892_v10 = vcombine.low %v1100_v62, %v1104_v63  ;;  %v13899_v11 = vcombine.high %v1107_v4, %v1111_v6  ;;  %v13901_v12 = vcombine.high %v1108_v7, %v1112_v8  ;;  %v1159_v60 = vld [vmem:[%s20161_s1 + $0x22b0] sm:$0xff]  ;;  %v1160_v62 = vld [vmem:[%s20161_s1 + $0x22b8] sm:$0xff] }
 0x51a   :  { %11263 = vmatpush1.bf16.msra.mxu0 %v13842_v17  ;;  %11822 = vmatpush1.bf16.msra.mxu1 %v13844_v18  ;;  %v1120_v17 = vld [vmem:[%s20161_s1 + $0x2178] sm:$0xff]  ;;  %v13898_v18 = vcombine.low %v1107_v4, %v1111_v6  ;;  %v1167_v4 = vld [vmem:[%s20161_s1 + $0x22f0] sm:$0xff] }
 0x51b   :  { %11264 = vmatprep.subr.bf16.mxu0 %v13851_v19  ;;  %11823 = vmatprep.subr.bf16.mxu1 %v13853_v21  ;;  %v13900_v19 = vcombine.low %v1108_v7, %v1112_v8  ;;  %v13907_v21 = vcombine.high %v1115_v13, %v1119_v15  ;;  %v13909_v22 = vcombine.high %v1116_v16, %v1120_v17  ;;  %v1164_v6 = vld [vmem:[%s20161_s1 + $0x22d8] sm:$0xff] }
 0x51c   :  { %v1168_v7 = vld [vmem:[%s20161_s1 + $0x22f8] sm:$0xff]  ;;  %v13946_v8 = vcombine.low %v1155_v59, %v1159_v60 }
 0x51e   :  { %11265 = vmatpush1.bf16.msra.mxu0 %v13850_v29  ;;  %11824 = vmatpush1.bf16.msra.mxu1 %v13852_v30  ;;  %v1128_v29 = vld [vmem:[%s20161_s1 + $0x21b8] sm:$0xff]  ;;  %v13906_v30 = vcombine.low %v1115_v13, %v1119_v15  ;;  %v1175_v13 = vld [vmem:[%s20161_s1 + $0x2330] sm:$0xff] }
 0x51f   :  { %11266 = vmatprep.subr.bf16.mxu0 %v13859_v31  ;;  %11825 = vmatprep.subr.bf16.mxu1 %v13861_v32  ;;  %v13908_v31 = vcombine.low %v1116_v16, %v1120_v17  ;;  %v13915_v32 = vcombine.high %v1123_v25, %v1127_v26  ;;  %v13917_v33 = vcombine.high %v1124_v27, %v1128_v29  ;;  %v1172_v15 = vld [vmem:[%s20161_s1 + $0x2318] sm:$0xff] }
 0x520   :  { %v1176_v16 = vld [vmem:[%s20161_s1 + $0x2338] sm:$0xff] }
 0x522   :  { %11267 = vmatpush1.bf16.msra.mxu0 %v13858_v38  ;;  %11826 = vmatpush1.bf16.msra.mxu1 %v13860_v39  ;;  %v1136_v38 = vld [vmem:[%s20161_s1 + $0x21f8] sm:$0xff]  ;;  %v13914_v39 = vcombine.low %v1123_v25, %v1127_v26  ;;  %v1183_v25 = vld [vmem:[%s20161_s1 + $0x2370] sm:$0xff] }
 0x523   :  { %11279 = vmatprep.subr.bf16.mxu0 %v13867_v40  ;;  %11838 = vmatprep.subr.bf16.mxu1 %v13869_v41  ;;  %v13916_v40 = vcombine.low %v1124_v27, %v1128_v29  ;;  %v13923_v41 = vcombine.high %v1131_v34, %v1135_v35  ;;  %v13925_v42 = vcombine.high %v1132_v36, %v1136_v38  ;;  %v1180_v26 = vld [vmem:[%s20161_s1 + $0x2358] sm:$0xff] }
 0x524   :  { %v1184_v27 = vld [vmem:[%s20161_s1 + $0x2378] sm:$0xff] }
 0x525   :  { %11269 = vmatmul.mubr.bf16.vlgmr.msra.gmra.mrb[4].mxu0 %v14920_v52  ;;  %11828 = vmatmul.mubr.bf16.vlgmr.msra.gmra.mrb[4].mxu1 %v14920_v52  ;;  %v1151_v52 = vld [vmem:[%s20161_s1 + $0x2270] sm:$0xff] }
 0x526   :  { %11280 = vmatpush1.bf16.msra.mxu0 %v13866_v46  ;;  %11839 = vmatpush1.bf16.msra.mxu1 %v13868_v47  ;;  %v1144_v46 = vld [vmem:[%s20161_s1 + $0x2238] sm:$0xff]  ;;  %v13922_v47 = vcombine.low %v1131_v34, %v1135_v35  ;;  %v13938_v63 = vcombine.low %v1147_v51, %v1151_v52  ;;  %v1191_v34 = vld [vmem:[%s20161_s1 + $0x23b0] sm:$0xff] }
 0x527   :  { %11281 = vmatprep.subr.bf16.mxu0 %v13875_v48  ;;  %11840 = vmatprep.subr.bf16.mxu1 %v13877_v49  ;;  %v13924_v48 = vcombine.low %v1132_v36, %v1136_v38  ;;  %v13931_v49 = vcombine.high %v1139_v43, %v1143_v44  ;;  %v13933_v50 = vcombine.high %v1140_v45, %v1144_v46  ;;  %v1188_v35 = vld [vmem:[%s20161_s1 + $0x2398] sm:$0xff] }
 0x528   :  { %11311 = vmatprep.mubr.bf16.mxu0 %v14921_v61  ;;  %11870 = vmatprep.mubr.bf16.mxu1 %v14921_v61  ;;  %v1156_v61 = vld [vmem:[%s20161_s1 + $0x2298] sm:$0xff] }
 0x529   :  { %v1192_v36 = vld [vmem:[%s20161_s1 + $0x23b8] sm:$0xff] }
 0x52a   :  { %11282 = vmatpush1.bf16.msra.mxu0 %v13874_v55  ;;  %11841 = vmatpush1.bf16.msra.mxu1 %v13876_v56  ;;  %v13930_v55 = vcombine.low %v1139_v43, %v1143_v44  ;;  %v13932_v56 = vcombine.low %v1140_v45, %v1144_v46  ;;  %v1199_v43 = vld [vmem:[%s20161_s1 + $0x23f0] sm:$0xff]  ;;  %v1196_v44 = vld [vmem:[%s20161_s1 + $0x23d8] sm:$0xff] }
 0x52b   :  { %11283 = vmatprep.subr.bf16.mxu0 %v13883_v57  ;;  %11842 = vmatprep.subr.bf16.mxu1 %v13885_v58  ;;  %v13939_v57 = vcombine.high %v1147_v51, %v1151_v52  ;;  %v13941_v58 = vcombine.high %v1148_v53, %v1152_v54  ;;  %v1200_v45 = vld [vmem:[%s20161_s1 + $0x23f8] sm:$0xff]  ;;  %v1207_v51 = vld [vmem:[%s20161_s1 + $0x2430] sm:$0xff] }
 0x52c   :  { %v1204_v52 = vld [vmem:[%s20161_s1 + $0x2418] sm:$0xff] }
 0x52e   :  { %11284 = vmatpush1.bf16.msra.mxu0 %v13882_v0  ;;  %11843 = vmatpush1.bf16.msra.mxu1 %v13884_v1  ;;  %v13940_v0 = vcombine.low %v1148_v53, %v1152_v54  ;;  %v13947_v1 = vcombine.high %v1155_v59, %v1159_v60  ;;  %v1208_v53 = vld [vmem:[%s20161_s1 + $0x2438] sm:$0xff]  ;;  %v1215_v59 = vld [vmem:[%s20161_s1 + $0x2470] sm:$0xff] }
 0x52f   :  { %11285 = vmatprep.subr.bf16.mxu0 %v13891_v2  ;;  %11844 = vmatprep.subr.bf16.mxu1 %v13893_v3  ;;  %v13949_v2 = vcombine.high %v1156_v61, %v1160_v62  ;;  %v1163_v3 = vld [vmem:[%s20161_s1 + $0x22d0] sm:$0xff]  ;;  %v1212_v60 = vld [vmem:[%s20161_s1 + $0x2458] sm:$0xff] }
 0x530   :  { %v13954_v17 = vcombine.low %v1163_v3, %v1167_v4 }
 0x532   :  { %11286 = vmatpush1.bf16.msra.mxu0 %v13890_v9  ;;  %11845 = vmatpush1.bf16.msra.mxu1 %v13892_v10  ;;  %v13948_v9 = vcombine.low %v1156_v61, %v1160_v62  ;;  %v13955_v10 = vcombine.high %v1163_v3, %v1167_v4  ;;  %v1216_v61 = vld [vmem:[%s20161_s1 + $0x2478] sm:$0xff]  ;;  %v1223_v3 = vld [vmem:[%s20161_s1 + $0x24b0] sm:$0xff]  ;;  %v14922_v4 = vld [vmem:[%s20162_s0 + $0x40] ss:$100 sps:$4 sm:$0xff]  }
 0x533   :  { %11287 = vmatprep.subr.bf16.mxu0 %v13899_v11  ;;  %11846 = vmatprep.subr.bf16.mxu1 %v13901_v12  ;;  %v13957_v11 = vcombine.high %v1164_v6, %v1168_v7  ;;  %v1171_v12 = vld [vmem:[%s20161_s1 + $0x2310] sm:$0xff] }
 0x534   :  { %v13962_v29 = vcombine.low %v1171_v12, %v1175_v13 }
 0x536   :  { %11288 = vmatpush1.bf16.msra.mxu0 %v13898_v18  ;;  %11847 = vmatpush1.bf16.msra.mxu1 %v13900_v19  ;;  %v13956_v18 = vcombine.low %v1164_v6, %v1168_v7  ;;  %v13963_v19 = vcombine.high %v1171_v12, %v1175_v13  ;;  %v1220_v6 = vld [vmem:[%s20161_s1 + $0x2498] sm:$0xff]  ;;  %v1227_v12 = vld [vmem:[%s20161_s1 + $0x24d0] sm:$0xff] }
 0x537   :  { %11289 = vmatprep.subr.bf16.mxu0 %v13907_v21  ;;  %11848 = vmatprep.subr.bf16.mxu1 %v13909_v22  ;;  %v13965_v21 = vcombine.high %v1172_v15, %v1176_v16  ;;  %v1179_v22 = vld [vmem:[%s20161_s1 + $0x2350] sm:$0xff]  ;;  %v1224_v7 = vld [vmem:[%s20161_s1 + $0x24b8] sm:$0xff] }
 0x538   :  { %v13970_v38 = vcombine.low %v1179_v22, %v1183_v25  ;;  %v1231_v13 = vld [vmem:[%s20161_s1 + $0x24f0] sm:$0xff] }
 0x53a   :  { %11290 = vmatpush1.bf16.msra.mxu0 %v13906_v30  ;;  %11849 = vmatpush1.bf16.msra.mxu1 %v13908_v31  ;;  %v13964_v30 = vcombine.low %v1172_v15, %v1176_v16  ;;  %v13971_v31 = vcombine.high %v1179_v22, %v1183_v25  ;;  %v14923_v15 = vld [vmem:[%s20162_s0 + $0x4c] ss:$100 sps:$4 sm:$0xff]   ;;  %v1228_v16 = vld [vmem:[%s20161_s1 + $0x24d8] sm:$0xff] }
 0x53b   :  { %11291 = vmatprep.subr.bf16.mxu0 %v13915_v32  ;;  %11850 = vmatprep.subr.bf16.mxu1 %v13917_v33  ;;  %v13973_v32 = vcombine.high %v1180_v26, %v1184_v27  ;;  %v1187_v33 = vld [vmem:[%s20161_s1 + $0x2390] sm:$0xff] }
 0x53c   :  { %v13978_v46 = vcombine.low %v1187_v33, %v1191_v34  ;;  %v1235_v25 = vld [vmem:[%s20161_s1 + $0x2510] sm:$0xff] }
 0x53e   :  { %11292 = vmatpush1.bf16.msra.mxu0 %v13914_v39  ;;  %11851 = vmatpush1.bf16.msra.mxu1 %v13916_v40  ;;  %v13972_v39 = vcombine.low %v1180_v26, %v1184_v27  ;;  %v13979_v40 = vcombine.high %v1187_v33, %v1191_v34  ;;  %v1239_v26 = vld [vmem:[%s20161_s1 + $0x2530] sm:$0xff]  ;;  %v1236_v27 = vld [vmem:[%s20161_s1 + $0x2518] sm:$0xff] }
 0x53f   :  { %11293 = vmatprep.subr.bf16.mxu0 %v13923_v41  ;;  %11852 = vmatprep.subr.bf16.mxu1 %v13925_v42  ;;  %v13981_v41 = vcombine.high %v1188_v35, %v1192_v36  ;;  %v1195_v42 = vld [vmem:[%s20161_s1 + $0x23d0] sm:$0xff] }
 0x540   :  { %v13986_v54 = vcombine.low %v1195_v42, %v1199_v43  ;;  %v1243_v34 = vld [vmem:[%s20161_s1 + $0x2550] sm:$0xff] }
 0x542   :  { %11294 = vmatpush1.bf16.msra.mxu0 %v13922_v47  ;;  %11853 = vmatpush1.bf16.msra.mxu1 %v13924_v48  ;;  %v13980_v47 = vcombine.low %v1188_v35, %v1192_v36  ;;  %v13987_v48 = vcombine.high %v1195_v42, %v1199_v43  ;;  %v1247_v35 = vld [vmem:[%s20161_s1 + $0x2570] sm:$0xff]  ;;  %v1244_v36 = vld [vmem:[%s20161_s1 + $0x2558] sm:$0xff] }
 0x543   :  { %11295 = vmatprep.subr.bf16.mxu0 %v13931_v49  ;;  %11854 = vmatprep.subr.bf16.mxu1 %v13933_v50  ;;  %v13989_v49 = vcombine.high %v1196_v44, %v1200_v45  ;;  %v1203_v50 = vld [vmem:[%s20161_s1 + $0x2410] sm:$0xff] }
 0x544   :  { %v13994_v62 = vcombine.low %v1203_v50, %v1207_v51  ;;  %v1251_v43 = vld [vmem:[%s20161_s1 + $0x2590] sm:$0xff] }
 0x546   :  { %11296 = vmatpush1.bf16.msra.mxu0 %v13930_v55  ;;  %11855 = vmatpush1.bf16.msra.mxu1 %v13932_v56  ;;  %v13988_v55 = vcombine.low %v1196_v44, %v1200_v45  ;;  %v13995_v56 = vcombine.high %v1203_v50, %v1207_v51  ;;  %v1255_v44 = vld [vmem:[%s20161_s1 + $0x25b0] sm:$0xff]  ;;  %v1252_v45 = vld [vmem:[%s20161_s1 + $0x2598] sm:$0xff] }
 0x547   :  { %11297 = vmatprep.subr.bf16.mxu0 %v13939_v57  ;;  %11856 = vmatprep.subr.bf16.mxu1 %v13941_v58  ;;  %v13997_v57 = vcombine.high %v1204_v52, %v1208_v53  ;;  %v1211_v58 = vld [vmem:[%s20161_s1 + $0x2450] sm:$0xff] }
 0x548   :  { %v1259_v51 = vld [vmem:[%s20161_s1 + $0x25d0] sm:$0xff] }
 0x54a   :  { %11298 = vmatpush1.bf16.msra.mxu0 %v13938_v63  ;;  %11857 = vmatpush1.bf16.msra.mxu1 %v13940_v0  ;;  %v13996_v63 = vcombine.low %v1204_v52, %v1208_v53  ;;  %v14003_v0 = vcombine.high %v1211_v58, %v1215_v59  ;;  %v1263_v52 = vld [vmem:[%s20161_s1 + $0x25f0] sm:$0xff]  ;;  %v1260_v53 = vld [vmem:[%s20161_s1 + $0x25d8] sm:$0xff] }
 0x54b   :  { %11299 = vmatprep.subr.bf16.mxu0 %v13947_v1  ;;  %11858 = vmatprep.subr.bf16.mxu1 %v13949_v2  ;;  %v14005_v1 = vcombine.high %v1212_v60, %v1216_v61  ;;  %v1219_v2 = vld [vmem:[%s20161_s1 + $0x2490] sm:$0xff] }
 0x54e   :  { %11300 = vmatpush1.bf16.msra.mxu0 %v13946_v8  ;;  %11859 = vmatpush1.bf16.msra.mxu1 %v13948_v9  ;;  %v14002_v8 = vcombine.low %v1211_v58, %v1215_v59  ;;  %v14004_v9 = vcombine.low %v1212_v60, %v1216_v61  ;;  %v1267_v59 = vld [vmem:[%s20161_s1 + $0x2610] sm:$0xff]  ;;  %v1268_v61 = vld [vmem:[%s20161_s1 + $0x2618] sm:$0xff] }
 0x54f   :  { %11301 = vmatprep.subr.bf16.mxu0 %v13955_v10  ;;  %11860 = vmatprep.subr.bf16.mxu1 %v13957_v11  ;;  %v14011_v10 = vcombine.high %v1219_v2, %v1223_v3  ;;  %v14013_v11 = vcombine.high %v1220_v6, %v1224_v7  ;;  %v1271_v60 = vld [vmem:[%s20161_s1 + $0x2630] sm:$0xff] }
 0x552   :  { %11302 = vmatpush1.bf16.msra.mxu0 %v13954_v17  ;;  %11861 = vmatpush1.bf16.msra.mxu1 %v13956_v18  ;;  %v1232_v17 = vld [vmem:[%s20161_s1 + $0x24f8] sm:$0xff]  ;;  %v14010_v18 = vcombine.low %v1219_v2, %v1223_v3  ;;  %v1275_v3 = vld [vmem:[%s20161_s1 + $0x2650] sm:$0xff] }
 0x553   :  { %11303 = vmatprep.subr.bf16.mxu0 %v13963_v19  ;;  %11862 = vmatprep.subr.bf16.mxu1 %v13965_v21  ;;  %v14012_v19 = vcombine.low %v1220_v6, %v1224_v7  ;;  %v14019_v21 = vcombine.high %v1227_v12, %v1231_v13  ;;  %v14021_v22 = vcombine.high %v1228_v16, %v1232_v17  ;;  %v1276_v6 = vld [vmem:[%s20161_s1 + $0x2658] sm:$0xff] }
 0x554   :  { %v1280_v7 = vld [vmem:[%s20161_s1 + $0x2678] sm:$0xff] }
 0x556   :  { %11304 = vmatpush1.bf16.msra.mxu0 %v13962_v29  ;;  %11863 = vmatpush1.bf16.msra.mxu1 %v13964_v30  ;;  %v1240_v29 = vld [vmem:[%s20161_s1 + $0x2538] sm:$0xff]  ;;  %v14018_v30 = vcombine.low %v1227_v12, %v1231_v13  ;;  %v1283_v12 = vld [vmem:[%s20161_s1 + $0x2690] sm:$0xff] }
 0x557   :  { %11305 = vmatprep.subr.bf16.mxu0 %v13971_v31  ;;  %11864 = vmatprep.subr.bf16.mxu1 %v13973_v32  ;;  %v14020_v31 = vcombine.low %v1228_v16, %v1232_v17  ;;  %v14027_v32 = vcombine.high %v1235_v25, %v1239_v26  ;;  %v14029_v33 = vcombine.high %v1236_v27, %v1240_v29  ;;  %v1287_v13 = vld [vmem:[%s20161_s1 + $0x26b0] sm:$0xff]  ;;  %v1288_v16 = vld [vmem:[%s20161_s1 + $0x26b8] sm:$0xff] }
 0x55a   :  { %11306 = vmatpush1.bf16.msra.mxu0 %v13970_v38  ;;  %11865 = vmatpush1.bf16.msra.mxu1 %v13972_v39  ;;  %v1248_v38 = vld [vmem:[%s20161_s1 + $0x2578] sm:$0xff]  ;;  %v14026_v39 = vcombine.low %v1235_v25, %v1239_v26  ;;  %v1295_v25 = vld [vmem:[%s20161_s1 + $0x26f0] sm:$0xff] }
 0x55b   :  { %11307 = vmatprep.subr.bf16.mxu0 %v13979_v40  ;;  %11866 = vmatprep.subr.bf16.mxu1 %v13981_v41  ;;  %v14028_v40 = vcombine.low %v1236_v27, %v1240_v29  ;;  %v14035_v41 = vcombine.high %v1243_v34, %v1247_v35  ;;  %v14037_v42 = vcombine.high %v1244_v36, %v1248_v38  ;;  %v1292_v26 = vld [vmem:[%s20161_s1 + $0x26d8] sm:$0xff] }
 0x55c   :  { %v1296_v27 = vld [vmem:[%s20161_s1 + $0x26f8] sm:$0xff]  ;;  %v14074_v29 = vcombine.low %v1283_v12, %v1287_v13 }
 0x55e   :  { %11308 = vmatpush1.bf16.msra.mxu0 %v13978_v46  ;;  %11867 = vmatpush1.bf16.msra.mxu1 %v13980_v47  ;;  %v1256_v46 = vld [vmem:[%s20161_s1 + $0x25b8] sm:$0xff]  ;;  %v14034_v47 = vcombine.low %v1243_v34, %v1247_v35  ;;  %v1303_v34 = vld [vmem:[%s20161_s1 + $0x2730] sm:$0xff] }
 0x55f   :  { %11309 = vmatprep.subr.bf16.mxu0 %v13987_v48  ;;  %11868 = vmatprep.subr.bf16.mxu1 %v13989_v49  ;;  %v14036_v48 = vcombine.low %v1244_v36, %v1248_v38  ;;  %v14043_v49 = vcombine.high %v1251_v43, %v1255_v44  ;;  %v14045_v50 = vcombine.high %v1252_v45, %v1256_v46  ;;  %v1300_v35 = vld [vmem:[%s20161_s1 + $0x2718] sm:$0xff] }
 0x560   :  { %v1304_v36 = vld [vmem:[%s20161_s1 + $0x2738] sm:$0xff] }
 0x562   :  { %11310 = vmatpush1.bf16.msra.mxu0 %v13986_v54  ;;  %11869 = vmatpush1.bf16.msra.mxu1 %v13988_v55  ;;  %v1264_v54 = vld [vmem:[%s20161_s1 + $0x25f8] sm:$0xff]  ;;  %v14042_v55 = vcombine.low %v1251_v43, %v1255_v44  ;;  %v1311_v43 = vld [vmem:[%s20161_s1 + $0x2770] sm:$0xff] }
 0x563   :  { %11322 = vmatprep.subr.bf16.mxu0 %v13995_v56  ;;  %11881 = vmatprep.subr.bf16.mxu1 %v13997_v57  ;;  %v14044_v56 = vcombine.low %v1252_v45, %v1256_v46  ;;  %v14051_v57 = vcombine.high %v1259_v51, %v1263_v52  ;;  %v14053_v58 = vcombine.high %v1260_v53, %v1264_v54  ;;  %v1308_v44 = vld [vmem:[%s20161_s1 + $0x2758] sm:$0xff] }
 0x564   :  { %v1312_v45 = vld [vmem:[%s20161_s1 + $0x2778] sm:$0xff] }
 0x565   :  { %11312 = vmatmul.mubr.bf16.vlgmr.msra.gmra.mrb[4].mxu0 %v14922_v4  ;;  %11871 = vmatmul.mubr.bf16.vlgmr.msra.gmra.mrb[4].mxu1 %v14922_v4  ;;  %v1279_v4 = vld [vmem:[%s20161_s1 + $0x2670] sm:$0xff] }
 0x566   :  { %11323 = vmatpush1.bf16.msra.mxu0 %v13994_v62  ;;  %11882 = vmatpush1.bf16.msra.mxu1 %v13996_v63  ;;  %v1272_v62 = vld [vmem:[%s20161_s1 + $0x2638] sm:$0xff]  ;;  %v14050_v63 = vcombine.low %v1259_v51, %v1263_v52  ;;  %v14066_v17 = vcombine.low %v1275_v3, %v1279_v4  ;;  %v1319_v51 = vld [vmem:[%s20161_s1 + $0x27b0] sm:$0xff] }
 0x567   :  { %11324 = vmatprep.subr.bf16.mxu0 %v14003_v0  ;;  %11883 = vmatprep.subr.bf16.mxu1 %v14005_v1  ;;  %v14052_v0 = vcombine.low %v1260_v53, %v1264_v54  ;;  %v14059_v1 = vcombine.high %v1267_v59, %v1271_v60  ;;  %v14061_v2 = vcombine.high %v1268_v61, %v1272_v62  ;;  %v1316_v52 = vld [vmem:[%s20161_s1 + $0x2798] sm:$0xff] }
 0x568   :  { %11354 = vmatprep.mubr.bf16.mxu0 %v14923_v15  ;;  %11913 = vmatprep.mubr.bf16.mxu1 %v14923_v15  ;;  %v1284_v15 = vld [vmem:[%s20161_s1 + $0x2698] sm:$0xff] }
 0x569   :  { %v1320_v53 = vld [vmem:[%s20161_s1 + $0x27b8] sm:$0xff] }
 0x56a   :  { %11325 = vmatpush1.bf16.msra.mxu0 %v14002_v8  ;;  %11884 = vmatpush1.bf16.msra.mxu1 %v14004_v9  ;;  %v14058_v8 = vcombine.low %v1267_v59, %v1271_v60  ;;  %v14060_v9 = vcombine.low %v1268_v61, %v1272_v62  ;;  %v1327_v59 = vld [vmem:[%s20161_s1 + $0x27f0] sm:$0xff]  ;;  %v1324_v60 = vld [vmem:[%s20161_s1 + $0x27d8] sm:$0xff] }
 0x56b   :  { %11326 = vmatprep.subr.bf16.mxu0 %v14011_v10  ;;  %11885 = vmatprep.subr.bf16.mxu1 %v14013_v11  ;;  %v14067_v10 = vcombine.high %v1275_v3, %v1279_v4  ;;  %v14069_v11 = vcombine.high %v1276_v6, %v1280_v7  ;;  %v1328_v61 = vld [vmem:[%s20161_s1 + $0x27f8] sm:$0xff]  ;;  %v1335_v3 = vld [vmem:[%s20161_s1 + $0x2830] sm:$0xff] }
 0x56c   :  { %v1332_v4 = vld [vmem:[%s20161_s1 + $0x2818] sm:$0xff] }
 0x56e   :  { %11327 = vmatpush1.bf16.msra.mxu0 %v14010_v18  ;;  %11886 = vmatpush1.bf16.msra.mxu1 %v14012_v19  ;;  %v14068_v18 = vcombine.low %v1276_v6, %v1280_v7  ;;  %v14075_v19 = vcombine.high %v1283_v12, %v1287_v13  ;;  %v1336_v6 = vld [vmem:[%s20161_s1 + $0x2838] sm:$0xff]  ;;  %v1343_v12 = vld [vmem:[%s20161_s1 + $0x2870] sm:$0xff] }
 0x56f   :  { %11328 = vmatprep.subr.bf16.mxu0 %v14019_v21  ;;  %11887 = vmatprep.subr.bf16.mxu1 %v14021_v22  ;;  %v14077_v21 = vcombine.high %v1284_v15, %v1288_v16  ;;  %v1291_v22 = vld [vmem:[%s20161_s1 + $0x26d0] sm:$0xff]  ;;  %v1340_v13 = vld [vmem:[%s20161_s1 + $0x2858] sm:$0xff] }
 0x570   :  { %v14082_v38 = vcombine.low %v1291_v22, %v1295_v25 }
 0x572   :  { %11329 = vmatpush1.bf16.msra.mxu0 %v14018_v30  ;;  %11888 = vmatpush1.bf16.msra.mxu1 %v14020_v31  ;;  %v14076_v30 = vcombine.low %v1284_v15, %v1288_v16  ;;  %v14083_v31 = vcombine.high %v1291_v22, %v1295_v25  ;;  %v1344_v15 = vld [vmem:[%s20161_s1 + $0x2878] sm:$0xff]  ;;  %v1351_v22 = vld [vmem:[%s20161_s1 + $0x28b0] sm:$0xff]  ;;  %v14924_v25 = vld [vmem:[%s20162_s0 + $0x48] ss:$100 sps:$4 sm:$0xff]  }
 0x573   :  { %11330 = vmatprep.subr.bf16.mxu0 %v14027_v32  ;;  %11889 = vmatprep.subr.bf16.mxu1 %v14029_v33  ;;  %v14085_v32 = vcombine.high %v1292_v26, %v1296_v27  ;;  %v1299_v33 = vld [vmem:[%s20161_s1 + $0x2710] sm:$0xff] }
 0x574   :  { %v14090_v46 = vcombine.low %v1299_v33, %v1303_v34 }
 0x576   :  { %11331 = vmatpush1.bf16.msra.mxu0 %v14026_v39  ;;  %11890 = vmatpush1.bf16.msra.mxu1 %v14028_v40  ;;  %v14084_v39 = vcombine.low %v1292_v26, %v1296_v27  ;;  %v14091_v40 = vcombine.high %v1299_v33, %v1303_v34  ;;  %v1348_v26 = vld [vmem:[%s20161_s1 + $0x2898] sm:$0xff]  ;;  %v1355_v33 = vld [vmem:[%s20161_s1 + $0x28d0] sm:$0xff] }
 0x577   :  { %11332 = vmatprep.subr.bf16.mxu0 %v14035_v41  ;;  %11891 = vmatprep.subr.bf16.mxu1 %v14037_v42  ;;  %v14093_v41 = vcombine.high %v1300_v35, %v1304_v36  ;;  %v1307_v42 = vld [vmem:[%s20161_s1 + $0x2750] sm:$0xff]  ;;  %v1352_v27 = vld [vmem:[%s20161_s1 + $0x28b8] sm:$0xff] }
 0x578   :  { %v14098_v54 = vcombine.low %v1307_v42, %v1311_v43  ;;  %v1359_v34 = vld [vmem:[%s20161_s1 + $0x28f0] sm:$0xff] }
 0x57a   :  { %11333 = vmatpush1.bf16.msra.mxu0 %v14034_v47  ;;  %11892 = vmatpush1.bf16.msra.mxu1 %v14036_v48  ;;  %v14092_v47 = vcombine.low %v1300_v35, %v1304_v36  ;;  %v14099_v48 = vcombine.high %v1307_v42, %v1311_v43  ;;  %v14925_v35 = vld [vmem:[%s20162_s0 + $0x54] ss:$100 sps:$4 sm:$0xff]  }
 0x57b   :  { %11334 = vmatprep.subr.bf16.mxu0 %v14043_v49  ;;  %11893 = vmatprep.subr.bf16.mxu1 %v14045_v50  ;;  %v14101_v49 = vcombine.high %v1308_v44, %v1312_v45  ;;  %v1315_v50 = vld [vmem:[%s20161_s1 + $0x2790] sm:$0xff]  ;;  %v1356_v36 = vld [vmem:[%s20161_s1 + $0x28d8] sm:$0xff] }
 0x57c   :  { %v14106_v62 = vcombine.low %v1315_v50, %v1319_v51  ;;  %v1363_v43 = vld [vmem:[%s20161_s1 + $0x2910] sm:$0xff] }
 0x57e   :  { %11335 = vmatpush1.bf16.msra.mxu0 %v14042_v55  ;;  %11894 = vmatpush1.bf16.msra.mxu1 %v14044_v56  ;;  %v14100_v55 = vcombine.low %v1308_v44, %v1312_v45  ;;  %v14107_v56 = vcombine.high %v1315_v50, %v1319_v51  ;;  %v1367_v44 = vld [vmem:[%s20161_s1 + $0x2930] sm:$0xff]  ;;  %v1364_v45 = vld [vmem:[%s20161_s1 + $0x2918] sm:$0xff] }
 0x57f   :  { %11336 = vmatprep.subr.bf16.mxu0 %v14051_v57  ;;  %11895 = vmatprep.subr.bf16.mxu1 %v14053_v58  ;;  %v14109_v57 = vcombine.high %v1316_v52, %v1320_v53  ;;  %v1323_v58 = vld [vmem:[%s20161_s1 + $0x27d0] sm:$0xff] }
 0x580   :  { %v14114_v7 = vcombine.low %v1323_v58, %v1327_v59  ;;  %v1371_v51 = vld [vmem:[%s20161_s1 + $0x2950] sm:$0xff] }
 0x582   :  { %11337 = vmatpush1.bf16.msra.mxu0 %v14050_v63  ;;  %11896 = vmatpush1.bf16.msra.mxu1 %v14052_v0  ;;  %v14108_v63 = vcombine.low %v1316_v52, %v1320_v53  ;;  %v14115_v0 = vcombine.high %v1323_v58, %v1327_v59  ;;  %v1375_v52 = vld [vmem:[%s20161_s1 + $0x2970] sm:$0xff]  ;;  %v1372_v53 = vld [vmem:[%s20161_s1 + $0x2958] sm:$0xff] }
 0x583   :  { %11338 = vmatprep.subr.bf16.mxu0 %v14059_v1  ;;  %11897 = vmatprep.subr.bf16.mxu1 %v14061_v2  ;;  %v14117_v1 = vcombine.high %v1324_v60, %v1328_v61  ;;  %v1331_v2 = vld [vmem:[%s20161_s1 + $0x2810] sm:$0xff] }
 0x584   :  { %v14122_v16 = vcombine.low %v1331_v2, %v1335_v3  ;;  %v1379_v59 = vld [vmem:[%s20161_s1 + $0x2990] sm:$0xff] }
 0x586   :  { %11339 = vmatpush1.bf16.msra.mxu0 %v14058_v8  ;;  %11898 = vmatpush1.bf16.msra.mxu1 %v14060_v9  ;;  %v14116_v8 = vcombine.low %v1324_v60, %v1328_v61  ;;  %v14123_v9 = vcombine.high %v1331_v2, %v1335_v3  ;;  %v1383_v60 = vld [vmem:[%s20161_s1 + $0x29b0] sm:$0xff]  ;;  %v1380_v61 = vld [vmem:[%s20161_s1 + $0x2998] sm:$0xff] }
 0x587   :  { %11340 = vmatprep.subr.bf16.mxu0 %v14067_v10  ;;  %11899 = vmatprep.subr.bf16.mxu1 %v14069_v11  ;;  %v14125_v10 = vcombine.high %v1332_v4, %v1336_v6  ;;  %v1339_v11 = vld [vmem:[%s20161_s1 + $0x2850] sm:$0xff] }
 0x588   :  { %v1387_v3 = vld [vmem:[%s20161_s1 + $0x29d0] sm:$0xff] }
 0x58a   :  { %11341 = vmatpush1.bf16.msra.mxu0 %v14066_v17  ;;  %11900 = vmatpush1.bf16.msra.mxu1 %v14068_v18  ;;  %v14124_v17 = vcombine.low %v1332_v4, %v1336_v6  ;;  %v14131_v18 = vcombine.high %v1339_v11, %v1343_v12  ;;  %v1391_v4 = vld [vmem:[%s20161_s1 + $0x29f0] sm:$0xff]  ;;  %v1388_v6 = vld [vmem:[%s20161_s1 + $0x29d8] sm:$0xff] }
 0x58b   :  { %11342 = vmatprep.subr.bf16.mxu0 %v14075_v19  ;;  %11901 = vmatprep.subr.bf16.mxu1 %v14077_v21  ;;  %v14133_v19 = vcombine.high %v1340_v13, %v1344_v15  ;;  %v1347_v21 = vld [vmem:[%s20161_s1 + $0x2890] sm:$0xff] }
 0x58e   :  { %11343 = vmatpush1.bf16.msra.mxu0 %v14074_v29  ;;  %11902 = vmatpush1.bf16.msra.mxu1 %v14076_v30  ;;  %v14130_v29 = vcombine.low %v1339_v11, %v1343_v12  ;;  %v14132_v30 = vcombine.low %v1340_v13, %v1344_v15  ;;  %v1395_v12 = vld [vmem:[%s20161_s1 + $0x2a10] sm:$0xff]  ;;  %v1396_v15 = vld [vmem:[%s20161_s1 + $0x2a18] sm:$0xff] }
 0x58f   :  { %11344 = vmatprep.subr.bf16.mxu0 %v14083_v31  ;;  %11903 = vmatprep.subr.bf16.mxu1 %v14085_v32  ;;  %v14139_v31 = vcombine.high %v1347_v21, %v1351_v22  ;;  %v14141_v32 = vcombine.high %v1348_v26, %v1352_v27  ;;  %v1399_v13 = vld [vmem:[%s20161_s1 + $0x2a30] sm:$0xff] }
 0x592   :  { %11345 = vmatpush1.bf16.msra.mxu0 %v14082_v38  ;;  %11904 = vmatpush1.bf16.msra.mxu1 %v14084_v39  ;;  %v1360_v38 = vld [vmem:[%s20161_s1 + $0x28f8] sm:$0xff]  ;;  %v14138_v39 = vcombine.low %v1347_v21, %v1351_v22  ;;  %v1403_v22 = vld [vmem:[%s20161_s1 + $0x2a50] sm:$0xff] }
 0x593   :  { %11346 = vmatprep.subr.bf16.mxu0 %v14091_v40  ;;  %11905 = vmatprep.subr.bf16.mxu1 %v14093_v41  ;;  %v14140_v40 = vcombine.low %v1348_v26, %v1352_v27  ;;  %v14147_v41 = vcombine.high %v1355_v33, %v1359_v34  ;;  %v14149_v42 = vcombine.high %v1356_v36, %v1360_v38  ;;  %v1404_v26 = vld [vmem:[%s20161_s1 + $0x2a58] sm:$0xff] }
 0x594   :  { %v1408_v27 = vld [vmem:[%s20161_s1 + $0x2a78] sm:$0xff] }
 0x596   :  { %11347 = vmatpush1.bf16.msra.mxu0 %v14090_v46  ;;  %11906 = vmatpush1.bf16.msra.mxu1 %v14092_v47  ;;  %v1368_v46 = vld [vmem:[%s20161_s1 + $0x2938] sm:$0xff]  ;;  %v14146_v47 = vcombine.low %v1355_v33, %v1359_v34  ;;  %v1415_v33 = vld [vmem:[%s20161_s1 + $0x2ab0] sm:$0xff]  ;;  %v14197_v34 = vcombine.high %v1404_v26, %v1408_v27 }
 0x597   :  { %11348 = vmatprep.subr.bf16.mxu0 %v14099_v48  ;;  %11907 = vmatprep.subr.bf16.mxu1 %v14101_v49  ;;  %v14148_v48 = vcombine.low %v1356_v36, %v1360_v38  ;;  %v14155_v49 = vcombine.high %v1363_v43, %v1367_v44  ;;  %v14157_v50 = vcombine.high %v1364_v45, %v1368_v46  ;;  %v1416_v36 = vld [vmem:[%s20161_s1 + $0x2ab8] sm:$0xff] }
 0x59a   :  { %11349 = vmatpush1.bf16.msra.mxu0 %v14098_v54  ;;  %11908 = vmatpush1.bf16.msra.mxu1 %v14100_v55  ;;  %v1376_v54 = vld [vmem:[%s20161_s1 + $0x2978] sm:$0xff]  ;;  %v14154_v55 = vcombine.low %v1363_v43, %v1367_v44 }
 0x59b   :  { %11350 = vmatprep.subr.bf16.mxu0 %v14107_v56  ;;  %11909 = vmatprep.subr.bf16.mxu1 %v14109_v57  ;;  %v14156_v56 = vcombine.low %v1364_v45, %v1368_v46  ;;  %v14163_v57 = vcombine.high %v1371_v51, %v1375_v52  ;;  %v14165_v58 = vcombine.high %v1372_v53, %v1376_v54  ;;  %v1420_v44 = vld [vmem:[%s20161_s1 + $0x2ad8] sm:$0xff] }
 0x59c   :  { %v1424_v45 = vld [vmem:[%s20161_s1 + $0x2af8] sm:$0xff] }
 0x59e   :  { %11351 = vmatpush1.bf16.msra.mxu0 %v14106_v62  ;;  %11910 = vmatpush1.bf16.msra.mxu1 %v14108_v63  ;;  %v1384_v62 = vld [vmem:[%s20161_s1 + $0x29b8] sm:$0xff]  ;;  %v14162_v63 = vcombine.low %v1371_v51, %v1375_v52  ;;  %v14213_v51 = vcombine.high %v1420_v44, %v1424_v45 }
 0x59f   :  { %11352 = vmatprep.subr.bf16.mxu0 %v14115_v0  ;;  %11911 = vmatprep.subr.bf16.mxu1 %v14117_v1  ;;  %v14164_v0 = vcombine.low %v1372_v53, %v1376_v54  ;;  %v14171_v1 = vcombine.high %v1379_v59, %v1383_v60  ;;  %v14173_v2 = vcombine.high %v1380_v61, %v1384_v62  ;;  %v1428_v52 = vld [vmem:[%s20161_s1 + $0x2b18] sm:$0xff] }
 0x5a0   :  { %v1432_v53 = vld [vmem:[%s20161_s1 + $0x2b38] sm:$0xff] }
 0x5a2   :  { %11353 = vmatpush1.bf16.msra.mxu0 %v14114_v7  ;;  %11912 = vmatpush1.bf16.msra.mxu1 %v14116_v8  ;;  %v1392_v7 = vld [vmem:[%s20161_s1 + $0x29f8] sm:$0xff]  ;;  %v14170_v8 = vcombine.low %v1379_v59, %v1383_v60  ;;  %v14221_v59 = vcombine.high %v1428_v52, %v1432_v53 }
 0x5a3   :  { %11365 = vmatprep.subr.bf16.mxu0 %v14123_v9  ;;  %11924 = vmatprep.subr.bf16.mxu1 %v14125_v10  ;;  %v14172_v9 = vcombine.low %v1380_v61, %v1384_v62  ;;  %v14179_v10 = vcombine.high %v1387_v3, %v1391_v4  ;;  %v14181_v11 = vcombine.high %v1388_v6, %v1392_v7  ;;  %v1436_v60 = vld [vmem:[%s20161_s1 + $0x2b58] sm:$0xff] }
 0x5a4   :  { %v1440_v61 = vld [vmem:[%s20161_s1 + $0x2b78] sm:$0xff] }
 0x5a5   :  { %11355 = vmatmul.mubr.bf16.vlgmr.msra.gmra.mrb[4].mxu0 %v14924_v25  ;;  %11914 = vmatmul.mubr.bf16.vlgmr.msra.gmra.mrb[4].mxu1 %v14924_v25  ;;  %v1407_v25 = vld [vmem:[%s20161_s1 + $0x2a70] sm:$0xff] }
 0x5a6   :  { %11366 = vmatpush1.bf16.msra.mxu0 %v14122_v16  ;;  %11925 = vmatpush1.bf16.msra.mxu1 %v14124_v17  ;;  %v1400_v16 = vld [vmem:[%s20161_s1 + $0x2a38] sm:$0xff]  ;;  %v14178_v17 = vcombine.low %v1387_v3, %v1391_v4  ;;  %v14194_v38 = vcombine.low %v1403_v22, %v1407_v25  ;;  %v14229_v3 = vcombine.high %v1436_v60, %v1440_v61 }
 0x5a7   :  { %11367 = vmatprep.subr.bf16.mxu0 %v14131_v18  ;;  %11926 = vmatprep.subr.bf16.mxu1 %v14133_v19  ;;  %v14180_v18 = vcombine.low %v1388_v6, %v1392_v7  ;;  %v14187_v19 = vcombine.high %v1395_v12, %v1399_v13  ;;  %v14189_v21 = vcombine.high %v1396_v15, %v1400_v16  ;;  %v1444_v4 = vld [vmem:[%s20161_s1 + $0x2b98] sm:$0xff] }
 0x5a8   :  { %11397 = vmatprep.mubr.bf16.mxu0 %v14925_v35  ;;  %11956 = vmatprep.mubr.bf16.mxu1 %v14925_v35  ;;  %v1412_v35 = vld [vmem:[%s20161_s1 + $0x2a98] sm:$0xff] }
 0x5a9   :  { %v14205_v43 = vcombine.high %v1412_v35, %v1416_v36  ;;  %v1448_v6 = vld [vmem:[%s20161_s1 + $0x2bb8] sm:$0xff] }
 0x5aa   :  { %11368 = vmatpush1.bf16.msra.mxu0 %v14130_v29  ;;  %11927 = vmatpush1.bf16.msra.mxu1 %v14132_v30  ;;  %v14186_v29 = vcombine.low %v1395_v12, %v1399_v13  ;;  %v14188_v30 = vcombine.low %v1396_v15, %v1400_v16  ;;  %v14237_v12 = vcombine.high %v1444_v4, %v1448_v6  ;;  %v1452_v13 = vld [vmem:[%s20161_s1 + $0x2bd8] sm:$0xff] }
 0x5ab   :  { %11369 = vmatprep.subr.bf16.mxu0 %v14139_v31  ;;  %11928 = vmatprep.subr.bf16.mxu1 %v14141_v32  ;;  %v14195_v31 = vcombine.high %v1403_v22, %v1407_v25  ;;  %v1411_v32 = vld [vmem:[%s20161_s1 + $0x2a90] sm:$0xff]  ;;  %v1456_v15 = vld [vmem:[%s20161_s1 + $0x2bf8] sm:$0xff] }
 0x5ac   :  { %v14202_v46 = vcombine.low %v1411_v32, %v1415_v33  ;;  %v14245_v22 = vcombine.high %v1452_v13, %v1456_v15  ;;  %v1460_v25 = vld [vmem:[%s20161_s1 + $0x2c18] sm:$0xff] }
 0x5ae   :  { %11370 = vmatpush1.bf16.msra.mxu0 %v14138_v39  ;;  %11929 = vmatpush1.bf16.msra.mxu1 %v14140_v40  ;;  %v1419_v39 = vld [vmem:[%s20161_s1 + $0x2ad0] sm:$0xff]  ;;  %v14196_v40 = vcombine.low %v1404_v26, %v1408_v27  ;;  %v1464_v26 = vld [vmem:[%s20161_s1 + $0x2c38] sm:$0xff] }
 0x5af   :  { %11371 = vmatprep.subr.bf16.mxu0 %v14147_v41  ;;  %11930 = vmatprep.subr.bf16.mxu1 %v14149_v42  ;;  %v14203_v41 = vcombine.high %v1411_v32, %v1415_v33  ;;  %v1423_v42 = vld [vmem:[%s20161_s1 + $0x2af0] sm:$0xff]  ;;  %v14253_v33 = vcombine.high %v1460_v25, %v1464_v26 }
 0x5b0   :  { %v14210_v54 = vcombine.low %v1419_v39, %v1423_v42  ;;  %v1471_v32 = vld [vmem:[%s20161_s1 + $0x2c70] sm:$0xff] }
 0x5b2   :  { %11372 = vmatpush1.bf16.msra.mxu0 %v14146_v47  ;;  %11931 = vmatpush1.bf16.msra.mxu1 %v14148_v48  ;;  %v1427_v47 = vld [vmem:[%s20161_s1 + $0x2b10] sm:$0xff]  ;;  %v14204_v48 = vcombine.low %v1412_v35, %v1416_v36  ;;  %v1472_v35 = vld [vmem:[%s20161_s1 + $0x2c78] sm:$0xff] }
 0x5b3   :  { %11373 = vmatprep.subr.bf16.mxu0 %v14155_v49  ;;  %11932 = vmatprep.subr.bf16.mxu1 %v14157_v50  ;;  %v14211_v49 = vcombine.high %v1419_v39, %v1423_v42  ;;  %v1431_v50 = vld [vmem:[%s20161_s1 + $0x2b30] sm:$0xff]  ;;  %v1476_v42 = vld [vmem:[%s20161_s1 + $0x2c98] sm:$0xff] }
 0x5b4   :  { %v14218_v62 = vcombine.low %v1427_v47, %v1431_v50  ;;  %v1479_v39 = vld [vmem:[%s20161_s1 + $0x2cb0] sm:$0xff] }
 0x5b6   :  { %11374 = vmatpush1.bf16.msra.mxu0 %v14154_v55  ;;  %11933 = vmatpush1.bf16.msra.mxu1 %v14156_v56  ;;  %v1435_v55 = vld [vmem:[%s20161_s1 + $0x2b50] sm:$0xff]  ;;  %v14212_v56 = vcombine.low %v1420_v44, %v1424_v45 }
 0x5b7   :  { %11375 = vmatprep.subr.bf16.mxu0 %v14163_v57  ;;  %11934 = vmatprep.subr.bf16.mxu1 %v14165_v58  ;;  %v14219_v57 = vcombine.high %v1427_v47, %v1431_v50  ;;  %v1439_v58 = vld [vmem:[%s20161_s1 + $0x2b70] sm:$0xff] }
 0x5b8   :  { %v14226_v7 = vcombine.low %v1435_v55, %v1439_v58  ;;  %v14926_v45 = vld [vmem:[%s20162_s0 + $0x50] ss:$100 sps:$4 sm:$0xff]  }
 0x5b9   :  { %v1483_v47 = vld [vmem:[%s20161_s1 + $0x2cd0] sm:$0xff] }
 0x5ba   :  { %11376 = vmatpush1.bf16.msra.mxu0 %v14162_v63  ;;  %11935 = vmatpush1.bf16.msra.mxu1 %v14164_v0  ;;  %v1443_v63 = vld [vmem:[%s20161_s1 + $0x2b90] sm:$0xff]  ;;  %v14220_v0 = vcombine.low %v1428_v52, %v1432_v53  ;;  %v1484_v52 = vld [vmem:[%s20161_s1 + $0x2cd8] sm:$0xff] }
 0x5bb   :  { %11377 = vmatprep.subr.bf16.mxu0 %v14171_v1  ;;  %11936 = vmatprep.subr.bf16.mxu1 %v14173_v2  ;;  %v14227_v1 = vcombine.high %v1435_v55, %v1439_v58  ;;  %v1447_v2 = vld [vmem:[%s20161_s1 + $0x2bb0] sm:$0xff]  ;;  %v14927_v53 = vld [vmem:[%s20162_s0 + $0x5c] ss:$100 sps:$4 sm:$0xff]  }
 0x5bc   :  { %v14234_v16 = vcombine.low %v1443_v63, %v1447_v2  ;;  %v1487_v50 = vld [vmem:[%s20161_s1 + $0x2cf0] sm:$0xff] }
 0x5bd   :  { %v14275_v58 = vcombine.high %v1483_v47, %v1487_v50 }
 0x5be   :  { %11378 = vmatpush1.bf16.msra.mxu0 %v14170_v8  ;;  %11937 = vmatpush1.bf16.msra.mxu1 %v14172_v9  ;;  %v1451_v8 = vld [vmem:[%s20161_s1 + $0x2bd0] sm:$0xff]  ;;  %v14228_v9 = vcombine.low %v1436_v60, %v1440_v61  ;;  %v1492_v61 = vld [vmem:[%s20161_s1 + $0x2d18] sm:$0xff] }
 0x5bf   :  { %11379 = vmatprep.subr.bf16.mxu0 %v14179_v10  ;;  %11938 = vmatprep.subr.bf16.mxu1 %v14181_v11  ;;  %v14235_v10 = vcombine.high %v1443_v63, %v1447_v2  ;;  %v1455_v11 = vld [vmem:[%s20161_s1 + $0x2bf0] sm:$0xff]  ;;  %v14274_v63 = vcombine.low %v1483_v47, %v1487_v50 }
 0x5c0   :  { %v14242_v27 = vcombine.low %v1451_v8, %v1455_v11  ;;  %v1539_v50 = vld [vmem:[%s20161_s1 + $0x2e90] sm:$0xff] }
 0x5c2   :  { %11380 = vmatpush1.bf16.msra.mxu0 %v14178_v17  ;;  %11939 = vmatpush1.bf16.msra.mxu1 %v14180_v18  ;;  %v1459_v17 = vld [vmem:[%s20161_s1 + $0x2c10] sm:$0xff]  ;;  %v14236_v18 = vcombine.low %v1444_v4, %v1448_v6  ;;  %v1500_v6 = vld [vmem:[%s20161_s1 + $0x2d58] sm:$0xff] }
 0x5c3   :  { %11381 = vmatprep.subr.bf16.mxu0 %v14187_v19  ;;  %11940 = vmatprep.subr.bf16.mxu1 %v14189_v21  ;;  %v14243_v19 = vcombine.high %v1451_v8, %v1455_v11  ;;  %v1463_v21 = vld [vmem:[%s20161_s1 + $0x2c30] sm:$0xff] }
 0x5c4   :  { %v14250_v36 = vcombine.low %v1459_v17, %v1463_v21 }
 0x5c6   :  { %11382 = vmatpush1.bf16.msra.mxu0 %v14186_v29  ;;  %11941 = vmatpush1.bf16.msra.mxu1 %v14188_v30  ;;  %v1467_v29 = vld [vmem:[%s20161_s1 + $0x2c50] sm:$0xff]  ;;  %v14244_v30 = vcombine.low %v1452_v13, %v1456_v15  ;;  %v1508_v15 = vld [vmem:[%s20161_s1 + $0x2d98] sm:$0xff] }
 0x5c7   :  { %11383 = vmatprep.subr.bf16.mxu0 %v14195_v31  ;;  %11942 = vmatprep.subr.bf16.mxu1 %v14197_v34  ;;  %v14251_v31 = vcombine.high %v1459_v17, %v1463_v21  ;;  %v1468_v34 = vld [vmem:[%s20161_s1 + $0x2c58] sm:$0xff] }
 0x5c8   :  { %v14261_v44 = vcombine.high %v1468_v34, %v1472_v35 }
 0x5ca   :  { %11384 = vmatpush1.bf16.msra.mxu0 %v14194_v38  ;;  %11943 = vmatpush1.bf16.msra.mxu1 %v14196_v40  ;;  %v1475_v38 = vld [vmem:[%s20161_s1 + $0x2c90] sm:$0xff]  ;;  %v14252_v40 = vcombine.low %v1460_v25, %v1464_v26  ;;  %v1516_v26 = vld [vmem:[%s20161_s1 + $0x2dd8] sm:$0xff] }
 0x5cb   :  { %11385 = vmatprep.subr.bf16.mxu0 %v14203_v41  ;;  %11944 = vmatprep.subr.bf16.mxu1 %v14205_v43  ;;  %v14259_v41 = vcombine.high %v1467_v29, %v1471_v32  ;;  %v1480_v43 = vld [vmem:[%s20161_s1 + $0x2cb8] sm:$0xff]  ;;  %v14266_v55 = vcombine.low %v1475_v38, %v1479_v39 }
 0x5ce   :  { %11386 = vmatpush1.bf16.msra.mxu0 %v14202_v46  ;;  %11945 = vmatpush1.bf16.msra.mxu1 %v14204_v48  ;;  %v14258_v46 = vcombine.low %v1467_v29, %v1471_v32  ;;  %v14260_v48 = vcombine.low %v1468_v34, %v1472_v35  ;;  %v1524_v34 = vld [vmem:[%s20161_s1 + $0x2e18] sm:$0xff] }
 0x5cf   :  { %11387 = vmatprep.subr.bf16.mxu0 %v14211_v49  ;;  %11946 = vmatprep.subr.bf16.mxu1 %v14213_v51  ;;  %v14267_v49 = vcombine.high %v1475_v38, %v1479_v39  ;;  %v14269_v51 = vcombine.high %v1476_v42, %v1480_v43  ;;  %v1528_v35 = vld [vmem:[%s20161_s1 + $0x2e38] sm:$0xff]  ;;  %v1531_v39 = vld [vmem:[%s20161_s1 + $0x2e50] sm:$0xff] }
 0x5d0   :  { %v14316_v47 = vcombine.low %v1524_v34, %v1528_v35 }
 0x5d2   :  { %11388 = vmatpush1.bf16.msra.mxu0 %v14210_v54  ;;  %11947 = vmatpush1.bf16.msra.mxu1 %v14212_v56  ;;  %v1488_v54 = vld [vmem:[%s20161_s1 + $0x2cf8] sm:$0xff]  ;;  %v1491_v56 = vld [vmem:[%s20161_s1 + $0x2d10] sm:$0xff] }
 0x5d3   :  { %11389 = vmatprep.subr.bf16.mxu0 %v14219_v57  ;;  %11948 = vmatprep.subr.bf16.mxu1 %v14221_v59  ;;  %v14268_v57 = vcombine.low %v1476_v42, %v1480_v43  ;;  %v1495_v59 = vld [vmem:[%s20161_s1 + $0x2d30] sm:$0xff]  ;;  %v14277_v60 = vcombine.high %v1484_v52, %v1488_v54  ;;  %v14317_v42 = vcombine.high %v1524_v34, %v1528_v35  ;;  %v1580_v34 = vld [vmem:[%s20161_s1 + $0x2fd8] sm:$0xff] }
 0x5d4   :  { %v14283_v2 = vcombine.high %v1491_v56, %v1495_v59  ;;  %v14282_v8 = vcombine.low %v1491_v56, %v1495_v59  ;;  %v1535_v43 = vld [vmem:[%s20161_s1 + $0x2e70] sm:$0xff]  ;;  %v1584_v35 = vld [vmem:[%s20161_s1 + $0x2ff8] sm:$0xff] }
 0x5d5   :  { %v1551_v59 = vld [vmem:[%s20161_s1 + $0x2ef0] sm:$0xff] }
 0x5d6   :  { %11390 = vmatpush1.bf16.msra.mxu0 %v14218_v62  ;;  %11949 = vmatpush1.bf16.msra.mxu1 %v14220_v0  ;;  %v1496_v62 = vld [vmem:[%s20161_s1 + $0x2d38] sm:$0xff]  ;;  %v1499_v0 = vld [vmem:[%s20161_s1 + $0x2d50] sm:$0xff] }
 0x5d7   :  { %11391 = vmatprep.subr.bf16.mxu0 %v14227_v1  ;;  %11950 = vmatprep.subr.bf16.mxu1 %v14229_v3  ;;  %v14276_v1 = vcombine.low %v1484_v52, %v1488_v54  ;;  %v1503_v3 = vld [vmem:[%s20161_s1 + $0x2d70] sm:$0xff]  ;;  %v14285_v4 = vcombine.high %v1492_v61, %v1496_v62  ;;  %v1540_v52 = vld [vmem:[%s20161_s1 + $0x2e98] sm:$0xff]  ;;  %v14322_v54 = vcombine.low %v1531_v39, %v1535_v43 }
 0x5d8   :  { %v14291_v11 = vcombine.high %v1499_v0, %v1503_v3  ;;  %v14290_v17 = vcombine.low %v1499_v0, %v1503_v3  ;;  %v1559_v3 = vld [vmem:[%s20161_s1 + $0x2f30] sm:$0xff] }
 0x5da   :  { %11392 = vmatpush1.bf16.msra.mxu0 %v14226_v7  ;;  %11951 = vmatpush1.bf16.msra.mxu1 %v14228_v9  ;;  %v1504_v7 = vld [vmem:[%s20161_s1 + $0x2d78] sm:$0xff]  ;;  %v1507_v9 = vld [vmem:[%s20161_s1 + $0x2d90] sm:$0xff] }
 0x5db   :  { %11393 = vmatprep.subr.bf16.mxu0 %v14235_v10  ;;  %11952 = vmatprep.subr.bf16.mxu1 %v14237_v12  ;;  %v14284_v10 = vcombine.low %v1492_v61, %v1496_v62  ;;  %v1511_v12 = vld [vmem:[%s20161_s1 + $0x2db0] sm:$0xff]  ;;  %v14293_v13 = vcombine.high %v1500_v6, %v1504_v7  ;;  %v1552_v61 = vld [vmem:[%s20161_s1 + $0x2ef8] sm:$0xff] }
 0x5dc   :  { %v14299_v21 = vcombine.high %v1507_v9, %v1511_v12  ;;  %v14298_v29 = vcombine.low %v1507_v9, %v1511_v12  ;;  %v1567_v12 = vld [vmem:[%s20161_s1 + $0x2f70] sm:$0xff] }
 0x5de   :  { %11394 = vmatpush1.bf16.msra.mxu0 %v14234_v16  ;;  %11953 = vmatpush1.bf16.msra.mxu1 %v14236_v18  ;;  %v1512_v16 = vld [vmem:[%s20161_s1 + $0x2db8] sm:$0xff]  ;;  %v1515_v18 = vld [vmem:[%s20161_s1 + $0x2dd0] sm:$0xff] }
 0x5df   :  { %11395 = vmatprep.subr.bf16.mxu0 %v14243_v19  ;;  %11954 = vmatprep.subr.bf16.mxu1 %v14245_v22  ;;  %v14292_v19 = vcombine.low %v1500_v6, %v1504_v7  ;;  %v1519_v22 = vld [vmem:[%s20161_s1 + $0x2df0] sm:$0xff]  ;;  %v14301_v25 = vcombine.high %v1508_v15, %v1512_v16  ;;  %v14300_v32 = vcombine.low %v1508_v15, %v1512_v16  ;;  %v1560_v6 = vld [vmem:[%s20161_s1 + $0x2f38] sm:$0xff] }
 0x5e0   :  { %v14306_v38 = vcombine.low %v1515_v18, %v1519_v22  ;;  %v1568_v15 = vld [vmem:[%s20161_s1 + $0x2f78] sm:$0xff] }
 0x5e2   :  { %11396 = vmatpush1.bf16.msra.mxu0 %v14242_v27  ;;  %11955 = vmatpush1.bf16.msra.mxu1 %v14244_v30  ;;  %v1520_v27 = vld [vmem:[%s20161_s1 + $0x2df8] sm:$0xff]  ;;  %v1523_v30 = vld [vmem:[%s20161_s1 + $0x2e10] sm:$0xff] }
 0x5e3   :  { %11408 = vmatprep.subr.bf16.mxu0 %v14251_v31  ;;  %11967 = vmatprep.subr.bf16.mxu1 %v14253_v33  ;;  %v1527_v31 = vld [vmem:[%s20161_s1 + $0x2e30] sm:$0xff]  ;;  %v14307_v33 = vcombine.high %v1515_v18, %v1519_v22 }
 0x5e4   :  { %v1575_v22 = vld [vmem:[%s20161_s1 + $0x2fb0] sm:$0xff] }
 0x5e5   :  { %11398 = vmatmul.mubr.bf16.vlgmr.msra.gmra.mrb[4].mxu0 %v14926_v45  ;;  %11957 = vmatmul.mubr.bf16.vlgmr.msra.gmra.mrb[4].mxu1 %v14926_v45  ;;  %v1536_v45 = vld [vmem:[%s20161_s1 + $0x2e78] sm:$0xff] }
 0x5e6   :  { %11409 = vmatpush1.bf16.msra.mxu0 %v14250_v36  ;;  %11968 = vmatpush1.bf16.msra.mxu1 %v14252_v40  ;;  %v14309_v36 = vcombine.high %v1516_v26, %v1520_v27  ;;  %v14308_v40 = vcombine.low %v1516_v26, %v1520_v27  ;;  %v1576_v26 = vld [vmem:[%s20161_s1 + $0x2fb8] sm:$0xff] }
 0x5e7   :  { %11410 = vmatprep.subr.bf16.mxu0 %v14259_v41  ;;  %11969 = vmatprep.subr.bf16.mxu1 %v14261_v44  ;;  %v14315_v41 = vcombine.high %v1523_v30, %v1527_v31  ;;  %v1532_v44 = vld [vmem:[%s20161_s1 + $0x2e58] sm:$0xff] }
 0x5e8   :  { %11440 = vmatprep.mubr.bf16.mxu0 %v14927_v53  ;;  %11999 = vmatprep.mubr.bf16.mxu1 %v14927_v53  ;;  %v1544_v53 = vld [vmem:[%s20161_s1 + $0x2eb8] sm:$0xff] }
 0x5ea   :  { %11411 = vmatpush1.bf16.msra.mxu0 %v14258_v46  ;;  %11970 = vmatpush1.bf16.msra.mxu1 %v14260_v48  ;;  %v14314_v46 = vcombine.low %v1523_v30, %v1527_v31  ;;  %v14323_v48 = vcombine.high %v1531_v39, %v1535_v43  ;;  %v1588_v43 = vld [vmem:[%s20161_s1 + $0x3018] sm:$0xff] }
 0x5eb   :  { %11412 = vmatprep.subr.bf16.mxu0 %v14267_v49  ;;  %11971 = vmatprep.subr.bf16.mxu1 %v14269_v51  ;;  %v14325_v49 = vcombine.high %v1532_v44, %v1536_v45  ;;  %v1543_v51 = vld [vmem:[%s20161_s1 + $0x2eb0] sm:$0xff] }
 0x5ec   :  { %v14331_v56 = vcombine.high %v1539_v50, %v1543_v51  ;;  %v14330_v62 = vcombine.low %v1539_v50, %v1543_v51  ;;  %v1599_v50 = vld [vmem:[%s20161_s1 + $0x3070] sm:$0xff]  ;;  %v1596_v51 = vld [vmem:[%s20161_s1 + $0x3058] sm:$0xff] }
 0x5ee   :  { %11413 = vmatpush1.bf16.msra.mxu0 %v14266_v55  ;;  %11972 = vmatpush1.bf16.msra.mxu1 %v14268_v57  ;;  %v14324_v55 = vcombine.low %v1532_v44, %v1536_v45  ;;  %v14333_v57 = vcombine.high %v1540_v52, %v1544_v53  ;;  %v1592_v44 = vld [vmem:[%s20161_s1 + $0x3038] sm:$0xff] }
 0x5ef   :  { %11414 = vmatprep.subr.bf16.mxu0 %v14275_v58  ;;  %11973 = vmatprep.subr.bf16.mxu1 %v14277_v60  ;;  %v1547_v58 = vld [vmem:[%s20161_s1 + $0x2ed0] sm:$0xff]  ;;  %v1548_v60 = vld [vmem:[%s20161_s1 + $0x2ed8] sm:$0xff] }
 0x5f0   :  { %v14339_v0 = vcombine.high %v1547_v58, %v1551_v59  ;;  %v14338_v7 = vcombine.low %v1547_v58, %v1551_v59  ;;  %v1607_v58 = vld [vmem:[%s20161_s1 + $0x30b0] sm:$0xff]  ;;  %v14928_v59 = vld [vmem:[%s20162_s0 + $0x58] ss:$100 sps:$4 sm:$0xff]  }
 0x5f2   :  { %11415 = vmatpush1.bf16.msra.mxu0 %v14274_v63  ;;  %11974 = vmatpush1.bf16.msra.mxu1 %v14276_v1  ;;  %v14332_v63 = vcombine.low %v1540_v52, %v1544_v53  ;;  %v14341_v1 = vcombine.high %v1548_v60, %v1552_v61  ;;  %v1600_v52 = vld [vmem:[%s20161_s1 + $0x3078] sm:$0xff] }
 0x5f3   :  { %11416 = vmatprep.subr.bf16.mxu0 %v14283_v2  ;;  %11975 = vmatprep.subr.bf16.mxu1 %v14285_v4  ;;  %v1555_v2 = vld [vmem:[%s20161_s1 + $0x2f10] sm:$0xff]  ;;  %v1556_v4 = vld [vmem:[%s20161_s1 + $0x2f18] sm:$0xff] }
 0x5f4   :  { %v14347_v9 = vcombine.high %v1555_v2, %v1559_v3  ;;  %v14346_v16 = vcombine.low %v1555_v2, %v1559_v3  ;;  %v1611_v2 = vld [vmem:[%s20161_s1 + $0x30d0] sm:$0xff] }
 0x5f5   :  { %v1615_v3 = vld [vmem:[%s20161_s1 + $0x30f0] sm:$0xff] }
 0x5f6   :  { %11417 = vmatpush1.bf16.msra.mxu0 %v14282_v8  ;;  %11976 = vmatpush1.bf16.msra.mxu1 %v14284_v10  ;;  %v14340_v8 = vcombine.low %v1548_v60, %v1552_v61  ;;  %v14349_v10 = vcombine.high %v1556_v4, %v1560_v6  ;;  %v1604_v60 = vld [vmem:[%s20161_s1 + $0x3098] sm:$0xff] }
 0x5f7   :  { %11418 = vmatprep.subr.bf16.mxu0 %v14291_v11  ;;  %11977 = vmatprep.subr.bf16.mxu1 %v14293_v13  ;;  %v1563_v11 = vld [vmem:[%s20161_s1 + $0x2f50] sm:$0xff]  ;;  %v1564_v13 = vld [vmem:[%s20161_s1 + $0x2f58] sm:$0xff] }
 0x5f8   :  { %v14355_v18 = vcombine.high %v1563_v11, %v1567_v12  ;;  %v14354_v27 = vcombine.low %v1563_v11, %v1567_v12  ;;  %v1608_v61 = vld [vmem:[%s20161_s1 + $0x30b8] sm:$0xff]  ;;  %v1619_v11 = vld [vmem:[%s20161_s1 + $0x3110] sm:$0xff] }
 0x5f9   :  { %v1623_v12 = vld [vmem:[%s20161_s1 + $0x3130] sm:$0xff] }
 0x5fa   :  { %11419 = vmatpush1.bf16.msra.mxu0 %v14290_v17  ;;  %11978 = vmatpush1.bf16.msra.mxu1 %v14292_v19  ;;  %v14348_v17 = vcombine.low %v1556_v4, %v1560_v6  ;;  %v14357_v19 = vcombine.high %v1564_v13, %v1568_v15  ;;  %v1612_v4 = vld [vmem:[%s20161_s1 + $0x30d8] sm:$0xff] }
 0x5fb   :  { %11420 = vmatprep.subr.bf16.mxu0 %v14299_v21  ;;  %11979 = vmatprep.subr.bf16.mxu1 %v14301_v25  ;;  %v1571_v21 = vld [vmem:[%s20161_s1 + $0x2f90] sm:$0xff]  ;;  %v1572_v25 = vld [vmem:[%s20161_s1 + $0x2f98] sm:$0xff] }
 0x5fc   :  { %v14363_v30 = vcombine.high %v1571_v21, %v1575_v22  ;;  %v14365_v31 = vcombine.high %v1572_v25, %v1576_v26  ;;  %v1616_v6 = vld [vmem:[%s20161_s1 + $0x30f8] sm:$0xff] }
 0x5fe   :  { %11421 = vmatpush1.bf16.msra.mxu0 %v14298_v29  ;;  %11980 = vmatpush1.bf16.msra.mxu1 %v14300_v32  ;;  %v14356_v29 = vcombine.low %v1564_v13, %v1568_v15  ;;  %v1579_v32 = vld [vmem:[%s20161_s1 + $0x2fd0] sm:$0xff]  ;;  %v1624_v13 = vld [vmem:[%s20161_s1 + $0x3138] sm:$0xff]  ;;  %v14402_v15 = vcombine.low %v1611_v2, %v1615_v3 }
 0x5ff   :  { %11422 = vmatprep.subr.bf16.mxu0 %v14307_v33  ;;  %11981 = vmatprep.subr.bf16.mxu1 %v14309_v36  ;;  %v1583_v33 = vld [vmem:[%s20161_s1 + $0x2ff0] sm:$0xff]  ;;  %v14362_v36 = vcombine.low %v1571_v21, %v1575_v22  ;;  %v1628_v22 = vld [vmem:[%s20161_s1 + $0x3158] sm:$0xff] }
 0x600   :  { %v14371_v39 = vcombine.high %v1579_v32, %v1583_v33  ;;  %v14370_v45 = vcombine.low %v1579_v32, %v1583_v33  ;;  %v1631_v21 = vld [vmem:[%s20161_s1 + $0x3170] sm:$0xff]  ;;  %v1636_v33 = vld [vmem:[%s20161_s1 + $0x3198] sm:$0xff] }
 0x601   :  { %v1639_v32 = vld [vmem:[%s20161_s1 + $0x31b0] sm:$0xff] }
 0x602   :  { %11423 = vmatpush1.bf16.msra.mxu0 %v14306_v38  ;;  %11982 = vmatpush1.bf16.msra.mxu1 %v14308_v40  ;;  %v14364_v38 = vcombine.low %v1572_v25, %v1576_v26  ;;  %v14373_v40 = vcombine.high %v1580_v34, %v1584_v35  ;;  %v1632_v25 = vld [vmem:[%s20161_s1 + $0x3178] sm:$0xff]  ;;  %v14410_v26 = vcombine.low %v1619_v11, %v1623_v12 }
 0x603   :  { %11424 = vmatprep.subr.bf16.mxu0 %v14315_v41  ;;  %11983 = vmatprep.subr.bf16.mxu1 %v14317_v42  ;;  %v1587_v41 = vld [vmem:[%s20161_s1 + $0x3010] sm:$0xff] }
 0x604   :  { %v1591_v42 = vld [vmem:[%s20161_s1 + $0x3030] sm:$0xff] }
 0x605   :  { %v14378_v53 = vcombine.low %v1587_v41, %v1591_v42 }
 0x606   :  { %11425 = vmatpush1.bf16.msra.mxu0 %v14314_v46  ;;  %11984 = vmatpush1.bf16.msra.mxu1 %v14316_v47  ;;  %v14372_v46 = vcombine.low %v1580_v34, %v1584_v35  ;;  %v14379_v47 = vcombine.high %v1587_v41, %v1591_v42  ;;  %v1640_v34 = vld [vmem:[%s20161_s1 + $0x31b8] sm:$0xff]  ;;  %v1647_v41 = vld [vmem:[%s20161_s1 + $0x31f0] sm:$0xff] }
 0x607   :  { %11426 = vmatprep.subr.bf16.mxu0 %v14323_v48  ;;  %11985 = vmatprep.subr.bf16.mxu1 %v14325_v49  ;;  %v14381_v48 = vcombine.high %v1588_v43, %v1592_v44  ;;  %v1595_v49 = vld [vmem:[%s20161_s1 + $0x3050] sm:$0xff]  ;;  %v1644_v42 = vld [vmem:[%s20161_s1 + $0x31d8] sm:$0xff] }
 0x60a   :  { %11427 = vmatpush1.bf16.msra.mxu0 %v14322_v54  ;;  %11986 = vmatpush1.bf16.msra.mxu1 %v14324_v55  ;;  %v14380_v54 = vcombine.low %v1588_v43, %v1592_v44  ;;  %v14387_v55 = vcombine.high %v1595_v49, %v1599_v50  ;;  %v1648_v43 = vld [vmem:[%s20161_s1 + $0x31f8] sm:$0xff] }
 0x60b   :  { %11428 = vmatprep.subr.bf16.mxu0 %v14331_v56  ;;  %11987 = vmatprep.subr.bf16.mxu1 %v14333_v57  ;;  %v14389_v56 = vcombine.high %v1596_v51, %v1600_v52  ;;  %v1603_v57 = vld [vmem:[%s20161_s1 + $0x3090] sm:$0xff] }
 0x60e   :  { %11429 = vmatpush1.bf16.msra.mxu0 %v14330_v62  ;;  %11988 = vmatpush1.bf16.msra.mxu1 %v14332_v63  ;;  %v14386_v62 = vcombine.low %v1595_v49, %v1599_v50  ;;  %v14388_v63 = vcombine.low %v1596_v51, %v1600_v52  ;;  %v14436_v49 = vcombine.low %v1644_v42, %v1648_v43  ;;  %v14841_v50 = vld [vmem:[%s20164_s3 + $0x40] sm:$0xff]  }
 0x60f   :  { %11430 = vmatprep.subr.bf16.mxu0 %v14339_v0  ;;  %11989 = vmatprep.subr.bf16.mxu1 %v14341_v1  ;;  %v14395_v0 = vcombine.high %v1603_v57, %v1607_v58  ;;  %v14397_v1 = vcombine.high %v1604_v60, %v1608_v61  ;;  %v14842_v51 = vld [vmem:[%s20164_s3 + $0xc0] sm:$0xff]  }
 0x610   :  { %v14843_v52 = vld [vmem:[%s20164_s3] sm:$0xff]  }
 0x612   :  { %11431 = vmatpush1.bf16.msra.mxu0 %v14338_v7  ;;  %11990 = vmatpush1.bf16.msra.mxu1 %v14340_v8  ;;  %v14394_v7 = vcombine.low %v1603_v57, %v1607_v58  ;;  %v14396_v8 = vcombine.low %v1604_v60, %v1608_v61  ;;  %v14847_v57 = vld [vmem:[%s20164_s3 + $0x8] sm:$0xff]   ;;  %v14850_v60 = vld [vmem:[%s20164_s3 + $0xd0] sm:$0xff]  }
 0x613   :  { %11432 = vmatprep.subr.bf16.mxu0 %v14347_v9  ;;  %11991 = vmatprep.subr.bf16.mxu1 %v14349_v10  ;;  %v14403_v9 = vcombine.high %v1611_v2, %v1615_v3  ;;  %v14405_v10 = vcombine.high %v1612_v4, %v1616_v6  ;;  %v14848_v58 = vld [vmem:[%s20164_s3 + $0x88] sm:$0xff]   ;;  %v14852_v61 = vld [vmem:[%s20164_s3 + $0x90] sm:$0xff]   ;;  %v14858_v2 = vld [vmem:[%s20164_s3 + $0xe0] sm:$0xff]  }
 0x614   :  { %v14859_v3 = vld [vmem:[%s20164_s3 + $0x20] sm:$0xff]  }
 0x616   :  { %11433 = vmatpush1.bf16.msra.mxu0 %v14346_v16  ;;  %11992 = vmatpush1.bf16.msra.mxu1 %v14348_v17  ;;  %v14404_v16 = vcombine.low %v1612_v4, %v1616_v6  ;;  %v14411_v17 = vcombine.high %v1619_v11, %v1623_v12  ;;  %v14860_v4 = vld [vmem:[%s20164_s3 + $0xa0] sm:$0xff]   ;;  %v14861_v6 = vld [vmem:[%s20164_s3 + $0x68] sm:$0xff]   ;;  %v14866_v11 = vld [vmem:[%s20164_s3 + $0xf0] sm:$0xff]  }
 0x617   :  { %11434 = vmatprep.subr.bf16.mxu0 %v14355_v18  ;;  %11993 = vmatprep.subr.bf16.mxu1 %v14357_v19  ;;  %v1627_v19 = vld [vmem:[%s20161_s1 + $0x3150] sm:$0xff] }
 0x618   :  { %v14418_v35 = vcombine.low %v1627_v19, %v1631_v21  ;;  %v14867_v12 = vld [vmem:[%s20164_s3 + $0x30] sm:$0xff]  }
 0x61a   :  { %11435 = vmatpush1.bf16.msra.mxu0 %v14354_v27  ;;  %11994 = vmatpush1.bf16.msra.mxu1 %v14356_v29  ;;  %v14419_v29 = vcombine.high %v1627_v19, %v1631_v21  ;;  %v14874_v19 = vld [vmem:[%s20164_s3 + $0x1c0] sm:$0xff]  }
 0x61b   :  { %11436 = vmatprep.subr.bf16.mxu0 %v14363_v30  ;;  %11995 = vmatprep.subr.bf16.mxu1 %v14365_v31  ;;  %v14421_v30 = vcombine.high %v1628_v22, %v1632_v25  ;;  %v1635_v31 = vld [vmem:[%s20161_s1 + $0x3190] sm:$0xff]  ;;  %v14875_v21 = vld [vmem:[%s20164_s3 + $0x100] sm:$0xff]  }
 0x61c   :  { %v14426_v44 = vcombine.low %v1635_v31, %v1639_v32 }
 0x61e   :  { %11437 = vmatpush1.bf16.msra.mxu0 %v14362_v36  ;;  %11996 = vmatpush1.bf16.msra.mxu1 %v14364_v38  ;;  %v14420_v36 = vcombine.low %v1628_v22, %v1632_v25  ;;  %v14427_v38 = vcombine.high %v1635_v31, %v1639_v32  ;;  %v14876_v22 = vld [vmem:[%s20164_s3 + $0x180] sm:$0xff]   ;;  %v14877_v25 = vld [vmem:[%s20164_s3 + $0x148] sm:$0xff]   ;;  %v14884_v31 = vld [vmem:[%s20164_s3 + $0x190] sm:$0xff]  }
 0x61f   :  { %11438 = vmatprep.subr.bf16.mxu0 %v14371_v39  ;;  %11997 = vmatprep.subr.bf16.mxu1 %v14373_v40  ;;  %v14429_v39 = vcombine.high %v1636_v33, %v1640_v34  ;;  %v1643_v40 = vld [vmem:[%s20161_s1 + $0x31d0] sm:$0xff]  ;;  %v14885_v32 = vld [vmem:[%s20164_s3 + $0x158] sm:$0xff]  }
 0x622   :  { %11439 = vmatpush1.bf16.msra.mxu0 %v14370_v45  ;;  %11998 = vmatpush1.bf16.msra.mxu1 %v14372_v46  ;;  %v14428_v45 = vcombine.low %v1636_v33, %v1640_v34  ;;  %v14435_v46 = vcombine.high %v1643_v40, %v1647_v41  ;;  %v14886_v33 = vld [vmem:[%s20164_s3 + $0x1d8] sm:$0xff]  }
 0x623   :  { %11451 = vmatprep.subr.bf16.mxu0 %v14379_v47  ;;  %12010 = vmatprep.subr.bf16.mxu1 %v14381_v48  ;;  %v14437_v47 = vcombine.high %v1644_v42, %v1648_v43  ;;  %v14434_v48 = vcombine.low %v1643_v40, %v1647_v41  ;;  %v14887_v34 = vld [vmem:[%s20164_s3 + $0x118] sm:$0xff]   ;;  %v14892_v40 = vld [vmem:[%s20164_s3 + $0x1a0] sm:$0xff]   ;;  %v14893_v41 = vld [vmem:[%s20164_s3 + $0x168] sm:$0xff]  }
 0x624   :  { %v14894_v42 = vld [vmem:[%s20164_s3 + $0x1e8] sm:$0xff]  }
 0x625   :  { %11441 = vmatmul.mubr.bf16.vlgmr.msra.gmra.mrb[4].mxu0 %v14928_v59  ;;  %12000 = vmatmul.mubr.bf16.vlgmr.msra.gmra.mrb[4].mxu1 %v14928_v59  ;;  %v14849_v59 = vld [vmem:[%s20164_s3 + $0x50] sm:$0xff]   ;;  %v14895_v43 = vld [vmem:[%s20164_s3 + $0x128] sm:$0xff]  }
 0x626   :  { %11452 = vmatpush1.bf16.msra.mxu0 %v14378_v53  ;;  %12011 = vmatpush1.bf16.msra.mxu1 %v14380_v54  ;;  %v14844_v53 = vld [vmem:[%s20164_s3 + $0x80] sm:$0xff]   ;;  %v14845_v54 = vld [vmem:[%s20164_s3 + $0x48] sm:$0xff]  }
 0x627   :  { %11453 = vmatprep.subr.bf16.mxu0 %v14387_v55  ;;  %12012 = vmatprep.subr.bf16.mxu1 %v14389_v56  ;;  %v14929_v55 = vld [vmem:[%s20162_s0 + $0x60] ss:$100 sps:$4 sm:$0xff]   ;;  %v14846_v56 = vld [vmem:[%s20164_s3 + $0xc8] sm:$0xff]  }
 0x628   :  { %11483 = vmatprep.mubr.bf16.mxu0 %v14931_v37  ;;  %12042 = vmatprep.mubr.bf16.mxu1 %v14931_v37  ;;  %v1620_v37 = vld [vmem:[%s20161_s1 + $0x3118] sm:$0xff] }
 0x629   :  { %v14413_v18 = vcombine.high %v1620_v37, %v1624_v13  ;;  %v14412_v27 = vcombine.low %v1620_v37, %v1624_v13  ;;  %v14868_v37 = vld [vmem:[%s20164_s3 + $0xb0] sm:$0xff]   ;;  %v14869_v13 = vld [vmem:[%s20164_s3 + $0x78] sm:$0xff]  }
 0x62a   :  { %11454 = vmatpush1.bf16.msra.mxu0 %v14386_v62  ;;  %12013 = vmatpush1.bf16.msra.mxu1 %v14388_v63  ;;  %v14854_v62 = vld [vmem:[%s20164_s3 + $0xd8] sm:$0xff]  }
 0x62b   :  { %11455 = vmatprep.subr.bf16.mxu0 %v14395_v0  ;;  %12014 = vmatprep.subr.bf16.mxu1 %v14397_v1  ;;  %v14855_v63 = vld [vmem:[%s20164_s3 + $0x18] sm:$0xff]   ;;  %v14857_v1 = vld [vmem:[%s20164_s3 + $0x60] sm:$0xff]  }
 0x62c   :  { %v14856_v0 = vld [vmem:[%s20164_s3 + $0x98] sm:$0xff]  }
 0x62e   :  { %11456 = vmatpush1.bf16.msra.mxu0 %v14394_v7  ;;  %12015 = vmatpush1.bf16.msra.mxu1 %v14396_v8  ;;  %v14862_v7 = vld [vmem:[%s20164_s3 + $0xe8] sm:$0xff]  }
 0x62f   :  { %11457 = vmatprep.subr.bf16.mxu0 %v14403_v9  ;;  %12016 = vmatprep.subr.bf16.mxu1 %v14405_v10  ;;  %v14863_v8 = vld [vmem:[%s20164_s3 + $0x28] sm:$0xff]   ;;  %v14865_v10 = vld [vmem:[%s20164_s3 + $0x70] sm:$0xff]  }
 0x630   :  { %v14864_v9 = vld [vmem:[%s20164_s3 + $0xa8] sm:$0xff]  }
 0x632   :  { %11458 = vmatpush1.bf16.msra.mxu0 %v14402_v15  ;;  %12017 = vmatpush1.bf16.msra.mxu1 %v14404_v16  ;;  %v14870_v15 = vld [vmem:[%s20164_s3 + $0xf8] sm:$0xff]  }
 0x633   :  { %11459 = vmatprep.subr.bf16.mxu0 %v14411_v17  ;;  %12018 = vmatprep.subr.bf16.mxu1 %v14413_v18  ;;  %v14871_v16 = vld [vmem:[%s20164_s3 + $0x38] sm:$0xff]   ;;  %v14873_v18 = vld [vmem:[%s20164_s3 + $0x140] sm:$0xff]  }
 0x634   :  { %v14872_v17 = vld [vmem:[%s20164_s3 + $0xb8] sm:$0xff]  }
 0x636   :  { %11460 = vmatpush1.bf16.msra.mxu0 %v14410_v26  ;;  %12019 = vmatpush1.bf16.msra.mxu1 %v14412_v27  ;;  %v14878_v26 = vld [vmem:[%s20164_s3 + $0x1c8] sm:$0xff]  }
 0x637   :  { %11461 = vmatprep.subr.bf16.mxu0 %v14419_v29  ;;  %12020 = vmatprep.subr.bf16.mxu1 %v14421_v30  ;;  %v14879_v27 = vld [vmem:[%s20164_s3 + $0x108] sm:$0xff]   ;;  %v14881_v30 = vld [vmem:[%s20164_s3 + $0x150] sm:$0xff]  }
 0x638   :  { %v14880_v29 = vld [vmem:[%s20164_s3 + $0x188] sm:$0xff]  }
 0x63a   :  { %11462 = vmatpush1.bf16.msra.mxu0 %v14418_v35  ;;  %12021 = vmatpush1.bf16.msra.mxu1 %v14420_v36  ;;  %v14888_v35 = vld [vmem:[%s20164_s3 + $0x198] sm:$0xff]   ;;  %v14889_v36 = vld [vmem:[%s20164_s3 + $0x160] sm:$0xff]  }
 0x63b   :  { %11463 = vmatprep.subr.bf16.mxu0 %v14427_v38  ;;  %12022 = vmatprep.subr.bf16.mxu1 %v14429_v39  ;;  %v14890_v38 = vld [vmem:[%s20164_s3 + $0x1e0] sm:$0xff]  }
 0x63c   :  { %v14891_v39 = vld [vmem:[%s20164_s3 + $0x120] sm:$0xff]  }
 0x63e   :  { %11464 = vmatpush1.bf16.msra.mxu0 %v14426_v44  ;;  %12023 = vmatpush1.bf16.msra.mxu1 %v14428_v45  ;;  %v14896_v44 = vld [vmem:[%s20164_s3 + $0x1a8] sm:$0xff]   ;;  %v14897_v45 = vld [vmem:[%s20164_s3 + $0x170] sm:$0xff]  }
 0x63f   :  { %11465 = vmatprep.subr.bf16.mxu0 %v14435_v46  ;;  %12024 = vmatprep.subr.bf16.mxu1 %v14437_v47  ;;  %v14898_v46 = vld [vmem:[%s20164_s3 + $0x1f0] sm:$0xff]  }
 0x640   :  { %v14899_v47 = vld [vmem:[%s20164_s3 + $0x130] sm:$0xff]  }
 0x642   :  { %11466 = vmatpush1.bf16.msra.mxu0 %v14434_v48  ;;  %12025 = vmatpush1.bf16.msra.mxu1 %v14436_v49  ;;  %v14900_v48 = vld [vmem:[%s20164_s3 + $0x1b0] sm:$0xff]   ;;  %v14901_v49 = vld [vmem:[%s20164_s3 + $0x178] sm:$0xff]  }
 0x643   :  { %14503 = vmatprep.subr.bf16.mxu0 %v14841_v50  ;;  %14525 = vmatprep.subr.bf16.mxu1 %v14842_v51  ;;  %v14902_v50 = vld [vmem:[%s20164_s3 + $0x1f8] sm:$0xff]  }
 0x644   :  { %v14903_v51 = vld [vmem:[%s20164_s3 + $0x138] sm:$0xff]  }
 0x645   :  { %11484 = vmatmul.mubr.bf16.vlgmr.msra.gmra.mrb[4].mxu0 %v14929_v55  ;;  %12043 = vmatmul.mubr.bf16.vlgmr.msra.gmra.mrb[4].mxu1 %v14929_v55  ;;  %v1673_v55 = vsub.s32 5, %v18104_v14 }
 0x646   :  { %14504 = vmatpush3.bf16.msra.mxu0 %v14843_v52  ;;  %12628 = vmatprep.mubr.bf16.mxu0 %v18165_v24  ;;  %v14851_v24 = vld [vmem:[%s20164_s3 + $0x10] sm:$0xff]   ;;  %v14904_v52 = vld [vmem:[%s20164_s3 + $0x1b8] sm:$0xff]  }
 0x647   :  { %14526 = vmatpush3.bf16.msra.mxu1 %v14844_v53  ;;  %12669 = vmatprep.mubr.bf16.mxu1 %v18173_v28  ;;  %v14853_v28 = vld [vmem:[%s20164_s3 + $0x58] sm:$0xff]   ;;  %v1669_v53 = vsub.s32 4, %v18104_v14 }
 0x648   :  { %14505 = vmatprep.subr.bf16.mxu0 %v14845_v54  ;;  %14527 = vmatprep.subr.bf16.mxu1 %v14846_v56  ;;  %v1677_v54 = vsub.s32 6, %v18104_v14  ;;  %v1681_v56 = vsub.s32 7, %v18104_v14 }
 0x64a   :  { %14506 = vmatpush3.bf16.msra.mxu0 %v14847_v57  ;;  %v14930_v57 = vld [vmem:[%s20163_s2] sm:$0xff] }
 0x64b   :  { %14528 = vmatpush3.bf16.msra.mxu1 %v14848_v58  ;;  %14507 = vmatprep.subr.bf16.mxu0 %v14849_v59  ;;  %v1670_v58 = vrot.slane %v14930_v57, %v1669_v53  ;;  %v1678_v59 = vrot.slane %v14930_v57, %v1677_v54 }
 0x64c   :  { %14529 = vmatprep.subr.bf16.mxu1 %v14850_v60  ;;  %v1674_v60 = vrot.slane %v14930_v57, %v1673_v55 }
 0x64e   :  { %14508 = vmatpush3.bf16.msra.mxu0 %v14851_v24  ;;  %v1682_v24 = vrot.slane %v14930_v57, %v1681_v56 }
 0x64f   :  { %14530 = vmatpush3.bf16.msra.mxu1 %v14852_v61  ;;  %14509 = vmatprep.subr.bf16.mxu0 %v14853_v28 }
 0x650   :  { %14531 = vmatprep.subr.bf16.mxu1 %v14854_v62 }
 0x652   :  { %14510 = vmatpush3.bf16.msra.mxu0 %v14855_v63 }
 0x653   :  { %14532 = vmatpush3.bf16.msra.mxu1 %v14856_v0  ;;  %14511 = vmatprep.subr.bf16.mxu0 %v14857_v1 }
 0x654   :  { %14533 = vmatprep.subr.bf16.mxu1 %v14858_v2 }
 0x656   :  { %14512 = vmatpush3.bf16.msra.mxu0 %v14859_v3 }
 0x657   :  { %14534 = vmatpush3.bf16.msra.mxu1 %v14860_v4  ;;  %14513 = vmatprep.subr.bf16.mxu0 %v14861_v6 }
 0x658   :  { %14535 = vmatprep.subr.bf16.mxu1 %v14862_v7 }
 0x65a   :  { %14514 = vmatpush3.bf16.msra.mxu0 %v14863_v8 }
 0x65b   :  { %14536 = vmatpush3.bf16.msra.mxu1 %v14864_v9  ;;  %14515 = vmatprep.subr.bf16.mxu0 %v14865_v10 }
 0x65c   :  { %14537 = vmatprep.subr.bf16.mxu1 %v14866_v11 }
 0x65e   :  { %14516 = vmatpush3.bf16.msra.mxu0 %v14867_v12 }
 0x65f   :  { %14538 = vmatpush3.bf16.msra.mxu1 %v14868_v37  ;;  %14517 = vmatprep.subr.bf16.mxu0 %v14869_v13 }
 0x660   :  { %14539 = vmatprep.subr.bf16.mxu1 %v14870_v15 }
 0x662   :  { %14518 = vmatpush3.bf16.msra.mxu0 %v14871_v16 }
 0x663   :  { %14540 = vmatpush3.bf16.msra.mxu1 %v14872_v17  ;;  %14547 = vmatprep.subr.bf16.mxu0 %v14873_v18 }
 0x664   :  { %14569 = vmatprep.subr.bf16.mxu1 %v14874_v19 }
 0x665   :  { %12629 = vmatmul.mubr.bf16.vlgmr.msra.gmra.mrb[8].mxu0 %v18161_v20  ;;  %v14882_v20 = vld [vmem:[%s20164_s3 + $0x1d0] sm:$0xff]  }
 0x666   :  { %12670 = vmatmul.mubr.bf16.vlgmr.msra.gmra.mrb[8].mxu1 %v18163_v23  ;;  %14548 = vmatpush3.bf16.msra.mxu0 %v14875_v21  ;;  %v14883_v23 = vld [vmem:[%s20164_s3 + $0x110] sm:$0xff]  }
 0x667   :  { %14570 = vmatpush3.bf16.msra.mxu1 %v14876_v22  ;;  %14549 = vmatprep.subr.bf16.mxu0 %v14877_v25 }
 0x668   :  { %14571 = vmatprep.subr.bf16.mxu1 %v14878_v26 }
 0x66a   :  { %14550 = vmatpush3.bf16.msra.mxu0 %v14879_v27 }
 0x66b   :  { %14572 = vmatpush3.bf16.msra.mxu1 %v14880_v29  ;;  %14551 = vmatprep.subr.bf16.mxu0 %v14881_v30 }
 0x66c   :  { %14573 = vmatprep.subr.bf16.mxu1 %v14882_v20  ;;  %v14438_v20 = vld [vmem:[%s20165_s4] ss:$0 sm:$0xff] }
 0x66e   :  { %14552 = vmatpush3.bf16.msra.mxu0 %v14883_v23 }
 0x66f   :  { %14574 = vmatpush3.bf16.msra.mxu1 %v14884_v31  ;;  %14553 = vmatprep.subr.bf16.mxu0 %v14885_v32 }
 0x670   :  { %14575 = vmatprep.subr.bf16.mxu1 %v14886_v33 }
 0x672   :  { %14554 = vmatpush3.bf16.msra.mxu0 %v14887_v34 }
 0x673   :  { %14576 = vmatpush3.bf16.msra.mxu1 %v14888_v35  ;;  %14555 = vmatprep.subr.bf16.mxu0 %v14889_v36 }
 0x674   :  { %14577 = vmatprep.subr.bf16.mxu1 %v14890_v38 }
 0x676   :  { %14556 = vmatpush3.bf16.msra.mxu0 %v14891_v39 }
 0x677   :  { %14578 = vmatpush3.bf16.msra.mxu1 %v14892_v40  ;;  %14557 = vmatprep.subr.bf16.mxu0 %v14893_v41 }
 0x678   :  { %14579 = vmatprep.subr.bf16.mxu1 %v14894_v42 }
 0x67a   :  { %14558 = vmatpush3.bf16.msra.mxu0 %v14895_v43 }
 0x67b   :  { %14580 = vmatpush3.bf16.msra.mxu1 %v14896_v44  ;;  %14559 = vmatprep.subr.bf16.mxu0 %v14897_v45  ;;  %v12764_v45 = vand.u32 127, %v1651_v5 }
 0x67c   :  { %14581 = vmatprep.subr.bf16.mxu1 %v14898_v46 }
 0x67d   :  { %vm12767_vm1 = vcmp.ge.s32.totalorder %v12764_v45, 1  ;;  %vm12770_vm3 = vcmp.lt.s32.totalorder %v12764_v45, 7 }
 0x67e   :  { %14560 = vmatpush3.bf16.msra.mxu0 %v14899_v47  ;;  %vm12768_vm2 = vmand %vm12765_vm0, %vm12767_vm1 }
 0x67f   :  { %14582 = vmatpush3.bf16.msra.mxu1 %v14900_v48  ;;  %14561 = vmatprep.subr.bf16.mxu0 %v14901_v49  ;;  %vm12771_vm4 = vmand %vm12768_vm2, %vm12770_vm3 }
 0x680   :  { %14583 = vmatprep.subr.bf16.mxu1 %v14902_v50 }
 0x682   :  { %14562 = vmatpush3.bf16.msra.mxu0 %v14903_v51 }
 0x683   :  { %14584 = vmatpush3.bf16.msra.mxu1 %v14904_v52 }
 0x718   :  { %v11485_v61 = vpop.f32.mrb[4].mxu0  ;;  %v12044_v62 = vpop.f32.mrb[4].mxu1 }
 0x719   :  { %v14599_v28 = vadd.f32 %v11485_v61, %v1670_v58  ;;  %v11487_v63 = vpop.f32.mrb[5].mxu0  ;;  %v14603_v0 = vadd.f32 %v12044_v62, %v1678_v59  ;;  %v12046_v2 = vpop.f32.mrb[5].mxu1 }
 0x71a   :  { %v14600_v1 = vadd.f32 %v11487_v63, %v1674_v60  ;;  %v11489_v3 = vpop.f32.mrb[6].mxu0  ;;  %v14604_v4 = vadd.f32 %v12046_v2, %v1682_v24  ;;  %v12048_v7 = vpop.f32.mrb[6].mxu1 }
 0x71b   :  { %v14601_v6 = vadd.f32 %v11489_v3, %v1670_v58  ;;  %v11491_v8 = vpop.f32.mrb[7].mxu0  ;;  %v14605_v9 = vadd.f32 %v12048_v7, %v1678_v59  ;;  %v12050_v11 = vpop.f32.mrb[7].mxu1  ;;  %v12057_v12 = vmax.f32 %v14599_v28, 0.0  ;;  %v12059_v15 = vmax.f32 %v14603_v0, 0.0 }
 0x71c   :  { %v14602_v10 = vadd.f32 %v11491_v8, %v1674_v60  ;;  %v14606_v13 = vadd.f32 %v12050_v11, %v1682_v24  ;;  %v12058_v16 = vmax.f32 %v14600_v1, 0.0  ;;  %v12060_v19 = vmax.f32 %v14604_v4, 0.0 }
 0x71d   :  { %v12065_v37 = vmax.f32 %v14601_v6, 0.0  ;;  %v12067_v17 = vmax.f32 %v14605_v9, 0.0 }
 0x71e   :  { %v12066_v18 = vmax.f32 %v14602_v10, 0.0  ;;  %v12068_v22 = vmax.f32 %v14606_v13, 0.0 }
 0x71f   :  { %v12073_v21 = vpack.c.bf16 %v12065_v37, %v12057_v12  ;;  %v12075_v25 = vpack.c.bf16 %v12067_v17, %v12059_v15 }
 0x720   :  { %v12074_v26 = vpack.c.bf16 %v12066_v18, %v12058_v16  ;;  %v12076_v27 = vpack.c.bf16 %v12068_v22, %v12060_v19 }
 0x722   :  { %12710 = vmatprep.mubr.bf16.mxu0 %v12074_v26  ;;  %12751 = vmatprep.mubr.bf16.mxu1 %v12076_v27 }
 0x723   :  { %12711 = vmatmul.mubr.bf16.vlgmr.msra.gmra.mrb[12].mxu0 %v12073_v21  ;;  %12752 = vmatmul.mubr.bf16.vlgmr.msra.gmra.mrb[12].mxu1 %v12075_v25 }
 0x738   :  { %v14519_v29 = vpop.f32.mrb[8].mxu0 }
 0x739   :  { %v14541_v30 = vpop.f32.mrb[8].mxu1  ;;  %v14520_v23 = vpop.f32.mrb[9].mxu0 }
 0x73a   :  { %v14521_v31 = vadd.f32 %v14520_v23, %v14519_v29  ;;  %v14542_v32 = vpop.f32.mrb[9].mxu1  ;;  %v14522_v33 = vpop.f32.mrb[10].mxu0 }
 0x73b   :  { %v14543_v34 = vadd.f32 %v14542_v32, %v14541_v30  ;;  %v14544_v35 = vpop.f32.mrb[10].mxu1  ;;  %v14523_v36 = vpop.f32.mrb[11].mxu0 }
 0x73c   :  { %v12631_v38 = vadd.f32 %v14521_v31, %v14438_v20  ;;  %v14524_v39 = vadd.f32 %v14523_v36, %v14522_v33  ;;  %v14545_v40 = vpop.f32.mrb[11].mxu1 }
 0x73d   :  { %v14546_v41 = vadd.f32 %v14545_v40, %v14544_v35 }
 0x73e   :  { %v12672_v42 = vadd.f32 %v14543_v34, %v12631_v38  ;;  %v12634_v43 = vadd.f32 %v14524_v39, %v14438_v20 }
 0x740   :  { %v12675_v44 = vadd.f32 %v14546_v41, %v12634_v43 }
 0x7f6   :  { %v14563_v46 = vpop.f32.mrb[12].mxu0  ;;  %v14585_v47 = vpop.f32.mrb[12].mxu1 }
 0x7f7   :  { %v14564_v48 = vpop.f32.mrb[13].mxu0  ;;  %v14586_v50 = vpop.f32.mrb[13].mxu1 }
 0x7f8   :  { %v14565_v49 = vadd.f32 %v14564_v48, %v14563_v46  ;;  %v14566_v51 = vpop.f32.mrb[14].mxu0  ;;  %v14587_v52 = vadd.f32 %v14586_v50, %v14585_v47  ;;  %v14588_v53 = vpop.f32.mrb[14].mxu1 }
 0x7f9   :  { %v14567_v54 = vpop.f32.mrb[15].mxu0  ;;  %v14589_v57 = vpop.f32.mrb[15].mxu1 }
 0x7fa   :  { %v12713_v55 = vadd.f32 %v14565_v49, %v12672_v42  ;;  %v14568_v56 = vadd.f32 %v14567_v54, %v14566_v51  ;;  %v14590_v58 = vadd.f32 %v14589_v57, %v14588_v53 }
 0x7fc   :  { %v12754_v5 = vadd.f32 %v14587_v52, %v12713_v55  ;;  %v12716_v59 = vadd.f32 %v14568_v56, %v12675_v44 }
 0x7fe   :  { %v12757_v14 = vadd.f32 %v14590_v58, %v12716_v59  ;;  %12785 = vst [vmem:[%s20166_s5] sm:$0xff] %v12754_v5  ;;  %v12773_v60 = vsel %vm12771_vm4, %v12754_v5, 0.0 }
 0x7ff   :  { %12776 = vadd.xlane.f32.xlu0 %v12773_v60 }
 0x800   :  { %12786 = vst [vmem:[%s20166_s5 + $0x8] sm:$0xff] %v12757_v14  ;;  %12798 = vperm.xlu1 %14803, %v12757_v14  }
 0x815   :  { %12793 = vperm.xlu0 %14802, %v12754_v5  }
 0x87f   :  { %v12799_v6 = vpop.permute.xlu1 %12798 }
 0x88c   :  { %v12777_v24 = vpop.xlane.xlu0 %12776 }
 0x88d   :  { %v12778_v61 = vrot.slane %v12777_v24, 4 }
 0x88f   :  { %v12779_v28 = vadd.f32 %v12778_v61, %v12777_v24 }
 0x891   :  { %v12780_v62 = vrot.slane %v12779_v28, 2 }
 0x893   :  { %v12781_v63 = vadd.f32 %v12780_v62, %v12779_v28 }
 0x894   :  { %v12794_v7 = vpop.permute.xlu0 %12793 }
 0x895   :  { %v12782_v0 = vrot.slane %v12781_v63, 1 }
 0x897   :  { %v12783_v1 = vadd.f32 %v12782_v0, %v12781_v63 }
 0x899   :  { %14799 = vpush %v12783_v1 }
 0x8ca   :  { %s14800_s13 = spop %14799 }
 0x8cb   :  { %s12787_s14 = smul.f32 0.16666667, %s14800_s13 }
 0x8cd   :  { %v12788_v2 = vstv %s12787_s14 }
 0x8ce   :  { %v12789_v3 = vsub.f32 %v12754_v5, %v12788_v2  ;;  %v12790_v4 = vsub.f32 %v12757_v14, %v12788_v2 }
 0x8d0   :  { %v12801_v8 = vadd.f32 %v12794_v7, %v12789_v3  ;;  %v12802_v9 = vadd.f32 %v12799_v6, %v12790_v4 }
 0x8d2   :  { %12803 = vst [vmem:[%s20167_s6] sm:$0xff] %v12801_v8  ;;  %12804 = vst [vmem:[%s20167_s6 + $0x8] sm:$0xff] %v12802_v9 }

</bundles_post_ra>
